<compile_context>
chip_gen: v7x
topology: tpu7x:2x2x1
jax: 0.10.0
libtpu: 0.0.40
codegen_flags: <defaults>
</compile_context>

<pallas_src>
import functools
import random

import jax
import jax.numpy as jnp
from jax.experimental import pallas as pl
from jax.experimental.pallas import tpu as pltpu


# ---------------------------------------------------------------------------
# Pallas kernel: one Sinkhorn problem per grid step (per batch element).
# ---------------------------------------------------------------------------
def _sinkhorn_kernel(cs_ref, mx_ref, my_ref, out_ref, *, epsilon, niter,
                     exp_dtype):
    N = cs_ref.shape[0]

    # ---- marginals: tiny (N,1)/(1,N) work, once per batch element ----------
    mx = mx_ref[...].astype(jnp.float32)          # (N, 1) raw canvas mass
    my = my_ref[...].astype(jnp.float32)          # (1, N) raw gt mass
    mx = jnp.clip(mx, 0.0, 1e9) + 1e-9
    my = jnp.clip(my, 0.0, 1e9) + 1e-9
    log_mu = jnp.log(mx / jnp.sum(mx, axis=0, keepdims=True))   # (N, 1)
    log_nu = jnp.log(my / jnp.sum(my, axis=1, keepdims=True))   # (1, N)

    # Ones vectors for MXU row/col sums; hoisted out of the unrolled loop
    # (JAX does not CSE broadcast_in_dim).
    ones_col = jnp.ones((N, 1), dtype=exp_dtype)
    ones_row = jnp.ones((1, N), dtype=exp_dtype)
    tiny = 1e-30   # underflow guard inside log (unreachable for [0,1] inputs)

    def expm(f, g):
        # m = (-C + u + v)/eps = cs + f + g.  m <= 0 at every call site:
        # initially m = cs <= 0, and after each row/col normalization every
        # entry of exp(m) is bounded by its marginal (<= 1).  Hence exp never
        # overflows and no max-stabilization pass is needed.
        return jnp.exp((cs_ref[...] + f + g).astype(exp_dtype))

    def lse_rows(f, g):   # logsumexp over lanes -> (N, 1); sum on the MXU
        s = jnp.dot(expm(f, g), ones_col, preferred_element_type=jnp.float32)
        return jnp.log(s + tiny)

    def lse_cols(f, g):   # logsumexp over sublanes -> (1, N); sum on the MXU
        s = jnp.dot(ones_row, expm(f, g), preferred_element_type=jnp.float32)
        return jnp.log(s + tiny)

    # Carried state is only the scaled dual potentials f = u/eps, g = v/eps.
    # The (N,N) iterate is recomputed per pass and never written back, so each
    # Sinkhorn iteration is ~2 streaming full-tile reads and 0 full-tile
    # writes (the EUP exp is the remaining bottleneck).
    f = jnp.zeros((N, 1), jnp.float32)
    g = jnp.zeros((1, N), jnp.float32)
    for _ in range(niter):            # niter is tiny & static -> unrolled
        f = f + (log_mu - lse_rows(f, g))      # row update (old f, old g)
        g = g + (log_nu - lse_cols(f, g))      # col update (new f, old g)

    # ---- final cost: sum(pi * C) = -eps * sum(exp(cs+f+g) * cs)  ----------
    cs = cs_ref[...]
    pi_cs = jnp.exp(cs + f + g) * cs                       # f32 epilogue (once)
    row = jnp.dot(pi_cs, ones_col.astype(jnp.float32),
                  preferred_element_type=jnp.float32)      # (N, 1) via MXU
    out_ref[...] = (-epsilon) * jnp.sum(row, axis=0, keepdims=True)   # (1, 1)


def sinkhorn_costs(cost_matrix, mass_x, mass_y, epsilon, niter,
                   use_bf16_exp=False):
    """cost_matrix: (N, N) f32; mass_x, mass_y: (B, N) f32 -> (B,) costs."""
    B, N = mass_x.shape
    mx = mass_x.reshape(B, N, 1).astype(jnp.float32)   # contiguous per-b block
    my = mass_y.reshape(B, 1, N).astype(jnp.float32)
    # Fold the negation and the 1/epsilon scaling into C once, outside the
    # kernel (constant per call, reused 2*niter+1 times per batch element).
    cs = (-cost_matrix.astype(jnp.float32)) / jnp.float32(epsilon)

    # bf16 exp roughly halves the EUP-bound loop on v6e/v7x (~1e-3 rel. loss
    # error); keep f32 by default and never enable on v5e.
    exp_dtype = jnp.bfloat16 if use_bf16_exp else jnp.float32

    kernel = functools.partial(_sinkhorn_kernel, epsilon=epsilon, niter=niter,
                               exp_dtype=exp_dtype)

    out = pl.pallas_call(
        kernel,
        out_shape=jax.ShapeDtypeStruct((B, 1, 1), jnp.float32),
        grid_spec=pltpu.PrefetchScalarGridSpec(
            num_scalar_prefetch=0,
            grid=(B,),
            in_specs=[
                # Constant index_map -> fetched once, reused for all b.
                # TODO(synk): could be single-buffered (pl.Buffered(1)) to save
                # one 256 KiB pipeline buffer; pure hygiene, skipped for safety.
                pl.BlockSpec((N, N), lambda b: (0, 0)),           # -C/eps
                pl.BlockSpec((None, N, 1), lambda b: (b, 0, 0)),  # mass_x[b]
                pl.BlockSpec((None, 1, N), lambda b: (b, 0, 0)),  # mass_y[b]
            ],
            out_specs=pl.BlockSpec((None, 1, 1), lambda b: (b, 0, 0)),
        ),
        compiler_params=pltpu.CompilerParams(
            # batch elements are independent -> shard across TCs on v7x
            dimension_semantics=("parallel",)),
    )(cs, mx, my)
    return out.reshape(B)


# ---------------------------------------------------------------------------
# JAX glue reproducing SinkhornLoss.forward
# ---------------------------------------------------------------------------
def _mesh_grid_points(h, w):
    a = jnp.linspace(0.0, h - 1.0, h)
    b = jnp.linspace(0.0, w - 1.0, w)
    y = jnp.repeat(a / h, w)            # row-major flatten of y_grid
    x = jnp.tile(b / w, h)              # row-major flatten of x_grid
    return jnp.stack([y, x], axis=-1)   # (h*w, 2), columns = [y, x]


def _cost_matrix(pts):                  # squared euclidean (p=2)
    d = pts[:, None, :] - pts[None, :, :]
    return jnp.sum(jnp.abs(d) ** 2, axis=-1).astype(jnp.float32)


class SinkhornLossPallas:
    def __init__(self, epsilon=0.01, niter=5, normalize=False,
                 use_bf16_exp=False):
        self.epsilon = epsilon
        self.niter = niter
        self.normalize = normalize
        self.use_bf16_exp = use_bf16_exp

    def __call__(self, canvas, gt):
        batch_size, c, h, w = gt.shape
        # TODO(synk): F.interpolate(mode='area') -> 24x24 branch for h > 24 not
        # implemented; example spatial size (16) never triggers it.
        assert h <= 24 and w <= 24, "h/w > 24 path not implemented"

        pts = _mesh_grid_points(h, w)           # canvas_grids == gt_grids
        cmat = _cost_matrix(pts)                # (N, N)

        # NOTE: evaluated at Python (trace) time; under jit the channel choice
        # is baked into the compiled function, unlike torch's per-forward draw.
        i = random.randint(0, 2)
        mass_x = canvas[:, i, :, :].reshape(batch_size, -1)
        mass_y = gt[:, i, :, :].reshape(batch_size, -1)

        if self.normalize:
            # TODO(synk): sinkhorn_normalized (2*Wxy - Wxx - Wyy) branch not
            # wired; default normalize=False path is implemented.
            raise NotImplementedError
        costs = sinkhorn_costs(cmat, mass_x, mass_y, self.epsilon, self.niter,
                               use_bf16_exp=self.use_bf16_exp)
        return jnp.mean(costs)                  # scalar sinkhorn loss


if __name__ == "__main__":
    key = jax.random.PRNGKey(0)
    k1, k2 = jax.random.split(key)
    canvas = jax.random.uniform(k1, (2, 4, 16, 16), dtype=jnp.float32)
    gt = jax.random.uniform(k2, (2, 4, 16, 16), dtype=jnp.float32)

    random.seed(0)                              # deterministic channel pick
    loss_mod = SinkhornLossPallas(epsilon=0.01, niter=5, normalize=False)
    loss = loss_mod(canvas, gt)
    jax.block_until_ready(loss)
    print("KERNEL_OK")
</pallas_src>

<mosaic_0001>
module attributes {stable_mosaic.version = 11 : i64} {
  func.func @_sinkhorn_kernel(%arg0: i32, %arg1: memref<256x256xf32, #tpu.memory_space<vmem>>, %arg2: memref<1x256x1xf32, #tpu.memory_space<vmem>>, %arg3: memref<1x1x256xf32, #tpu.memory_space<vmem>>, %arg4: memref<1x1x1xf32, #tpu.memory_space<vmem>>) attributes {dimension_semantics = [#tpu.dimension_semantics<parallel>], iteration_bounds = array<i64: 2>, scalar_prefetch = 0 : i64, scratch_operands = 0 : i64, tpu.core_type = #tpu.core_type<tc>, window_params = [{pipeline_mode = #tpu.pipeline_mode<synchronous>, transform_indices = @transform_0, window_bounds = array<i64: 256, 256>}, {transform_indices = @transform_1, window_bounds = array<i64: 1, 256, 1>}, {transform_indices = @transform_2, window_bounds = array<i64: 1, 1, 256>}, {transform_indices = @transform_3, window_bounds = array<i64: 1, 1, 1>}]} {
    %c0 = arith.constant 0 : index
    %c0_0 = arith.constant 0 : index
    %c0_1 = arith.constant 0 : index
    %0 = vector.load %arg2[%c0, %c0_0, %c0_1] : memref<1x256x1xf32, #tpu.memory_space<vmem>>, vector<1x256x1xf32>
    %1 = vector.shape_cast %0 : vector<1x256x1xf32> to vector<256x1xf32>
    %c0_2 = arith.constant 0 : index
    %c0_3 = arith.constant 0 : index
    %c0_4 = arith.constant 0 : index
    %2 = vector.load %arg3[%c0_2, %c0_3, %c0_4] : memref<1x1x256xf32, #tpu.memory_space<vmem>>, vector<1x1x256xf32>
    %3 = vector.shape_cast %2 : vector<1x1x256xf32> to vector<1x256xf32>
    %cst = arith.constant 0.000000e+00 : f32
    %cst_5 = arith.constant 1.000000e+09 : f32
    %4 = vector.broadcast %cst : f32 to vector<256x1xf32>
    %5 = arith.maximumf %4, %1 : vector<256x1xf32>
    %6 = vector.broadcast %cst_5 : f32 to vector<256x1xf32>
    %7 = arith.minimumf %6, %5 : vector<256x1xf32>
    %cst_6 = arith.constant 9.99999971E-10 : f32
    %8 = vector.broadcast %cst_6 : f32 to vector<256x1xf32>
    %9 = arith.addf %7, %8 : vector<256x1xf32>
    %cst_7 = arith.constant 0.000000e+00 : f32
    %cst_8 = arith.constant 1.000000e+09 : f32
    %10 = vector.broadcast %cst_7 : f32 to vector<1x256xf32>
    %11 = arith.maximumf %10, %3 : vector<1x256xf32>
    %12 = vector.broadcast %cst_8 : f32 to vector<1x256xf32>
    %13 = arith.minimumf %12, %11 : vector<1x256xf32>
    %cst_9 = arith.constant 9.99999971E-10 : f32
    %14 = vector.broadcast %cst_9 : f32 to vector<1x256xf32>
    %15 = arith.addf %13, %14 : vector<1x256xf32>
    %cst_10 = arith.constant dense<0.000000e+00> : vector<1xf32>
    %16 = vector.multi_reduction <add>, %9, %cst_10 [0] : vector<256x1xf32> to vector<1xf32>
    %17 = vector.shape_cast %16 : vector<1xf32> to vector<1x1xf32>
    %18 = vector.broadcast %17 : vector<1x1xf32> to vector<256x1xf32>
    %19 = arith.divf %9, %18 : vector<256x1xf32>
    %20 = math.log %19 : vector<256x1xf32>
    %cst_11 = arith.constant dense<0.000000e+00> : vector<1xf32>
    %21 = vector.multi_reduction <add>, %15, %cst_11 [1] : vector<1x256xf32> to vector<1xf32>
    %22 = vector.shape_cast %21 : vector<1xf32> to vector<1x1xf32>
    %23 = vector.broadcast %22 : vector<1x1xf32> to vector<1x256xf32>
    %24 = arith.divf %15, %23 : vector<1x256xf32>
    %25 = math.log %24 : vector<1x256xf32>
    %cst_12 = arith.constant 1.000000e+00 : f32
    %26 = vector.broadcast %cst_12 : f32 to vector<256x1xf32>
    %cst_13 = arith.constant 1.000000e+00 : f32
    %27 = vector.broadcast %cst_13 : f32 to vector<1x256xf32>
    %cst_14 = arith.constant 0.000000e+00 : f32
    %28 = vector.broadcast %cst_14 : f32 to vector<256x1xf32>
    %cst_15 = arith.constant 0.000000e+00 : f32
    %29 = vector.broadcast %cst_15 : f32 to vector<1x256xf32>
    %c0_16 = arith.constant 0 : index
    %c0_17 = arith.constant 0 : index
    %30 = vector.load %arg1[%c0_16, %c0_17] : memref<256x256xf32, #tpu.memory_space<vmem>>, vector<256x256xf32>
    %31 = vector.broadcast %28 : vector<256x1xf32> to vector<256x256xf32>
    %32 = arith.addf %30, %31 : vector<256x256xf32>
    %33 = vector.broadcast %29 : vector<1x256xf32> to vector<256x256xf32>
    %34 = arith.addf %32, %33 : vector<256x256xf32>
    %35 = math.exp %34 : vector<256x256xf32>
    %cst_18 = arith.constant dense<0.000000e+00> : vector<256x1xf32>
    %36 = tpu.matmul %35, %26, %cst_18 {dimension_numbers = #tpu.dot_dimension_numbers<[1], [0], [0], [1], [0, 0, 1, 1], [], []>} : vector<256x256xf32>, vector<256x1xf32>, vector<256x1xf32> -> vector<256x1xf32>
    %cst_19 = arith.constant 1.000000e-30 : f32
    %37 = vector.broadcast %cst_19 : f32 to vector<256x1xf32>
    %38 = arith.addf %36, %37 : vector<256x1xf32>
    %39 = math.log %38 : vector<256x1xf32>
    %40 = arith.subf %20, %39 : vector<256x1xf32>
    %41 = arith.addf %28, %40 : vector<256x1xf32>
    %c0_20 = arith.constant 0 : index
    %c0_21 = arith.constant 0 : index
    %42 = vector.load %arg1[%c0_20, %c0_21] : memref<256x256xf32, #tpu.memory_space<vmem>>, vector<256x256xf32>
    %43 = vector.broadcast %41 : vector<256x1xf32> to vector<256x256xf32>
    %44 = arith.addf %42, %43 : vector<256x256xf32>
    %45 = vector.broadcast %29 : vector<1x256xf32> to vector<256x256xf32>
    %46 = arith.addf %44, %45 : vector<256x256xf32>
    %47 = math.exp %46 : vector<256x256xf32>
    %cst_22 = arith.constant dense<0.000000e+00> : vector<1x256xf32>
    %48 = tpu.matmul %27, %47, %cst_22 {dimension_numbers = #tpu.dot_dimension_numbers<[1], [0], [0], [1], [0, 0, 1, 1], [], []>} : vector<1x256xf32>, vector<256x256xf32>, vector<1x256xf32> -> vector<1x256xf32>
    %cst_23 = arith.constant 1.000000e-30 : f32
    %49 = vector.broadcast %cst_23 : f32 to vector<1x256xf32>
    %50 = arith.addf %48, %49 : vector<1x256xf32>
    %51 = math.log %50 : vector<1x256xf32>
    %52 = arith.subf %25, %51 : vector<1x256xf32>
    %53 = arith.addf %29, %52 : vector<1x256xf32>
    %c0_24 = arith.constant 0 : index
    %c0_25 = arith.constant 0 : index
    %54 = vector.load %arg1[%c0_24, %c0_25] : memref<256x256xf32, #tpu.memory_space<vmem>>, vector<256x256xf32>
    %55 = vector.broadcast %41 : vector<256x1xf32> to vector<256x256xf32>
    %56 = arith.addf %54, %55 : vector<256x256xf32>
    %57 = vector.broadcast %53 : vector<1x256xf32> to vector<256x256xf32>
    %58 = arith.addf %56, %57 : vector<256x256xf32>
    %59 = math.exp %58 : vector<256x256xf32>
    %cst_26 = arith.constant dense<0.000000e+00> : vector<256x1xf32>
    %60 = tpu.matmul %59, %26, %cst_26 {dimension_numbers = #tpu.dot_dimension_numbers<[1], [0], [0], [1], [0, 0, 1, 1], [], []>} : vector<256x256xf32>, vector<256x1xf32>, vector<256x1xf32> -> vector<256x1xf32>
    %cst_27 = arith.constant 1.000000e-30 : f32
    %61 = vector.broadcast %cst_27 : f32 to vector<256x1xf32>
    %62 = arith.addf %60, %61 : vector<256x1xf32>
    %63 = math.log %62 : vector<256x1xf32>
    %64 = arith.subf %20, %63 : vector<256x1xf32>
    %65 = arith.addf %41, %64 : vector<256x1xf32>
    %c0_28 = arith.constant 0 : index
    %c0_29 = arith.constant 0 : index
    %66 = vector.load %arg1[%c0_28, %c0_29] : memref<256x256xf32, #tpu.memory_space<vmem>>, vector<256x256xf32>
    %67 = vector.broadcast %65 : vector<256x1xf32> to vector<256x256xf32>
    %68 = arith.addf %66, %67 : vector<256x256xf32>
    %69 = vector.broadcast %53 : vector<1x256xf32> to vector<256x256xf32>
    %70 = arith.addf %68, %69 : vector<256x256xf32>
    %71 = math.exp %70 : vector<256x256xf32>
    %cst_30 = arith.constant dense<0.000000e+00> : vector<1x256xf32>
    %72 = tpu.matmul %27, %71, %cst_30 {dimension_numbers = #tpu.dot_dimension_numbers<[1], [0], [0], [1], [0, 0, 1, 1], [], []>} : vector<1x256xf32>, vector<256x256xf32>, vector<1x256xf32> -> vector<1x256xf32>
    %cst_31 = arith.constant 1.000000e-30 : f32
    %73 = vector.broadcast %cst_31 : f32 to vector<1x256xf32>
    %74 = arith.addf %72, %73 : vector<1x256xf32>
    %75 = math.log %74 : vector<1x256xf32>
    %76 = arith.subf %25, %75 : vector<1x256xf32>
    %77 = arith.addf %53, %76 : vector<1x256xf32>
    %c0_32 = arith.constant 0 : index
    %c0_33 = arith.constant 0 : index
    %78 = vector.load %arg1[%c0_32, %c0_33] : memref<256x256xf32, #tpu.memory_space<vmem>>, vector<256x256xf32>
    %79 = vector.broadcast %65 : vector<256x1xf32> to vector<256x256xf32>
    %80 = arith.addf %78, %79 : vector<256x256xf32>
    %81 = vector.broadcast %77 : vector<1x256xf32> to vector<256x256xf32>
    %82 = arith.addf %80, %81 : vector<256x256xf32>
    %83 = math.exp %82 : vector<256x256xf32>
    %cst_34 = arith.constant dense<0.000000e+00> : vector<256x1xf32>
    %84 = tpu.matmul %83, %26, %cst_34 {dimension_numbers = #tpu.dot_dimension_numbers<[1], [0], [0], [1], [0, 0, 1, 1], [], []>} : vector<256x256xf32>, vector<256x1xf32>, vector<256x1xf32> -> vector<256x1xf32>
    %cst_35 = arith.constant 1.000000e-30 : f32
    %85 = vector.broadcast %cst_35 : f32 to vector<256x1xf32>
    %86 = arith.addf %84, %85 : vector<256x1xf32>
    %87 = math.log %86 : vector<256x1xf32>
    %88 = arith.subf %20, %87 : vector<256x1xf32>
    %89 = arith.addf %65, %88 : vector<256x1xf32>
    %c0_36 = arith.constant 0 : index
    %c0_37 = arith.constant 0 : index
    %90 = vector.load %arg1[%c0_36, %c0_37] : memref<256x256xf32, #tpu.memory_space<vmem>>, vector<256x256xf32>
    %91 = vector.broadcast %89 : vector<256x1xf32> to vector<256x256xf32>
    %92 = arith.addf %90, %91 : vector<256x256xf32>
    %93 = vector.broadcast %77 : vector<1x256xf32> to vector<256x256xf32>
    %94 = arith.addf %92, %93 : vector<256x256xf32>
    %95 = math.exp %94 : vector<256x256xf32>
    %cst_38 = arith.constant dense<0.000000e+00> : vector<1x256xf32>
    %96 = tpu.matmul %27, %95, %cst_38 {dimension_numbers = #tpu.dot_dimension_numbers<[1], [0], [0], [1], [0, 0, 1, 1], [], []>} : vector<1x256xf32>, vector<256x256xf32>, vector<1x256xf32> -> vector<1x256xf32>
    %cst_39 = arith.constant 1.000000e-30 : f32
    %97 = vector.broadcast %cst_39 : f32 to vector<1x256xf32>
    %98 = arith.addf %96, %97 : vector<1x256xf32>
    %99 = math.log %98 : vector<1x256xf32>
    %100 = arith.subf %25, %99 : vector<1x256xf32>
    %101 = arith.addf %77, %100 : vector<1x256xf32>
    %c0_40 = arith.constant 0 : index
    %c0_41 = arith.constant 0 : index
    %102 = vector.load %arg1[%c0_40, %c0_41] : memref<256x256xf32, #tpu.memory_space<vmem>>, vector<256x256xf32>
    %103 = vector.broadcast %89 : vector<256x1xf32> to vector<256x256xf32>
    %104 = arith.addf %102, %103 : vector<256x256xf32>
    %105 = vector.broadcast %101 : vector<1x256xf32> to vector<256x256xf32>
    %106 = arith.addf %104, %105 : vector<256x256xf32>
    %107 = math.exp %106 : vector<256x256xf32>
    %cst_42 = arith.constant dense<0.000000e+00> : vector<256x1xf32>
    %108 = tpu.matmul %107, %26, %cst_42 {dimension_numbers = #tpu.dot_dimension_numbers<[1], [0], [0], [1], [0, 0, 1, 1], [], []>} : vector<256x256xf32>, vector<256x1xf32>, vector<256x1xf32> -> vector<256x1xf32>
    %cst_43 = arith.constant 1.000000e-30 : f32
    %109 = vector.broadcast %cst_43 : f32 to vector<256x1xf32>
    %110 = arith.addf %108, %109 : vector<256x1xf32>
    %111 = math.log %110 : vector<256x1xf32>
    %112 = arith.subf %20, %111 : vector<256x1xf32>
    %113 = arith.addf %89, %112 : vector<256x1xf32>
    %c0_44 = arith.constant 0 : index
    %c0_45 = arith.constant 0 : index
    %114 = vector.load %arg1[%c0_44, %c0_45] : memref<256x256xf32, #tpu.memory_space<vmem>>, vector<256x256xf32>
    %115 = vector.broadcast %113 : vector<256x1xf32> to vector<256x256xf32>
    %116 = arith.addf %114, %115 : vector<256x256xf32>
    %117 = vector.broadcast %101 : vector<1x256xf32> to vector<256x256xf32>
    %118 = arith.addf %116, %117 : vector<256x256xf32>
    %119 = math.exp %118 : vector<256x256xf32>
    %cst_46 = arith.constant dense<0.000000e+00> : vector<1x256xf32>
    %120 = tpu.matmul %27, %119, %cst_46 {dimension_numbers = #tpu.dot_dimension_numbers<[1], [0], [0], [1], [0, 0, 1, 1], [], []>} : vector<1x256xf32>, vector<256x256xf32>, vector<1x256xf32> -> vector<1x256xf32>
    %cst_47 = arith.constant 1.000000e-30 : f32
    %121 = vector.broadcast %cst_47 : f32 to vector<1x256xf32>
    %122 = arith.addf %120, %121 : vector<1x256xf32>
    %123 = math.log %122 : vector<1x256xf32>
    %124 = arith.subf %25, %123 : vector<1x256xf32>
    %125 = arith.addf %101, %124 : vector<1x256xf32>
    %c0_48 = arith.constant 0 : index
    %c0_49 = arith.constant 0 : index
    %126 = vector.load %arg1[%c0_48, %c0_49] : memref<256x256xf32, #tpu.memory_space<vmem>>, vector<256x256xf32>
    %127 = vector.broadcast %113 : vector<256x1xf32> to vector<256x256xf32>
    %128 = arith.addf %126, %127 : vector<256x256xf32>
    %129 = vector.broadcast %125 : vector<1x256xf32> to vector<256x256xf32>
    %130 = arith.addf %128, %129 : vector<256x256xf32>
    %131 = math.exp %130 : vector<256x256xf32>
    %cst_50 = arith.constant dense<0.000000e+00> : vector<256x1xf32>
    %132 = tpu.matmul %131, %26, %cst_50 {dimension_numbers = #tpu.dot_dimension_numbers<[1], [0], [0], [1], [0, 0, 1, 1], [], []>} : vector<256x256xf32>, vector<256x1xf32>, vector<256x1xf32> -> vector<256x1xf32>
    %cst_51 = arith.constant 1.000000e-30 : f32
    %133 = vector.broadcast %cst_51 : f32 to vector<256x1xf32>
    %134 = arith.addf %132, %133 : vector<256x1xf32>
    %135 = math.log %134 : vector<256x1xf32>
    %136 = arith.subf %20, %135 : vector<256x1xf32>
    %137 = arith.addf %113, %136 : vector<256x1xf32>
    %c0_52 = arith.constant 0 : index
    %c0_53 = arith.constant 0 : index
    %138 = vector.load %arg1[%c0_52, %c0_53] : memref<256x256xf32, #tpu.memory_space<vmem>>, vector<256x256xf32>
    %139 = vector.broadcast %137 : vector<256x1xf32> to vector<256x256xf32>
    %140 = arith.addf %138, %139 : vector<256x256xf32>
    %141 = vector.broadcast %125 : vector<1x256xf32> to vector<256x256xf32>
    %142 = arith.addf %140, %141 : vector<256x256xf32>
    %143 = math.exp %142 : vector<256x256xf32>
    %cst_54 = arith.constant dense<0.000000e+00> : vector<1x256xf32>
    %144 = tpu.matmul %27, %143, %cst_54 {dimension_numbers = #tpu.dot_dimension_numbers<[1], [0], [0], [1], [0, 0, 1, 1], [], []>} : vector<1x256xf32>, vector<256x256xf32>, vector<1x256xf32> -> vector<1x256xf32>
    %cst_55 = arith.constant 1.000000e-30 : f32
    %145 = vector.broadcast %cst_55 : f32 to vector<1x256xf32>
    %146 = arith.addf %144, %145 : vector<1x256xf32>
    %147 = math.log %146 : vector<1x256xf32>
    %148 = arith.subf %25, %147 : vector<1x256xf32>
    %149 = arith.addf %125, %148 : vector<1x256xf32>
    %c0_56 = arith.constant 0 : index
    %c0_57 = arith.constant 0 : index
    %150 = vector.load %arg1[%c0_56, %c0_57] : memref<256x256xf32, #tpu.memory_space<vmem>>, vector<256x256xf32>
    %151 = vector.broadcast %137 : vector<256x1xf32> to vector<256x256xf32>
    %152 = arith.addf %150, %151 : vector<256x256xf32>
    %153 = vector.broadcast %149 : vector<1x256xf32> to vector<256x256xf32>
    %154 = arith.addf %152, %153 : vector<256x256xf32>
    %155 = math.exp %154 : vector<256x256xf32>
    %156 = arith.mulf %155, %150 : vector<256x256xf32>
    %cst_58 = arith.constant dense<0.000000e+00> : vector<256x1xf32>
    %157 = tpu.matmul %156, %26, %cst_58 {dimension_numbers = #tpu.dot_dimension_numbers<[1], [0], [0], [1], [0, 0, 1, 1], [], []>} : vector<256x256xf32>, vector<256x1xf32>, vector<256x1xf32> -> vector<256x1xf32>
    %cst_59 = arith.constant dense<0.000000e+00> : vector<1xf32>
    %158 = vector.multi_reduction <add>, %157, %cst_59 [0] : vector<256x1xf32> to vector<1xf32>
    %159 = vector.shape_cast %158 : vector<1xf32> to vector<1x1xf32>
    %cst_60 = arith.constant -0.00999999977 : f32
    %160 = vector.broadcast %cst_60 : f32 to vector<1x1xf32>
    %161 = arith.mulf %160, %159 : vector<1x1xf32>
    %c0_61 = arith.constant 0 : index
    %c0_62 = arith.constant 0 : index
    %c0_63 = arith.constant 0 : index
    %162 = vector.load %arg4[%c0_61, %c0_62, %c0_63] : memref<1x1x1xf32, #tpu.memory_space<vmem>>, vector<1x1x1xf32>
    %163 = vector.shape_cast %162 : vector<1x1x1xf32> to vector<1x1xf32>
    %164 = vector.shape_cast %161 : vector<1x1xf32> to vector<1x1x1xf32>
    tpu.vector_store %arg4[%c0_61, %c0_62, %c0_63], %164 {strides = array<i32>} : memref<1x1x1xf32, #tpu.memory_space<vmem>>, vector<1x1x1xf32>,
    return
  }
  func.func @transform_0(%arg0: i32) -> (i32, i32) {
    %c0_i32 = arith.constant 0 : i32
    %c0_i32_0 = arith.constant 0 : i32
    %c0_i32_1 = arith.constant 0 : i32
    return %c0_i32, %c0_i32_0 : i32, i32
  }
  func.func @transform_1(%arg0: i32) -> (i32, i32, i32) {
    %c0_i32 = arith.constant 0 : i32
    %c0_i32_0 = arith.constant 0 : i32
    %c0_i32_1 = arith.constant 0 : i32
    return %arg0, %c0_i32, %c0_i32_0 : i32, i32, i32
  }
  func.func @transform_2(%arg0: i32) -> (i32, i32, i32) {
    %c0_i32 = arith.constant 0 : i32
    %c0_i32_0 = arith.constant 0 : i32
    %c0_i32_1 = arith.constant 0 : i32
    return %arg0, %c0_i32, %c0_i32_0 : i32, i32, i32
  }
  func.func @transform_3(%arg0: i32) -> (i32, i32, i32) {
    %c0_i32 = arith.constant 0 : i32
    %c0_i32_0 = arith.constant 0 : i32
    %c0_i32_1 = arith.constant 0 : i32
    return %arg0, %c0_i32, %c0_i32_0 : i32, i32, i32
  }
}

</mosaic_0001>

<bundles_post_ra>
// kernel: tpu_custom_call.1
= control target key start
LH: loop header
LB: loop body
LE: loop exit
PB: predicated region body
PF: predicated region fallthrough
CT: control target
= control target key end

     0   :  { %s9294_s12 = smov 0   ;;  %s13871_s0 = inlined_call_operand.vmem [shape: f32[256,256], index: 0, kind: input, shape index: {}]   ;;  %s13872_s1 = inlined_call_operand.vmem [shape: f32[2,256,1], index: 1, kind: input, shape index: {}]   ;;  %s13873_s2 = inlined_call_operand.vmem [shape: f32[2,1,256], index: 2, kind: input, shape index: {}]   ;;  %s13874_s3 = inlined_call_operand.vmem [shape: f32[2,1,1], index: 3, kind: output, shape index: {}]  }
   0x1 LB: > { %s6585_s13 = sadd.s32 4294967295, %s9267_s12   ;;  %p6589_p0 = scmp.ge.s32.totalorder %s9267_s12, 1  ;;  %s9267_s12 = sphi %s9294_s12, %s13_s12  }
   0x2   : > { %p146_p1 = scmp.lt.s32.totalorder %s9267_s12, 3 }
   0x4   : > { %p147_p2 = pnand %p6589_p0, %p146_p1 }
   0x6   : > { %150 = sbr.rel (%p147_p2) target bundleno = 4248 (0x1098), region = 32 }
   0xd   : > { %v511_v0 = vld [vmem:[%s13871_s0 + $0x8] sm:$0xff]  ;;  %v13877_v1 = vmov 0.0|0.0   ;;  %v13875_v3 = vmov 1.0|1.0   ;;  %v510_v5 = vld [vmem:[%s13871_s0] sm:$0xff]  ;;  %v513_v6 = vld [vmem:[%s13871_s0 + $0x18] sm:$0xff] }
   0xe   : > { %6596 = vmatprep.subr.bf16.mxu0 %v13877_v1  ;;  %v704_v2 = vmul.f32 1.442695, %v511_v0  ;;  %v702_v7 = vmul.f32 1.442695, %v510_v5  ;;  %v708_v8 = vmul.f32 1.442695, %v513_v6 }
   0xf   : > { %6597 = vmatpush1.bf16.msra.mxu0 %v13875_v3  ;;  %v512_v9 = vld [vmem:[%s13871_s0 + $0x10] sm:$0xff]  ;;  %v515_v10 = vld [vmem:[%s13871_s0 + $0x28] sm:$0xff]  ;;  %v514_v13 = vld [vmem:[%s13871_s0 + $0x20] sm:$0xff]  ;;  %p172_p3 = scmp.lt.s32.totalorder %s6585_s13, 1  ;;  %vm316_vm0 = vcmask 7168   ;;  %vm494_vm1 = vcmask 1040384  }
  0x10   : > { %6598 = vmatprep.subr.bf16.mxu0 %v13877_v1  ;;  %7123 = vpow2.f32 %v704_v2  ;;  %v706_v11 = vmul.f32 1.442695, %v512_v9  ;;  %v712_v12 = vmul.f32 1.442695, %v515_v10  ;;  %v517_v14 = vld [vmem:[%s13871_s0 + $0x38] sm:$0xff]  ;;  %v516_v17 = vld [vmem:[%s13871_s0 + $0x30] sm:$0xff] }
  0x11   : > { %7125 = vpow2.f32 %v702_v7  ;;  %v710_v15 = vmul.f32 1.442695, %v514_v13  ;;  %v716_v16 = vmul.f32 1.442695, %v517_v14  ;;  %v519_v18 = vld [vmem:[%s13871_s0 + $0x48] sm:$0xff]  ;;  %v518_v21 = vld [vmem:[%s13871_s0 + $0x40] sm:$0xff] }
  0x12   : > { %7127 = vpow2.f32 %v708_v8  ;;  %v714_v19 = vmul.f32 1.442695, %v516_v17  ;;  %v720_v20 = vmul.f32 1.442695, %v519_v18  ;;  %v521_v23 = vld [vmem:[%s13871_s0 + $0x58] sm:$0xff]  ;;  %v520_v27 = vld [vmem:[%s13871_s0 + $0x50] sm:$0xff] }
  0x13   : > { %6599 = vmatpush1.bf16.msra.mxu0 %v13875_v3  ;;  %7129 = vpow2.f32 %v706_v11  ;;  %v718_v25 = vmul.f32 1.442695, %v518_v21  ;;  %v724_v26 = vmul.f32 1.442695, %v521_v23  ;;  %v523_v29 = vld [vmem:[%s13871_s0 + $0x68] sm:$0xff]  ;;  %v522_v33 = vld [vmem:[%s13871_s0 + $0x60] sm:$0xff] }
  0x14   : > { %6600 = vmatprep.subr.bf16.mxu0 %v13877_v1  ;;  %7131 = vpow2.f32 %v712_v12  ;;  %v722_v31 = vmul.f32 1.442695, %v520_v27  ;;  %v728_v32 = vmul.f32 1.442695, %v523_v29  ;;  %v525_v35 = vld [vmem:[%s13871_s0 + $0x78] sm:$0xff]  ;;  %v524_v39 = vld [vmem:[%s13871_s0 + $0x70] sm:$0xff] }
  0x15   : > { %7133 = vpow2.f32 %v710_v15  ;;  %v726_v37 = vmul.f32 1.442695, %v522_v33  ;;  %v732_v38 = vmul.f32 1.442695, %v525_v35  ;;  %v527_v41 = vld [vmem:[%s13871_s0 + $0x88] sm:$0xff]  ;;  %v526_v45 = vld [vmem:[%s13871_s0 + $0x80] sm:$0xff] }
  0x16   : > { %7135 = vpow2.f32 %v716_v16  ;;  %v730_v43 = vmul.f32 1.442695, %v524_v39  ;;  %v736_v44 = vmul.f32 1.442695, %v527_v41  ;;  %v529_v47 = vld [vmem:[%s13871_s0 + $0x98] sm:$0xff]  ;;  %v528_v51 = vld [vmem:[%s13871_s0 + $0x90] sm:$0xff] }
  0x17   : > { %6601 = vmatpush1.bf16.msra.mxu0 %v13875_v3  ;;  %7137 = vpow2.f32 %v714_v19  ;;  %v734_v49 = vmul.f32 1.442695, %v526_v45  ;;  %v740_v50 = vmul.f32 1.442695, %v529_v47  ;;  %v531_v53 = vld [vmem:[%s13871_s0 + $0xa8] sm:$0xff]  ;;  %s15064_s13 = smov (!%p172_p3, %s6585_s13), 1 }
  0x18   : > { %6602 = vmatprep.subr.bf16.mxu0 %v13877_v1  ;;  %7139 = vpow2.f32 %v720_v20  ;;  %v738_v55 = vmul.f32 1.442695, %v528_v51  ;;  %v744_v56 = vmul.f32 1.442695, %v531_v53  ;;  %v530_v57 = vld [vmem:[%s13871_s0 + $0xa0] sm:$0xff]  ;;  %v533_v59 = vld [vmem:[%s13871_s0 + $0xb8] sm:$0xff]  ;;  %s183_s20 = scalar_lea.vmem %s13874_s3, %s15064_s13 }
  0x19   : > { %7141 = vpow2.f32 %v718_v25  ;;  %s6595_s8 = sshll.u32 %s15064_s13, 8  ;;  %v742_v61 = vmul.f32 1.442695, %v530_v57  ;;  %v748_v62 = vmul.f32 1.442695, %v533_v59  ;;  %v532_v63 = vld [vmem:[%s13871_s0 + $0xb0] sm:$0xff] }
  0x1a   : > { %v7124_v4 = vpop.eup %7123  ;;  %7143 = vpow2.f32 %v724_v26  ;;  %s9416_s15 = scalar_lea.vmem %s13872_s1, %s6595_s8  ;;  %v535_v2 = vld [vmem:[%s13871_s0 + $0xc8] sm:$0xff]  ;;  %v746_v5 = vmul.f32 1.442695, %v532_v63  ;;  %v534_v9 = vld [vmem:[%s13871_s0 + $0xc0] sm:$0xff]  ;;  %v537_v11 = vld [vmem:[%s13871_s0 + $0xd8] sm:$0xff]  ;;  %s6592_s19 = sshll.u32 %s15064_s13, 1 }
  0x1b   : > { %6603 = vmatpush1.bf16.msra.mxu0 %v13875_v3  ;;  %894 = vmatprep.mubr.f32.mxu0 %v7124_v4  ;;  %v7126_v22 = vpop.eup %7125  ;;  %7145 = vpow2.f32 %v722_v31  ;;  %v184_v6 = vld [vmem:[%s9416_s15] sm:$0xff]  ;;  %v185_v7 = vld [vmem:[%s9416_s15 + $0x8] sm:$0xff]  ;;  %v752_v8 = vmul.f32 1.442695, %v535_v2  ;;  %v186_v13 = vld [vmem:[%s9416_s15 + $0x10] sm:$0xff]  ;;  %s180_s22 = scalar_lea.vmem %s13873_s2, %s6592_s19  ;;  %vm6524_vm2 = vcmask 0  }
  0x1c   : > { %6604 = vmatprep.subr.bf16.mxu0 %v13877_v1  ;;  %v7128_v24 = vpop.eup %7127  ;;  %7147 = vpow2.f32 %v728_v32  ;;  %v217_v14 = vmax.f32 %v184_v6, 0.0  ;;  %v218_v15 = vmax.f32 %v185_v7, 0.0  ;;  %v750_v16 = vmul.f32 1.442695, %v534_v9  ;;  %v536_v18 = vld [vmem:[%s13871_s0 + $0xd0] sm:$0xff]  ;;  %v539_v20 = vld [vmem:[%s13871_s0 + $0xe8] sm:$0xff] }
  0x1d   : > { %v7130_v28 = vpop.eup %7129  ;;  %7149 = vpow2.f32 %v726_v37  ;;  %v756_v17 = vmul.f32 1.442695, %v537_v11  ;;  %v219_v21 = vmax.f32 %v186_v13, 0.0  ;;  %v754_v25 = vmul.f32 1.442695, %v536_v18  ;;  %v187_v26 = vld [vmem:[%s9416_s15 + $0x18] sm:$0xff] }
  0x1e   : > { %v7132_v30 = vpop.eup %7131  ;;  %7151 = vpow2.f32 %v732_v38  ;;  %v249_v23 = vmin.f32 %v217_v14, 1e+09  ;;  %v760_v27 = vmul.f32 1.442695, %v539_v20  ;;  %v188_v33 = vld [vmem:[%s9416_s15 + $0x20] sm:$0xff]  ;;  %v540_v39 = vld [vmem:[%s13871_s0 + $0xf0] sm:$0xff] }
  0x1f   : > { %6605 = vmatpush1.bf16.msra.mxu0 %v13875_v3  ;;  %v7134_v34 = vpop.eup %7133  ;;  %7153 = vpow2.f32 %v730_v43  ;;  %v251_v31 = vmin.f32 %v219_v21, 1e+09  ;;  %v543_v41 = vld [vmem:[%s13871_s0 + $0x108] sm:$0xff]  ;;  %v542_v51 = vld [vmem:[%s13871_s0 + $0x100] sm:$0xff]  ;;  %v545_v53 = vld [vmem:[%s13871_s0 + $0x118] sm:$0xff] }
  0x20   : > { %6606 = vmatprep.subr.bf16.mxu0 %v13877_v1  ;;  %v7136_v36 = vpop.eup %7135  ;;  %7155 = vpow2.f32 %v736_v44  ;;  %v9444_v35 = vadd.f32 1e-09, %v249_v23  ;;  %v544_v63 = vld [vmem:[%s13871_s0 + $0x110] sm:$0xff]  ;;  %v547_v2 = vld [vmem:[%s13871_s0 + $0x128] sm:$0xff]  ;;  %v191_v11 = vld [vmem:[%s9416_s15 + $0x38] sm:$0xff] }
  0x21   : > { %v7138_v40 = vpop.eup %7137  ;;  %7157 = vpow2.f32 %v734_v49  ;;  %v9454_v45 = vadd.f32 1e-09, %v251_v31  ;;  %v189_v49 = vld [vmem:[%s9416_s15 + $0x28] sm:$0xff]  ;;  %v546_v13 = vld [vmem:[%s13871_s0 + $0x120] sm:$0xff]  ;;  %v224_v18 = vmax.f32 %v191_v11, 0.0 }
  0x22   : > { %v7140_v42 = vpop.eup %7139  ;;  %7159 = vpow2.f32 %v740_v50  ;;  %v768_v50 = vmul.f32 1.442695, %v543_v41  ;;  %v192_v23 = vld [vmem:[%s9416_s15 + $0x40] sm:$0xff]  ;;  %v553_v41 = vld [vmem:[%s13871_s0 + $0x158] sm:$0xff] }
  0x23   : > { %6607 = vmatpush1.bf16.msra.mxu0 %v13875_v3  ;;  %v7142_v46 = vpop.eup %7141  ;;  %7161 = vpow2.f32 %v738_v55  ;;  %v320_v59 = vsel %vm316_vm0, %v9454_v45, 0.0  ;;  %v256_v31 = vmin.f32 %v224_v18, 1e+09  ;;  %v559_v18 = vld [vmem:[%s13871_s0 + $0x188] sm:$0xff] }
  0x24   : > { %6608 = vmatprep.subr.bf16.mxu0 %v13877_v1  ;;  %v7144_v48 = vpop.eup %7143  ;;  %7163 = vpow2.f32 %v744_v56  ;;  %v222_v56 = vmax.f32 %v189_v49, 0.0 }
  0x25   : > { %v7146_v52 = vpop.eup %7145  ;;  %7165 = vpow2.f32 %v742_v61  ;;  %v190_v61 = vld [vmem:[%s9416_s15 + $0x30] sm:$0xff] }
  0x26   : > { %v7148_v54 = vpop.eup %7147  ;;  %7167 = vpow2.f32 %v748_v62  ;;  %v772_v62 = vmul.f32 1.442695, %v545_v53  ;;  %v223_v6 = vmax.f32 %v190_v61, 0.0  ;;  %v254_v7 = vmin.f32 %v222_v56, 1e+09 }
  0x27   : > { %6609 = vmatpush1.bf16.msra.mxu0 %v13875_v3  ;;  %v7150_v58 = vpop.eup %7149  ;;  %7169 = vpow2.f32 %v746_v5 }
  0x28   : > { %6610 = vmatprep.subr.bf16.mxu0 %v13877_v1  ;;  %v7152_v60 = vpop.eup %7151  ;;  %7171 = vpow2.f32 %v752_v8  ;;  %v9489_v20 = vadd.f32 1e-09, %v254_v7 }
  0x29   : > { %v7154_v0 = vpop.eup %7153  ;;  %7173 = vpow2.f32 %v750_v16 }
  0x2a   : > { %v7156_v4 = vpop.eup %7155  ;;  %7175 = vpow2.f32 %v756_v17 }
  0x2b   : > { %6611 = vmatpush1.bf16.msra.mxu0 %v13875_v3  ;;  %v7158_v10 = vpop.eup %7157  ;;  %7177 = vpow2.f32 %v754_v25  ;;  %v548_v25 = vld [vmem:[%s13871_s0 + $0x130] sm:$0xff] }
  0x2c   : > { %6612 = vmatprep.subr.bf16.mxu0 %v13877_v1  ;;  %v7160_v12 = vpop.eup %7159  ;;  %7179 = vpow2.f32 %v760_v27  ;;  %v551_v27 = vld [vmem:[%s13871_s0 + $0x148] sm:$0xff] }
  0x2d   : > { %v7162_v19 = vpop.eup %7161 }
  0x2f   : > { %6613 = vmatpush1.bf16.msra.mxu0 %v13875_v3 }
  0x30   : > { %6614 = vmatprep.subr.bf16.mxu0 %v13877_v1 }
  0x33   : > { %6615 = vmatpush1.bf16.msra.mxu0 %v13875_v3 }
  0x34   : > { %6616 = vmatprep.subr.bf16.mxu0 %v13877_v1 }
  0x37   : > { %6617 = vmatpush1.bf16.msra.mxu0 %v13875_v3 }
  0x38   : > { %6618 = vmatprep.subr.bf16.mxu0 %v13877_v1 }
  0x3b   : > { %6619 = vmatpush1.bf16.msra.mxu0 %v13875_v3 }
  0x3c   : > { %6620 = vmatprep.subr.bf16.mxu0 %v13877_v1 }
  0x3f   : > { %6621 = vmatpush1.bf16.msra.mxu0 %v13875_v3 }
  0x40   : > { %6622 = vmatprep.subr.bf16.mxu0 %v13877_v1 }
  0x43   : > { %6623 = vmatpush1.bf16.msra.mxu0 %v13875_v3 }
  0x44   : > { %6624 = vmatprep.subr.bf16.mxu0 %v13877_v1 }
  0x47   : > { %6625 = vmatpush1.bf16.msra.mxu0 %v13875_v3 }
  0x48   : > { %6626 = vmatprep.subr.bf16.mxu0 %v13877_v1 }
  0x4b   : > { %6627 = vmatpush1.bf16.msra.mxu0 %v13875_v3 }
  0x4e   : > { %895 = vmatmul.mubr.f32.vlgmr.msra.gmra.mrb[0].mxu0 %v7126_v22  ;;  %v7164_v22 = vpop.eup %7163 }
  0x4f   : > { %899 = vmatprep.mubr.f32.mxu0 %v7128_v24  ;;  %v250_v24 = vmin.f32 %v218_v15, 1e+09  ;;  %v7166_v29 = vpop.eup %7165  ;;  %v549_v15 = vld [vmem:[%s13871_s0 + $0x138] sm:$0xff] }
  0x50   : > { %v7168_v32 = vpop.eup %7167 }
  0x52   : > { %900 = vmatmul.mubr.f32.gmra.mrb[2].mxu0 %v7130_v28  ;;  %v538_v28 = vld [vmem:[%s13871_s0 + $0xe0] sm:$0xff] }
  0x53   : > { %904 = vmatprep.mubr.f32.mxu0 %v7132_v30  ;;  %v541_v30 = vld [vmem:[%s13871_s0 + $0xf8] sm:$0xff]  ;;  %v758_v37 = vmul.f32 1.442695, %v538_v28 }
  0x54   : > { %v764_v38 = vmul.f32 1.442695, %v541_v30  ;;  %v225_v30 = vmax.f32 %v192_v23, 0.0 }
  0x55   : > { %7181 = vpow2.f32 %v758_v37  ;;  %v193_v37 = vld [vmem:[%s9416_s15 + $0x48] sm:$0xff] }
  0x56   : > { %905 = vmatmul.mubr.f32.gmra.mrb[4].mxu0 %v7134_v34  ;;  %v220_v34 = vmax.f32 %v187_v26, 0.0  ;;  %7183 = vpow2.f32 %v764_v38  ;;  %v784_v38 = vmul.f32 1.442695, %v551_v27  ;;  %v197_v27 = vld [vmem:[%s9416_s15 + $0x68] sm:$0xff] }
  0x57   : > { %909 = vmatprep.mubr.f32.mxu0 %v7136_v36  ;;  %v9446_v36 = vadd.f32 1e-09, %v250_v24  ;;  %v780_v24 = vmul.f32 1.442695, %v549_v15 }
  0x58   : > { %v252_v44 = vmin.f32 %v220_v34, 1e+09  ;;  %v778_v34 = vmul.f32 1.442695, %v548_v25 }
  0x59   : > { %v318_v47 = vsel %vm316_vm0, %v9446_v36, 0.0 }
  0x5a   : > { %910 = vmatmul.mubr.f32.gmra.mrb[6].mxu0 %v7138_v40  ;;  %v7170_v40 = vpop.eup %7169 }
  0x5b   : > { %914 = vmatprep.mubr.f32.mxu0 %v7140_v42  ;;  %v221_v42 = vmax.f32 %v188_v33, 0.0  ;;  %v7172_v43 = vpop.eup %7171  ;;  %v326_v33 = vsel %vm316_vm0, %v9489_v20, 0.0 }
  0x5d   : > { %v253_v57 = vmin.f32 %v221_v42, 1e+09 }
  0x5e   : > { %915 = vmatmul.mubr.f32.gmra.mrb[8].mxu0 %v7142_v46  ;;  %v317_v46 = vsel %vm316_vm0, %v9444_v35, 0.0 }
  0x5f   : > { %919 = vmatprep.mubr.f32.mxu0 %v7144_v48  ;;  %v762_v48 = vmul.f32 1.442695, %v540_v39  ;;  %v9478_v8 = vadd.f32 1e-09, %v253_v57  ;;  %v550_v39 = vld [vmem:[%s13871_s0 + $0x140] sm:$0xff] }
  0x60   : > { %v782_v49 = vmul.f32 1.442695, %v550_v39 }
  0x61   : > { %7185 = vpow2.f32 %v762_v48  ;;  %v324_v21 = vsel %vm316_vm0, %v9478_v8, 0.0 }
  0x62   : > { %920 = vmatmul.mubr.f32.gmra.mrb[10].mxu0 %v7146_v52  ;;  %v7174_v52 = vpop.eup %7173  ;;  %7187 = vpow2.f32 %v768_v50  ;;  %v194_v50 = vld [vmem:[%s9416_s15 + $0x50] sm:$0xff] }
  0x63   : > { %924 = vmatprep.mubr.f32.mxu0 %v7148_v54  ;;  %v319_v54 = vadd.f32 %v318_v47, %v317_v46  ;;  %v7176_v55 = vpop.eup %7175  ;;  %v257_v46 = vmin.f32 %v225_v30, 1e+09  ;;  %v9511_v47 = vadd.f32 1e-09, %v256_v31  ;;  %v227_v57 = vmax.f32 %v194_v50, 0.0  ;;  %v561_v31 = vld [vmem:[%s13871_s0 + $0x198] sm:$0xff] }
  0x65   : > { %v330_v61 = vsel %vm316_vm0, %v9511_v47, 0.0 }
  0x66   : > { %925 = vmatmul.mubr.f32.gmra.mrb[12].mxu0 %v7150_v58  ;;  %v9467_v58 = vadd.f32 1e-09, %v252_v44  ;;  %v226_v44 = vmax.f32 %v193_v37, 0.0  ;;  %v230_v37 = vmax.f32 %v197_v27, 0.0 }
  0x67   : > { %929 = vmatprep.mubr.f32.mxu0 %v7152_v60  ;;  %v766_v60 = vmul.f32 1.442695, %v542_v51  ;;  %v788_v51 = vmul.f32 1.442695, %v553_v41 }
  0x68   : > { %v322_v9 = vsel %vm316_vm0, %v9467_v58, 0.0 }
  0x69   : > { %7189 = vpow2.f32 %v766_v60  ;;  %v9522_v60 = vadd.f32 1e-09, %v257_v46 }
  0x6a   : > { %930 = vmatmul.mubr.f32.gmra.mrb[14].mxu0 %v7154_v0  ;;  %v7178_v0 = vpop.eup %7177  ;;  %7191 = vpow2.f32 %v772_v62 }
  0x6b   : > { %934 = vmatprep.mubr.f32.mxu0 %v7156_v4  ;;  %v321_v4 = vadd.f32 %v320_v59, %v319_v54  ;;  %v7180_v5 = vpop.eup %7179  ;;  %v555_v54 = vld [vmem:[%s13871_s0 + $0x168] sm:$0xff]  ;;  %v258_v59 = vmin.f32 %v226_v44, 1e+09  ;;  %v560_v44 = vld [vmem:[%s13871_s0 + $0x190] sm:$0xff] }
  0x6c   : > { %v7182_v14 = vpop.eup %7181 }
  0x6d   : > { %v323_v16 = vadd.f32 %v322_v9, %v321_v4  ;;  %v7184_v17 = vpop.eup %7183  ;;  %v9533_v11 = vadd.f32 1e-09, %v258_v59  ;;  %v562_v59 = vld [vmem:[%s13871_s0 + $0x1a0] sm:$0xff] }
  0x6e   : > { %935 = vmatmul.mubr.f32.gmra.mrb[16].mxu0 %v7158_v10  ;;  %v770_v10 = vmul.f32 1.442695, %v544_v63  ;;  %v7186_v26 = vpop.eup %7185  ;;  %v195_v63 = vld [vmem:[%s9416_s15 + $0x58] sm:$0xff] }
  0x6f   : > { %939 = vmatprep.mubr.f32.mxu0 %v7160_v12  ;;  %v776_v12 = vmul.f32 1.442695, %v547_v2  ;;  %v325_v28 = vadd.f32 %v324_v21, %v323_v16  ;;  %v554_v2 = vld [vmem:[%s13871_s0 + $0x160] sm:$0xff]  ;;  %v228_v9 = vmax.f32 %v195_v63, 0.0  ;;  %v556_v16 = vld [vmem:[%s13871_s0 + $0x170] sm:$0xff]  ;;  %v334_v25 = vsel %vm316_vm0, %v9533_v11, 0.0 }
  0x70   : > { %7193 = vpow2.f32 %v770_v10  ;;  %v259_v10 = vmin.f32 %v227_v57, 1e+09 }
  0x71   : > { %7195 = vpow2.f32 %v776_v12  ;;  %v327_v42 = vadd.f32 %v326_v33, %v325_v28  ;;  %v332_v12 = vsel %vm316_vm0, %v9522_v60, 0.0  ;;  %v260_v23 = vmin.f32 %v228_v9, 1e+09  ;;  %v200_v9 = vld [vmem:[%s9416_s15 + $0x80] sm:$0xff] }
  0x72   : > { %940 = vmatmul.mubr.f32.gmra.mrb[18].mxu0 %v7162_v19  ;;  %v255_v19 = vmin.f32 %v223_v6, 1e+09  ;;  %v800_v28 = vmul.f32 1.442695, %v559_v18 }
  0x73   : > { %944 = vmatprep.mubr.f32.mxu0 %v7164_v22  ;;  %v774_v22 = vmul.f32 1.442695, %v546_v13  ;;  %v790_v13 = vmul.f32 1.442695, %v554_v2  ;;  %v9555_v39 = vadd.f32 1e-09, %v260_v23 }
  0x74   : > { %v201_v23 = vld [vmem:[%s9416_s15 + $0x88] sm:$0xff] }
  0x75   : > { %7197 = vpow2.f32 %v774_v22 }
  0x76   : > { %945 = vmatmul.mubr.f32.gmra.mrb[20].mxu0 %v7166_v29  ;;  %v7188_v29 = vpop.eup %7187  ;;  %7199 = vpow2.f32 %v780_v24  ;;  %v9544_v24 = vadd.f32 1e-09, %v259_v10 }
  0x77   : > { %949 = vmatprep.mubr.f32.mxu0 %v7168_v32  ;;  %v9500_v32 = vadd.f32 1e-09, %v255_v19  ;;  %7201 = vpow2.f32 %v778_v34 }
  0x78   : > { %7203 = vpow2.f32 %v784_v38 }
  0x79   : > { %v328_v48 = vsel %vm316_vm0, %v9500_v32, 0.0  ;;  %7205 = vpow2.f32 %v782_v49 }
  0x7a   : > { %950 = vmatmul.mubr.f32.gmra.mrb[22].mxu0 %v7170_v40  ;;  %v7190_v40 = vpop.eup %7189  ;;  %7207 = vpow2.f32 %v788_v51 }
  0x7b   : > { %954 = vmatprep.mubr.f32.mxu0 %v7172_v43  ;;  %v7192_v43 = vpop.eup %7191 }
  0x7c   : > { %v7194_v53 = vpop.eup %7193 }
  0x7d   : > { %v7196_v56 = vpop.eup %7195 }
  0x7e   : > { %955 = vmatmul.mubr.f32.gmra.mrb[24].mxu0 %v7174_v52  ;;  %v552_v52 = vld [vmem:[%s13871_s0 + $0x150] sm:$0xff] }
  0x7f   : > { %959 = vmatprep.mubr.f32.mxu0 %v7176_v55  ;;  %v329_v55 = vadd.f32 %v328_v48, %v327_v42  ;;  %v786_v62 = vmul.f32 1.442695, %v552_v52  ;;  %v7198_v4 = vpop.eup %7197  ;;  %v198_v42 = vld [vmem:[%s9416_s15 + $0x70] sm:$0xff]  ;;  %v563_v48 = vld [vmem:[%s13871_s0 + $0x1a8] sm:$0xff]  ;;  %v262_v52 = vmin.f32 %v230_v37, 1e+09 }
  0x80   : > { %v7200_v7 = vpop.eup %7199  ;;  %v231_v51 = vmax.f32 %v198_v42, 0.0  ;;  %v808_v57 = vmul.f32 1.442695, %v563_v48  ;;  %v568_v42 = vld [vmem:[%s13871_s0 + $0x1d0] sm:$0xff] }
  0x81   : > { %v331_v6 = vadd.f32 %v330_v61, %v329_v55  ;;  %7209 = vpow2.f32 %v786_v62  ;;  %v802_v55 = vmul.f32 1.442695, %v560_v44  ;;  %v565_v62 = vld [vmem:[%s13871_s0 + $0x1b8] sm:$0xff]  ;;  %v571_v44 = vld [vmem:[%s13871_s0 + $0x1e8] sm:$0xff] }
  0x82   : > { %960 = vmatmul.mubr.f32.gmra.mrb[26].mxu0 %v7178_v0  ;;  %v792_v0 = vmul.f32 1.442695, %v555_v54  ;;  %v338_v54 = vsel %vm316_vm0, %v9555_v39, 0.0  ;;  %v812_v10 = vmul.f32 1.442695, %v565_v62  ;;  %v573_v62 = vld [vmem:[%s13871_s0 + $0x1f8] sm:$0xff] }
  0x83   : > { %964 = vmatprep.mubr.f32.mxu0 %v7180_v5  ;;  %v557_v5 = vld [vmem:[%s13871_s0 + $0x178] sm:$0xff]  ;;  %v333_v19 = vadd.f32 %v332_v12, %v331_v6  ;;  %v564_v12 = vld [vmem:[%s13871_s0 + $0x1b0] sm:$0xff] }
  0x84   : > { %7211 = vpow2.f32 %v792_v0  ;;  %v796_v15 = vmul.f32 1.442695, %v557_v5  ;;  %v9577_v5 = vadd.f32 1e-09, %v262_v52 }
  0x85   : > { %7213 = vpow2.f32 %v790_v13  ;;  %v335_v33 = vadd.f32 %v334_v25, %v333_v19 }
  0x86   : > { %965 = vmatmul.mubr.f32.gmra.mrb[28].mxu0 %v7182_v14  ;;  %v196_v14 = vld [vmem:[%s9416_s15 + $0x60] sm:$0xff]  ;;  %7215 = vpow2.f32 %v796_v15 }
  0x87   : > { %969 = vmatprep.mubr.f32.mxu0 %v7184_v17  ;;  %v7202_v17 = vpop.eup %7201  ;;  %v229_v22 = vmax.f32 %v196_v14, 0.0  ;;  %v567_v14 = vld [vmem:[%s13871_s0 + $0x1c8] sm:$0xff] }
  0x88   : > { %v7204_v21 = vpop.eup %7203  ;;  %v816_v25 = vmul.f32 1.442695, %v567_v14 }
  0x89   : > { %v7206_v30 = vpop.eup %7205  ;;  %v261_v38 = vmin.f32 %v229_v22, 1e+09  ;;  %v810_v22 = vmul.f32 1.442695, %v564_v12  ;;  %v828_v12 = vmul.f32 1.442695, %v573_v62 }
  0x8a   : > { %970 = vmatmul.mubr.f32.gmra.mrb[30].mxu0 %v7186_v26  ;;  %v794_v26 = vmul.f32 1.442695, %v556_v16  ;;  %v7208_v34 = vpop.eup %7207 }
  0x8b   : > { %974 = vmatprep.mubr.f32.mxu0 %v7188_v29  ;;  %v558_v29 = vld [vmem:[%s13871_s0 + $0x180] sm:$0xff]  ;;  %v7210_v46 = vpop.eup %7209 }
  0x8c   : > { %7217 = vpow2.f32 %v794_v26  ;;  %v798_v41 = vmul.f32 1.442695, %v558_v29  ;;  %v566_v26 = vld [vmem:[%s13871_s0 + $0x1c0] sm:$0xff] }
  0x8d   : > { %7219 = vpow2.f32 %v800_v28  ;;  %v569_v28 = vld [vmem:[%s13871_s0 + $0x1d8] sm:$0xff] }
  0x8e   : > { %975 = vmatmul.mubr.f32.gmra.mrb[32].mxu0 %v7190_v40  ;;  %v336_v40 = vsel %vm316_vm0, %v9544_v24, 0.0  ;;  %v7212_v50 = vpop.eup %7211  ;;  %7221 = vpow2.f32 %v798_v41  ;;  %v820_v41 = vmul.f32 1.442695, %v569_v28 }
  0x8f   : > { %979 = vmatprep.mubr.f32.mxu0 %v7192_v43  ;;  %v804_v43 = vmul.f32 1.442695, %v561_v31  ;;  %v337_v49 = vadd.f32 %v336_v40, %v335_v33  ;;  %v7214_v61 = vpop.eup %7213  ;;  %v234_v31 = vmax.f32 %v201_v23, 0.0  ;;  %v202_v40 = vld [vmem:[%s9416_s15 + $0x90] sm:$0xff] }
  0x90   : > { %v7216_v0 = vpop.eup %7215 }
  0x91   : > { %7223 = vpow2.f32 %v804_v43  ;;  %v339_v63 = vadd.f32 %v338_v54, %v337_v49  ;;  %v235_v49 = vmax.f32 %v202_v40, 0.0  ;;  %v818_v54 = vmul.f32 1.442695, %v568_v42 }
  0x92   : > { %980 = vmatmul.mubr.f32.gmra.mrb[34].mxu0 %v7194_v53  ;;  %v9566_v53 = vadd.f32 1e-09, %v261_v38  ;;  %7225 = vpow2.f32 %v802_v55  ;;  %v814_v38 = vmul.f32 1.442695, %v566_v26  ;;  %v203_v55 = vld [vmem:[%s9416_s15 + $0x98] sm:$0xff] }
  0x93   : > { %984 = vmatprep.mubr.f32.mxu0 %v7196_v56  ;;  %v199_v56 = vld [vmem:[%s9416_s15 + $0x78] sm:$0xff]  ;;  %7227 = vpow2.f32 %v808_v57  ;;  %v570_v57 = vld [vmem:[%s13871_s0 + $0x1e0] sm:$0xff] }
  0x94   : > { %v232_v2 = vmax.f32 %v199_v56, 0.0  ;;  %v340_v6 = vsel %vm316_vm0, %v9566_v53, 0.0  ;;  %v824_v56 = vmul.f32 1.442695, %v571_v44 }
  0x95   : > { %v341_v15 = vadd.f32 %v340_v6, %v339_v63 }
  0x96   : > { %985 = vmatmul.mubr.f32.gmra.mrb[36].mxu0 %v7198_v4  ;;  %v263_v4 = vmin.f32 %v231_v51, 1e+09  ;;  %v7218_v13 = vpop.eup %7217  ;;  %v264_v18 = vmin.f32 %v232_v2, 1e+09  ;;  %v236_v2 = vmax.f32 %v203_v55, 0.0 }
  0x97   : > { %989 = vmatprep.mubr.f32.mxu0 %v7200_v7  ;;  %v806_v7 = vmul.f32 1.442695, %v562_v59  ;;  %v7220_v16 = vpop.eup %7219  ;;  %v9271_v59 = vmov 0  }
  0x98   : > { %v9588_v19 = vadd.f32 1e-09, %v263_v4  ;;  %v7222_v27 = vpop.eup %7221  ;;  %7121 = vset.pattern.permute.xlu0 %v9271_v59  ;;  %7122 = vset.pattern.permute.xlu1 %v9271_v59  ;;  %v267_v4 = vmin.f32 %v235_v49, 1e+09  ;;  %v208_v59 = vld [vmem:[%s9416_s15 + $0xc0] sm:$0xff] }
  0x99   : > { %7229 = vpow2.f32 %v806_v7 }
  0x9a   : > { %990 = vmatmul.mubr.f32.gmra.mrb[38].mxu0 %v7202_v17  ;;  %v233_v17 = vmax.f32 %v200_v9, 0.0  ;;  %7231 = vpow2.f32 %v812_v10  ;;  %v344_v37 = vsel %vm316_vm0, %v9588_v19, 0.0  ;;  %v822_v9 = vmul.f32 1.442695, %v570_v57  ;;  %v204_v10 = vld [vmem:[%s9416_s15 + $0xa0] sm:$0xff] }
  0x9b   : > { %994 = vmatprep.mubr.f32.mxu0 %v7204_v21  ;;  %v342_v21 = vsel %vm316_vm0, %v9577_v5, 0.0  ;;  %7233 = vpow2.f32 %v810_v22 }
  0x9c   : > { %v343_v29 = vadd.f32 %v342_v21, %v341_v15  ;;  %v265_v33 = vmin.f32 %v233_v17, 1e+09  ;;  %7235 = vpow2.f32 %v816_v25  ;;  %v237_v17 = vmax.f32 %v204_v10, 0.0  ;;  %v205_v25 = vld [vmem:[%s9416_s15 + $0xa8] sm:$0xff] }
  0x9d   : > { %7237 = vpow2.f32 %v814_v38  ;;  %v9629_v21 = vadd.f32 1e-09, %v267_v4 }
  0x9e   : > { %995 = vmatmul.mubr.f32.gmra.mrb[40].mxu0 %v7206_v30  ;;  %v7224_v30 = vpop.eup %7223  ;;  %v9610_v51 = vadd.f32 1e-09, %v265_v33  ;;  %7239 = vpow2.f32 %v820_v41 }
  0x9f   : > { %999 = vmatprep.mubr.f32.mxu0 %v7208_v34  ;;  %v9599_v34 = vadd.f32 1e-09, %v264_v18  ;;  %v7226_v43 = vpop.eup %7225  ;;  %7241 = vpow2.f32 %v818_v54  ;;  %v268_v18 = vmin.f32 %v236_v2, 1e+09  ;;  %v352_v33 = vsel %vm316_vm0, %v9629_v21, 0.0 }
  0xa0   : > { %v7228_v48 = vpop.eup %7227  ;;  %v348_v7 = vsel %vm316_vm0, %v9610_v51, 0.0  ;;  %7243 = vpow2.f32 %v824_v56 }
  0xa1   : > { %v346_v52 = vsel %vm316_vm0, %v9599_v34, 0.0  ;;  %7245 = vpow2.f32 %v822_v9 }
  0xa2   : > { %1000 = vmatmul.mubr.f32.gmra.mrb[42].mxu0 %v7210_v46  ;;  %v345_v46 = vadd.f32 %v344_v37, %v343_v29  ;;  %7247 = vpow2.f32 %v828_v12  ;;  %v238_v29 = vmax.f32 %v205_v25, 0.0  ;;  %v206_v37 = vld [vmem:[%s9416_s15 + $0xb0] sm:$0xff]  ;;  %v211_v25 = vld [vmem:[%s9416_s15 + $0xd8] sm:$0xff] }
  0xa3   : > { %1004 = vmatprep.mubr.f32.mxu0 %v7212_v50  ;;  %v266_v50 = vmin.f32 %v234_v31, 1e+09  ;;  %v9634_v31 = vadd.f32 1e-09, %v268_v18  ;;  %v239_v42 = vmax.f32 %v206_v37, 0.0 }
  0xa4   : > { %v347_v63 = vadd.f32 %v346_v52, %v345_v46 }
  0xa5   : > { %v9621_v6 = vadd.f32 1e-09, %v266_v50  ;;  %v354_v46 = vsel %vm316_vm0, %v9634_v31, 0.0  ;;  %v271_v55 = vmin.f32 %v239_v42, 1e+09 }
  0xa6   : > { %1005 = vmatmul.mubr.f32.gmra.mrb[44].mxu0 %v7214_v61  ;;  %v7230_v61 = vpop.eup %7229  ;;  %v349_v15 = vadd.f32 %v348_v7, %v347_v63  ;;  %v241_v63 = vmax.f32 %v208_v59, 0.0  ;;  %v209_v7 = vld [vmem:[%s9416_s15 + $0xc8] sm:$0xff] }
  0xa7   : > { %1009 = vmatprep.mubr.f32.mxu0 %v7216_v0  ;;  %v7232_v0 = vpop.eup %7231  ;;  %v350_v22 = vsel %vm316_vm0, %v9621_v6, 0.0  ;;  %v9649_v2 = vadd.f32 1e-09, %v271_v55  ;;  %v242_v10 = vmax.f32 %v209_v7, 0.0 }
  0xa8   : > { %v7234_v14 = vpop.eup %7233  ;;  %v273_v12 = vmin.f32 %v241_v63, 1e+09  ;;  %v215_v63 = vld [vmem:[%s9416_s15 + $0xf8] sm:$0xff] }
  0xa9   : > { %v274_v18 = vmin.f32 %v242_v10, 1e+09 }
  0xaa   : > { %1010 = vmatmul.mubr.f32.gmra.mrb[46].mxu0 %v7218_v13  ;;  %v572_v13 = vld [vmem:[%s13871_s0 + $0x1f0] sm:$0xff] }
  0xab   : > { %1014 = vmatprep.mubr.f32.mxu0 %v7220_v16  ;;  %v7236_v16 = vpop.eup %7235  ;;  %v826_v23 = vmul.f32 1.442695, %v572_v13 }
  0xac   : > { %v7238_v26 = vpop.eup %7237 }
  0xad   : > { %v7240_v28 = vpop.eup %7239  ;;  %7249 = vpow2.f32 %v826_v23 }
  0xae   : > { %1015 = vmatmul.mubr.f32.gmra.mrb[48].mxu0 %v7222_v27  ;;  %v351_v27 = vadd.f32 %v350_v22, %v349_v15  ;;  %v7242_v38 = vpop.eup %7241  ;;  %v210_v15 = vld [vmem:[%s9416_s15 + $0xd0] sm:$0xff]  ;;  %v9659_v22 = vadd.f32 1e-09, %v273_v12 }
  0xaf   : > { %1019 = vmatprep.mubr.f32.mxu0 %v7224_v30  ;;  %v269_v30 = vmin.f32 %v237_v17, 1e+09  ;;  %v7244_v41 = vpop.eup %7243  ;;  %v243_v17 = vmax.f32 %v210_v15, 0.0 }
  0xb0   : > { %v353_v40 = vadd.f32 %v352_v33, %v351_v27  ;;  %v7246_v49 = vpop.eup %7245  ;;  %v244_v27 = vmax.f32 %v211_v25, 0.0  ;;  %v212_v33 = vld [vmem:[%s9416_s15 + $0xe0] sm:$0xff] }
  0xb1   : > { %v9639_v44 = vadd.f32 1e-09, %v269_v30  ;;  %v7248_v52 = vpop.eup %7247  ;;  %v364_v30 = vsel %vm316_vm0, %v9659_v22, 0.0 }
  0xb2   : > { %1020 = vmatmul.mubr.f32.gmra.mrb[50].mxu0 %v7226_v43  ;;  %v270_v43 = vmin.f32 %v238_v29, 1e+09  ;;  %v355_v50 = vadd.f32 %v354_v46, %v353_v40  ;;  %v9664_v29 = vadd.f32 1e-09, %v274_v18  ;;  %v276_v40 = vmin.f32 %v244_v27, 1e+09 }
  0xb3   : > { %1024 = vmatprep.mubr.f32.mxu0 %v7228_v48  ;;  %v207_v48 = vld [vmem:[%s9416_s15 + $0xb8] sm:$0xff]  ;;  %v356_v57 = vsel %vm316_vm0, %v9639_v44, 0.0 }
  0xb4   : > { %v240_v54 = vmax.f32 %v207_v48, 0.0  ;;  %v9644_v56 = vadd.f32 1e-09, %v270_v43  ;;  %v357_v62 = vadd.f32 %v356_v57, %v355_v50  ;;  %v366_v42 = vsel %vm316_vm0, %v9664_v29, 0.0  ;;  %v213_v43 = vld [vmem:[%s9416_s15 + $0xe8] sm:$0xff] }
  0xb5   : > { %v246_v48 = vmax.f32 %v213_v43, 0.0  ;;  %v9674_v50 = vadd.f32 1e-09, %v276_v40 }
  0xb6   : > { %1025 = vmatmul.mubr.f32.gmra.mrb[52].mxu0 %v7230_v61  ;;  %v358_v4 = vsel %vm316_vm0, %v9644_v56, 0.0 }
  0xb7   : > { %1029 = vmatprep.mubr.f32.mxu0 %v7232_v0  ;;  %v7250_v61 = vpop.eup %7249  ;;  %v272_v0 = vmin.f32 %v240_v54, 1e+09  ;;  %v359_v9 = vadd.f32 %v358_v4, %v357_v62  ;;  %v214_v54 = vld [vmem:[%s9416_s15 + $0xf0] sm:$0xff]  ;;  %v278_v59 = vmin.f32 %v246_v48, 1e+09  ;;  %v370_v62 = vsel %vm316_vm0, %v9674_v50, 0.0 }
  0xb8   : > { %v247_v57 = vmax.f32 %v214_v54, 0.0  ;;  %v248_v4 = vmax.f32 %v215_v63, 0.0 }
  0xb9   : > { %v9654_v13 = vadd.f32 1e-09, %v272_v0 }
  0xba   : > { %1030 = vmatmul.mubr.f32.gmra.mrb[54].mxu0 %v7234_v14  ;;  %v360_v14 = vsel %vm316_vm0, %v9649_v2, 0.0  ;;  %v279_v7 = vmin.f32 %v247_v57, 1e+09 }
  0xbb   : > { %1034 = vmatprep.mubr.f32.mxu0 %v7236_v16  ;;  %v361_v16 = vadd.f32 %v360_v14, %v359_v9  ;;  %v362_v23 = vsel %vm316_vm0, %v9654_v13, 0.0  ;;  %v9684_v9 = vadd.f32 1e-09, %v278_v59  ;;  %v280_v14 = vmin.f32 %v248_v4, 1e+09 }
  0xbc   : > { %v9688_v15 = vadd.f32 1e-09, %v279_v7 }
  0xbd   : > { %v9692_v18 = vadd.f32 1e-09, %v280_v14 }
  0xbe   : > { %1035 = vmatmul.mubr.f32.gmra.mrb[56].mxu0 %v7238_v26  ;;  %v363_v26 = vadd.f32 %v362_v23, %v361_v16  ;;  %v374_v16 = vsel %vm316_vm0, %v9684_v9, 0.0  ;;  %v376_v23 = vsel %vm316_vm0, %v9688_v15, 0.0 }
  0xbf   : > { %1039 = vmatprep.mubr.f32.mxu0 %v7240_v28  ;;  %v275_v28 = vmin.f32 %v243_v17, 1e+09 }
  0xc0   : > { %v365_v37 = vadd.f32 %v364_v30, %v363_v26  ;;  %v378_v26 = vsel %vm316_vm0, %v9692_v18, 0.0 }
  0xc2   : > { %1040 = vmatmul.mubr.f32.gmra.mrb[58].mxu0 %v7242_v38  ;;  %v245_v38 = vmax.f32 %v212_v33, 0.0  ;;  %v367_v46 = vadd.f32 %v366_v42, %v365_v37 }
  0xc3   : > { %1044 = vmatprep.mubr.f32.mxu0 %v7244_v41  ;;  %v9669_v41 = vadd.f32 1e-09, %v275_v28 }
  0xc6   : > { %1045 = vmatmul.mubr.f32.gmra.mrb[60].mxu0 %v7246_v49  ;;  %v277_v49 = vmin.f32 %v245_v38, 1e+09 }
  0xc7   : > { %1049 = vmatprep.mubr.f32.mxu0 %v7248_v52  ;;  %v368_v52 = vsel %vm316_vm0, %v9669_v41, 0.0 }
  0xc8   : > { %v369_v55 = vadd.f32 %v368_v52, %v367_v46 }
  0xca   : > { %1050 = vmatmul.mubr.f32.gmra.mrb[62].mxu0 %v7250_v61  ;;  %v9679_v61 = vadd.f32 1e-09, %v277_v49  ;;  %v371_v0 = vadd.f32 %v370_v62, %v369_v55 }
  0xcc   : > { %v372_v10 = vsel %vm316_vm0, %v9679_v61, 0.0 }
  0xcd   : > { %v373_v12 = vadd.f32 %v372_v10, %v371_v0 }
  0xcf   : > { %v375_v17 = vadd.f32 %v374_v16, %v373_v12 }
  0xd1   : > { %v377_v25 = vadd.f32 %v376_v23, %v375_v17 }
  0xd3   : > { %v379_v27 = vadd.f32 %v378_v26, %v377_v25 }
  0xd5   : > { %v380_v28 = vrot.slane %v379_v27, 4 }
  0xd7   : > { %v381_v30 = vadd.f32 %v380_v28, %v379_v27 }
  0xd9   : > { %v382_v33 = vrot.slane %v381_v30, 2 }
  0xdb   : > { %v383_v37 = vadd.f32 %v382_v33, %v381_v30 }
  0xdd   : > { %v384_v38 = vrot.slane %v383_v37, 1 }
  0xdf   : > { %v385_v40 = vadd.f32 %v384_v38, %v383_v37 }
  0xe1   : > { %7251 = vrcp.f32 %v385_v40 }
  0xeb   : > { %v9698_v42 = vpop.eup %7251 }
  0xec   : > { %v387_v43 = vmul.f32 %v9698_v42, %v9444_v35  ;;  %v388_v46 = vmul.f32 %v9698_v42, %v9446_v36  ;;  %v389_v54 = vmul.f32 %v9698_v42, %v9454_v45  ;;  %v390_v62 = vmul.f32 %v9698_v42, %v9467_v58 }
  0xed   : > { %v391_v4 = vmul.f32 %v9698_v42, %v9478_v8  ;;  %v392_v58 = vmul.f32 %v9698_v42, %v9489_v20  ;;  %v393_v37 = vmul.f32 %v9698_v42, %v9500_v32 }
  0xee   : > { %7253 = vlog2.f32 %v387_v43 }
  0xef   : > { %7255 = vlog2.f32 %v388_v46 }
  0xf8   : > { %v7254_v63 = vpop.eup %7253 }
  0xf9   : > { %v7256_v7 = vpop.eup %7255  ;;  %v9710_v10 = vmul.f32 0.6931472, %v7254_v63 }
  0xfa   : > { %v9717_v8 = vmul.f32 0.6931472, %v7256_v7 }
  0xfb   : > { %14264 = vst [vmem:[#allocation2_spill] sm:$0xff] %v9710_v10 }
  0xfc   : > { %14266 = vst [vmem:[#allocation4_spill] sm:$0xff] %v9717_v8 }
 0x121   : > { %v896_v48 = vpop.f32.mrb[0].mxu0 }
 0x122   : > { %v897_v49 = vadd.f32 1e-30, %v896_v48  ;;  %v898_v52 = vpop.f32.mrb[1].mxu0 }
 0x124   : > { %7257 = vlog2.f32 %v897_v49 }
 0x125   : > { %v901_v55 = vpop.f32.mrb[2].mxu0  ;;  %7259 = vlog2.f32 %v389_v54  ;;  %v394_v54 = vmul.f32 %v9698_v42, %v9511_v47 }
 0x126   : > { %v902_v57 = vadd.f32 1e-30, %v901_v55  ;;  %v903_v59 = vpop.f32.mrb[3].mxu0 }
 0x128   : > { %7261 = vlog2.f32 %v902_v57 }
 0x129   : > { %v906_v35 = vpop.f32.mrb[4].mxu0  ;;  %7263 = vlog2.f32 %v390_v62 }
 0x12a   : > { %v907_v36 = vadd.f32 1e-30, %v906_v35  ;;  %v908_v0 = vpop.f32.mrb[5].mxu0 }
 0x12b   : > { %v395_v0 = vmul.f32 %v9698_v42, %v9522_v60 }
 0x12c   : > { %7265 = vlog2.f32 %v907_v36 }
 0x12d   : > { %v911_v45 = vpop.f32.mrb[6].mxu0  ;;  %7267 = vlog2.f32 %v391_v4 }
 0x12e   : > { %v7258_v12 = vpop.eup %7257  ;;  %v912_v14 = vadd.f32 1e-30, %v911_v45  ;;  %v913_v16 = vpop.f32.mrb[7].mxu0 }
 0x12f   : > { %v1056_v17 = vmul.f32 0.6931472, %v7258_v12  ;;  %v7260_v23 = vpop.eup %7259 }
 0x130   : > { %7269 = vlog2.f32 %v912_v14  ;;  %v9725_v43 = vmul.f32 0.6931472, %v7260_v23 }
 0x131   : > { %v916_v25 = vpop.f32.mrb[8].mxu0  ;;  %v9715_v26 = vsub.f32 %v9710_v10, %v1056_v17  ;;  %7271 = vlog2.f32 %v392_v58  ;;  %v396_v58 = vmul.f32 %v9698_v42, %v9533_v11 }
 0x132   : > { %v7262_v27 = vpop.eup %7261  ;;  %v917_v28 = vadd.f32 1e-30, %v916_v25  ;;  %v918_v30 = vpop.f32.mrb[9].mxu0  ;;  %14268 = vst [vmem:[#allocation6_spill] sm:$0xff] %v9725_v43 }
 0x133   : > { %14265 = vst [vmem:[#allocation3_spill] sm:$0xff] %v9715_v26  ;;  %v1058_v33 = vmul.f32 0.6931472, %v7262_v27  ;;  %1185 = vperm.xlu0 %7121, %v9715_v26   ;;  %v7264_v20 = vpop.eup %7263 }
 0x134   : > { %7273 = vlog2.f32 %v917_v28  ;;  %v9733_v59 = vmul.f32 0.6931472, %v7264_v20  ;;  %v397_v20 = vmul.f32 %v9698_v42, %v9544_v24 }
 0x135   : > { %v921_v38 = vpop.f32.mrb[10].mxu0  ;;  %v9723_v40 = vsub.f32 %v9717_v8, %v1058_v33  ;;  %7275 = vlog2.f32 %v393_v37 }
 0x136   : > { %v7266_v46 = vpop.eup %7265  ;;  %v922_v48 = vadd.f32 1e-30, %v921_v38  ;;  %v923_v49 = vpop.f32.mrb[11].mxu0  ;;  %14270 = vst [vmem:[#allocation8_spill] sm:$0xff] %v9733_v59 }
 0x137   : > { %14267 = vst [vmem:[#allocation5_spill] sm:$0xff] %v9723_v40  ;;  %1190 = vperm.xlu0 %7121, %v9723_v40   ;;  %v1060_v52 = vmul.f32 0.6931472, %v7266_v46  ;;  %v7268_v32 = vpop.eup %7267 }
 0x138   : > { %7277 = vlog2.f32 %v922_v48  ;;  %v9741_v45 = vmul.f32 0.6931472, %v7268_v32 }
 0x139   : > { %v926_v55 = vpop.f32.mrb[12].mxu0  ;;  %v9731_v57 = vsub.f32 %v9725_v43, %v1060_v52  ;;  %7279 = vlog2.f32 %v394_v54 }
 0x13a   : > { %v7270_v62 = vpop.eup %7269  ;;  %v927_v35 = vadd.f32 1e-30, %v926_v55  ;;  %v928_v63 = vpop.f32.mrb[13].mxu0  ;;  %14272 = vst [vmem:[#allocation10_spill] sm:$0xff] %v9741_v45  ;;  %v398_v55 = vmul.f32 %v9698_v42, %v9555_v39 }
 0x13b   : > { %14269 = vst [vmem:[#allocation7_spill] sm:$0xff] %v9731_v57  ;;  %v1062_v36 = vmul.f32 0.6931472, %v7270_v62  ;;  %1195 = vperm.xlu1 %7122, %v9731_v57   ;;  %v7272_v47 = vpop.eup %7271 }
 0x13c   : > { %7281 = vlog2.f32 %v927_v35  ;;  %v9749_v27 = vmul.f32 0.6931472, %v7272_v47 }
 0x13d   : > { %v931_v4 = vpop.f32.mrb[14].mxu0  ;;  %v9739_v7 = vsub.f32 %v9733_v59, %v1062_v36  ;;  %7283 = vlog2.f32 %v395_v0 }
 0x13e   : > { %v7274_v12 = vpop.eup %7273  ;;  %v932_v14 = vadd.f32 1e-30, %v931_v4  ;;  %v933_v16 = vpop.f32.mrb[15].mxu0  ;;  %14274 = vst [vmem:[#allocation12_spill] sm:$0xff] %v9749_v27 }
 0x13f   : > { %14271 = vst [vmem:[#allocation9_spill] sm:$0xff] %v9739_v7  ;;  %v1064_v17 = vmul.f32 0.6931472, %v7274_v12  ;;  %1200 = vperm.xlu1 %7122, %v9739_v7   ;;  %v7276_v60 = vpop.eup %7275  ;;  %v399_v12 = vmul.f32 %v9698_v42, %v9566_v53 }
 0x140   : > { %7285 = vlog2.f32 %v932_v14  ;;  %v9757_v48 = vmul.f32 0.6931472, %v7276_v60 }
 0x141   : > { %v936_v23 = vpop.f32.mrb[16].mxu0  ;;  %v9747_v25 = vsub.f32 %v9741_v45, %v1064_v17  ;;  %7287 = vlog2.f32 %v396_v58 }
 0x142   : > { %v7278_v28 = vpop.eup %7277  ;;  %v937_v30 = vadd.f32 1e-30, %v936_v23  ;;  %v938_v33 = vpop.f32.mrb[17].mxu0  ;;  %14276 = vst [vmem:[#allocation14_spill] sm:$0xff] %v9757_v48 }
 0x143   : > { %14273 = vst [vmem:[#allocation11_spill] sm:$0xff] %v9747_v25  ;;  %v1066_v37 = vmul.f32 0.6931472, %v7278_v28  ;;  %1205 = vperm.xlu0 %7121, %v9747_v25   ;;  %v7280_v11 = vpop.eup %7279 }
 0x144   : > { %7289 = vlog2.f32 %v937_v30  ;;  %v9765_v63 = vmul.f32 0.6931472, %v7280_v11  ;;  %v400_v30 = vmul.f32 %v9698_v42, %v9577_v5 }
 0x145   : > { %v941_v38 = vpop.f32.mrb[18].mxu0  ;;  %v9755_v46 = vsub.f32 %v9749_v27, %v1066_v37  ;;  %7291 = vlog2.f32 %v397_v20 }
 0x146   : > { %v7282_v49 = vpop.eup %7281  ;;  %v942_v52 = vadd.f32 1e-30, %v941_v38  ;;  %v943_v54 = vpop.f32.mrb[19].mxu0  ;;  %14278 = vst [vmem:[#allocation16_spill] sm:$0xff] %v9765_v63 }
 0x147   : > { %14275 = vst [vmem:[#allocation13_spill] sm:$0xff] %v9755_v46  ;;  %v1068_v32 = vmul.f32 0.6931472, %v7282_v49  ;;  %1210 = vperm.xlu1 %7122, %v9755_v46   ;;  %v7284_v24 = vpop.eup %7283  ;;  %v401_v54 = vmul.f32 %v9698_v42, %v9588_v19 }
 0x148   : > { %7293 = vlog2.f32 %v942_v52  ;;  %v9773_v17 = vmul.f32 0.6931472, %v7284_v24 }
 0x149   : > { %v946_v62 = vpop.f32.mrb[20].mxu0  ;;  %v9763_v35 = vsub.f32 %v9757_v48, %v1068_v32  ;;  %7295 = vlog2.f32 %v398_v55 }
 0x14a   : > { %v7286_v36 = vpop.eup %7285  ;;  %v947_v0 = vadd.f32 1e-30, %v946_v62  ;;  %v948_v47 = vpop.f32.mrb[21].mxu0  ;;  %14280 = vst [vmem:[#allocation18_spill] sm:$0xff] %v9773_v17 }
 0x14b   : > { %14277 = vst [vmem:[#allocation15_spill] sm:$0xff] %v9763_v35  ;;  %v1070_v4 = vmul.f32 0.6931472, %v7286_v36  ;;  %1215 = vperm.xlu0 %7121, %v9763_v35   ;;  %v7288_v39 = vpop.eup %7287 }
 0x14c   : > { %7297 = vlog2.f32 %v947_v0  ;;  %v9781_v20 = vmul.f32 0.6931472, %v7288_v39 }
 0x14d   : > { %v951_v14 = vpop.f32.mrb[22].mxu0  ;;  %v9771_v16 = vsub.f32 %v9765_v63, %v1070_v4  ;;  %7299 = vlog2.f32 %v399_v12  ;;  %v402_v4 = vmul.f32 %v9698_v42, %v9599_v34 }
 0x14e   : > { %v7290_v58 = vpop.eup %7289  ;;  %v952_v60 = vadd.f32 1e-30, %v951_v14  ;;  %v953_v23 = vpop.f32.mrb[23].mxu0  ;;  %14282 = vst [vmem:[#allocation20_spill] sm:$0xff] %v9781_v20 }
 0x14f   : > { %14279 = vst [vmem:[#allocation17_spill] sm:$0xff] %v9771_v16  ;;  %v1072_v28 = vmul.f32 0.6931472, %v7290_v58  ;;  %1220 = vperm.xlu1 %7122, %v9771_v16   ;;  %v7292_v53 = vpop.eup %7291 }
 0x150   : > { %7301 = vlog2.f32 %v952_v60  ;;  %v9789_v24 = vmul.f32 0.6931472, %v7292_v53 }
 0x151   : > { %v956_v33 = vpop.f32.mrb[24].mxu0  ;;  %v9779_v37 = vsub.f32 %v9773_v17, %v1072_v28  ;;  %7303 = vlog2.f32 %v400_v30  ;;  %v403_v30 = vmul.f32 %v9698_v42, %v9610_v51 }
 0x152   : > { %v7294_v11 = vpop.eup %7293  ;;  %v957_v38 = vadd.f32 1e-30, %v956_v33  ;;  %v958_v49 = vpop.f32.mrb[25].mxu0  ;;  %14284 = vst [vmem:[#allocation22_spill] sm:$0xff] %v9789_v24 }
 0x153   : > { %14281 = vst [vmem:[#allocation19_spill] sm:$0xff] %v9779_v37  ;;  %v1074_v52 = vmul.f32 0.6931472, %v7294_v11  ;;  %1225 = vperm.xlu0 %7121, %v9779_v37   ;;  %v7296_v5 = vpop.eup %7295 }
 0x154   : > { %7305 = vlog2.f32 %v957_v38  ;;  %v9797_v14 = vmul.f32 0.6931472, %v7296_v5  ;;  %v404_v5 = vmul.f32 %v9698_v42, %v9621_v6 }
 0x155   : > { %v961_v32 = vpop.f32.mrb[26].mxu0  ;;  %v9787_v55 = vsub.f32 %v9781_v20, %v1074_v52  ;;  %7307 = vlog2.f32 %v401_v54 }
 0x156   : > { %v7298_v62 = vpop.eup %7297  ;;  %v962_v36 = vadd.f32 1e-30, %v961_v32  ;;  %v963_v0 = vpop.f32.mrb[27].mxu0  ;;  %14286 = vst [vmem:[#allocation24_spill] sm:$0xff] %v9797_v14 }
 0x157   : > { %14283 = vst [vmem:[#allocation21_spill] sm:$0xff] %v9787_v55  ;;  %v1076_v47 = vmul.f32 0.6931472, %v7298_v62  ;;  %1230 = vperm.xlu1 %7122, %v9787_v55   ;;  %v7300_v19 = vpop.eup %7299 }
 0x158   : > { %7309 = vlog2.f32 %v962_v36  ;;  %v9805_v11 = vmul.f32 0.6931472, %v7300_v19 }
 0x159   : > { %v966_v12 = vpop.f32.mrb[28].mxu0  ;;  %v9795_v39 = vsub.f32 %v9789_v24, %v1076_v47  ;;  %7311 = vlog2.f32 %v402_v4 }
 0x15a   : > { %v7302_v58 = vpop.eup %7301  ;;  %v967_v60 = vadd.f32 1e-30, %v966_v12  ;;  %v968_v23 = vpop.f32.mrb[29].mxu0  ;;  %14288 = vst [vmem:[#allocation26_spill] sm:$0xff] %v9805_v11  ;;  %v405_v12 = vmul.f32 %v9698_v42, %v9629_v21 }
 0x15b   : > { %14285 = vst [vmem:[#allocation23_spill] sm:$0xff] %v9795_v39  ;;  %v1078_v28 = vmul.f32 0.6931472, %v7302_v58  ;;  %1235 = vperm.xlu0 %7121, %v9795_v39   ;;  %v7304_v34 = vpop.eup %7303 }
 0x15c   : > { %7313 = vlog2.f32 %v967_v60  ;;  %v9813_v36 = vmul.f32 0.6931472, %v7304_v34 }
 0x15d   : > { %v971_v53 = vpop.f32.mrb[30].mxu0  ;;  %v9803_v33 = vsub.f32 %v9797_v14, %v1078_v28  ;;  %7315 = vlog2.f32 %v403_v30 }
 0x15e   : > { %v7306_v38 = vpop.eup %7305  ;;  %v972_v49 = vadd.f32 1e-30, %v971_v53  ;;  %v973_v52 = vpop.f32.mrb[31].mxu0  ;;  %14290 = vst [vmem:[#allocation28_spill] sm:$0xff] %v9813_v36 }
 0x15f   : > { %14287 = vst [vmem:[#allocation25_spill] sm:$0xff] %v9803_v33  ;;  %v1080_v54 = vmul.f32 0.6931472, %v7306_v38  ;;  %1240 = vperm.xlu1 %7122, %v9803_v33   ;;  %v7308_v51 = vpop.eup %7307  ;;  %v406_v38 = vmul.f32 %v9698_v42, %v9634_v31 }
 0x160   : > { %7317 = vlog2.f32 %v972_v49  ;;  %v9821_v23 = vmul.f32 0.6931472, %v7308_v51 }
 0x161   : > { %v976_v32 = vpop.f32.mrb[32].mxu0  ;;  %v9811_v62 = vsub.f32 %v9805_v11, %v1080_v54  ;;  %7319 = vlog2.f32 %v404_v5 }
 0x162   : > { %v7310_v0 = vpop.eup %7309  ;;  %v977_v47 = vadd.f32 1e-30, %v976_v32  ;;  %v978_v4 = vpop.f32.mrb[33].mxu0  ;;  %14292 = vst [vmem:[#allocation30_spill] sm:$0xff] %v9821_v23 }
 0x163   : > { %14289 = vst [vmem:[#allocation27_spill] sm:$0xff] %v9811_v62  ;;  %v1082_v19 = vmul.f32 0.6931472, %v7310_v0  ;;  %1245 = vperm.xlu0 %7121, %v9811_v62   ;;  %v7312_v6 = vpop.eup %7311 }
 0x164   : > { %7321 = vlog2.f32 %v977_v47  ;;  %v9829_v54 = vmul.f32 0.6931472, %v7312_v6  ;;  %v407_v47 = vmul.f32 %v9698_v42, %v9639_v44 }
 0x165   : > { %v981_v58 = vpop.f32.mrb[34].mxu0  ;;  %v9819_v60 = vsub.f32 %v9813_v36, %v1082_v19  ;;  %7323 = vlog2.f32 %v405_v12 }
 0x166   : > { %v7314_v28 = vpop.eup %7313  ;;  %v982_v30 = vadd.f32 1e-30, %v981_v58  ;;  %v983_v34 = vpop.f32.mrb[35].mxu0  ;;  %14294 = vst [vmem:[#allocation32_spill] sm:$0xff] %v9829_v54 }
 0x167   : > { %14291 = vst [vmem:[#allocation29_spill] sm:$0xff] %v9819_v60  ;;  %v1084_v53 = vmul.f32 0.6931472, %v7314_v28  ;;  %1250 = vperm.xlu1 %7122, %v9819_v60   ;;  %v7316_v21 = vpop.eup %7315  ;;  %v408_v34 = vmul.f32 %v9698_v42, %v9644_v56 }
 0x168   : > { %7325 = vlog2.f32 %v982_v30  ;;  %v9837_v12 = vmul.f32 0.6931472, %v7316_v21 }
 0x169   : > { %v986_v49 = vpop.f32.mrb[36].mxu0  ;;  %v9827_v52 = vsub.f32 %v9821_v23, %v1084_v53  ;;  %7327 = vlog2.f32 %v406_v38 }
 0x16a   : > { %v7318_v5 = vpop.eup %7317  ;;  %v987_v51 = vadd.f32 1e-30, %v986_v49  ;;  %v988_v32 = vpop.f32.mrb[37].mxu0  ;;  %14296 = vst [vmem:[#allocation34_spill] sm:$0xff] %v9837_v12 }
 0x16b   : > { %14293 = vst [vmem:[#allocation31_spill] sm:$0xff] %v9827_v52  ;;  %v1086_v0 = vmul.f32 0.6931472, %v7318_v5  ;;  %1255 = vperm.xlu0 %7121, %v9827_v52   ;;  %v7320_v31 = vpop.eup %7319 }
 0x16c   : > { %7329 = vlog2.f32 %v987_v51  ;;  %v9845_v49 = vmul.f32 0.6931472, %v7320_v31 }
 0x16d   : > { %v991_v4 = vpop.f32.mrb[38].mxu0  ;;  %v9835_v19 = vsub.f32 %v9829_v54, %v1086_v0  ;;  %7331 = vlog2.f32 %v407_v47  ;;  %v409_v0 = vmul.f32 %v9698_v42, %v9649_v2 }
 0x16e   : > { %v7322_v6 = vpop.eup %7321  ;;  %v992_v58 = vadd.f32 1e-30, %v991_v4  ;;  %v993_v28 = vpop.f32.mrb[39].mxu0  ;;  %14298 = vst [vmem:[#allocation36_spill] sm:$0xff] %v9845_v49 }
 0x16f   : > { %14295 = vst [vmem:[#allocation33_spill] sm:$0xff] %v9835_v19  ;;  %v1088_v30 = vmul.f32 0.6931472, %v7322_v6  ;;  %1260 = vperm.xlu1 %7122, %v9835_v19   ;;  %v7324_v44 = vpop.eup %7323 }
 0x170   : > { %7333 = vlog2.f32 %v992_v58  ;;  %v9853_v6 = vmul.f32 0.6931472, %v7324_v44 }
 0x171   : > { %v996_v53 = vpop.f32.mrb[40].mxu0  ;;  %v9843_v38 = vsub.f32 %v9837_v12, %v1088_v30  ;;  %7335 = vlog2.f32 %v408_v34  ;;  %v410_v34 = vmul.f32 %v9698_v42, %v9654_v13 }
 0x172   : > { %v7326_v21 = vpop.eup %7325  ;;  %v997_v5 = vadd.f32 1e-30, %v996_v53  ;;  %v998_v51 = vpop.f32.mrb[41].mxu0  ;;  %14300 = vst [vmem:[#allocation38_spill] sm:$0xff] %v9853_v6 }
 0x173   : > { %14297 = vst [vmem:[#allocation35_spill] sm:$0xff] %v9843_v38  ;;  %v1090_v32 = vmul.f32 0.6931472, %v7326_v21  ;;  %1265 = vperm.xlu0 %7121, %v9843_v38   ;;  %v7328_v56 = vpop.eup %7327 }
 0x174   : > { %7337 = vlog2.f32 %v997_v5  ;;  %v9861_v5 = vmul.f32 0.6931472, %v7328_v56 }
 0x175   : > { %v1001_v47 = vpop.f32.mrb[42].mxu0  ;;  %v9851_v4 = vsub.f32 %v9845_v49, %v1090_v32  ;;  %7339 = vlog2.f32 %v409_v0  ;;  %v411_v0 = vmul.f32 %v9698_v42, %v9659_v22 }
 0x176   : > { %v7330_v31 = vpop.eup %7329  ;;  %v1002_v58 = vadd.f32 1e-30, %v1001_v47  ;;  %v1003_v28 = vpop.f32.mrb[43].mxu0  ;;  %14302 = vst [vmem:[#allocation40_spill] sm:$0xff] %v9861_v5 }
 0x177   : > { %14299 = vst [vmem:[#allocation37_spill] sm:$0xff] %v9851_v4  ;;  %v1092_v30 = vmul.f32 0.6931472, %v7330_v31  ;;  %1270 = vperm.xlu1 %7122, %v9851_v4   ;;  %v7332_v2 = vpop.eup %7331 }
 0x178   : > { %7341 = vlog2.f32 %v1002_v58  ;;  %v9869_v28 = vmul.f32 0.6931472, %v7332_v2 }
 0x179   : > { %v1006_v53 = vpop.f32.mrb[44].mxu0  ;;  %v9859_v21 = vsub.f32 %v9853_v6, %v1092_v30  ;;  %7343 = vlog2.f32 %v410_v34  ;;  %v412_v34 = vmul.f32 %v9698_v42, %v9664_v29 }
 0x17a   : > { %v7334_v44 = vpop.eup %7333  ;;  %v1007_v51 = vadd.f32 1e-30, %v1006_v53  ;;  %v1008_v32 = vpop.f32.mrb[45].mxu0  ;;  %14304 = vst [vmem:[#allocation42_spill] sm:$0xff] %v9869_v28 }
 0x17b   : > { %14301 = vst [vmem:[#allocation39_spill] sm:$0xff] %v9859_v21  ;;  %v1094_v47 = vmul.f32 0.6931472, %v7334_v44  ;;  %1275 = vperm.xlu0 %7121, %v9859_v21   ;;  %v7336_v13 = vpop.eup %7335 }
 0x17c   : > { %7345 = vlog2.f32 %v1007_v51  ;;  %v9877_v32 = vmul.f32 0.6931472, %v7336_v13 }
 0x17d   : > { %v1011_v31 = vpop.f32.mrb[46].mxu0  ;;  %v9867_v58 = vsub.f32 %v9861_v5, %v1094_v47  ;;  %7347 = vlog2.f32 %v411_v0 }
 0x17e   : > { %v7338_v56 = vpop.eup %7337  ;;  %v1012_v30 = vadd.f32 1e-30, %v1011_v31  ;;  %v1013_v3 = vpop.f32.mrb[47].mxu0  ;;  %14306 = vst [vmem:[#allocation44_spill] sm:$0xff] %v9877_v32 }
 0x17f   : > { %14303 = vst [vmem:[#allocation41_spill] sm:$0xff] %v9867_v58  ;;  %v1096_v53 = vmul.f32 0.6931472, %v7338_v56  ;;  %1280 = vperm.xlu1 %7122, %v9867_v58   ;;  %v7340_v22 = vpop.eup %7339  ;;  %v413_v3 = vmul.f32 %v9698_v42, %v9669_v41  ;;  %v216_v58 = vld [vmem:[%s180_s22] sm:$0x3] }
 0x180   : > { %7349 = vlog2.f32 %v1012_v30  ;;  %v9885_v30 = vmul.f32 0.6931472, %v7340_v22  ;;  %v313_v5 = vmax.f32 %v216_v58, 0.0  ;;  %v8953_v58 = vld [vmem:[%s13871_s0 + $0x60] sm:$0xff] }
 0x181   : > { %v1016_v44 = vpop.f32.mrb[48].mxu0  ;;  %v9875_v51 = vsub.f32 %v9869_v28, %v1096_v53  ;;  %7351 = vlog2.f32 %v412_v34 }
 0x182   : > { %v7342_v2 = vpop.eup %7341  ;;  %v1017_v47 = vadd.f32 1e-30, %v1016_v44  ;;  %v1018_v1 = vpop.f32.mrb[49].mxu0  ;;  %14308 = vst [vmem:[#allocation46_spill] sm:$0xff] %v9885_v30  ;;  %v314_v6 = vmin.f32 %v313_v5, 1e+09 }
 0x183   : > { %14305 = vst [vmem:[#allocation43_spill] sm:$0xff] %v9875_v51  ;;  %v1098_v31 = vmul.f32 0.6931472, %v7342_v2  ;;  %1285 = vperm.xlu0 %7121, %v9875_v51   ;;  %v7344_v29 = vpop.eup %7343  ;;  %v414_v1 = vmul.f32 %v9698_v42, %v9674_v50 }
 0x184   : > { %7353 = vlog2.f32 %v1017_v47  ;;  %v9893_v47 = vmul.f32 0.6931472, %v7344_v29 }
 0x185   : > { %v1021_v0 = vpop.f32.mrb[50].mxu0  ;;  %v9883_v56 = vsub.f32 %v9877_v32, %v1098_v31  ;;  %7355 = vlog2.f32 %v413_v3 }
 0x186   : > { %v7346_v13 = vpop.eup %7345  ;;  %v1022_v53 = vadd.f32 1e-30, %v1021_v0  ;;  %v1023_v28 = vpop.f32.mrb[51].mxu0  ;;  %14310 = vst [vmem:[#allocation48_spill] sm:$0xff] %v9893_v47 }
 0x187   : > { %14307 = vst [vmem:[#allocation45_spill] sm:$0xff] %v9883_v56  ;;  %v1100_v44 = vmul.f32 0.6931472, %v7346_v13  ;;  %1290 = vperm.xlu1 %7122, %v9883_v56   ;;  %v7348_v41 = vpop.eup %7347  ;;  %v415_v28 = vmul.f32 %v9698_v42, %v9679_v61 }
 0x188   : > { %7357 = vlog2.f32 %v1022_v53  ;;  %v9901_v53 = vmul.f32 0.6931472, %v7348_v41 }
 0x189   : > { %v1026_v34 = vpop.f32.mrb[52].mxu0  ;;  %v9891_v2 = vsub.f32 %v9885_v30, %v1100_v44  ;;  %7359 = vlog2.f32 %v414_v1 }
 0x18a   : > { %v7350_v22 = vpop.eup %7349  ;;  %v1027_v31 = vadd.f32 1e-30, %v1026_v34  ;;  %v1028_v32 = vpop.f32.mrb[53].mxu0  ;;  %14312 = vst [vmem:[#allocation50_spill] sm:$0xff] %v9901_v53 }
 0x18b   : > { %14309 = vst [vmem:[#allocation47_spill] sm:$0xff] %v9891_v2  ;;  %v1102_v0 = vmul.f32 0.6931472, %v7350_v22  ;;  %1295 = vperm.xlu0 %7121, %v9891_v2   ;;  %v7352_v50 = vpop.eup %7351  ;;  %v416_v32 = vmul.f32 %v9698_v42, %v9684_v9 }
 0x18c   : > { %7361 = vlog2.f32 %v1027_v31  ;;  %v9909_v31 = vmul.f32 0.6931472, %v7352_v50 }
 0x18d   : > { %v1031_v3 = vpop.f32.mrb[54].mxu0  ;;  %v9899_v13 = vsub.f32 %v9893_v47, %v1102_v0  ;;  %7363 = vlog2.f32 %v415_v28 }
 0x18e   : > { %v7354_v29 = vpop.eup %7353  ;;  %v1032_v44 = vadd.f32 1e-30, %v1031_v3  ;;  %v1033_v30 = vpop.f32.mrb[55].mxu0  ;;  %14314 = vst [vmem:[#allocation52_spill] sm:$0xff] %v9909_v31 }
 0x18f   : > { %14311 = vst [vmem:[#allocation49_spill] sm:$0xff] %v9899_v13  ;;  %v1104_v34 = vmul.f32 0.6931472, %v7354_v29  ;;  %1300 = vperm.xlu1 %7122, %v9899_v13   ;;  %v7356_v61 = vpop.eup %7355  ;;  %v417_v30 = vmul.f32 %v9698_v42, %v9688_v15 }
 0x190   : > { %7365 = vlog2.f32 %v1032_v44  ;;  %v9917_v44 = vmul.f32 0.6931472, %v7356_v61 }
 0x191   : > { %v1036_v1 = vpop.f32.mrb[56].mxu0  ;;  %v9907_v22 = vsub.f32 %v9901_v53, %v1104_v34  ;;  %7367 = vlog2.f32 %v416_v32 }
 0x192   : > { %v7358_v41 = vpop.eup %7357  ;;  %v1037_v0 = vadd.f32 1e-30, %v1036_v1  ;;  %v1038_v47 = vpop.f32.mrb[57].mxu0  ;;  %14316 = vst [vmem:[#allocation54_spill] sm:$0xff] %v9917_v44 }
 0x193   : > { %14313 = vst [vmem:[#allocation51_spill] sm:$0xff] %v9907_v22  ;;  %v1106_v3 = vmul.f32 0.6931472, %v7358_v41  ;;  %1305 = vperm.xlu0 %7121, %v9907_v22   ;;  %v7360_v9 = vpop.eup %7359  ;;  %v418_v47 = vmul.f32 %v9698_v42, %v9692_v18  ;;  %v484_v22 = vlaneseq }
 0x194   : > { %7369 = vlog2.f32 %v1037_v0  ;;  %v9925_v0 = vmul.f32 0.6931472, %v7360_v9 }
 0x195   : > { %v1041_v28 = vpop.f32.mrb[58].mxu0  ;;  %v9915_v29 = vsub.f32 %v9909_v31, %v1106_v3  ;;  %7371 = vlog2.f32 %v417_v30 }
 0x196   : > { %v7362_v50 = vpop.eup %7361  ;;  %v1042_v34 = vadd.f32 1e-30, %v1041_v28  ;;  %v1043_v53 = vpop.f32.mrb[59].mxu0  ;;  %14318 = vst [vmem:[#allocation56_spill] sm:$0xff] %v9925_v0 }
 0x197   : > { %14315 = vst [vmem:[#allocation53_spill] sm:$0xff] %v9915_v29  ;;  %v1108_v1 = vmul.f32 0.6931472, %v7362_v50  ;;  %1310 = vperm.xlu1 %7122, %v9915_v29   ;;  %v7364_v15 = vpop.eup %7363 }
 0x198   : > { %7373 = vlog2.f32 %v1042_v34  ;;  %v9931_v42 = vmul.f32 0.6931472, %v7364_v15 }
 0x199   : > { %v1046_v32 = vpop.f32.mrb[60].mxu0  ;;  %v9923_v41 = vsub.f32 %v9917_v44, %v1108_v1  ;;  %7375 = vlog2.f32 %v418_v47 }
 0x19a   : > { %v7366_v61 = vpop.eup %7365  ;;  %v1047_v3 = vadd.f32 1e-30, %v1046_v32  ;;  %v1048_v31 = vpop.f32.mrb[61].mxu0  ;;  %14320 = vst [vmem:[#allocation58_spill] sm:$0xff] %v9931_v42 }
 0x19b   : > { %14317 = vst [vmem:[#allocation55_spill] sm:$0xff] %v9923_v41  ;;  %v1110_v28 = vmul.f32 0.6931472, %v7366_v61  ;;  %1315 = vperm.xlu0 %7121, %v9923_v41   ;;  %v7368_v53 = vpop.eup %7367 }
 0x19c   : > { %7377 = vlog2.f32 %v1047_v3  ;;  %v9937_v47 = vmul.f32 0.6931472, %v7368_v53 }
 0x19d   : > { %v1051_v30 = vpop.f32.mrb[62].mxu0  ;;  %v9929_v18 = vsub.f32 %v9925_v0, %v1110_v28 }
 0x19e   : > { %v7370_v50 = vpop.eup %7369  ;;  %v1052_v34 = vadd.f32 1e-30, %v1051_v30  ;;  %v1053_v1 = vpop.f32.mrb[63].mxu0  ;;  %14322 = vst [vmem:[#allocation60_spill] sm:$0xff] %v9937_v47 }
 0x19f   : > { %14319 = vst [vmem:[#allocation57_spill] sm:$0xff] %v9929_v18  ;;  %v1112_v9 = vmul.f32 0.6931472, %v7370_v50  ;;  %1320 = vperm.xlu1 %7122, %v9929_v18   ;;  %v7372_v31 = vpop.eup %7371 }
 0x1a0   : > { %7379 = vlog2.f32 %v1052_v34  ;;  %v9943_v30 = vmul.f32 0.6931472, %v7372_v31 }
 0x1a1   : > { %v9935_v32 = vsub.f32 %v9931_v42, %v1112_v9 }
 0x1a2   : > { %v7374_v61 = vpop.eup %7373  ;;  %14324 = vst [vmem:[#allocation62_spill] sm:$0xff] %v9943_v30 }
 0x1a3   : > { %14321 = vst [vmem:[#allocation59_spill] sm:$0xff] %v9935_v32  ;;  %v1114_v3 = vmul.f32 0.6931472, %v7374_v61  ;;  %1325 = vperm.xlu0 %7121, %v9935_v32   ;;  %v7376_v28 = vpop.eup %7375  ;;  %v8946_v32 = vld [vmem:[%s13871_s0 + $0x28] sm:$0xff] }
 0x1a4   : > { %v9949_v9 = vmul.f32 0.6931472, %v7376_v28  ;;  %v8942_v28 = vld [vmem:[%s13871_s0 + $0x8] sm:$0xff] }
 0x1a5   : > { %v9941_v15 = vsub.f32 %v9937_v47, %v1114_v3  ;;  %v8941_v3 = vld [vmem:[%s13871_s0] sm:$0xff] }
 0x1a6   : > { %v7378_v50 = vpop.eup %7377  ;;  %14326 = vst [vmem:[#allocation64_spill] sm:$0xff] %v9949_v9  ;;  %v8945_v47 = vld [vmem:[%s13871_s0 + $0x20] sm:$0xff] }
 0x1a7   : > { %14323 = vst [vmem:[#allocation61_spill] sm:$0xff] %v9941_v15  ;;  %v1116_v1 = vmul.f32 0.6931472, %v7378_v50  ;;  %1330 = vperm.xlu1 %7122, %v9941_v15  }
 0x1a9   : > { %v9947_v34 = vsub.f32 %v9943_v30, %v1116_v1 }
 0x1aa   : > { %v7380_v53 = vpop.eup %7379 }
 0x1ab   : > { %14325 = vst [vmem:[#allocation63_spill] sm:$0xff] %v9947_v34  ;;  %v1118_v42 = vmul.f32 0.6931472, %v7380_v53  ;;  %1335 = vperm.xlu0 %7121, %v9947_v34  }
 0x1ad   : > { %v9953_v61 = vsub.f32 %v9949_v9, %v1118_v42 }
 0x1af   : > { %14327 = vst [vmem:[#allocation65_spill] sm:$0xff] %v9953_v61  ;;  %1340 = vperm.xlu1 %7122, %v9953_v61   ;;  %v8943_v61 = vld [vmem:[%s13871_s0 + $0x10] sm:$0xff] }
 0x1b2   : > { %v1186_v31 = vpop.permute.xlu0 %1185 }
 0x1b3   : > { %v9959_v50 = vadd.f32 %v8941_v3, %v1186_v31  ;;  %v9964_v1 = vadd.f32 %v8942_v28, %v1186_v31  ;;  %v8944_v3 = vld [vmem:[%s13871_s0 + $0x18] sm:$0xff] }
 0x1b5   : > { %v1471_v53 = vmul.f32 1.442695, %v9959_v50  ;;  %v1473_v42 = vmul.f32 1.442695, %v9964_v1 }
 0x1b6   : > { %v1191_v9 = vpop.permute.xlu0 %1190 }
 0x1b7   : > { %v9971_v34 = vadd.f32 %v8943_v61, %v1191_v9  ;;  %v9976_v30 = vadd.f32 %v8944_v3, %v1191_v9  ;;  %7381 = vpow2.f32 %v1471_v53 }
 0x1b8   : > { %7383 = vpow2.f32 %v1473_v42 }
 0x1b9   : > { %v1475_v31 = vmul.f32 1.442695, %v9971_v34  ;;  %v1477_v28 = vmul.f32 1.442695, %v9976_v30 }
 0x1ba   : > { %v1196_v15 = vpop.permute.xlu1 %1195 }
 0x1bb   : > { %7385 = vpow2.f32 %v1475_v31  ;;  %v9983_v61 = vadd.f32 %v8945_v47, %v1196_v15  ;;  %v9988_v9 = vadd.f32 %v8946_v32, %v1196_v15  ;;  %v8947_v31 = vld [vmem:[%s13871_s0 + $0x30] sm:$0xff]  ;;  %v8948_v47 = vld [vmem:[%s13871_s0 + $0x38] sm:$0xff] }
 0x1bc   : > { %7387 = vpow2.f32 %v1477_v28 }
 0x1bd   : > { %v1479_v53 = vmul.f32 1.442695, %v9983_v61  ;;  %v1481_v3 = vmul.f32 1.442695, %v9988_v9 }
 0x1be   : > { %v1201_v42 = vpop.permute.xlu1 %1200 }
 0x1bf   : > { %v9995_v18 = vadd.f32 %v8947_v31, %v1201_v42  ;;  %v10000_v0 = vadd.f32 %v8948_v47, %v1201_v42  ;;  %7389 = vpow2.f32 %v1479_v53  ;;  %v8949_v31 = vld [vmem:[%s13871_s0 + $0x40] sm:$0xff]  ;;  %v8950_v42 = vld [vmem:[%s13871_s0 + $0x48] sm:$0xff]  ;;  %v13914_v47 = vmov 1.0  }
 0x1c0   : > { %7391 = vpow2.f32 %v1481_v3  ;;  %1663 = vmatprep.mubr.f32.mxu1 %v13914_v47  ;;  %2730 = vmatprep.mubr.f32.mxu0 %v13914_v47 }
 0x1c1   : > { %v1483_v32 = vmul.f32 1.442695, %v9995_v18  ;;  %v1485_v15 = vmul.f32 1.442695, %v10000_v0  ;;  %v7382_v41 = vpop.eup %7381 }
 0x1c2   : > { %v1206_v28 = vpop.permute.xlu0 %1205  ;;  %v7384_v3 = vpop.eup %7383 }
 0x1c3   : > { %7393 = vpow2.f32 %v1483_v32  ;;  %v10007_v44 = vadd.f32 %v8949_v31, %v1206_v28  ;;  %v10012_v53 = vadd.f32 %v8950_v42, %v1206_v28  ;;  %v8951_v28 = vld [vmem:[%s13871_s0 + $0x50] sm:$0xff] }
 0x1c4   : > { %7395 = vpow2.f32 %v1485_v15  ;;  %v8952_v15 = vld [vmem:[%s13871_s0 + $0x58] sm:$0xff] }
 0x1c5   : > { %v7386_v32 = vpop.eup %7385  ;;  %v1487_v29 = vmul.f32 1.442695, %v10007_v44  ;;  %v1489_v13 = vmul.f32 1.442695, %v10012_v53 }
 0x1c6   : > { %v7388_v31 = vpop.eup %7387  ;;  %v1211_v2 = vpop.permute.xlu1 %1210  ;;  %v6630_v56 = vpack.c.bf16 %v7386_v32, %v7382_v41  ;;  %v10032_v41 = vshrl.u32 %v484_v22, 7 }
 0x1c7   : > { %v10025_v42 = vadd.f32 %v8951_v28, %v1211_v2  ;;  %v10030_v47 = vadd.f32 %v8952_v15, %v1211_v2  ;;  %v6628_v51 = vpack.c.bf16 %v7388_v31, %v7384_v3  ;;  %7397 = vpow2.f32 %v1487_v29 }
 0x1c8   : > { %7399 = vpow2.f32 %v1489_v13  ;;  %v10037_v4 = vsub.s32 0, %v10032_v41  ;;  %v10040_v2 = vsub.s32 1, %v10032_v41  ;;  %v10052_v13 = vadd.f32 1e-09, %v314_v6  ;;  %v8955_v6 = vld [vmem:[%s13871_s0 + $0x70] sm:$0xff] }
 0x1c9   : > { %v1491_v32 = vmul.f32 1.442695, %v10025_v42  ;;  %v1493_v21 = vmul.f32 1.442695, %v10030_v47  ;;  %6629 = vmatprep.subr.bf16.mxu1 %v6628_v51  ;;  %v7390_v3 = vpop.eup %7389  ;;  %v8954_v51 = vld [vmem:[%s13871_s0 + $0x68] sm:$0xff] }
 0x1ca   : > { %6631 = vmatpush1.bf16.msra.mxu1 %v6630_v56  ;;  %v1216_v28 = vpop.permute.xlu0 %1215  ;;  %v7392_v5 = vpop.eup %7391  ;;  %v487_v38 = vrot.slane %v10052_v13, %v10037_v4 }
 0x1cb   : > { %7401 = vpow2.f32 %v1491_v32  ;;  %v10045_v22 = vadd.f32 %v8953_v58, %v1216_v28  ;;  %v10050_v56 = vadd.f32 %v8954_v51, %v1216_v28  ;;  %v491_v28 = vrot.slane %v10052_v13, %v10040_v2  ;;  %v8956_v51 = vld [vmem:[%s13871_s0 + $0x78] sm:$0xff] }
 0x1cc   : > { %7403 = vpow2.f32 %v1493_v21 }
 0x1cd   : > { %v7394_v29 = vpop.eup %7393  ;;  %v1495_v31 = vmul.f32 1.442695, %v10045_v22  ;;  %v1497_v32 = vmul.f32 1.442695, %v10050_v56 }
 0x1ce   : > { %v7396_v15 = vpop.eup %7395  ;;  %v1221_v49 = vpop.permute.xlu1 %1220  ;;  %v6634_v58 = vpack.c.bf16 %v7394_v29, %v7390_v3  ;;  %v495_v3 = vsel %vm494_vm1, %v487_v38, 0.0  ;;  %v496_v29 = vsel %vm494_vm1, %v491_v28, 0.0  ;;  %v8958_v38 = vld [vmem:[%s13871_s0 + $0x88] sm:$0xff] }
 0x1cf   : > { %v10063_v21 = vadd.f32 %v8955_v6, %v1221_v49  ;;  %v10068_v12 = vadd.f32 %v8956_v51, %v1221_v49  ;;  %v6632_v19 = vpack.c.bf16 %v7396_v15, %v7392_v5  ;;  %7405 = vpow2.f32 %v1495_v31  ;;  %v8957_v49 = vld [vmem:[%s13871_s0 + $0x80] sm:$0xff] }
 0x1d0   : > { %v497_v23 = vadd.f32 %v496_v29, %v495_v3  ;;  %7407 = vpow2.f32 %v1497_v32  ;;  %v8959_v3 = vld [vmem:[%s13871_s0 + $0x90] sm:$0xff] }
 0x1d1   : > { %v1499_v54 = vmul.f32 1.442695, %v10063_v21  ;;  %v1501_v52 = vmul.f32 1.442695, %v10068_v12  ;;  %6633 = vmatprep.subr.bf16.mxu1 %v6632_v19  ;;  %v7398_v60 = vpop.eup %7397 }
 0x1d2   : > { %6635 = vmatpush1.bf16.msra.mxu1 %v6634_v58  ;;  %v1226_v6 = vpop.permute.xlu0 %1225  ;;  %498 = vadd.xlane.f32.xlu0 %v497_v23  ;;  %v7400_v19 = vpop.eup %7399  ;;  %v8960_v23 = vld [vmem:[%s13871_s0 + $0x98] sm:$0xff] }
 0x1d3   : > { %7409 = vpow2.f32 %v1499_v54  ;;  %v10075_v51 = vadd.f32 %v8957_v49, %v1226_v6  ;;  %v10080_v5 = vadd.f32 %v8958_v38, %v1226_v6 }
 0x1d4   : > { %7411 = vpow2.f32 %v1501_v52 }
 0x1d5   : > { %v7402_v31 = vpop.eup %7401  ;;  %v1503_v15 = vmul.f32 1.442695, %v10075_v51  ;;  %v1505_v54 = vmul.f32 1.442695, %v10080_v5 }
 0x1d6   : > { %v7404_v32 = vpop.eup %7403  ;;  %v1231_v58 = vpop.permute.xlu1 %1230  ;;  %v6638_v28 = vpack.c.bf16 %v7402_v31, %v7398_v60 }
 0x1d7   : > { %v10087_v29 = vadd.f32 %v8959_v3, %v1231_v58  ;;  %v10092_v6 = vadd.f32 %v8960_v23, %v1231_v58  ;;  %v6636_v52 = vpack.c.bf16 %v7404_v32, %v7400_v19  ;;  %7413 = vpow2.f32 %v1503_v15  ;;  %v8961_v3 = vld [vmem:[%s13871_s0 + $0xa0] sm:$0xff]  ;;  %v8962_v19 = vld [vmem:[%s13871_s0 + $0xa8] sm:$0xff] }
 0x1d8   : > { %7415 = vpow2.f32 %v1505_v54 }
 0x1d9   : > { %v1507_v49 = vmul.f32 1.442695, %v10087_v29  ;;  %v1509_v38 = vmul.f32 1.442695, %v10092_v6  ;;  %6637 = vmatprep.subr.bf16.mxu1 %v6636_v52  ;;  %v7406_v31 = vpop.eup %7405 }
 0x1da   : > { %6639 = vmatpush1.bf16.msra.mxu1 %v6638_v28  ;;  %v1236_v60 = vpop.permute.xlu0 %1235  ;;  %v7408_v32 = vpop.eup %7407 }
 0x1db   : > { %7417 = vpow2.f32 %v1507_v49  ;;  %v10099_v36 = vadd.f32 %v8961_v3, %v1236_v60  ;;  %v10104_v15 = vadd.f32 %v8962_v19, %v1236_v60  ;;  %v8963_v3 = vld [vmem:[%s13871_s0 + $0xb0] sm:$0xff]  ;;  %v8964_v60 = vld [vmem:[%s13871_s0 + $0xb8] sm:$0xff] }
 0x1dc   : > { %7419 = vpow2.f32 %v1509_v38 }
 0x1dd   : > { %v7410_v58 = vpop.eup %7409  ;;  %v1511_v54 = vmul.f32 1.442695, %v10099_v36  ;;  %v1513_v23 = vmul.f32 1.442695, %v10104_v15 }
 0x1de   : > { %v7412_v28 = vpop.eup %7411  ;;  %v1241_v52 = vpop.permute.xlu1 %1240  ;;  %v6642_v49 = vpack.c.bf16 %v7410_v58, %v7406_v31 }
 0x1df   : > { %v10111_v62 = vadd.f32 %v8963_v3, %v1241_v52  ;;  %v10116_v19 = vadd.f32 %v8964_v60, %v1241_v52  ;;  %v6640_v38 = vpack.c.bf16 %v7412_v28, %v7408_v32  ;;  %7421 = vpow2.f32 %v1511_v54  ;;  %v8965_v3 = vld [vmem:[%s13871_s0 + $0xc0] sm:$0xff]  ;;  %v8966_v32 = vld [vmem:[%s13871_s0 + $0xc8] sm:$0xff] }
 0x1e0   : > { %7423 = vpow2.f32 %v1513_v23 }
 0x1e1   : > { %v1515_v11 = vmul.f32 1.442695, %v10111_v62  ;;  %v1517_v33 = vmul.f32 1.442695, %v10116_v19  ;;  %6641 = vmatprep.subr.bf16.mxu1 %v6640_v38  ;;  %v7414_v58 = vpop.eup %7413 }
 0x1e2   : > { %6643 = vmatpush1.bf16.msra.mxu1 %v6642_v49  ;;  %v1246_v31 = vpop.permute.xlu0 %1245  ;;  %v7416_v28 = vpop.eup %7415 }
 0x1e3   : > { %7425 = vpow2.f32 %v1515_v11  ;;  %v10123_v14 = vadd.f32 %v8965_v3, %v1246_v31  ;;  %v10128_v54 = vadd.f32 %v8966_v32, %v1246_v31  ;;  %v8967_v3 = vld [vmem:[%s13871_s0 + $0xd0] sm:$0xff]  ;;  %v8968_v31 = vld [vmem:[%s13871_s0 + $0xd8] sm:$0xff] }
 0x1e4   : > { %7427 = vpow2.f32 %v1517_v33 }
 0x1e5   : > { %v7418_v52 = vpop.eup %7417  ;;  %v1519_v23 = vmul.f32 1.442695, %v10123_v14  ;;  %v1521_v11 = vmul.f32 1.442695, %v10128_v54 }
 0x1e6   : > { %v7420_v49 = vpop.eup %7419  ;;  %v1251_v60 = vpop.permute.xlu1 %1250  ;;  %v6646_v38 = vpack.c.bf16 %v7418_v52, %v7414_v58 }
 0x1e7   : > { %v10135_v39 = vadd.f32 %v8967_v3, %v1251_v60  ;;  %v10140_v32 = vadd.f32 %v8968_v31, %v1251_v60  ;;  %v6644_v33 = vpack.c.bf16 %v7420_v49, %v7416_v28  ;;  %7429 = vpow2.f32 %v1519_v23  ;;  %v8969_v3 = vld [vmem:[%s13871_s0 + $0xe0] sm:$0xff]  ;;  %v8970_v28 = vld [vmem:[%s13871_s0 + $0xe8] sm:$0xff] }
 0x1e8   : > { %7431 = vpow2.f32 %v1521_v11 }
 0x1e9   : > { %v1523_v24 = vmul.f32 1.442695, %v10135_v39  ;;  %v1525_v55 = vmul.f32 1.442695, %v10140_v32  ;;  %6645 = vmatprep.subr.bf16.mxu1 %v6644_v33  ;;  %v7422_v52 = vpop.eup %7421 }
 0x1ea   : > { %6647 = vmatpush1.bf16.msra.mxu1 %v6646_v38  ;;  %v1256_v58 = vpop.permute.xlu0 %1255  ;;  %v7424_v49 = vpop.eup %7423 }
 0x1eb   : > { %7433 = vpow2.f32 %v1523_v24  ;;  %v10147_v20 = vadd.f32 %v8969_v3, %v1256_v58  ;;  %v10152_v23 = vadd.f32 %v8970_v28, %v1256_v58  ;;  %v8971_v3 = vld [vmem:[%s13871_s0 + $0xf0] sm:$0xff]  ;;  %v8972_v58 = vld [vmem:[%s13871_s0 + $0xf8] sm:$0xff] }
 0x1ec   : > { %7435 = vpow2.f32 %v1525_v55 }
 0x1ed   : > { %v7426_v60 = vpop.eup %7425  ;;  %v1527_v11 = vmul.f32 1.442695, %v10147_v20  ;;  %v1529_v24 = vmul.f32 1.442695, %v10152_v23 }
 0x1ee   : > { %v7428_v38 = vpop.eup %7427  ;;  %v1261_v31 = vpop.permute.xlu1 %1260  ;;  %v6650_v33 = vpack.c.bf16 %v7426_v60, %v7422_v52 }
 0x1ef   : > { %v10159_v37 = vadd.f32 %v8971_v3, %v1261_v31  ;;  %v10164_v28 = vadd.f32 %v8972_v58, %v1261_v31  ;;  %v6648_v55 = vpack.c.bf16 %v7428_v38, %v7424_v49  ;;  %7437 = vpow2.f32 %v1527_v11  ;;  %v8973_v3 = vld [vmem:[%s13871_s0 + $0x100] sm:$0xff]  ;;  %v8974_v49 = vld [vmem:[%s13871_s0 + $0x108] sm:$0xff] }
 0x1f0   : > { %7439 = vpow2.f32 %v1529_v24 }
 0x1f1   : > { %v1531_v17 = vmul.f32 1.442695, %v10159_v37  ;;  %v1533_v16 = vmul.f32 1.442695, %v10164_v28  ;;  %6649 = vmatprep.subr.bf16.mxu1 %v6648_v55  ;;  %v7430_v60 = vpop.eup %7429 }
 0x1f2   : > { %6651 = vmatpush1.bf16.msra.mxu1 %v6650_v33  ;;  %v1266_v52 = vpop.permute.xlu0 %1265  ;;  %v7432_v38 = vpop.eup %7431 }
 0x1f3   : > { %7441 = vpow2.f32 %v1531_v17  ;;  %v10171_v63 = vadd.f32 %v8973_v3, %v1266_v52  ;;  %v10176_v11 = vadd.f32 %v8974_v49, %v1266_v52  ;;  %v8975_v3 = vld [vmem:[%s13871_s0 + $0x110] sm:$0xff]  ;;  %v8976_v52 = vld [vmem:[%s13871_s0 + $0x118] sm:$0xff] }
 0x1f4   : > { %7443 = vpow2.f32 %v1533_v16 }
 0x1f5   : > { %v7434_v31 = vpop.eup %7433  ;;  %v1535_v24 = vmul.f32 1.442695, %v10171_v63  ;;  %v1537_v17 = vmul.f32 1.442695, %v10176_v11 }
 0x1f6   : > { %v7436_v33 = vpop.eup %7435  ;;  %v1271_v58 = vpop.permute.xlu1 %1270  ;;  %v6654_v55 = vpack.c.bf16 %v7434_v31, %v7430_v60 }
 0x1f7   : > { %v10183_v35 = vadd.f32 %v8975_v3, %v1271_v58  ;;  %v10188_v49 = vadd.f32 %v8976_v52, %v1271_v58  ;;  %v6652_v16 = vpack.c.bf16 %v7436_v33, %v7432_v38  ;;  %7445 = vpow2.f32 %v1535_v24  ;;  %v8977_v3 = vld [vmem:[%s13871_s0 + $0x120] sm:$0xff]  ;;  %v8978_v38 = vld [vmem:[%s13871_s0 + $0x128] sm:$0xff] }
 0x1f8   : > { %7447 = vpow2.f32 %v1537_v17 }
 0x1f9   : > { %v1539_v48 = vmul.f32 1.442695, %v10183_v35  ;;  %v1541_v46 = vmul.f32 1.442695, %v10188_v49  ;;  %6653 = vmatprep.subr.bf16.mxu1 %v6652_v16  ;;  %v7438_v31 = vpop.eup %7437 }
 0x1fa   : > { %6655 = vmatpush1.bf16.msra.mxu1 %v6654_v55  ;;  %v1276_v60 = vpop.permute.xlu0 %1275  ;;  %v7440_v33 = vpop.eup %7439 }
 0x1fb   : > { %7449 = vpow2.f32 %v1539_v48  ;;  %v10195_v27 = vadd.f32 %v8977_v3, %v1276_v60  ;;  %v10200_v24 = vadd.f32 %v8978_v38, %v1276_v60  ;;  %v8979_v3 = vld [vmem:[%s13871_s0 + $0x130] sm:$0xff]  ;;  %v8980_v60 = vld [vmem:[%s13871_s0 + $0x138] sm:$0xff] }
 0x1fc   : > { %7451 = vpow2.f32 %v1541_v46 }
 0x1fd   : > { %v7442_v58 = vpop.eup %7441  ;;  %v1543_v17 = vmul.f32 1.442695, %v10195_v27  ;;  %v1545_v48 = vmul.f32 1.442695, %v10200_v24 }
 0x1fe   : > { %v7444_v55 = vpop.eup %7443  ;;  %v1281_v52 = vpop.permute.xlu1 %1280  ;;  %v6658_v16 = vpack.c.bf16 %v7442_v58, %v7438_v31 }
 0x1ff   : > { %v10207_v25 = vadd.f32 %v8979_v3, %v1281_v52  ;;  %v10212_v38 = vadd.f32 %v8980_v60, %v1281_v52  ;;  %v6656_v46 = vpack.c.bf16 %v7444_v55, %v7440_v33  ;;  %7453 = vpow2.f32 %v1543_v17  ;;  %v8981_v3 = vld [vmem:[%s13871_s0 + $0x140] sm:$0xff]  ;;  %v8982_v33 = vld [vmem:[%s13871_s0 + $0x148] sm:$0xff] }
 0x200   : > { %7455 = vpow2.f32 %v1545_v48 }
 0x201   : > { %v1547_v45 = vmul.f32 1.442695, %v10207_v25  ;;  %v1549_v7 = vmul.f32 1.442695, %v10212_v38  ;;  %6657 = vmatprep.subr.bf16.mxu1 %v6656_v46  ;;  %v7446_v58 = vpop.eup %7445 }
 0x202   : > { %6659 = vmatpush1.bf16.msra.mxu1 %v6658_v16  ;;  %v1286_v31 = vpop.permute.xlu0 %1285  ;;  %v7448_v55 = vpop.eup %7447 }
 0x203   : > { %7457 = vpow2.f32 %v1547_v45  ;;  %v10219_v59 = vadd.f32 %v8981_v3, %v1286_v31  ;;  %v10224_v17 = vadd.f32 %v8982_v33, %v1286_v31  ;;  %v8983_v3 = vld [vmem:[%s13871_s0 + $0x150] sm:$0xff]  ;;  %v8984_v31 = vld [vmem:[%s13871_s0 + $0x158] sm:$0xff] }
 0x204   : > { %7459 = vpow2.f32 %v1549_v7 }
 0x205   : > { %v7450_v52 = vpop.eup %7449  ;;  %v1551_v48 = vmul.f32 1.442695, %v10219_v59  ;;  %v1553_v45 = vmul.f32 1.442695, %v10224_v17 }
 0x206   : > { %v7452_v16 = vpop.eup %7451  ;;  %v1291_v60 = vpop.permute.xlu1 %1290  ;;  %v6662_v46 = vpack.c.bf16 %v7450_v52, %v7446_v58 }
 0x207   : > { %v10231_v57 = vadd.f32 %v8983_v3, %v1291_v60  ;;  %v10236_v33 = vadd.f32 %v8984_v31, %v1291_v60  ;;  %v6660_v7 = vpack.c.bf16 %v7452_v16, %v7448_v55  ;;  %7461 = vpow2.f32 %v1551_v48  ;;  %v8985_v3 = vld [vmem:[%s13871_s0 + $0x160] sm:$0xff]  ;;  %v8986_v55 = vld [vmem:[%s13871_s0 + $0x168] sm:$0xff] }
 0x208   : > { %7463 = vpow2.f32 %v1553_v45 }
 0x209   : > { %14328 = vst [vmem:[#allocation66_spill] sm:$0xff] %v10231_v57  ;;  %14329 = vst [vmem:[#allocation67_spill] sm:$0xff] %v10236_v33  ;;  %v1555_v43 = vmul.f32 1.442695, %v10231_v57  ;;  %v1557_v40 = vmul.f32 1.442695, %v10236_v33  ;;  %6661 = vmatprep.subr.bf16.mxu1 %v6660_v7  ;;  %v7454_v52 = vpop.eup %7453 }
 0x20a   : > { %6663 = vmatpush1.bf16.msra.mxu1 %v6662_v46  ;;  %v1296_v58 = vpop.permute.xlu0 %1295  ;;  %v7456_v16 = vpop.eup %7455 }
 0x20b   : > { %7465 = vpow2.f32 %v1555_v43  ;;  %v10243_v8 = vadd.f32 %v8985_v3, %v1296_v58  ;;  %v10248_v48 = vadd.f32 %v8986_v55, %v1296_v58  ;;  %v8987_v3 = vld [vmem:[%s13871_s0 + $0x170] sm:$0xff]  ;;  %v8988_v58 = vld [vmem:[%s13871_s0 + $0x178] sm:$0xff] }
 0x20c   : > { %7467 = vpow2.f32 %v1557_v40 }
 0x20d   : > { %14330 = vst [vmem:[#allocation68_spill] sm:$0xff] %v10243_v8  ;;  %14331 = vst [vmem:[#allocation69_spill] sm:$0xff] %v10248_v48  ;;  %v7458_v60 = vpop.eup %7457  ;;  %v1559_v45 = vmul.f32 1.442695, %v10243_v8  ;;  %v1561_v43 = vmul.f32 1.442695, %v10248_v48 }
 0x20e   : > { %v7460_v46 = vpop.eup %7459  ;;  %v1301_v31 = vpop.permute.xlu1 %1300  ;;  %v6666_v7 = vpack.c.bf16 %v7458_v60, %v7454_v52 }
 0x20f   : > { %v10255_v26 = vadd.f32 %v8987_v3, %v1301_v31  ;;  %v10260_v55 = vadd.f32 %v8988_v58, %v1301_v31  ;;  %v6664_v40 = vpack.c.bf16 %v7460_v46, %v7456_v16  ;;  %7469 = vpow2.f32 %v1559_v45  ;;  %v8989_v3 = vld [vmem:[%s13871_s0 + $0x180] sm:$0xff]  ;;  %v8990_v16 = vld [vmem:[%s13871_s0 + $0x188] sm:$0xff] }
 0x210   : > { %7471 = vpow2.f32 %v1561_v43 }
 0x211   : > { %14332 = vst [vmem:[#allocation70_spill] sm:$0xff] %v10255_v26  ;;  %14333 = vst [vmem:[#allocation71_spill] sm:$0xff] %v10260_v55  ;;  %v1563_v10 = vmul.f32 1.442695, %v10255_v26  ;;  %v1565_v8 = vmul.f32 1.442695, %v10260_v55  ;;  %6665 = vmatprep.subr.bf16.mxu1 %v6664_v40  ;;  %v7462_v60 = vpop.eup %7461 }
 0x212   : > { %6667 = vmatpush1.bf16.msra.mxu1 %v6666_v7  ;;  %v1306_v52 = vpop.permute.xlu0 %1305  ;;  %v7464_v46 = vpop.eup %7463 }
 0x213   : > { %7473 = vpow2.f32 %v1563_v10  ;;  %v10267_v48 = vadd.f32 %v8989_v3, %v1306_v52  ;;  %v10272_v45 = vadd.f32 %v8990_v16, %v1306_v52  ;;  %v8991_v3 = vld [vmem:[%s13871_s0 + $0x190] sm:$0xff]  ;;  %v8992_v52 = vld [vmem:[%s13871_s0 + $0x198] sm:$0xff] }
 0x214   : > { %7475 = vpow2.f32 %v1565_v8 }
 0x215   : > { %14334 = vst [vmem:[#allocation72_spill] sm:$0xff] %v10267_v48  ;;  %14335 = vst [vmem:[#allocation73_spill] sm:$0xff] %v10272_v45  ;;  %v7466_v31 = vpop.eup %7465  ;;  %v1567_v43 = vmul.f32 1.442695, %v10267_v48  ;;  %v1569_v10 = vmul.f32 1.442695, %v10272_v45 }
 0x216   : > { %v7468_v7 = vpop.eup %7467  ;;  %v1311_v58 = vpop.permute.xlu1 %1310  ;;  %v6670_v40 = vpack.c.bf16 %v7466_v31, %v7462_v60 }
 0x217   : > { %v10279_v26 = vadd.f32 %v8991_v3, %v1311_v58  ;;  %v10284_v16 = vadd.f32 %v8992_v52, %v1311_v58  ;;  %v6668_v8 = vpack.c.bf16 %v7468_v7, %v7464_v46  ;;  %7477 = vpow2.f32 %v1567_v43  ;;  %v8993_v3 = vld [vmem:[%s13871_s0 + $0x1a0] sm:$0xff]  ;;  %v8994_v46 = vld [vmem:[%s13871_s0 + $0x1a8] sm:$0xff] }
 0x218   : > { %7479 = vpow2.f32 %v1569_v10 }
 0x219   : > { %14336 = vst [vmem:[#allocation74_spill] sm:$0xff] %v10279_v26  ;;  %14337 = vst [vmem:[#allocation75_spill] sm:$0xff] %v10284_v16  ;;  %v1571_v48 = vmul.f32 1.442695, %v10279_v26  ;;  %v1573_v45 = vmul.f32 1.442695, %v10284_v16  ;;  %6669 = vmatprep.subr.bf16.mxu1 %v6668_v8  ;;  %v7470_v31 = vpop.eup %7469 }
 0x21a   : > { %6671 = vmatpush1.bf16.msra.mxu1 %v6670_v40  ;;  %v1316_v60 = vpop.permute.xlu0 %1315  ;;  %v7472_v7 = vpop.eup %7471 }
 0x21b   : > { %7481 = vpow2.f32 %v1571_v48  ;;  %v10291_v55 = vadd.f32 %v8993_v3, %v1316_v60  ;;  %v10296_v43 = vadd.f32 %v8994_v46, %v1316_v60  ;;  %v8995_v3 = vld [vmem:[%s13871_s0 + $0x1b0] sm:$0xff]  ;;  %v8996_v60 = vld [vmem:[%s13871_s0 + $0x1b8] sm:$0xff] }
 0x21c   : > { %7483 = vpow2.f32 %v1573_v45 }
 0x21d   : > { %14338 = vst [vmem:[#allocation76_spill] sm:$0xff] %v10291_v55  ;;  %14339 = vst [vmem:[#allocation77_spill] sm:$0xff] %v10296_v43  ;;  %v7474_v58 = vpop.eup %7473  ;;  %v1575_v10 = vmul.f32 1.442695, %v10291_v55  ;;  %v1577_v48 = vmul.f32 1.442695, %v10296_v43 }
 0x21e   : > { %v7476_v40 = vpop.eup %7475  ;;  %v1321_v52 = vpop.permute.xlu1 %1320  ;;  %v6674_v8 = vpack.c.bf16 %v7474_v58, %v7470_v31 }
 0x21f   : > { %v10303_v26 = vadd.f32 %v8995_v3, %v1321_v52  ;;  %v10308_v46 = vadd.f32 %v8996_v60, %v1321_v52  ;;  %v6672_v45 = vpack.c.bf16 %v7476_v40, %v7472_v7  ;;  %7485 = vpow2.f32 %v1575_v10  ;;  %v8997_v3 = vld [vmem:[%s13871_s0 + $0x1c0] sm:$0xff]  ;;  %v8998_v7 = vld [vmem:[%s13871_s0 + $0x1c8] sm:$0xff] }
 0x220   : > { %7487 = vpow2.f32 %v1577_v48 }
 0x221   : > { %14340 = vst [vmem:[#allocation78_spill] sm:$0xff] %v10303_v26  ;;  %14341 = vst [vmem:[#allocation79_spill] sm:$0xff] %v10308_v46  ;;  %v1579_v55 = vmul.f32 1.442695, %v10303_v26  ;;  %v1581_v43 = vmul.f32 1.442695, %v10308_v46  ;;  %6673 = vmatprep.subr.bf16.mxu1 %v6672_v45  ;;  %v7478_v58 = vpop.eup %7477 }
 0x222   : > { %6675 = vmatpush1.bf16.msra.mxu1 %v6674_v8  ;;  %v1326_v31 = vpop.permute.xlu0 %1325  ;;  %v7480_v40 = vpop.eup %7479 }
 0x223   : > { %7489 = vpow2.f32 %v1579_v55  ;;  %v10315_v16 = vadd.f32 %v8997_v3, %v1326_v31  ;;  %v10320_v10 = vadd.f32 %v8998_v7, %v1326_v31  ;;  %v8999_v3 = vld [vmem:[%s13871_s0 + $0x1d0] sm:$0xff]  ;;  %v9000_v31 = vld [vmem:[%s13871_s0 + $0x1d8] sm:$0xff] }
 0x224   : > { %7491 = vpow2.f32 %v1581_v43 }
 0x225   : > { %14342 = vst [vmem:[#allocation80_spill] sm:$0xff] %v10315_v16  ;;  %14343 = vst [vmem:[#allocation81_spill] sm:$0xff] %v10320_v10  ;;  %v7482_v52 = vpop.eup %7481  ;;  %v1583_v48 = vmul.f32 1.442695, %v10315_v16  ;;  %v1585_v55 = vmul.f32 1.442695, %v10320_v10 }
 0x226   : > { %v7484_v8 = vpop.eup %7483  ;;  %v1331_v60 = vpop.permute.xlu1 %1330  ;;  %v6678_v45 = vpack.c.bf16 %v7482_v52, %v7478_v58 }
 0x227   : > { %v10327_v26 = vadd.f32 %v8999_v3, %v1331_v60  ;;  %v10332_v7 = vadd.f32 %v9000_v31, %v1331_v60  ;;  %v6676_v43 = vpack.c.bf16 %v7484_v8, %v7480_v40  ;;  %7493 = vpow2.f32 %v1583_v48  ;;  %v9001_v3 = vld [vmem:[%s13871_s0 + $0x1e0] sm:$0xff]  ;;  %v9002_v40 = vld [vmem:[%s13871_s0 + $0x1e8] sm:$0xff] }
 0x228   : > { %7495 = vpow2.f32 %v1585_v55 }
 0x229   : > { %14344 = vst [vmem:[#allocation82_spill] sm:$0xff] %v10327_v26  ;;  %14345 = vst [vmem:[#allocation83_spill] sm:$0xff] %v10332_v7  ;;  %v1587_v16 = vmul.f32 1.442695, %v10327_v26  ;;  %v1589_v10 = vmul.f32 1.442695, %v10332_v7  ;;  %6677 = vmatprep.subr.bf16.mxu1 %v6676_v43  ;;  %v7486_v52 = vpop.eup %7485 }
 0x22a   : > { %6679 = vmatpush1.bf16.msra.mxu1 %v6678_v45  ;;  %v1336_v58 = vpop.permute.xlu0 %1335  ;;  %v7488_v8 = vpop.eup %7487 }
 0x22b   : > { %7497 = vpow2.f32 %v1587_v16  ;;  %v10339_v46 = vadd.f32 %v9001_v3, %v1336_v58  ;;  %v10344_v48 = vadd.f32 %v9002_v40, %v1336_v58  ;;  %v9003_v3 = vld [vmem:[%s13871_s0 + $0x1f0] sm:$0xff]  ;;  %v9004_v58 = vld [vmem:[%s13871_s0 + $0x1f8] sm:$0xff] }
 0x22c   : > { %7499 = vpow2.f32 %v1589_v10 }
 0x22d   : > { %14346 = vst [vmem:[#allocation84_spill] sm:$0xff] %v10339_v46  ;;  %14347 = vst [vmem:[#allocation85_spill] sm:$0xff] %v10344_v48  ;;  %v7490_v60 = vpop.eup %7489  ;;  %v1591_v55 = vmul.f32 1.442695, %v10339_v46  ;;  %v1593_v16 = vmul.f32 1.442695, %v10344_v48 }
 0x22e   : > { %v7492_v45 = vpop.eup %7491  ;;  %v1341_v31 = vpop.permute.xlu1 %1340  ;;  %v6682_v43 = vpack.c.bf16 %v7490_v60, %v7486_v52 }
 0x22f   : > { %v10351_v26 = vadd.f32 %v9003_v3, %v1341_v31  ;;  %v10356_v40 = vadd.f32 %v9004_v58, %v1341_v31  ;;  %v6680_v10 = vpack.c.bf16 %v7492_v45, %v7488_v8  ;;  %7501 = vpow2.f32 %v1591_v55 }
 0x230   : > { %7503 = vpow2.f32 %v1593_v16  ;;  %v14349_v16 = vmov 0.0|0.0  }
 0x231   : > { %14348 = vst [vmem:[#allocation86_spill] sm:$0xff] %v10351_v26  ;;  %v1595_v46 = vmul.f32 1.442695, %v10351_v26  ;;  %v1597_v48 = vmul.f32 1.442695, %v10356_v40  ;;  %6681 = vmatprep.subr.bf16.mxu1 %v6680_v10  ;;  %v7494_v52 = vpop.eup %7493 }
 0x232   : > { %6683 = vmatpush1.bf16.msra.mxu1 %v6682_v43  ;;  %v7496_v60 = vpop.eup %7495  ;;  %v14350_v43 = vmov 1.0  }
 0x233   : > { %7505 = vpow2.f32 %v1595_v46  ;;  %v14351_v46 = vmov 1.0|1.0  }
 0x234   : > { %7507 = vpow2.f32 %v1597_v48 }
 0x235   : > { %v7498_v3 = vpop.eup %7497 }
 0x236   : > { %v7500_v7 = vpop.eup %7499  ;;  %v6686_v57 = vpack.c.bf16 %v7498_v3, %v7494_v52  ;;  %v9273_v3 = vmov 1966171168  }
 0x237   : > { %v6684_v33 = vpack.c.bf16 %v7500_v7, %v7496_v60 }
 0x239   : > { %6685 = vmatprep.subr.bf16.mxu1 %v6684_v33  ;;  %v7502_v31 = vpop.eup %7501 }
 0x23a   : > { %6687 = vmatpush1.bf16.msra.mxu1 %v6686_v57  ;;  %v7504_v8 = vpop.eup %7503 }
 0x23d   : > { %v7506_v55 = vpop.eup %7505 }
 0x23e   : > { %v7508_v45 = vpop.eup %7507  ;;  %v6690_v58 = vpack.c.bf16 %v7506_v55, %v7502_v31  ;;  %v1678_v31 = vunpack.c.l.s4 %v9273_v3 }
 0x23f   : > { %v6688_v26 = vpack.c.bf16 %v7508_v45, %v7504_v8 }
 0x241   : > { %6689 = vmatprep.subr.bf16.mxu1 %v6688_v26 }
 0x242   : > { %6691 = vmatpush1.bf16.msra.mxu1 %v6690_v58  ;;  %v1679_v58 = vunpack.c.0.s8 %v1678_v31 }
 0x243   : > { %6692 = vmatprep.subr.bf16.mxu1 %v14349_v16 }
 0x245   : > { %1664 = vmatmul.mubr.f32.vlgmr.msra.gmra.mrb[0].mxu1 %v14350_v43 }
 0x246   : > { %6693 = vmatpush1.bf16.msra.mxu1 %v14351_v46 }
 0x247   : > { %6694 = vmatprep.subr.bf16.mxu1 %v14349_v16 }
 0x24a   : > { %6695 = vmatpush1.bf16.msra.mxu1 %v14351_v46 }
 0x24b   : > { %6696 = vmatprep.subr.bf16.mxu1 %v14349_v16 }
 0x24e   : > { %6697 = vmatpush1.bf16.msra.mxu1 %v14351_v46 }
 0x24f   : > { %6698 = vmatprep.subr.bf16.mxu1 %v14349_v16 }
 0x252   : > { %6699 = vmatpush1.bf16.msra.mxu1 %v14351_v46 }
 0x253   : > { %6700 = vmatprep.subr.bf16.mxu1 %v14349_v16 }
 0x256   : > { %6701 = vmatpush1.bf16.msra.mxu1 %v14351_v46 }
 0x257   : > { %6702 = vmatprep.subr.bf16.mxu1 %v14349_v16 }
 0x25a   : > { %6703 = vmatpush1.bf16.msra.mxu1 %v14351_v46 }
 0x25b   : > { %6704 = vmatprep.subr.bf16.mxu1 %v14349_v16 }
 0x25e   : > { %6705 = vmatpush1.bf16.msra.mxu1 %v14351_v46 }
 0x25f   : > { %6706 = vmatprep.subr.bf16.mxu1 %v14349_v16  ;;  %v499_v26 = vpop.xlane.xlu0 %498 }
 0x260   : > { %v504_v57 = vrot.slane %v499_v26, %v10037_v4  ;;  %v10396_v26 = vsub.s32 %v1679_v58, %v10032_v41 }
 0x262   : > { %6707 = vmatpush1.bf16.msra.mxu1 %v14351_v46  ;;  %7509 = vrcp.f32 %v504_v57 }
 0x263   : > { %6708 = vmatprep.subr.bf16.mxu1 %v14349_v16 }
 0x266   : > { %6709 = vmatpush1.bf16.msra.mxu1 %v14351_v46 }
 0x267   : > { %6710 = vmatprep.subr.bf16.mxu1 %v14349_v16 }
 0x26a   : > { %6711 = vmatpush1.bf16.msra.mxu1 %v14351_v46 }
 0x26b   : > { %6712 = vmatprep.subr.bf16.mxu1 %v14349_v16 }
 0x26c   : > { %v7510_v52 = vpop.eup %7509 }
 0x26d   : > { %v507_v60 = vmul.f32 %v7510_v52, %v10052_v13 }
 0x26e   : > { %6713 = vmatpush1.bf16.msra.mxu1 %v14351_v46 }
 0x26f   : > { %6714 = vmatprep.subr.bf16.mxu1 %v14349_v16 }
 0x272   : > { %6715 = vmatpush1.bf16.msra.mxu1 %v14351_v46 }
 0x273   : > { %6716 = vmatprep.subr.bf16.mxu1 %v14349_v16 }
 0x276   : > { %6717 = vmatpush1.bf16.msra.mxu1 %v14351_v46 }
 0x277   : > { %6718 = vmatprep.subr.bf16.mxu1 %v14349_v16 }
 0x27a   : > { %6719 = vmatpush1.bf16.msra.mxu1 %v14351_v46 }
 0x27b   : > { %6720 = vmatprep.subr.bf16.mxu1 %v14349_v16 }
 0x27e   : > { %6721 = vmatpush1.bf16.msra.mxu1 %v14351_v46 }
 0x27f   : > { %6722 = vmatprep.subr.bf16.mxu1 %v14349_v16 }
 0x282   : > { %6723 = vmatpush1.bf16.msra.mxu1 %v14351_v46 }
 0x318   : > { %v1665_v33 = vpop.f32.mrb[0].mxu1 }
 0x319   : > { %v1666_v7 = vadd.f32 1e-30, %v1665_v33  ;;  %v1667_v48 = vpop.f32.mrb[1].mxu1 }
 0x31a   : > { %v1668_v10 = vadd.f32 1e-30, %v1667_v48 }
 0x31b   : > { %7511 = vlog2.f32 %v1666_v7 }
 0x31c   : > { %7513 = vlog2.f32 %v1668_v10 }
 0x31d   : > { %7515 = vlog2.f32 %v507_v60 }
 0x325   : > { %v7512_v8 = vpop.eup %7511 }
 0x326   : > { %v7514_v55 = vpop.eup %7513  ;;  %v1671_v45 = vmul.f32 0.6931472, %v7512_v8 }
 0x327   : > { %v1673_v46 = vmul.f32 0.6931472, %v7514_v55  ;;  %v7516_v33 = vpop.eup %7515 }
 0x328   : > { %v10399_v7 = vmul.f32 0.6931472, %v7516_v33 }
 0x329   : > { %v1676_v16 = vcombine.low %v1671_v45, %v1673_v46 }
 0x32b   : > { %v1683_v57 = vrot.slane %v1676_v16, %v10396_v26 }
 0x32d   : > { %v1690_v48 = vrot.slane %v1683_v57, %v10396_v26 }
 0x32f   : > { %v10403_v13 = vsub.f32 %v10399_v7, %v1690_v48 }
 0x331   : > { %v10407_v10 = vrot.slane %v10403_v13, %v10037_v4  ;;  %v10411_v46 = vrot.slane %v10403_v13, %v10040_v2 }
 0x333   : > { %v1705_v41 = vadd.f32 %v10407_v10, %v9959_v50  ;;  %v1706_v16 = vadd.f32 %v10411_v46, %v9964_v1  ;;  %v1708_v52 = vadd.f32 %v10411_v46, %v9976_v30  ;;  %v1707_v60 = vadd.f32 %v10407_v10, %v9971_v34 }
 0x334   : > { %v1710_v8 = vadd.f32 %v10411_v46, %v9988_v9  ;;  %v1709_v50 = vadd.f32 %v10407_v10, %v9983_v61  ;;  %v1712_v1 = vadd.f32 %v10411_v46, %v10000_v0  ;;  %v1711_v34 = vadd.f32 %v10407_v10, %v9995_v18 }
 0x335   : > { %v1769_v3 = vmul.f32 1.442695, %v1705_v41  ;;  %v1771_v31 = vmul.f32 1.442695, %v1706_v16  ;;  %v1775_v55 = vmul.f32 1.442695, %v1708_v52  ;;  %v1714_v9 = vadd.f32 %v10411_v46, %v10012_v53 }
 0x336   : > { %v1773_v45 = vmul.f32 1.442695, %v1707_v60  ;;  %v1779_v30 = vmul.f32 1.442695, %v1710_v8  ;;  %v1777_v58 = vmul.f32 1.442695, %v1709_v50  ;;  %v1713_v61 = vadd.f32 %v10407_v10, %v10007_v44 }
 0x337   : > { %7517 = vpow2.f32 %v1769_v3  ;;  %v1783_v57 = vmul.f32 1.442695, %v1712_v1  ;;  %v1781_v48 = vmul.f32 1.442695, %v1711_v34  ;;  %v1716_v0 = vadd.f32 %v10411_v46, %v10030_v47 }
 0x338   : > { %7519 = vpow2.f32 %v1771_v31  ;;  %v1787_v16 = vmul.f32 1.442695, %v1714_v9  ;;  %v1715_v53 = vadd.f32 %v10407_v10, %v10025_v42  ;;  %v1785_v52 = vmul.f32 1.442695, %v1713_v61 }
 0x339   : > { %7521 = vpow2.f32 %v1775_v55  ;;  %v1718_v44 = vadd.f32 %v10411_v46, %v10050_v56  ;;  %v1791_v60 = vmul.f32 1.442695, %v1716_v0  ;;  %v1717_v47 = vadd.f32 %v10407_v10, %v10045_v22 }
 0x33a   : > { %7523 = vpow2.f32 %v1773_v45  ;;  %v1789_v8 = vmul.f32 1.442695, %v1715_v53  ;;  %v1720_v42 = vadd.f32 %v10411_v46, %v10068_v12  ;;  %v1719_v56 = vadd.f32 %v10407_v10, %v10063_v21 }
 0x33b   : > { %7525 = vpow2.f32 %v1779_v30  ;;  %v1795_v55 = vmul.f32 1.442695, %v1718_v44  ;;  %v1793_v1 = vmul.f32 1.442695, %v1717_v47  ;;  %v1722_v22 = vadd.f32 %v10411_v46, %v10080_v5 }
 0x33c   : > { %7527 = vpow2.f32 %v1777_v58  ;;  %v1799_v30 = vmul.f32 1.442695, %v1720_v42  ;;  %v1721_v12 = vadd.f32 %v10407_v10, %v10075_v51  ;;  %v1797_v9 = vmul.f32 1.442695, %v1719_v56 }
 0x33d   : > { %7529 = vpow2.f32 %v1783_v57  ;;  %v1724_v21 = vadd.f32 %v10411_v46, %v10092_v6  ;;  %v1803_v57 = vmul.f32 1.442695, %v1722_v22  ;;  %v1723_v5 = vadd.f32 %v10407_v10, %v10087_v29 }
 0x33e   : > { %7531 = vpow2.f32 %v1781_v48  ;;  %v1801_v48 = vmul.f32 1.442695, %v1721_v12  ;;  %v1726_v51 = vadd.f32 %v10411_v46, %v10104_v15  ;;  %v1725_v6 = vadd.f32 %v10407_v10, %v10099_v36 }
 0x33f   : > { %7533 = vpow2.f32 %v1787_v16  ;;  %v1728_v29 = vadd.f32 %v10411_v46, %v10116_v19  ;;  %v1727_v15 = vadd.f32 %v10407_v10, %v10111_v62  ;;  %v1730_v36 = vadd.f32 %v10411_v46, %v10128_v54 }
 0x340   : > { %7535 = vpow2.f32 %v1785_v52  ;;  %v1811_v53 = vmul.f32 1.442695, %v1726_v51  ;;  %v1729_v19 = vadd.f32 %v10407_v10, %v10123_v14  ;;  %v1732_v62 = vadd.f32 %v10411_v46, %v10140_v32 }
 0x341   : > { %v7518_v33 = vpop.eup %7517  ;;  %7537 = vpow2.f32 %v1791_v60  ;;  %v1809_v60 = vmul.f32 1.442695, %v1725_v6  ;;  %v1819_v42 = vmul.f32 1.442695, %v1730_v36  ;;  %v1731_v54 = vadd.f32 %v10407_v10, %v10135_v39 }
 0x342   : > { %v7520_v41 = vpop.eup %7519  ;;  %7539 = vpow2.f32 %v1789_v8  ;;  %v1813_v8 = vmul.f32 1.442695, %v1727_v15  ;;  %v1734_v14 = vadd.f32 %v10411_v46, %v10152_v23  ;;  %v1823_v56 = vmul.f32 1.442695, %v1732_v62 }
 0x343   : > { %1961 = vmatprep.mubr.f32.mxu1 %v7520_v41  ;;  %v7522_v18 = vpop.eup %7521  ;;  %7541 = vpow2.f32 %v1795_v55  ;;  %v1807_v41 = vmul.f32 1.442695, %v1724_v21  ;;  %v1733_v32 = vadd.f32 %v10407_v10, %v10147_v20  ;;  %v1736_v39 = vadd.f32 %v10411_v46, %v10164_v28 }
 0x344   : > { %1962 = vmatmul.mubr.f32.vlgmr.msra.gmra.mrb[2].mxu1 %v7518_v33  ;;  %v7524_v3 = vpop.eup %7523  ;;  %7543 = vpow2.f32 %v1793_v1  ;;  %v1735_v23 = vadd.f32 %v10407_v10, %v10159_v37  ;;  %v1738_v20 = vadd.f32 %v10411_v46, %v10176_v11  ;;  %v1737_v28 = vadd.f32 %v10407_v10, %v10171_v63 }
 0x345   : > { %1966 = vmatprep.mubr.f32.mxu1 %v7522_v18  ;;  %v7526_v31 = vpop.eup %7525  ;;  %7545 = vpow2.f32 %v1799_v30  ;;  %v1805_v18 = vmul.f32 1.442695, %v1723_v5  ;;  %v1821_v30 = vmul.f32 1.442695, %v1731_v54  ;;  %v1831_v21 = vmul.f32 1.442695, %v1736_v39 }
 0x346   : > { %v7528_v50 = vpop.eup %7527  ;;  %7547 = vpow2.f32 %v1797_v9  ;;  %v1825_v9 = vmul.f32 1.442695, %v1733_v32  ;;  %v1740_v37 = vadd.f32 %v10411_v46, %v10188_v49  ;;  %v1835_v5 = vmul.f32 1.442695, %v1738_v20 }
 0x347   : > { %v7530_v45 = vpop.eup %7529  ;;  %7549 = vpow2.f32 %v1803_v57  ;;  %v1739_v11 = vadd.f32 %v10407_v10, %v10183_v35  ;;  %v1742_v63 = vadd.f32 %v10411_v46, %v10200_v24  ;;  %v1741_v49 = vadd.f32 %v10407_v10, %v10195_v27 }
 0x348   : > { %1967 = vmatmul.mubr.f32.gmra.mrb[4].mxu1 %v7524_v3  ;;  %v7532_v34 = vpop.eup %7531  ;;  %7551 = vpow2.f32 %v1801_v48  ;;  %v1815_v3 = vmul.f32 1.442695, %v1728_v29  ;;  %v1744_v35 = vadd.f32 %v10411_v46, %v10212_v38  ;;  %v1743_v24 = vadd.f32 %v10407_v10, %v10207_v25 }
 0x349   : > { %1971 = vmatprep.mubr.f32.mxu1 %v7526_v31  ;;  %v7534_v58 = vpop.eup %7533  ;;  %7553 = vpow2.f32 %v1807_v41  ;;  %v1833_v41 = vmul.f32 1.442695, %v1737_v28  ;;  %v1843_v29 = vmul.f32 1.442695, %v1742_v63  ;;  %v1746_v27 = vadd.f32 %v10411_v46, %v10224_v17  ;;  %v14353_v17 = vld [vmem:[#allocation66_spill] sm:$0xff]  ;;  %v14359_v28 = vld [vmem:[#allocation72_spill] sm:$0xff] }
 0x34a   : > { %v7536_v33 = vpop.eup %7535  ;;  %7555 = vpow2.f32 %v1805_v18  ;;  %v1837_v18 = vmul.f32 1.442695, %v1739_v11  ;;  %v1847_v15 = vmul.f32 1.442695, %v1744_v35  ;;  %v1745_v38 = vadd.f32 %v10407_v10, %v10219_v59  ;;  %v14361_v63 = vld [vmem:[#allocation74_spill] sm:$0xff] }
 0x34b   : > { %v7538_v61 = vpop.eup %7537  ;;  %7557 = vpow2.f32 %v1811_v53  ;;  %v1747_v62 = vadd.f32 %v10407_v10, %v14353_v17 }
 0x34c   : > { %1972 = vmatmul.mubr.f32.gmra.mrb[6].mxu1 %v7528_v50  ;;  %v7540_v0 = vpop.eup %7539  ;;  %7559 = vpow2.f32 %v1809_v60 }
 0x34d   : > { %1976 = vmatprep.mubr.f32.mxu1 %v7530_v45  ;;  %v7542_v16 = vpop.eup %7541  ;;  %7561 = vpow2.f32 %v1815_v3  ;;  %v1817_v45 = vmul.f32 1.442695, %v1729_v19  ;;  %v1845_v3 = vmul.f32 1.442695, %v1743_v24 }
 0x34e   : > { %v7544_v52 = vpop.eup %7543  ;;  %7563 = vpow2.f32 %v1813_v8 }
 0x34f   : > { %v7546_v44 = vpop.eup %7545  ;;  %7565 = vpow2.f32 %v1819_v42  ;;  %v1849_v42 = vmul.f32 1.442695, %v1745_v38  ;;  %v14365_v38 = vld [vmem:[#allocation78_spill] sm:$0xff] }
 0x350   : > { %1977 = vmatmul.mubr.f32.gmra.mrb[8].mxu1 %v7532_v34  ;;  %v7548_v31 = vpop.eup %7547  ;;  %7567 = vpow2.f32 %v1817_v45  ;;  %v1827_v34 = vmul.f32 1.442695, %v1734_v14  ;;  %v14355_v14 = vld [vmem:[#allocation68_spill] sm:$0xff] }
 0x351   : > { %1981 = vmatprep.mubr.f32.mxu1 %v7534_v58  ;;  %v7550_v47 = vpop.eup %7549  ;;  %7569 = vpow2.f32 %v1823_v56  ;;  %v1749_v56 = vadd.f32 %v10407_v10, %v14355_v14 }
 0x352   : > { %v7552_v55 = vpop.eup %7551  ;;  %7571 = vpow2.f32 %v1821_v30 }
 0x353   : > { %v7554_v50 = vpop.eup %7553  ;;  %7573 = vpow2.f32 %v1827_v34 }
 0x354   : > { %1982 = vmatmul.mubr.f32.gmra.mrb[10].mxu1 %v7536_v33  ;;  %v7556_v1 = vpop.eup %7555  ;;  %7575 = vpow2.f32 %v1825_v9  ;;  %v14358_v9 = vld [vmem:[#allocation73_spill] sm:$0xff] }
 0x355   : > { %1986 = vmatprep.mubr.f32.mxu1 %v7538_v61  ;;  %v7558_v22 = vpop.eup %7557  ;;  %v1829_v61 = vmul.f32 1.442695, %v1735_v23  ;;  %7577 = vpow2.f32 %v1831_v21  ;;  %v1857_v23 = vmul.f32 1.442695, %v1749_v56  ;;  %v1754_v20 = vadd.f32 %v10411_v46, %v14358_v9  ;;  %v14369_v56 = vld [vmem:[#allocation82_spill] sm:$0xff] }
 0x356   : > { %v7560_v58 = vpop.eup %7559 }
 0x357   : > { %v7562_v12 = vpop.eup %7561  ;;  %7579 = vpow2.f32 %v1829_v61  ;;  %v1753_v61 = vadd.f32 %v10407_v10, %v14359_v28  ;;  %v14372_v28 = vld [vmem:[#allocation86_spill] sm:$0xff] }
 0x358   : > { %1987 = vmatmul.mubr.f32.gmra.mrb[12].mxu1 %v7540_v0  ;;  %v7564_v57 = vpop.eup %7563  ;;  %7581 = vpow2.f32 %v1835_v5  ;;  %v1839_v0 = vmul.f32 1.442695, %v1740_v37  ;;  %v14360_v5 = vld [vmem:[#allocation75_spill] sm:$0xff] }
 0x359   : > { %1991 = vmatprep.mubr.f32.mxu1 %v7542_v16  ;;  %v7566_v33 = vpop.eup %7565  ;;  %7583 = vpow2.f32 %v1833_v41 }
 0x35a   : > { %v7568_v48 = vpop.eup %7567  ;;  %7585 = vpow2.f32 %v1839_v0  ;;  %v1755_v0 = vadd.f32 %v10407_v10, %v14361_v63 }
 0x35b   : > { %v7570_v51 = vpop.eup %7569  ;;  %7587 = vpow2.f32 %v1837_v18 }
 0x35c   : > { %1992 = vmatmul.mubr.f32.gmra.mrb[14].mxu1 %v7544_v52  ;;  %v7572_v16 = vpop.eup %7571  ;;  %7589 = vpow2.f32 %v1843_v29  ;;  %v1869_v24 = vmul.f32 1.442695, %v1755_v0 }
 0x35d   : > { %1996 = vmatprep.mubr.f32.mxu1 %v7546_v44  ;;  %v7574_v6 = vpop.eup %7573  ;;  %v1841_v44 = vmul.f32 1.442695, %v1741_v49 }
 0x35e   : > { %v7576_v53 = vpop.eup %7575 }
 0x35f   : > { %v7578_v52 = vpop.eup %7577  ;;  %7591 = vpow2.f32 %v1841_v44  ;;  %v14364_v44 = vld [vmem:[#allocation79_spill] sm:$0xff] }
 0x360   : > { %1997 = vmatmul.mubr.f32.gmra.mrb[16].mxu1 %v7548_v31  ;;  %v14352_v31 = vld [vmem:[#allocation67_spill] sm:$0xff]  ;;  %7593 = vpow2.f32 %v1847_v15 }
 0x361   : > { %2001 = vmatprep.mubr.f32.mxu1 %v7550_v47  ;;  %v7580_v60 = vpop.eup %7579  ;;  %v1748_v25 = vadd.f32 %v10411_v46, %v14352_v31  ;;  %v1851_v47 = vmul.f32 1.442695, %v1746_v27  ;;  %7595 = vpow2.f32 %v1845_v3  ;;  %v1760_v27 = vadd.f32 %v10411_v46, %v14364_v44 }
 0x362   : > { %v7582_v36 = vpop.eup %7581  ;;  %v1759_v3 = vadd.f32 %v10407_v10, %v14365_v38 }
 0x363   : > { %v7584_v19 = vpop.eup %7583  ;;  %7597 = vpow2.f32 %v1851_v47 }
 0x364   : > { %2002 = vmatmul.mubr.f32.gmra.mrb[18].mxu1 %v7552_v55  ;;  %v7586_v8 = vpop.eup %7585  ;;  %v14354_v55 = vld [vmem:[#allocation69_spill] sm:$0xff]  ;;  %7599 = vpow2.f32 %v1849_v42 }
 0x365   : > { %2006 = vmatprep.mubr.f32.mxu1 %v7554_v50  ;;  %v1750_v59 = vadd.f32 %v10411_v46, %v14354_v55  ;;  %v1855_v50 = vmul.f32 1.442695, %v1748_v25  ;;  %v7588_v54 = vpop.eup %7587  ;;  %v14366_v25 = vld [vmem:[#allocation81_spill] sm:$0xff]  ;;  %v1877_v55 = vmul.f32 1.442695, %v1759_v3 }
 0x366   : > { %v7590_v45 = vpop.eup %7589  ;;  %v1762_v47 = vadd.f32 %v10411_v46, %v14366_v25  ;;  %v14373_v25 = vld [vmem:[#allocation2_spill] sm:$0xff] }
 0x367   : > { %7601 = vpow2.f32 %v1855_v50  ;;  %v1859_v30 = vmul.f32 1.442695, %v1750_v59  ;;  %v14368_v59 = vld [vmem:[#allocation83_spill] sm:$0xff] }
 0x368   : > { %2007 = vmatmul.mubr.f32.gmra.mrb[20].mxu1 %v7556_v1  ;;  %v1853_v1 = vmul.f32 1.442695, %v1747_v62  ;;  %v14367_v62 = vld [vmem:[#allocation80_spill] sm:$0xff]  ;;  %v1764_v50 = vadd.f32 %v10411_v46, %v14368_v59 }
 0x369   : > { %2011 = vmatprep.mubr.f32.mxu1 %v7558_v22  ;;  %v14356_v22 = vld [vmem:[#allocation71_spill] sm:$0xff]  ;;  %v7592_v39 = vpop.eup %7591  ;;  %v1761_v42 = vadd.f32 %v10407_v10, %v14367_v62 }
 0x36a   : > { %v1752_v32 = vadd.f32 %v10411_v46, %v14356_v22  ;;  %v7594_v34 = vpop.eup %7593  ;;  %7603 = vpow2.f32 %v1853_v1  ;;  %v1763_v1 = vadd.f32 %v10407_v10, %v14369_v56 }
 0x36b   : > { %7605 = vpow2.f32 %v1859_v30  ;;  %v1881_v22 = vmul.f32 1.442695, %v1761_v42 }
 0x36c   : > { %2012 = vmatmul.mubr.f32.gmra.mrb[22].mxu1 %v7560_v58  ;;  %v14357_v58 = vld [vmem:[#allocation70_spill] sm:$0xff]  ;;  %v1863_v21 = vmul.f32 1.442695, %v1752_v32  ;;  %7607 = vpow2.f32 %v1857_v23  ;;  %v14370_v32 = vld [vmem:[#allocation85_spill] sm:$0xff]  ;;  %v1885_v9 = vmul.f32 1.442695, %v1763_v1 }
 0x36d   : > { %2016 = vmatprep.mubr.f32.mxu1 %v7562_v12  ;;  %v1751_v12 = vadd.f32 %v10407_v10, %v14357_v58  ;;  %v1766_v30 = vadd.f32 %v10411_v46, %v14370_v32  ;;  %v14377_v32 = vld [vmem:[#allocation5_spill] sm:$0xff] }
 0x36e   : > { %7609 = vpow2.f32 %v1863_v21 }
 0x36f   : > { %v1861_v37 = vmul.f32 1.442695, %v1751_v12  ;;  %v14371_v12 = vld [vmem:[#allocation84_spill] sm:$0xff]  ;;  %v1891_v21 = vmul.f32 1.442695, %v1766_v30 }
 0x370   : > { %2017 = vmatmul.mubr.f32.gmra.mrb[24].mxu1 %v7564_v57  ;;  %v7596_v57 = vpop.eup %7595  ;;  %v1765_v23 = vadd.f32 %v10407_v10, %v14371_v12 }
 0x371   : > { %2021 = vmatprep.mubr.f32.mxu1 %v7566_v33  ;;  %v7598_v33 = vpop.eup %7597  ;;  %7611 = vpow2.f32 %v1861_v37 }
 0x372   : > { %v7600_v11 = vpop.eup %7599  ;;  %v1889_v37 = vmul.f32 1.442695, %v1765_v23 }
 0x373   : > { %v7602_v41 = vpop.eup %7601 }
 0x374   : > { %2022 = vmatmul.mubr.f32.gmra.mrb[26].mxu1 %v7568_v48  ;;  %v1756_v48 = vadd.f32 %v10411_v46, %v14360_v5  ;;  %v7604_v35 = vpop.eup %7603 }
 0x375   : > { %2026 = vmatprep.mubr.f32.mxu1 %v7570_v51  ;;  %v1867_v51 = vmul.f32 1.442695, %v1754_v20  ;;  %v7606_v29 = vpop.eup %7605  ;;  %v1768_v20 = vadd.f32 %v10411_v46, %v10356_v40 }
 0x376   : > { %v1871_v18 = vmul.f32 1.442695, %v1756_v48 }
 0x377   : > { %7613 = vpow2.f32 %v1867_v51  ;;  %v1895_v5 = vmul.f32 1.442695, %v1768_v20 }
 0x378   : > { %2027 = vmatmul.mubr.f32.gmra.mrb[28].mxu1 %v7572_v16  ;;  %v1865_v16 = vmul.f32 1.442695, %v1753_v61  ;;  %v1767_v61 = vadd.f32 %v10407_v10, %v14372_v28 }
 0x379   : > { %2031 = vmatprep.mubr.f32.mxu1 %v7574_v6  ;;  %v14362_v6 = vld [vmem:[#allocation77_spill] sm:$0xff] }
 0x37a   : > { %v1758_v49 = vadd.f32 %v10411_v46, %v14362_v6  ;;  %7615 = vpow2.f32 %v1865_v16 }
 0x37b   : > { %7617 = vpow2.f32 %v1871_v18 }
 0x37c   : > { %2032 = vmatmul.mubr.f32.gmra.mrb[30].mxu1 %v7576_v53  ;;  %v14363_v53 = vld [vmem:[#allocation76_spill] sm:$0xff]  ;;  %v1875_v15 = vmul.f32 1.442695, %v1758_v49  ;;  %7619 = vpow2.f32 %v1869_v24 }
 0x37d   : > { %2036 = vmatprep.mubr.f32.mxu1 %v7578_v52  ;;  %v1757_v52 = vadd.f32 %v10407_v10, %v14363_v53 }
 0x37e   : > { %7621 = vpow2.f32 %v1875_v15 }
 0x37f   : > { %v1873_v31 = vmul.f32 1.442695, %v1757_v52 }
 0x380   : > { %2037 = vmatmul.mubr.f32.gmra.mrb[32].mxu1 %v7580_v60  ;;  %v7608_v60 = vpop.eup %7607 }
 0x381   : > { %2041 = vmatprep.mubr.f32.mxu1 %v7582_v36  ;;  %v7610_v36 = vpop.eup %7609  ;;  %7623 = vpow2.f32 %v1873_v31 }
 0x384   : > { %2042 = vmatmul.mubr.f32.gmra.mrb[34].mxu1 %v7584_v19  ;;  %v1879_v19 = vmul.f32 1.442695, %v1760_v27 }
 0x385   : > { %2046 = vmatprep.mubr.f32.mxu1 %v7586_v8  ;;  %v7612_v8 = vpop.eup %7611 }
 0x386   : > { %v7614_v17 = vpop.eup %7613  ;;  %7625 = vpow2.f32 %v1879_v19 }
 0x387   : > { %7627 = vpow2.f32 %v1877_v55  ;;  %v14374_v55 = vld [vmem:[#allocation3_spill] sm:$0xff] }
 0x388   : > { %2047 = vmatmul.mubr.f32.gmra.mrb[36].mxu1 %v7588_v54  ;;  %v1883_v54 = vmul.f32 1.442695, %v1762_v47 }
 0x389   : > { %2051 = vmatprep.mubr.f32.mxu1 %v7590_v45  ;;  %v7616_v45 = vpop.eup %7615 }
 0x38a   : > { %v7618_v14 = vpop.eup %7617  ;;  %7629 = vpow2.f32 %v1883_v54 }
 0x38b   : > { %7631 = vpow2.f32 %v1881_v22 }
 0x38c   : > { %2052 = vmatmul.mubr.f32.gmra.mrb[38].mxu1 %v7592_v39  ;;  %v1887_v39 = vmul.f32 1.442695, %v1764_v50  ;;  %v14376_v50 = vld [vmem:[#allocation4_spill] sm:$0xff] }
 0x38d   : > { %2056 = vmatprep.mubr.f32.mxu1 %v7594_v34  ;;  %v7620_v34 = vpop.eup %7619 }
 0x38e   : > { %v7622_v58 = vpop.eup %7621  ;;  %7633 = vpow2.f32 %v1887_v39  ;;  %v14379_v39 = vld [vmem:[#allocation6_spill] sm:$0xff] }
 0x38f   : > { %7635 = vpow2.f32 %v1885_v9 }
 0x390   : > { %2057 = vmatmul.mubr.f32.gmra.mrb[40].mxu1 %v7596_v57  ;;  %v7624_v57 = vpop.eup %7623  ;;  %7637 = vpow2.f32 %v1891_v21  ;;  %v14380_v21 = vld [vmem:[#allocation7_spill] sm:$0xff] }
 0x391   : > { %2061 = vmatprep.mubr.f32.mxu1 %v7598_v33  ;;  %v7626_v33 = vpop.eup %7625  ;;  %7639 = vpow2.f32 %v1889_v37 }
 0x392   : > { %v7628_v48 = vpop.eup %7627  ;;  %7641 = vpow2.f32 %v1895_v5 }
 0x394   : > { %2062 = vmatmul.mubr.f32.gmra.mrb[42].mxu1 %v7600_v11  ;;  %v7630_v51 = vpop.eup %7629  ;;  %v1893_v11 = vmul.f32 1.442695, %v1767_v61 }
 0x395   : > { %2066 = vmatprep.mubr.f32.mxu1 %v7602_v41  ;;  %v7632_v40 = vpop.eup %7631 }
 0x396   : > { %7643 = vpow2.f32 %v1893_v11  ;;  %v14383_v11 = vld [vmem:[#allocation9_spill] sm:$0xff] }
 0x398   : > { %2067 = vmatmul.mubr.f32.gmra.mrb[44].mxu1 %v7604_v35  ;;  %v7634_v41 = vpop.eup %7633 }
 0x399   : > { %2071 = vmatprep.mubr.f32.mxu1 %v7606_v29  ;;  %v7636_v63 = vpop.eup %7635 }
 0x39a   : > { %v7638_v0 = vpop.eup %7637 }
 0x39b   : > { %v7640_v16 = vpop.eup %7639 }
 0x39c   : > { %2072 = vmatmul.mubr.f32.gmra.mrb[46].mxu1 %v7608_v60  ;;  %v7642_v6 = vpop.eup %7641 }
 0x39d   : > { %2076 = vmatprep.mubr.f32.mxu1 %v7610_v36 }
 0x3a0   : > { %2077 = vmatmul.mubr.f32.gmra.mrb[48].mxu1 %v7612_v8  ;;  %v7644_v49 = vpop.eup %7643 }
 0x3a1   : > { %2081 = vmatprep.mubr.f32.mxu1 %v7614_v17 }
 0x3a4   : > { %2082 = vmatmul.mubr.f32.gmra.mrb[50].mxu1 %v7616_v45 }
 0x3a5   : > { %2086 = vmatprep.mubr.f32.mxu1 %v7618_v14 }
 0x3a8   : > { %2087 = vmatmul.mubr.f32.gmra.mrb[52].mxu1 %v7620_v34 }
 0x3a9   : > { %2091 = vmatprep.mubr.f32.mxu1 %v7622_v58 }
 0x3ac   : > { %2092 = vmatmul.mubr.f32.gmra.mrb[54].mxu1 %v7624_v57 }
 0x3ad   : > { %2096 = vmatprep.mubr.f32.mxu1 %v7626_v33  ;;  %v14382_v33 = vld [vmem:[#allocation8_spill] sm:$0xff] }
 0x3b0   : > { %2097 = vmatmul.mubr.f32.gmra.mrb[56].mxu1 %v7628_v48 }
 0x3b1   : > { %2101 = vmatprep.mubr.f32.mxu1 %v7630_v51 }
 0x3b4   : > { %2102 = vmatmul.mubr.f32.gmra.mrb[58].mxu1 %v7632_v40 }
 0x3b5   : > { %2106 = vmatprep.mubr.f32.mxu1 %v7634_v41  ;;  %v14385_v41 = vld [vmem:[#allocation10_spill] sm:$0xff] }
 0x3b8   : > { %2107 = vmatmul.mubr.f32.gmra.mrb[60].mxu1 %v7636_v63 }
 0x3b9   : > { %2111 = vmatprep.mubr.f32.mxu1 %v7638_v0 }
 0x3bc   : > { %2112 = vmatmul.mubr.f32.gmra.mrb[62].mxu1 %v7640_v16 }
 0x3bd   : > { %2116 = vmatprep.mubr.f32.mxu1 %v7642_v6 }
 0x3c0   : > { %2117 = vmatmul.mubr.f32.gmra.mrb[64].mxu1 %v7644_v49 }
 0x3c1   : > { %3797 = vmatprep.mubr.f32.mxu1 %v14350_v43 }
 0x417   : > { %v1963_v18 = vpop.f32.mrb[2].mxu1 }
 0x418   : > { %v1964_v35 = vadd.f32 1e-30, %v1963_v18  ;;  %v1965_v29 = vpop.f32.mrb[3].mxu1 }
 0x41a   : > { %7645 = vlog2.f32 %v1964_v35  ;;  %v14386_v35 = vld [vmem:[#allocation11_spill] sm:$0xff] }
 0x41b   : > { %v1968_v53 = vpop.f32.mrb[4].mxu1 }
 0x41c   : > { %v1969_v52 = vadd.f32 1e-30, %v1968_v53  ;;  %v1970_v24 = vpop.f32.mrb[5].mxu1  ;;  %v14388_v53 = vld [vmem:[#allocation12_spill] sm:$0xff] }
 0x41e   : > { %7647 = vlog2.f32 %v1969_v52 }
 0x41f   : > { %v1973_v44 = vpop.f32.mrb[6].mxu1 }
 0x420   : > { %v1974_v27 = vadd.f32 1e-30, %v1973_v44  ;;  %v1975_v15 = vpop.f32.mrb[7].mxu1 }
 0x422   : > { %7649 = vlog2.f32 %v1974_v27 }
 0x423   : > { %v1978_v60 = vpop.f32.mrb[8].mxu1 }
 0x424   : > { %v7646_v36 = vpop.eup %7645  ;;  %v1979_v38 = vadd.f32 1e-30, %v1978_v60  ;;  %v1980_v3 = vpop.f32.mrb[9].mxu1 }
 0x425   : > { %v2123_v31 = vmul.f32 0.6931472, %v7646_v36  ;;  %v14389_v36 = vld [vmem:[#allocation13_spill] sm:$0xff]  ;;  %v14391_v3 = vld [vmem:[#allocation14_spill] sm:$0xff] }
 0x426   : > { %7651 = vlog2.f32 %v1979_v38 }
 0x427   : > { %v2186_v47 = vsub.f32 %v14373_v25, %v2123_v31  ;;  %v1983_v19 = vpop.f32.mrb[10].mxu1 }
 0x428   : > { %v7648_v8 = vpop.eup %7647  ;;  %v1984_v17 = vadd.f32 1e-30, %v1983_v19  ;;  %v1985_v62 = vpop.f32.mrb[11].mxu1 }
 0x429   : > { %v2125_v42 = vmul.f32 0.6931472, %v7648_v8  ;;  %v10544_v59 = vadd.f32 %v2186_v47, %v14374_v55 }
 0x42a   : > { %7653 = vlog2.f32 %v1984_v17 }
 0x42b   : > { %14375 = vst [vmem:[#allocation67_spill] sm:$0xff] %v10544_v59  ;;  %v2187_v54 = vsub.f32 %v14376_v50, %v2125_v42  ;;  %v1988_v45 = vpop.f32.mrb[12].mxu1  ;;  %2252 = vperm.xlu1 %7122, %v10544_v59   ;;  %v14392_v42 = vld [vmem:[#allocation15_spill] sm:$0xff] }
 0x42c   : > { %v7650_v14 = vpop.eup %7649  ;;  %v1989_v56 = vadd.f32 1e-30, %v1988_v45  ;;  %v1990_v1 = vpop.f32.mrb[13].mxu1 }
 0x42d   : > { %v2127_v22 = vmul.f32 0.6931472, %v7650_v14  ;;  %v10549_v30 = vadd.f32 %v2187_v54, %v14377_v32  ;;  %v14394_v54 = vld [vmem:[#allocation16_spill] sm:$0xff] }
 0x42e   : > { %7655 = vlog2.f32 %v1989_v56 }
 0x42f   : > { %14378 = vst [vmem:[#allocation66_spill] sm:$0xff] %v10549_v30  ;;  %v2188_v34 = vsub.f32 %v14379_v39, %v2127_v22  ;;  %v1993_v58 = vpop.f32.mrb[14].mxu1  ;;  %2257 = vperm.xlu1 %7122, %v10549_v30  }
 0x430   : > { %v7652_v12 = vpop.eup %7651  ;;  %v1994_v23 = vadd.f32 1e-30, %v1993_v58  ;;  %v1995_v9 = vpop.f32.mrb[15].mxu1 }
 0x431   : > { %v2129_v20 = vmul.f32 0.6931472, %v7652_v12  ;;  %v10554_v57 = vadd.f32 %v2188_v34, %v14380_v21  ;;  %v14395_v34 = vld [vmem:[#allocation17_spill] sm:$0xff]  ;;  %v14397_v12 = vld [vmem:[#allocation18_spill] sm:$0xff] }
 0x432   : > { %7657 = vlog2.f32 %v1994_v23 }
 0x433   : > { %14381 = vst [vmem:[#allocation69_spill] sm:$0xff] %v10554_v57  ;;  %v2189_v28 = vsub.f32 %v14382_v33, %v2129_v20  ;;  %v1998_v61 = vpop.f32.mrb[16].mxu1  ;;  %2262 = vperm.xlu1 %7122, %v10554_v57  }
 0x434   : > { %v7654_v37 = vpop.eup %7653  ;;  %v1999_v5 = vadd.f32 1e-30, %v1998_v61  ;;  %v2000_v48 = vpop.f32.mrb[17].mxu1 }
 0x435   : > { %v2131_v51 = vmul.f32 0.6931472, %v7654_v37  ;;  %v10559_v40 = vadd.f32 %v2189_v28, %v14383_v11  ;;  %v14398_v37 = vld [vmem:[#allocation19_spill] sm:$0xff]  ;;  %v14400_v48 = vld [vmem:[#allocation20_spill] sm:$0xff] }
 0x436   : > { %7659 = vlog2.f32 %v1999_v5 }
 0x437   : > { %14384 = vst [vmem:[#allocation68_spill] sm:$0xff] %v10559_v40  ;;  %v2190_v63 = vsub.f32 %v14385_v41, %v2131_v51  ;;  %v2003_v0 = vpop.f32.mrb[18].mxu1  ;;  %2267 = vperm.xlu1 %7122, %v10559_v40  }
 0x438   : > { %v7656_v16 = vpop.eup %7655  ;;  %v2004_v6 = vadd.f32 1e-30, %v2003_v0  ;;  %v2005_v49 = vpop.f32.mrb[19].mxu1 }
 0x439   : > { %v2133_v18 = vmul.f32 0.6931472, %v7656_v16  ;;  %v10564_v29 = vadd.f32 %v2190_v63, %v14386_v35  ;;  %v14401_v49 = vld [vmem:[#allocation21_spill] sm:$0xff]  ;;  %v14403_v35 = vld [vmem:[#allocation22_spill] sm:$0xff] }
 0x43a   : > { %7661 = vlog2.f32 %v2004_v6 }
 0x43b   : > { %14387 = vst [vmem:[#allocation71_spill] sm:$0xff] %v10564_v29  ;;  %v2191_v52 = vsub.f32 %v14388_v53, %v2133_v18  ;;  %v2008_v24 = vpop.f32.mrb[20].mxu1  ;;  %2272 = vperm.xlu1 %7122, %v10564_v29  }
 0x43c   : > { %v7658_v44 = vpop.eup %7657  ;;  %v2009_v27 = vadd.f32 1e-30, %v2008_v24  ;;  %v2010_v15 = vpop.f32.mrb[21].mxu1 }
 0x43d   : > { %v2135_v60 = vmul.f32 0.6931472, %v7658_v44  ;;  %v10569_v38 = vadd.f32 %v2191_v52, %v14389_v36  ;;  %v14404_v36 = vld [vmem:[#allocation23_spill] sm:$0xff] }
 0x43e   : > { %7663 = vlog2.f32 %v2009_v27 }
 0x43f   : > { %14390 = vst [vmem:[#allocation70_spill] sm:$0xff] %v10569_v38  ;;  %v2192_v31 = vsub.f32 %v14391_v3, %v2135_v60  ;;  %v2013_v47 = vpop.f32.mrb[22].mxu1  ;;  %2277 = vperm.xlu1 %7122, %v10569_v38  }
 0x440   : > { %v7660_v19 = vpop.eup %7659  ;;  %v2014_v8 = vadd.f32 1e-30, %v2013_v47  ;;  %v2015_v17 = vpop.f32.mrb[23].mxu1  ;;  %v14406_v47 = vld [vmem:[#allocation24_spill] sm:$0xff] }
 0x441   : > { %v2137_v62 = vmul.f32 0.6931472, %v7660_v19  ;;  %v10574_v55 = vadd.f32 %v2192_v31, %v14392_v42 }
 0x442   : > { %7665 = vlog2.f32 %v2014_v8 }
 0x443   : > { %14393 = vst [vmem:[#allocation73_spill] sm:$0xff] %v10574_v55  ;;  %v2193_v45 = vsub.f32 %v14394_v54, %v2137_v62  ;;  %v2018_v14 = vpop.f32.mrb[24].mxu1  ;;  %2282 = vperm.xlu1 %7122, %v10574_v55  }
 0x444   : > { %v7662_v56 = vpop.eup %7661  ;;  %v2019_v1 = vadd.f32 1e-30, %v2018_v14  ;;  %v2020_v22 = vpop.f32.mrb[25].mxu1  ;;  %v14407_v14 = vld [vmem:[#allocation25_spill] sm:$0xff] }
 0x445   : > { %v2139_v32 = vmul.f32 0.6931472, %v7662_v56  ;;  %v10579_v58 = vadd.f32 %v2193_v45, %v14395_v34 }
 0x446   : > { %7667 = vlog2.f32 %v2019_v1  ;;  %v14409_v1 = vld [vmem:[#allocation26_spill] sm:$0xff] }
 0x447   : > { %14396 = vst [vmem:[#allocation72_spill] sm:$0xff] %v10579_v58  ;;  %v2194_v23 = vsub.f32 %v14397_v12, %v2139_v32  ;;  %v2023_v9 = vpop.f32.mrb[26].mxu1  ;;  %2287 = vperm.xlu1 %7122, %v10579_v58  }
 0x448   : > { %v7664_v20 = vpop.eup %7663  ;;  %v2024_v21 = vadd.f32 1e-30, %v2023_v9  ;;  %v2025_v28 = vpop.f32.mrb[27].mxu1 }
 0x449   : > { %v2141_v61 = vmul.f32 0.6931472, %v7664_v20  ;;  %v10584_v5 = vadd.f32 %v2194_v23, %v14398_v37 }
 0x44a   : > { %7669 = vlog2.f32 %v2024_v21  ;;  %v14410_v21 = vld [vmem:[#allocation27_spill] sm:$0xff] }
 0x44b   : > { %14399 = vst [vmem:[#allocation75_spill] sm:$0xff] %v10584_v5  ;;  %v2195_v51 = vsub.f32 %v14400_v48, %v2141_v61  ;;  %v2028_v11 = vpop.f32.mrb[28].mxu1  ;;  %2292 = vperm.xlu0 %7121, %v10584_v5   ;;  %v14412_v61 = vld [vmem:[#allocation28_spill] sm:$0xff] }
 0x44c   : > { %v7666_v63 = vpop.eup %7665  ;;  %v2029_v0 = vadd.f32 1e-30, %v2028_v11  ;;  %v2030_v16 = vpop.f32.mrb[29].mxu1 }
 0x44d   : > { %v2143_v6 = vmul.f32 0.6931472, %v7666_v63  ;;  %v10589_v18 = vadd.f32 %v2195_v51, %v14401_v49 }
 0x44e   : > { %7671 = vlog2.f32 %v2029_v0 }
 0x44f   : > { %14402 = vst [vmem:[#allocation74_spill] sm:$0xff] %v10589_v18  ;;  %v2196_v52 = vsub.f32 %v14403_v35, %v2143_v6  ;;  %v2033_v24 = vpop.f32.mrb[30].mxu1  ;;  %2297 = vperm.xlu1 %7122, %v10589_v18   ;;  %v14413_v6 = vld [vmem:[#allocation29_spill] sm:$0xff] }
 0x450   : > { %v7668_v44 = vpop.eup %7667  ;;  %v2034_v27 = vadd.f32 1e-30, %v2033_v24  ;;  %v2035_v15 = vpop.f32.mrb[31].mxu1 }
 0x451   : > { %v2145_v60 = vmul.f32 0.6931472, %v7668_v44  ;;  %v10594_v31 = vadd.f32 %v2196_v52, %v14404_v36  ;;  %v14415_v52 = vld [vmem:[#allocation30_spill] sm:$0xff] }
 0x452   : > { %7673 = vlog2.f32 %v2034_v27 }
 0x453   : > { %14405 = vst [vmem:[#allocation77_spill] sm:$0xff] %v10594_v31  ;;  %v2197_v19 = vsub.f32 %v14406_v47, %v2145_v60  ;;  %v2038_v8 = vpop.f32.mrb[32].mxu1  ;;  %2302 = vperm.xlu1 %7122, %v10594_v31  }
 0x454   : > { %v7670_v17 = vpop.eup %7669  ;;  %v2039_v62 = vadd.f32 1e-30, %v2038_v8  ;;  %v2040_v42 = vpop.f32.mrb[33].mxu1 }
 0x455   : > { %v2147_v45 = vmul.f32 0.6931472, %v7670_v17  ;;  %v10599_v56 = vadd.f32 %v2197_v19, %v14407_v14  ;;  %v14416_v19 = vld [vmem:[#allocation31_spill] sm:$0xff]  ;;  %v14418_v17 = vld [vmem:[#allocation32_spill] sm:$0xff] }
 0x456   : > { %7675 = vlog2.f32 %v2039_v62 }
 0x457   : > { %14408 = vst [vmem:[#allocation76_spill] sm:$0xff] %v10599_v56  ;;  %v2198_v22 = vsub.f32 %v14409_v1, %v2147_v45  ;;  %v2043_v32 = vpop.f32.mrb[34].mxu1  ;;  %2307 = vperm.xlu1 %7122, %v10599_v56   ;;  %v9021_v56 = vld [vmem:[%s13871_s0 + $0x80] sm:$0xff] }
 0x458   : > { %v7672_v34 = vpop.eup %7671  ;;  %v2044_v23 = vadd.f32 1e-30, %v2043_v32  ;;  %v2045_v9 = vpop.f32.mrb[35].mxu1 }
 0x459   : > { %v2149_v20 = vmul.f32 0.6931472, %v7672_v34  ;;  %v10604_v28 = vadd.f32 %v2198_v22, %v14410_v21  ;;  %v14419_v34 = vld [vmem:[#allocation33_spill] sm:$0xff]  ;;  %v14421_v9 = vld [vmem:[#allocation34_spill] sm:$0xff] }
 0x45a   : > { %7677 = vlog2.f32 %v2044_v23 }
 0x45b   : > { %14411 = vst [vmem:[#allocation79_spill] sm:$0xff] %v10604_v28  ;;  %v2199_v37 = vsub.f32 %v14412_v61, %v2149_v20  ;;  %v2048_v51 = vpop.f32.mrb[36].mxu1  ;;  %2312 = vperm.xlu1 %7122, %v10604_v28  }
 0x45c   : > { %v7674_v11 = vpop.eup %7673  ;;  %v2049_v63 = vadd.f32 1e-30, %v2048_v51  ;;  %v2050_v0 = vpop.f32.mrb[37].mxu1 }
 0x45d   : > { %v2151_v16 = vmul.f32 0.6931472, %v7674_v11  ;;  %v10609_v49 = vadd.f32 %v2199_v37, %v14413_v6  ;;  %v14422_v0 = vld [vmem:[#allocation35_spill] sm:$0xff]  ;;  %v14424_v6 = vld [vmem:[#allocation36_spill] sm:$0xff] }
 0x45e   : > { %7679 = vlog2.f32 %v2049_v63 }
 0x45f   : > { %14414 = vst [vmem:[#allocation78_spill] sm:$0xff] %v10609_v49  ;;  %v2200_v24 = vsub.f32 %v14415_v52, %v2151_v16  ;;  %v2053_v44 = vpop.f32.mrb[38].mxu1  ;;  %2317 = vperm.xlu1 %7122, %v10609_v49  }
 0x460   : > { %v7676_v27 = vpop.eup %7675  ;;  %v2054_v15 = vadd.f32 1e-30, %v2053_v44  ;;  %v2055_v60 = vpop.f32.mrb[39].mxu1 }
 0x461   : > { %v2153_v36 = vmul.f32 0.6931472, %v7676_v27  ;;  %v10614_v8 = vadd.f32 %v2200_v24, %v14416_v19  ;;  %v14425_v19 = vld [vmem:[#allocation37_spill] sm:$0xff] }
 0x462   : > { %7681 = vlog2.f32 %v2054_v15 }
 0x463   : > { %14417 = vst [vmem:[#allocation81_spill] sm:$0xff] %v10614_v8  ;;  %v2201_v62 = vsub.f32 %v14418_v17, %v2153_v36  ;;  %v2058_v42 = vpop.f32.mrb[40].mxu1  ;;  %2322 = vperm.xlu1 %7122, %v10614_v8  }
 0x464   : > { %v7678_v45 = vpop.eup %7677  ;;  %v2059_v14 = vadd.f32 1e-30, %v2058_v42  ;;  %v2060_v22 = vpop.f32.mrb[41].mxu1  ;;  %v14427_v42 = vld [vmem:[#allocation38_spill] sm:$0xff] }
 0x465   : > { %v2155_v32 = vmul.f32 0.6931472, %v7678_v45  ;;  %v10619_v23 = vadd.f32 %v2201_v62, %v14419_v34 }
 0x466   : > { %7683 = vlog2.f32 %v2059_v14 }
 0x467   : > { %14420 = vst [vmem:[#allocation80_spill] sm:$0xff] %v10619_v23  ;;  %v2202_v20 = vsub.f32 %v14421_v9, %v2155_v32  ;;  %v2063_v21 = vpop.f32.mrb[42].mxu1  ;;  %2327 = vperm.xlu0 %7121, %v10619_v23  }
 0x468   : > { %v7680_v37 = vpop.eup %7679  ;;  %v2064_v51 = vadd.f32 1e-30, %v2063_v21  ;;  %v2065_v11 = vpop.f32.mrb[43].mxu1  ;;  %v14428_v21 = vld [vmem:[#allocation39_spill] sm:$0xff] }
 0x469   : > { %v2157_v63 = vmul.f32 0.6931472, %v7680_v37  ;;  %v10624_v16 = vadd.f32 %v2202_v20, %v14422_v0 }
 0x46a   : > { %7685 = vlog2.f32 %v2064_v51  ;;  %v14430_v51 = vld [vmem:[#allocation40_spill] sm:$0xff] }
 0x46b   : > { %14423 = vst [vmem:[#allocation83_spill] sm:$0xff] %v10624_v16  ;;  %v2203_v24 = vsub.f32 %v14424_v6, %v2157_v63  ;;  %v2068_v44 = vpop.f32.mrb[44].mxu1  ;;  %2332 = vperm.xlu1 %7122, %v10624_v16   ;;  %v9015_v16 = vld [vmem:[%s13871_s0 + $0x50] sm:$0xff] }
 0x46c   : > { %v7682_v27 = vpop.eup %7681  ;;  %v2069_v15 = vadd.f32 1e-30, %v2068_v44  ;;  %v2070_v60 = vpop.f32.mrb[45].mxu1 }
 0x46d   : > { %v2159_v36 = vmul.f32 0.6931472, %v7682_v27  ;;  %v10629_v62 = vadd.f32 %v2203_v24, %v14425_v19 }
 0x46e   : > { %7687 = vlog2.f32 %v2069_v15  ;;  %v14431_v15 = vld [vmem:[#allocation41_spill] sm:$0xff] }
 0x46f   : > { %14426 = vst [vmem:[#allocation82_spill] sm:$0xff] %v10629_v62  ;;  %v2204_v45 = vsub.f32 %v14427_v42, %v2159_v36  ;;  %v2073_v14 = vpop.f32.mrb[46].mxu1  ;;  %2337 = vperm.xlu0 %7121, %v10629_v62   ;;  %v14433_v36 = vld [vmem:[#allocation42_spill] sm:$0xff] }
 0x470   : > { %v7684_v22 = vpop.eup %7683  ;;  %v2074_v32 = vadd.f32 1e-30, %v2073_v14  ;;  %v2075_v34 = vpop.f32.mrb[47].mxu1 }
 0x471   : > { %v2161_v20 = vmul.f32 0.6931472, %v7684_v22  ;;  %v10634_v37 = vadd.f32 %v2204_v45, %v14428_v21 }
 0x472   : > { %7689 = vlog2.f32 %v2074_v32 }
 0x473   : > { %14429 = vst [vmem:[#allocation85_spill] sm:$0xff] %v10634_v37  ;;  %v2205_v11 = vsub.f32 %v14430_v51, %v2161_v20  ;;  %v2078_v63 = vpop.f32.mrb[48].mxu1  ;;  %2342 = vperm.xlu1 %7122, %v10634_v37   ;;  %v14434_v20 = vld [vmem:[#allocation43_spill] sm:$0xff] }
 0x474   : > { %v7686_v0 = vpop.eup %7685  ;;  %v2079_v24 = vadd.f32 1e-30, %v2078_v63  ;;  %v2080_v44 = vpop.f32.mrb[49].mxu1  ;;  %v14436_v63 = vld [vmem:[#allocation44_spill] sm:$0xff] }
 0x475   : > { %v2163_v27 = vmul.f32 0.6931472, %v7686_v0  ;;  %v10639_v60 = vadd.f32 %v2205_v11, %v14431_v15 }
 0x476   : > { %7691 = vlog2.f32 %v2079_v24 }
 0x477   : > { %14432 = vst [vmem:[#allocation84_spill] sm:$0xff] %v10639_v60  ;;  %v2206_v19 = vsub.f32 %v14433_v36, %v2163_v27  ;;  %v2083_v14 = vpop.f32.mrb[50].mxu1  ;;  %2347 = vperm.xlu0 %7121, %v10639_v60   ;;  %v14437_v36 = vld [vmem:[#allocation45_spill] sm:$0xff] }
 0x478   : > { %v7688_v45 = vpop.eup %7687  ;;  %v2084_v22 = vadd.f32 1e-30, %v2083_v14  ;;  %v2085_v32 = vpop.f32.mrb[51].mxu1  ;;  %v14439_v14 = vld [vmem:[#allocation46_spill] sm:$0xff] }
 0x479   : > { %v2165_v34 = vmul.f32 0.6931472, %v7688_v45  ;;  %v10644_v21 = vadd.f32 %v2206_v19, %v14434_v20 }
 0x47a   : > { %7693 = vlog2.f32 %v2084_v22 }
 0x47b   : > { %14435 = vst [vmem:[#allocation86_spill] sm:$0xff] %v10644_v21  ;;  %v2207_v44 = vsub.f32 %v14436_v63, %v2165_v34  ;;  %v2088_v0 = vpop.f32.mrb[52].mxu1  ;;  %2352 = vperm.xlu1 %7122, %v10644_v21   ;;  %v14440_v63 = vld [vmem:[#allocation47_spill] sm:$0xff] }
 0x47c   : > { %v7690_v11 = vpop.eup %7689  ;;  %v2089_v24 = vadd.f32 1e-30, %v2088_v0  ;;  %v2090_v15 = vpop.f32.mrb[53].mxu1  ;;  %v14442_v0 = vld [vmem:[#allocation48_spill] sm:$0xff] }
 0x47d   : > { %v2167_v27 = vmul.f32 0.6931472, %v7690_v11  ;;  %v10649_v51 = vadd.f32 %v2207_v44, %v14437_v36 }
 0x47e   : > { %7695 = vlog2.f32 %v2089_v24 }
 0x47f   : > { %14438 = vst [vmem:[#allocation3_spill] sm:$0xff] %v10649_v51  ;;  %v2208_v32 = vsub.f32 %v14439_v14, %v2167_v27  ;;  %v2093_v45 = vpop.f32.mrb[54].mxu1  ;;  %2357 = vperm.xlu0 %7121, %v10649_v51   ;;  %v14443_v14 = vld [vmem:[#allocation49_spill] sm:$0xff] }
 0x480   : > { %v7692_v19 = vpop.eup %7691  ;;  %v2094_v22 = vadd.f32 1e-30, %v2093_v45  ;;  %v2095_v20 = vpop.f32.mrb[55].mxu1  ;;  %v14445_v45 = vld [vmem:[#allocation50_spill] sm:$0xff] }
 0x481   : > { %v2169_v34 = vmul.f32 0.6931472, %v7692_v19  ;;  %v10654_v60 = vadd.f32 %v2208_v32, %v14440_v63 }
 0x482   : > { %7697 = vlog2.f32 %v2094_v22 }
 0x483   : > { %14441 = vst [vmem:[#allocation5_spill] sm:$0xff] %v10654_v60  ;;  %v2209_v15 = vsub.f32 %v14442_v0, %v2169_v34  ;;  %v2098_v11 = vpop.f32.mrb[56].mxu1  ;;  %2362 = vperm.xlu1 %7122, %v10654_v60   ;;  %v14446_v0 = vld [vmem:[#allocation51_spill] sm:$0xff] }
 0x484   : > { %v7694_v36 = vpop.eup %7693  ;;  %v2099_v44 = vadd.f32 1e-30, %v2098_v11  ;;  %v2100_v24 = vpop.f32.mrb[57].mxu1  ;;  %v14448_v11 = vld [vmem:[#allocation52_spill] sm:$0xff] }
 0x485   : > { %v2171_v27 = vmul.f32 0.6931472, %v7694_v36  ;;  %v10659_v21 = vadd.f32 %v2209_v15, %v14443_v14 }
 0x486   : > { %7699 = vlog2.f32 %v2099_v44 }
 0x487   : > { %14444 = vst [vmem:[#allocation7_spill] sm:$0xff] %v10659_v21  ;;  %v2210_v20 = vsub.f32 %v14445_v45, %v2171_v27  ;;  %v2103_v19 = vpop.f32.mrb[58].mxu1  ;;  %2367 = vperm.xlu0 %7121, %v10659_v21   ;;  %v14449_v45 = vld [vmem:[#allocation53_spill] sm:$0xff] }
 0x488   : > { %v7696_v63 = vpop.eup %7695  ;;  %v2104_v32 = vadd.f32 1e-30, %v2103_v19  ;;  %v2105_v22 = vpop.f32.mrb[59].mxu1  ;;  %v14451_v19 = vld [vmem:[#allocation54_spill] sm:$0xff] }
 0x489   : > { %v2173_v34 = vmul.f32 0.6931472, %v7696_v63  ;;  %v10664_v51 = vadd.f32 %v2210_v20, %v14446_v0 }
 0x48a   : > { %7701 = vlog2.f32 %v2104_v32 }
 0x48b   : > { %14447 = vst [vmem:[#allocation9_spill] sm:$0xff] %v10664_v51  ;;  %v2211_v24 = vsub.f32 %v14448_v11, %v2173_v34  ;;  %v2108_v36 = vpop.f32.mrb[60].mxu1  ;;  %2372 = vperm.xlu1 %7122, %v10664_v51   ;;  %v14452_v11 = vld [vmem:[#allocation55_spill] sm:$0xff] }
 0x48c   : > { %v7698_v14 = vpop.eup %7697  ;;  %v2109_v15 = vadd.f32 1e-30, %v2108_v36  ;;  %v2110_v44 = vpop.f32.mrb[61].mxu1  ;;  %v14454_v36 = vld [vmem:[#allocation56_spill] sm:$0xff] }
 0x48d   : > { %v2175_v27 = vmul.f32 0.6931472, %v7698_v14  ;;  %v10669_v60 = vadd.f32 %v2211_v24, %v14449_v45 }
 0x48e   : > { %7703 = vlog2.f32 %v2109_v15 }
 0x48f   : > { %14450 = vst [vmem:[#allocation11_spill] sm:$0xff] %v10669_v60  ;;  %v2212_v22 = vsub.f32 %v14451_v19, %v2175_v27  ;;  %v2113_v63 = vpop.f32.mrb[62].mxu1  ;;  %2377 = vperm.xlu0 %7121, %v10669_v60   ;;  %v14455_v19 = vld [vmem:[#allocation57_spill] sm:$0xff] }
 0x490   : > { %v7700_v0 = vpop.eup %7699  ;;  %v2114_v20 = vadd.f32 1e-30, %v2113_v63  ;;  %v2115_v32 = vpop.f32.mrb[63].mxu1  ;;  %v14457_v63 = vld [vmem:[#allocation58_spill] sm:$0xff] }
 0x491   : > { %v2177_v34 = vmul.f32 0.6931472, %v7700_v0  ;;  %v10674_v21 = vadd.f32 %v2212_v22, %v14452_v11  ;;  %v14458_v0 = vld [vmem:[#allocation59_spill] sm:$0xff] }
 0x492   : > { %7705 = vlog2.f32 %v2114_v20 }
 0x493   : > { %14453 = vst [vmem:[#allocation13_spill] sm:$0xff] %v10674_v21  ;;  %v2213_v44 = vsub.f32 %v14454_v36, %v2177_v34  ;;  %v2118_v14 = vpop.f32.mrb[64].mxu1  ;;  %2382 = vperm.xlu1 %7122, %v10674_v21   ;;  %v14460_v34 = vld [vmem:[#allocation60_spill] sm:$0xff] }
 0x494   : > { %v7702_v45 = vpop.eup %7701  ;;  %v2119_v24 = vadd.f32 1e-30, %v2118_v14  ;;  %v2120_v15 = vpop.f32.mrb[65].mxu1 }
 0x495   : > { %v2179_v27 = vmul.f32 0.6931472, %v7702_v45  ;;  %v10679_v51 = vadd.f32 %v2213_v44, %v14455_v19  ;;  %v14461_v45 = vld [vmem:[#allocation61_spill] sm:$0xff]  ;;  %v14463_v19 = vld [vmem:[#allocation62_spill] sm:$0xff] }
 0x496   : > { %7707 = vlog2.f32 %v2119_v24 }
 0x497   : > { %14456 = vst [vmem:[#allocation15_spill] sm:$0xff] %v10679_v51  ;;  %v2214_v32 = vsub.f32 %v14457_v63, %v2179_v27  ;;  %2387 = vperm.xlu0 %7121, %v10679_v51   ;;  %v14464_v63 = vld [vmem:[#allocation63_spill] sm:$0xff] }
 0x498   : > { %v7704_v11 = vpop.eup %7703 }
 0x499   : > { %v2181_v22 = vmul.f32 0.6931472, %v7704_v11  ;;  %v10684_v20 = vadd.f32 %v2214_v32, %v14458_v0  ;;  %v14466_v32 = vld [vmem:[#allocation64_spill] sm:$0xff] }
 0x49b   : > { %14459 = vst [vmem:[#allocation17_spill] sm:$0xff] %v10684_v20  ;;  %v2215_v36 = vsub.f32 %v14460_v34, %v2181_v22  ;;  %2392 = vperm.xlu1 %7122, %v10684_v20   ;;  %v14467_v22 = vld [vmem:[#allocation65_spill] sm:$0xff] }
 0x49c   : > { %v7706_v14 = vpop.eup %7705 }
 0x49d   : > { %v2183_v15 = vmul.f32 0.6931472, %v7706_v14  ;;  %v10689_v21 = vadd.f32 %v2215_v36, %v14461_v45  ;;  %v9005_v14 = vld [vmem:[%s13871_s0] sm:$0xff] }
 0x49f   : > { %14462 = vst [vmem:[#allocation19_spill] sm:$0xff] %v10689_v21  ;;  %v2216_v44 = vsub.f32 %v14463_v19, %v2183_v15  ;;  %2397 = vperm.xlu0 %7121, %v10689_v21  }
 0x4a0   : > { %v7708_v24 = vpop.eup %7707 }
 0x4a1   : > { %v2185_v27 = vmul.f32 0.6931472, %v7708_v24  ;;  %v10694_v11 = vadd.f32 %v2216_v44, %v14464_v63  ;;  %v9006_v63 = vld [vmem:[%s13871_s0 + $0x8] sm:$0xff] }
 0x4a3   : > { %14465 = vst [vmem:[#allocation21_spill] sm:$0xff] %v10694_v11  ;;  %v2217_v0 = vsub.f32 %v14466_v32, %v2185_v27  ;;  %2402 = vperm.xlu1 %7122, %v10694_v11  }
 0x4a5   : > { %v10699_v34 = vadd.f32 %v2217_v0, %v14467_v22  ;;  %v9007_v22 = vld [vmem:[%s13871_s0 + $0x10] sm:$0xff] }
 0x4a7   : > { %14468 = vst [vmem:[#allocation23_spill] sm:$0xff] %v10699_v34  ;;  %2407 = vperm.xlu0 %7121, %v10699_v34   ;;  %v9008_v34 = vld [vmem:[%s13871_s0 + $0x18] sm:$0xff] }
 0x4aa   : > { %v2253_v36 = vpop.permute.xlu1 %2252 }
 0x4ab   : > { %v10705_v15 = vadd.f32 %v9005_v14, %v2253_v36  ;;  %v10710_v45 = vadd.f32 %v9006_v63, %v2253_v36 }
 0x4ad   : > { %v2474_v44 = vadd.f32 %v10705_v15, %v10407_v10  ;;  %v2475_v24 = vadd.f32 %v10710_v45, %v10411_v46 }
 0x4ae   : > { %v2258_v27 = vpop.permute.xlu1 %2257 }
 0x4af   : > { %v2538_v0 = vmul.f32 1.442695, %v2474_v44  ;;  %v10719_v14 = vadd.f32 %v9007_v22, %v2258_v27  ;;  %v10724_v36 = vadd.f32 %v9008_v34, %v2258_v27  ;;  %v2540_v63 = vmul.f32 1.442695, %v2475_v24  ;;  %v9009_v22 = vld [vmem:[%s13871_s0 + $0x20] sm:$0xff]  ;;  %v9010_v34 = vld [vmem:[%s13871_s0 + $0x28] sm:$0xff] }
 0x4b1   : > { %v2476_v32 = vadd.f32 %v10719_v14, %v10407_v10  ;;  %v2477_v11 = vadd.f32 %v10724_v36, %v10411_v46  ;;  %7709 = vpow2.f32 %v2538_v0 }
 0x4b2   : > { %v2263_v44 = vpop.permute.xlu1 %2262  ;;  %7711 = vpow2.f32 %v2540_v63  ;;  %v9012_v63 = vld [vmem:[%s13871_s0 + $0x38] sm:$0xff] }
 0x4b3   : > { %v2542_v19 = vmul.f32 1.442695, %v2476_v32  ;;  %v2544_v21 = vmul.f32 1.442695, %v2477_v11  ;;  %v10733_v20 = vadd.f32 %v9009_v22, %v2263_v44  ;;  %v10738_v24 = vadd.f32 %v9010_v34, %v2263_v44  ;;  %v9011_v22 = vld [vmem:[%s13871_s0 + $0x30] sm:$0xff] }
 0x4b5   : > { %7713 = vpow2.f32 %v2542_v19  ;;  %v2478_v27 = vadd.f32 %v10733_v20, %v10407_v10  ;;  %v2479_v11 = vadd.f32 %v10738_v24, %v10411_v46 }
 0x4b6   : > { %7715 = vpow2.f32 %v2544_v21  ;;  %v2268_v32 = vpop.permute.xlu1 %2267 }
 0x4b7   : > { %v2546_v0 = vmul.f32 1.442695, %v2478_v27  ;;  %v10747_v51 = vadd.f32 %v9011_v22, %v2268_v32  ;;  %v10752_v19 = vadd.f32 %v9012_v63, %v2268_v32  ;;  %v2548_v44 = vmul.f32 1.442695, %v2479_v11  ;;  %v9013_v22 = vld [vmem:[%s13871_s0 + $0x40] sm:$0xff]  ;;  %v9014_v11 = vld [vmem:[%s13871_s0 + $0x48] sm:$0xff] }
 0x4b9   : > { %v2480_v34 = vadd.f32 %v10747_v51, %v10407_v10  ;;  %v2481_v21 = vadd.f32 %v10752_v19, %v10411_v46  ;;  %7717 = vpow2.f32 %v2546_v0 }
 0x4ba   : > { %v2273_v27 = vpop.permute.xlu1 %2272  ;;  %7719 = vpow2.f32 %v2548_v44 }
 0x4bb   : > { %v2550_v60 = vmul.f32 1.442695, %v2480_v34  ;;  %v2552_v37 = vmul.f32 1.442695, %v2481_v21  ;;  %v10761_v42 = vadd.f32 %v9013_v22, %v2273_v27  ;;  %v10766_v32 = vadd.f32 %v9014_v11, %v2273_v27  ;;  %v7710_v63 = vpop.eup %7709 }
 0x4bc   : > { %v7712_v21 = vpop.eup %7711 }
 0x4bd   : > { %7721 = vpow2.f32 %v2550_v60  ;;  %v2482_v0 = vadd.f32 %v10761_v42, %v10407_v10  ;;  %v2483_v34 = vadd.f32 %v10766_v32, %v10411_v46  ;;  %v9016_v60 = vld [vmem:[%s13871_s0 + $0x58] sm:$0xff] }
 0x4be   : > { %7723 = vpow2.f32 %v2552_v37  ;;  %v2278_v62 = vpop.permute.xlu1 %2277 }
 0x4bf   : > { %v7714_v22 = vpop.eup %7713  ;;  %v2554_v6 = vmul.f32 1.442695, %v2482_v0  ;;  %v10775_v27 = vadd.f32 %v9015_v16, %v2278_v62  ;;  %v10780_v44 = vadd.f32 %v9016_v60, %v2278_v62  ;;  %v2556_v9 = vmul.f32 1.442695, %v2483_v34  ;;  %v9017_v62 = vld [vmem:[%s13871_s0 + $0x60] sm:$0xff] }
 0x4c0   : > { %v7716_v11 = vpop.eup %7715  ;;  %v6726_v23 = vpack.c.bf16 %v7714_v22, %v7710_v63  ;;  %v9018_v63 = vld [vmem:[%s13871_s0 + $0x68] sm:$0xff] }
 0x4c1   : > { %v2484_v37 = vadd.f32 %v10775_v27, %v10407_v10  ;;  %v2485_v0 = vadd.f32 %v10780_v44, %v10411_v46  ;;  %v6724_v17 = vpack.c.bf16 %v7716_v11, %v7712_v21  ;;  %7725 = vpow2.f32 %v2554_v6 }
 0x4c2   : > { %v2283_v8 = vpop.permute.xlu1 %2282  ;;  %7727 = vpow2.f32 %v2556_v9 }
 0x4c3   : > { %v2558_v16 = vmul.f32 1.442695, %v2484_v37  ;;  %v2560_v52 = vmul.f32 1.442695, %v2485_v0  ;;  %6725 = vmatprep.subr.bf16.mxu0 %v6724_v17  ;;  %v10789_v60 = vadd.f32 %v9017_v62, %v2283_v8  ;;  %v10794_v34 = vadd.f32 %v9018_v63, %v2283_v8  ;;  %v7718_v22 = vpop.eup %7717  ;;  %v9019_v8 = vld [vmem:[%s13871_s0 + $0x70] sm:$0xff] }
 0x4c4   : > { %6727 = vmatpush1.bf16.msra.mxu0 %v6726_v23  ;;  %v7720_v21 = vpop.eup %7719  ;;  %v9020_v23 = vld [vmem:[%s13871_s0 + $0x78] sm:$0xff] }
 0x4c5   : > { %7729 = vpow2.f32 %v2558_v16  ;;  %v2486_v6 = vadd.f32 %v10789_v60, %v10407_v10  ;;  %v2487_v17 = vadd.f32 %v10794_v34, %v10411_v46 }
 0x4c6   : > { %7731 = vpow2.f32 %v2560_v52  ;;  %v2288_v11 = vpop.permute.xlu1 %2287 }
 0x4c7   : > { %v7722_v37 = vpop.eup %7721  ;;  %v2562_v0 = vmul.f32 1.442695, %v2486_v6  ;;  %v10803_v62 = vadd.f32 %v9019_v8, %v2288_v11  ;;  %v10808_v9 = vadd.f32 %v9020_v23, %v2288_v11  ;;  %v2564_v63 = vmul.f32 1.442695, %v2487_v17 }
 0x4c8   : > { %v7724_v16 = vpop.eup %7723  ;;  %v6730_v49 = vpack.c.bf16 %v7722_v37, %v7718_v22  ;;  %v9022_v22 = vld [vmem:[%s13871_s0 + $0x88] sm:$0xff] }
 0x4c9   : > { %v2488_v52 = vadd.f32 %v10803_v62, %v10407_v10  ;;  %v2489_v6 = vadd.f32 %v10808_v9, %v10411_v46  ;;  %v6728_v61 = vpack.c.bf16 %v7724_v16, %v7720_v21  ;;  %7733 = vpow2.f32 %v2562_v0 }
 0x4ca   : > { %v2293_v28 = vpop.permute.xlu0 %2292  ;;  %7735 = vpow2.f32 %v2564_v63 }
 0x4cb   : > { %v2566_v8 = vmul.f32 1.442695, %v2488_v52  ;;  %v2568_v1 = vmul.f32 1.442695, %v2489_v6  ;;  %v10817_v11 = vadd.f32 %v9021_v56, %v2293_v28  ;;  %v10822_v17 = vadd.f32 %v9022_v22, %v2293_v28  ;;  %6729 = vmatprep.subr.bf16.mxu0 %v6728_v61  ;;  %v7726_v37 = vpop.eup %7725  ;;  %v9023_v28 = vld [vmem:[%s13871_s0 + $0x90] sm:$0xff] }
 0x4cc   : > { %6731 = vmatpush1.bf16.msra.mxu0 %v6730_v49  ;;  %v7728_v23 = vpop.eup %7727  ;;  %v9024_v49 = vld [vmem:[%s13871_s0 + $0x98] sm:$0xff] }
 0x4cd   : > { %7737 = vpow2.f32 %v2566_v8  ;;  %v2490_v21 = vadd.f32 %v10817_v11, %v10407_v10  ;;  %v2491_v0 = vadd.f32 %v10822_v17, %v10411_v46 }
 0x4ce   : > { %7739 = vpow2.f32 %v2568_v1  ;;  %v2298_v56 = vpop.permute.xlu1 %2297 }
 0x4cf   : > { %v7730_v16 = vpop.eup %7729  ;;  %v2570_v52 = vmul.f32 1.442695, %v2490_v21  ;;  %v10831_v61 = vadd.f32 %v9023_v28, %v2298_v56  ;;  %v10836_v63 = vadd.f32 %v9024_v49, %v2298_v56  ;;  %v2572_v8 = vmul.f32 1.442695, %v2491_v0  ;;  %v9025_v56 = vld [vmem:[%s13871_s0 + $0xa0] sm:$0xff] }
 0x4d0   : > { %v7732_v6 = vpop.eup %7731  ;;  %v6734_v22 = vpack.c.bf16 %v7730_v16, %v7726_v37  ;;  %v9026_v37 = vld [vmem:[%s13871_s0 + $0xa8] sm:$0xff] }
 0x4d1   : > { %v2492_v1 = vadd.f32 %v10831_v61, %v10407_v10  ;;  %v2493_v21 = vadd.f32 %v10836_v63, %v10411_v46  ;;  %v6732_v47 = vpack.c.bf16 %v7732_v6, %v7728_v23  ;;  %7741 = vpow2.f32 %v2570_v52 }
 0x4d2   : > { %v2303_v31 = vpop.permute.xlu1 %2302  ;;  %7743 = vpow2.f32 %v2572_v8  ;;  %v9028_v8 = vld [vmem:[%s13871_s0 + $0xb8] sm:$0xff] }
 0x4d3   : > { %v2574_v28 = vmul.f32 1.442695, %v2492_v1  ;;  %v2576_v35 = vmul.f32 1.442695, %v2493_v21  ;;  %6733 = vmatprep.subr.bf16.mxu0 %v6732_v47  ;;  %v10845_v49 = vadd.f32 %v9025_v56, %v2303_v31  ;;  %v10850_v0 = vadd.f32 %v9026_v37, %v2303_v31  ;;  %v7734_v16 = vpop.eup %7733  ;;  %v9027_v31 = vld [vmem:[%s13871_s0 + $0xb0] sm:$0xff] }
 0x4d4   : > { %6735 = vmatpush1.bf16.msra.mxu0 %v6734_v22  ;;  %v7736_v52 = vpop.eup %7735 }
 0x4d5   : > { %7745 = vpow2.f32 %v2574_v28  ;;  %v2494_v23 = vadd.f32 %v10845_v49, %v10407_v10  ;;  %v2495_v47 = vadd.f32 %v10850_v0, %v10411_v46 }
 0x4d6   : > { %7747 = vpow2.f32 %v2576_v35  ;;  %v2308_v6 = vpop.permute.xlu1 %2307 }
 0x4d7   : > { %v7738_v1 = vpop.eup %7737  ;;  %v2578_v21 = vmul.f32 1.442695, %v2494_v23  ;;  %v10859_v56 = vadd.f32 %v9027_v31, %v2308_v6  ;;  %v10864_v22 = vadd.f32 %v9028_v8, %v2308_v6  ;;  %v2580_v37 = vmul.f32 1.442695, %v2495_v47  ;;  %v9029_v6 = vld [vmem:[%s13871_s0 + $0xc0] sm:$0xff] }
 0x4d8   : > { %v7740_v28 = vpop.eup %7739  ;;  %v6738_v18 = vpack.c.bf16 %v7738_v1, %v7734_v16  ;;  %v9030_v16 = vld [vmem:[%s13871_s0 + $0xc8] sm:$0xff] }
 0x4d9   : > { %v2496_v35 = vadd.f32 %v10859_v56, %v10407_v10  ;;  %v2497_v23 = vadd.f32 %v10864_v22, %v10411_v46  ;;  %v6736_v48 = vpack.c.bf16 %v7740_v28, %v7736_v52  ;;  %7749 = vpow2.f32 %v2578_v21 }
 0x4da   : > { %v2313_v5 = vpop.permute.xlu1 %2312  ;;  %7751 = vpow2.f32 %v2580_v37 }
 0x4db   : > { %v2582_v31 = vmul.f32 1.442695, %v2496_v35  ;;  %v2584_v12 = vmul.f32 1.442695, %v2497_v23  ;;  %6737 = vmatprep.subr.bf16.mxu0 %v6736_v48  ;;  %v10873_v8 = vadd.f32 %v9029_v6, %v2313_v5  ;;  %v10878_v47 = vadd.f32 %v9030_v16, %v2313_v5  ;;  %v7742_v1 = vpop.eup %7741  ;;  %v9031_v5 = vld [vmem:[%s13871_s0 + $0xd0] sm:$0xff] }
 0x4dc   : > { %6739 = vmatpush1.bf16.msra.mxu0 %v6738_v18  ;;  %v7744_v21 = vpop.eup %7743  ;;  %v9032_v18 = vld [vmem:[%s13871_s0 + $0xd8] sm:$0xff] }
 0x4dd   : > { %7753 = vpow2.f32 %v2582_v31  ;;  %v2498_v52 = vadd.f32 %v10873_v8, %v10407_v10  ;;  %v2499_v48 = vadd.f32 %v10878_v47, %v10411_v46 }
 0x4de   : > { %7755 = vpow2.f32 %v2584_v12  ;;  %v2318_v28 = vpop.permute.xlu1 %2317 }
 0x4df   : > { %v7746_v35 = vpop.eup %7745  ;;  %v2586_v23 = vmul.f32 1.442695, %v2498_v52  ;;  %v10887_v6 = vadd.f32 %v9031_v5, %v2318_v28  ;;  %v10892_v37 = vadd.f32 %v9032_v18, %v2318_v28  ;;  %v2588_v16 = vmul.f32 1.442695, %v2499_v48  ;;  %v9033_v28 = vld [vmem:[%s13871_s0 + $0xe0] sm:$0xff] }
 0x4e0   : > { %v7748_v31 = vpop.eup %7747  ;;  %v6742_v58 = vpack.c.bf16 %v7746_v35, %v7742_v1  ;;  %v9034_v1 = vld [vmem:[%s13871_s0 + $0xe8] sm:$0xff] }
 0x4e1   : > { %v2500_v12 = vadd.f32 %v10887_v6, %v10407_v10  ;;  %v2501_v52 = vadd.f32 %v10892_v37, %v10411_v46  ;;  %v6740_v54 = vpack.c.bf16 %v7748_v31, %v7744_v21  ;;  %7757 = vpow2.f32 %v2586_v23 }
 0x4e2   : > { %v2323_v55 = vpop.permute.xlu1 %2322  ;;  %7759 = vpow2.f32 %v2588_v16 }
 0x4e3   : > { %v2590_v5 = vmul.f32 1.442695, %v2500_v12  ;;  %v2592_v3 = vmul.f32 1.442695, %v2501_v52  ;;  %6741 = vmatprep.subr.bf16.mxu0 %v6740_v54  ;;  %v10901_v18 = vadd.f32 %v9033_v28, %v2323_v55  ;;  %v10906_v48 = vadd.f32 %v9034_v1, %v2323_v55  ;;  %v7750_v35 = vpop.eup %7749  ;;  %v9035_v55 = vld [vmem:[%s13871_s0 + $0xf0] sm:$0xff] }
 0x4e4   : > { %6743 = vmatpush1.bf16.msra.mxu0 %v6742_v58  ;;  %v7752_v23 = vpop.eup %7751  ;;  %v9036_v58 = vld [vmem:[%s13871_s0 + $0xf8] sm:$0xff] }
 0x4e5   : > { %7761 = vpow2.f32 %v2590_v5  ;;  %v2502_v21 = vadd.f32 %v10901_v18, %v10407_v10  ;;  %v2503_v54 = vadd.f32 %v10906_v48, %v10411_v46 }
 0x4e6   : > { %7763 = vpow2.f32 %v2592_v3  ;;  %v2328_v31 = vpop.permute.xlu0 %2327 }
 0x4e7   : > { %v7754_v12 = vpop.eup %7753  ;;  %v2594_v52 = vmul.f32 1.442695, %v2502_v21  ;;  %v10915_v28 = vadd.f32 %v9035_v55, %v2328_v31  ;;  %v10920_v16 = vadd.f32 %v9036_v58, %v2328_v31  ;;  %v2596_v1 = vmul.f32 1.442695, %v2503_v54  ;;  %v9037_v31 = vld [vmem:[%s13871_s0 + $0x100] sm:$0xff] }
 0x4e8   : > { %v7756_v5 = vpop.eup %7755  ;;  %v6746_v38 = vpack.c.bf16 %v7754_v12, %v7750_v35  ;;  %v9038_v35 = vld [vmem:[%s13871_s0 + $0x108] sm:$0xff] }
 0x4e9   : > { %v2504_v3 = vadd.f32 %v10915_v28, %v10407_v10  ;;  %v2505_v21 = vadd.f32 %v10920_v16, %v10411_v46  ;;  %v6744_v53 = vpack.c.bf16 %v7756_v5, %v7752_v23  ;;  %7765 = vpow2.f32 %v2594_v52 }
 0x4ea   : > { %v2333_v29 = vpop.permute.xlu1 %2332  ;;  %7767 = vpow2.f32 %v2596_v1 }
 0x4eb   : > { %v2598_v55 = vmul.f32 1.442695, %v2504_v3  ;;  %v2600_v41 = vmul.f32 1.442695, %v2505_v21  ;;  %6745 = vmatprep.subr.bf16.mxu0 %v6744_v53  ;;  %v10929_v58 = vadd.f32 %v9037_v31, %v2333_v29  ;;  %v10934_v54 = vadd.f32 %v9038_v35, %v2333_v29  ;;  %v7758_v12 = vpop.eup %7757  ;;  %v9039_v29 = vld [vmem:[%s13871_s0 + $0x110] sm:$0xff] }
 0x4ec   : > { %6747 = vmatpush1.bf16.msra.mxu0 %v6746_v38  ;;  %v7760_v52 = vpop.eup %7759  ;;  %v9040_v38 = vld [vmem:[%s13871_s0 + $0x118] sm:$0xff] }
 0x4ed   : > { %7769 = vpow2.f32 %v2598_v55  ;;  %v2506_v23 = vadd.f32 %v10929_v58, %v10407_v10  ;;  %v2507_v53 = vadd.f32 %v10934_v54, %v10411_v46 }
 0x4ee   : > { %7771 = vpow2.f32 %v2600_v41  ;;  %v2338_v5 = vpop.permute.xlu0 %2337 }
 0x4ef   : > { %v7762_v3 = vpop.eup %7761  ;;  %v2602_v21 = vmul.f32 1.442695, %v2506_v23  ;;  %v10943_v31 = vadd.f32 %v9039_v29, %v2338_v5  ;;  %v10948_v1 = vadd.f32 %v9040_v38, %v2338_v5  ;;  %v2604_v35 = vmul.f32 1.442695, %v2507_v53  ;;  %v9041_v5 = vld [vmem:[%s13871_s0 + $0x120] sm:$0xff] }
 0x4f0   : > { %v7764_v55 = vpop.eup %7763  ;;  %v6750_v40 = vpack.c.bf16 %v7762_v3, %v7758_v12  ;;  %v9042_v12 = vld [vmem:[%s13871_s0 + $0x128] sm:$0xff] }
 0x4f1   : > { %v2508_v41 = vadd.f32 %v10943_v31, %v10407_v10  ;;  %v2509_v23 = vadd.f32 %v10948_v1, %v10411_v46  ;;  %v6748_v33 = vpack.c.bf16 %v7764_v55, %v7760_v52  ;;  %7773 = vpow2.f32 %v2602_v21 }
 0x4f2   : > { %v2343_v57 = vpop.permute.xlu1 %2342  ;;  %7775 = vpow2.f32 %v2604_v35 }
 0x4f3   : > { %v2606_v29 = vmul.f32 1.442695, %v2508_v41  ;;  %v2608_v39 = vmul.f32 1.442695, %v2509_v23  ;;  %6749 = vmatprep.subr.bf16.mxu0 %v6748_v33  ;;  %v10957_v38 = vadd.f32 %v9041_v5, %v2343_v57  ;;  %v10962_v53 = vadd.f32 %v9042_v12, %v2343_v57  ;;  %v7766_v3 = vpop.eup %7765  ;;  %v9043_v57 = vld [vmem:[%s13871_s0 + $0x130] sm:$0xff] }
 0x4f4   : > { %6751 = vmatpush1.bf16.msra.mxu0 %v6750_v40  ;;  %v7768_v21 = vpop.eup %7767  ;;  %v9044_v40 = vld [vmem:[%s13871_s0 + $0x138] sm:$0xff] }
 0x4f5   : > { %7777 = vpow2.f32 %v2606_v29  ;;  %v2510_v52 = vadd.f32 %v10957_v38, %v10407_v10  ;;  %v2511_v33 = vadd.f32 %v10962_v53, %v10411_v46 }
 0x4f6   : > { %7779 = vpow2.f32 %v2608_v39  ;;  %v2348_v55 = vpop.permute.xlu0 %2347 }
 0x4f7   : > { %v7770_v41 = vpop.eup %7769  ;;  %v2610_v23 = vmul.f32 1.442695, %v2510_v52  ;;  %v10971_v5 = vadd.f32 %v9043_v57, %v2348_v55  ;;  %v10976_v35 = vadd.f32 %v9044_v40, %v2348_v55  ;;  %v2612_v12 = vmul.f32 1.442695, %v2511_v33  ;;  %v9045_v55 = vld [vmem:[%s13871_s0 + $0x140] sm:$0xff] }
 0x4f8   : > { %v7772_v29 = vpop.eup %7771  ;;  %v6754_v30 = vpack.c.bf16 %v7770_v41, %v7766_v3  ;;  %v9046_v3 = vld [vmem:[%s13871_s0 + $0x148] sm:$0xff] }
 0x4f9   : > { %14469 = vst [vmem:[#allocation25_spill] sm:$0xff] %v10971_v5  ;;  %14470 = vst [vmem:[#allocation27_spill] sm:$0xff] %v10976_v35  ;;  %v2512_v39 = vadd.f32 %v10971_v5, %v10407_v10  ;;  %v2513_v52 = vadd.f32 %v10976_v35, %v10411_v46  ;;  %v6752_v50 = vpack.c.bf16 %v7772_v29, %v7768_v21  ;;  %7781 = vpow2.f32 %v2610_v23 }
 0x4fa   : > { %v2353_v59 = vpop.permute.xlu1 %2352  ;;  %7783 = vpow2.f32 %v2612_v12 }
 0x4fb   : > { %v2614_v57 = vmul.f32 1.442695, %v2512_v39  ;;  %v2616_v25 = vmul.f32 1.442695, %v2513_v52  ;;  %6753 = vmatprep.subr.bf16.mxu0 %v6752_v50  ;;  %v10985_v40 = vadd.f32 %v9045_v55, %v2353_v59  ;;  %v10990_v33 = vadd.f32 %v9046_v3, %v2353_v59  ;;  %v7774_v41 = vpop.eup %7773  ;;  %v9047_v59 = vld [vmem:[%s13871_s0 + $0x150] sm:$0xff] }
 0x4fc   : > { %6755 = vmatpush1.bf16.msra.mxu0 %v6754_v30  ;;  %v7776_v23 = vpop.eup %7775  ;;  %v9048_v30 = vld [vmem:[%s13871_s0 + $0x158] sm:$0xff] }
 0x4fd   : > { %14471 = vst [vmem:[#allocation29_spill] sm:$0xff] %v10985_v40  ;;  %14472 = vst [vmem:[#allocation31_spill] sm:$0xff] %v10990_v33  ;;  %7785 = vpow2.f32 %v2614_v57  ;;  %v2514_v21 = vadd.f32 %v10985_v40, %v10407_v10  ;;  %v2515_v50 = vadd.f32 %v10990_v33, %v10411_v46 }
 0x4fe   : > { %7787 = vpow2.f32 %v2616_v25  ;;  %v2358_v29 = vpop.permute.xlu0 %2357 }
 0x4ff   : > { %v7778_v39 = vpop.eup %7777  ;;  %v2618_v52 = vmul.f32 1.442695, %v2514_v21  ;;  %v10999_v55 = vadd.f32 %v9047_v59, %v2358_v29  ;;  %v11004_v12 = vadd.f32 %v9048_v30, %v2358_v29  ;;  %v2620_v3 = vmul.f32 1.442695, %v2515_v50  ;;  %v9049_v29 = vld [vmem:[%s13871_s0 + $0x160] sm:$0xff] }
 0x500   : > { %v7780_v57 = vpop.eup %7779  ;;  %v6758_v40 = vpack.c.bf16 %v7778_v39, %v7774_v41  ;;  %v9050_v41 = vld [vmem:[%s13871_s0 + $0x168] sm:$0xff] }
 0x501   : > { %14473 = vst [vmem:[#allocation33_spill] sm:$0xff] %v10999_v55  ;;  %14474 = vst [vmem:[#allocation35_spill] sm:$0xff] %v11004_v12  ;;  %v2516_v25 = vadd.f32 %v10999_v55, %v10407_v10  ;;  %v2517_v21 = vadd.f32 %v11004_v12, %v10411_v46  ;;  %v6756_v33 = vpack.c.bf16 %v7780_v57, %v7776_v23  ;;  %7789 = vpow2.f32 %v2618_v52 }
 0x502   : > { %v2363_v5 = vpop.permute.xlu1 %2362  ;;  %7791 = vpow2.f32 %v2620_v3 }
 0x503   : > { %v2622_v59 = vmul.f32 1.442695, %v2516_v25  ;;  %v2624_v35 = vmul.f32 1.442695, %v2517_v21  ;;  %6757 = vmatprep.subr.bf16.mxu0 %v6756_v33  ;;  %v11013_v30 = vadd.f32 %v9049_v29, %v2363_v5  ;;  %v11018_v50 = vadd.f32 %v9050_v41, %v2363_v5  ;;  %v7782_v39 = vpop.eup %7781  ;;  %v9051_v5 = vld [vmem:[%s13871_s0 + $0x170] sm:$0xff] }
 0x504   : > { %6759 = vmatpush1.bf16.msra.mxu0 %v6758_v40  ;;  %v7784_v52 = vpop.eup %7783  ;;  %v9052_v40 = vld [vmem:[%s13871_s0 + $0x178] sm:$0xff] }
 0x505   : > { %14475 = vst [vmem:[#allocation37_spill] sm:$0xff] %v11013_v30  ;;  %14476 = vst [vmem:[#allocation39_spill] sm:$0xff] %v11018_v50  ;;  %7793 = vpow2.f32 %v2622_v59  ;;  %v2518_v23 = vadd.f32 %v11013_v30, %v10407_v10  ;;  %v2519_v33 = vadd.f32 %v11018_v50, %v10411_v46 }
 0x506   : > { %7795 = vpow2.f32 %v2624_v35  ;;  %v2368_v57 = vpop.permute.xlu0 %2367 }
 0x507   : > { %v7786_v25 = vpop.eup %7785  ;;  %v2626_v21 = vmul.f32 1.442695, %v2518_v23  ;;  %v11027_v29 = vadd.f32 %v9051_v5, %v2368_v57  ;;  %v11032_v3 = vadd.f32 %v9052_v40, %v2368_v57  ;;  %v2628_v41 = vmul.f32 1.442695, %v2519_v33  ;;  %v9053_v57 = vld [vmem:[%s13871_s0 + $0x180] sm:$0xff] }
 0x508   : > { %v7788_v59 = vpop.eup %7787  ;;  %v6762_v30 = vpack.c.bf16 %v7786_v25, %v7782_v39  ;;  %v9054_v39 = vld [vmem:[%s13871_s0 + $0x188] sm:$0xff] }
 0x509   : > { %14477 = vst [vmem:[#allocation41_spill] sm:$0xff] %v11027_v29  ;;  %14478 = vst [vmem:[#allocation43_spill] sm:$0xff] %v11032_v3  ;;  %v2520_v35 = vadd.f32 %v11027_v29, %v10407_v10  ;;  %v2521_v23 = vadd.f32 %v11032_v3, %v10411_v46  ;;  %v6760_v50 = vpack.c.bf16 %v7788_v59, %v7784_v52  ;;  %7797 = vpow2.f32 %v2626_v21 }
 0x50a   : > { %v2373_v55 = vpop.permute.xlu1 %2372  ;;  %7799 = vpow2.f32 %v2628_v41 }
 0x50b   : > { %v2630_v5 = vmul.f32 1.442695, %v2520_v35  ;;  %v2632_v12 = vmul.f32 1.442695, %v2521_v23  ;;  %6761 = vmatprep.subr.bf16.mxu0 %v6760_v50  ;;  %v11041_v40 = vadd.f32 %v9053_v57, %v2373_v55  ;;  %v11046_v33 = vadd.f32 %v9054_v39, %v2373_v55  ;;  %v7790_v25 = vpop.eup %7789  ;;  %v9055_v55 = vld [vmem:[%s13871_s0 + $0x190] sm:$0xff] }
 0x50c   : > { %6763 = vmatpush1.bf16.msra.mxu0 %v6762_v30  ;;  %v7792_v21 = vpop.eup %7791  ;;  %v9056_v30 = vld [vmem:[%s13871_s0 + $0x198] sm:$0xff] }
 0x50d   : > { %14479 = vst [vmem:[#allocation45_spill] sm:$0xff] %v11041_v40  ;;  %14480 = vst [vmem:[#allocation47_spill] sm:$0xff] %v11046_v33  ;;  %7801 = vpow2.f32 %v2630_v5  ;;  %v2522_v52 = vadd.f32 %v11041_v40, %v10407_v10  ;;  %v2523_v50 = vadd.f32 %v11046_v33, %v10411_v46 }
 0x50e   : > { %7803 = vpow2.f32 %v2632_v12  ;;  %v2378_v59 = vpop.permute.xlu0 %2377 }
 0x50f   : > { %v7794_v35 = vpop.eup %7793  ;;  %v2634_v23 = vmul.f32 1.442695, %v2522_v52  ;;  %v11055_v57 = vadd.f32 %v9055_v55, %v2378_v59  ;;  %v11060_v41 = vadd.f32 %v9056_v30, %v2378_v59  ;;  %v2636_v39 = vmul.f32 1.442695, %v2523_v50  ;;  %v9057_v59 = vld [vmem:[%s13871_s0 + $0x1a0] sm:$0xff] }
 0x510   : > { %v7796_v5 = vpop.eup %7795  ;;  %v6766_v40 = vpack.c.bf16 %v7794_v35, %v7790_v25  ;;  %v9058_v25 = vld [vmem:[%s13871_s0 + $0x1a8] sm:$0xff] }
 0x511   : > { %14481 = vst [vmem:[#allocation49_spill] sm:$0xff] %v11055_v57  ;;  %14482 = vst [vmem:[#allocation51_spill] sm:$0xff] %v11060_v41  ;;  %v2524_v12 = vadd.f32 %v11055_v57, %v10407_v10  ;;  %v2525_v52 = vadd.f32 %v11060_v41, %v10411_v46  ;;  %v6764_v33 = vpack.c.bf16 %v7796_v5, %v7792_v21  ;;  %7805 = vpow2.f32 %v2634_v23 }
 0x512   : > { %v2383_v29 = vpop.permute.xlu1 %2382  ;;  %7807 = vpow2.f32 %v2636_v39 }
 0x513   : > { %v2638_v55 = vmul.f32 1.442695, %v2524_v12  ;;  %v2640_v3 = vmul.f32 1.442695, %v2525_v52  ;;  %6765 = vmatprep.subr.bf16.mxu0 %v6764_v33  ;;  %v11069_v30 = vadd.f32 %v9057_v59, %v2383_v29  ;;  %v11074_v50 = vadd.f32 %v9058_v25, %v2383_v29  ;;  %v7798_v35 = vpop.eup %7797  ;;  %v9059_v29 = vld [vmem:[%s13871_s0 + $0x1b0] sm:$0xff] }
 0x514   : > { %6767 = vmatpush1.bf16.msra.mxu0 %v6766_v40  ;;  %v7800_v23 = vpop.eup %7799  ;;  %v9060_v40 = vld [vmem:[%s13871_s0 + $0x1b8] sm:$0xff] }
 0x515   : > { %14483 = vst [vmem:[#allocation53_spill] sm:$0xff] %v11069_v30  ;;  %14484 = vst [vmem:[#allocation55_spill] sm:$0xff] %v11074_v50  ;;  %7809 = vpow2.f32 %v2638_v55  ;;  %v2526_v21 = vadd.f32 %v11069_v30, %v10407_v10  ;;  %v2527_v33 = vadd.f32 %v11074_v50, %v10411_v46 }
 0x516   : > { %7811 = vpow2.f32 %v2640_v3  ;;  %v2388_v5 = vpop.permute.xlu0 %2387 }
 0x517   : > { %v7802_v12 = vpop.eup %7801  ;;  %v2642_v52 = vmul.f32 1.442695, %v2526_v21  ;;  %v11083_v59 = vadd.f32 %v9059_v29, %v2388_v5  ;;  %v11088_v39 = vadd.f32 %v9060_v40, %v2388_v5  ;;  %v2644_v25 = vmul.f32 1.442695, %v2527_v33  ;;  %v9061_v5 = vld [vmem:[%s13871_s0 + $0x1c0] sm:$0xff] }
 0x518   : > { %v7804_v55 = vpop.eup %7803  ;;  %v6770_v30 = vpack.c.bf16 %v7802_v12, %v7798_v35  ;;  %v9062_v35 = vld [vmem:[%s13871_s0 + $0x1c8] sm:$0xff] }
 0x519   : > { %14485 = vst [vmem:[#allocation57_spill] sm:$0xff] %v11083_v59  ;;  %14486 = vst [vmem:[#allocation59_spill] sm:$0xff] %v11088_v39  ;;  %v2528_v3 = vadd.f32 %v11083_v59, %v10407_v10  ;;  %v2529_v21 = vadd.f32 %v11088_v39, %v10411_v46  ;;  %v6768_v50 = vpack.c.bf16 %v7804_v55, %v7800_v23  ;;  %7813 = vpow2.f32 %v2642_v52 }
 0x51a   : > { %v2393_v57 = vpop.permute.xlu1 %2392  ;;  %7815 = vpow2.f32 %v2644_v25 }
 0x51b   : > { %v2646_v29 = vmul.f32 1.442695, %v2528_v3  ;;  %v2648_v41 = vmul.f32 1.442695, %v2529_v21  ;;  %6769 = vmatprep.subr.bf16.mxu0 %v6768_v50  ;;  %v11097_v40 = vadd.f32 %v9061_v5, %v2393_v57  ;;  %v11102_v33 = vadd.f32 %v9062_v35, %v2393_v57  ;;  %v7806_v12 = vpop.eup %7805  ;;  %v9063_v57 = vld [vmem:[%s13871_s0 + $0x1d0] sm:$0xff] }
 0x51c   : > { %6771 = vmatpush1.bf16.msra.mxu0 %v6770_v30  ;;  %v7808_v52 = vpop.eup %7807  ;;  %v9064_v30 = vld [vmem:[%s13871_s0 + $0x1d8] sm:$0xff] }
 0x51d   : > { %14487 = vst [vmem:[#allocation61_spill] sm:$0xff] %v11097_v40  ;;  %14488 = vst [vmem:[#allocation63_spill] sm:$0xff] %v11102_v33  ;;  %7817 = vpow2.f32 %v2646_v29  ;;  %v2530_v23 = vadd.f32 %v11097_v40, %v10407_v10  ;;  %v2531_v50 = vadd.f32 %v11102_v33, %v10411_v46 }
 0x51e   : > { %7819 = vpow2.f32 %v2648_v41  ;;  %v2398_v55 = vpop.permute.xlu0 %2397 }
 0x51f   : > { %v7810_v3 = vpop.eup %7809  ;;  %v2650_v21 = vmul.f32 1.442695, %v2530_v23  ;;  %v11111_v5 = vadd.f32 %v9063_v57, %v2398_v55  ;;  %v11116_v25 = vadd.f32 %v9064_v30, %v2398_v55  ;;  %v2652_v35 = vmul.f32 1.442695, %v2531_v50  ;;  %v9065_v55 = vld [vmem:[%s13871_s0 + $0x1e0] sm:$0xff] }
 0x520   : > { %v7812_v29 = vpop.eup %7811  ;;  %v6774_v40 = vpack.c.bf16 %v7810_v3, %v7806_v12  ;;  %v9066_v12 = vld [vmem:[%s13871_s0 + $0x1e8] sm:$0xff] }
 0x521   : > { %14489 = vst [vmem:[#allocation65_spill] sm:$0xff] %v11111_v5  ;;  %14490 = vst [vmem:[#allocation87_spill] sm:$0xff] %v11116_v25  ;;  %v2532_v41 = vadd.f32 %v11111_v5, %v10407_v10  ;;  %v2533_v23 = vadd.f32 %v11116_v25, %v10411_v46  ;;  %v6772_v33 = vpack.c.bf16 %v7812_v29, %v7808_v52  ;;  %7821 = vpow2.f32 %v2650_v21 }
 0x522   : > { %v2403_v59 = vpop.permute.xlu1 %2402  ;;  %7823 = vpow2.f32 %v2652_v35 }
 0x523   : > { %v2654_v57 = vmul.f32 1.442695, %v2532_v41  ;;  %v2656_v39 = vmul.f32 1.442695, %v2533_v23  ;;  %6773 = vmatprep.subr.bf16.mxu0 %v6772_v33  ;;  %v11125_v30 = vadd.f32 %v9065_v55, %v2403_v59  ;;  %v11130_v50 = vadd.f32 %v9066_v12, %v2403_v59  ;;  %v7814_v3 = vpop.eup %7813  ;;  %v9067_v59 = vld [vmem:[%s13871_s0 + $0x1f0] sm:$0xff] }
 0x524   : > { %6775 = vmatpush1.bf16.msra.mxu0 %v6774_v40  ;;  %v7816_v21 = vpop.eup %7815  ;;  %v9068_v40 = vld [vmem:[%s13871_s0 + $0x1f8] sm:$0xff] }
 0x525   : > { %14491 = vst [vmem:[#allocation88_spill] sm:$0xff] %v11125_v30  ;;  %14492 = vst [vmem:[#allocation89_spill] sm:$0xff] %v11130_v50  ;;  %7825 = vpow2.f32 %v2654_v57  ;;  %v2534_v52 = vadd.f32 %v11125_v30, %v10407_v10  ;;  %v2535_v33 = vadd.f32 %v11130_v50, %v10411_v46 }
 0x526   : > { %7827 = vpow2.f32 %v2656_v39  ;;  %v2408_v29 = vpop.permute.xlu0 %2407 }
 0x527   : > { %v7818_v41 = vpop.eup %7817  ;;  %v2658_v23 = vmul.f32 1.442695, %v2534_v52  ;;  %v11139_v55 = vadd.f32 %v9067_v59, %v2408_v29  ;;  %v11144_v35 = vadd.f32 %v9068_v40, %v2408_v29  ;;  %v2660_v12 = vmul.f32 1.442695, %v2535_v33 }
 0x528   : > { %v7820_v57 = vpop.eup %7819  ;;  %v6778_v30 = vpack.c.bf16 %v7818_v41, %v7814_v3 }
 0x529   : > { %14493 = vst [vmem:[#allocation90_spill] sm:$0xff] %v11139_v55  ;;  %v2536_v39 = vadd.f32 %v11139_v55, %v10407_v10  ;;  %v2537_v52 = vadd.f32 %v11144_v35, %v10411_v46  ;;  %v6776_v50 = vpack.c.bf16 %v7820_v57, %v7816_v21  ;;  %7829 = vpow2.f32 %v2658_v23 }
 0x52a   : > { %7831 = vpow2.f32 %v2660_v12 }
 0x52b   : > { %v2662_v5 = vmul.f32 1.442695, %v2536_v39  ;;  %v2664_v59 = vmul.f32 1.442695, %v2537_v52  ;;  %6777 = vmatprep.subr.bf16.mxu0 %v6776_v50  ;;  %v7822_v25 = vpop.eup %7821  ;;  %v14494_v50 = vmov 0.0|0.0  }
 0x52c   : > { %6779 = vmatpush1.bf16.msra.mxu0 %v6778_v30  ;;  %v7824_v29 = vpop.eup %7823 }
 0x52d   : > { %7833 = vpow2.f32 %v2662_v5  ;;  %v14495_v5 = vmov 1.0|1.0  }
 0x52e   : > { %7835 = vpow2.f32 %v2664_v59 }
 0x52f   : > { %v7826_v40 = vpop.eup %7825 }
 0x530   : > { %v7828_v33 = vpop.eup %7827  ;;  %v6782_v3 = vpack.c.bf16 %v7826_v40, %v7822_v25 }
 0x531   : > { %v6780_v41 = vpack.c.bf16 %v7828_v33, %v7824_v29 }
 0x533   : > { %6781 = vmatprep.subr.bf16.mxu0 %v6780_v41  ;;  %v7830_v10 = vpop.eup %7829 }
 0x534   : > { %6783 = vmatpush1.bf16.msra.mxu0 %v6782_v3  ;;  %v7832_v55 = vpop.eup %7831 }
 0x537   : > { %v7834_v46 = vpop.eup %7833 }
 0x538   : > { %v7836_v21 = vpop.eup %7835  ;;  %v6786_v23 = vpack.c.bf16 %v7834_v46, %v7830_v10 }
 0x539   : > { %v6784_v57 = vpack.c.bf16 %v7836_v21, %v7832_v55 }
 0x53b   : > { %6785 = vmatprep.subr.bf16.mxu0 %v6784_v57 }
 0x53c   : > { %6787 = vmatpush1.bf16.msra.mxu0 %v6786_v23 }
 0x53d   : > { %6788 = vmatprep.subr.bf16.mxu0 %v14494_v50 }
 0x53f   : > { %2731 = vmatmul.mubr.f32.vlgmr.msra.gmra.mrb[64].mxu0 %v14350_v43 }
 0x540   : > { %6789 = vmatpush1.bf16.msra.mxu0 %v14495_v5 }
 0x541   : > { %6790 = vmatprep.subr.bf16.mxu0 %v14494_v50 }
 0x544   : > { %6791 = vmatpush1.bf16.msra.mxu0 %v14495_v5 }
 0x545   : > { %6792 = vmatprep.subr.bf16.mxu0 %v14494_v50 }
 0x548   : > { %6793 = vmatpush1.bf16.msra.mxu0 %v14495_v5 }
 0x549   : > { %6794 = vmatprep.subr.bf16.mxu0 %v14494_v50 }
 0x54c   : > { %6795 = vmatpush1.bf16.msra.mxu0 %v14495_v5 }
 0x54d   : > { %6796 = vmatprep.subr.bf16.mxu0 %v14494_v50 }
 0x550   : > { %6797 = vmatpush1.bf16.msra.mxu0 %v14495_v5 }
 0x551   : > { %6798 = vmatprep.subr.bf16.mxu0 %v14494_v50 }
 0x554   : > { %6799 = vmatpush1.bf16.msra.mxu0 %v14495_v5 }
 0x555   : > { %6800 = vmatprep.subr.bf16.mxu0 %v14494_v50 }
 0x558   : > { %6801 = vmatpush1.bf16.msra.mxu0 %v14495_v5 }
 0x559   : > { %6802 = vmatprep.subr.bf16.mxu0 %v14494_v50 }
 0x55c   : > { %6803 = vmatpush1.bf16.msra.mxu0 %v14495_v5 }
 0x55d   : > { %6804 = vmatprep.subr.bf16.mxu0 %v14494_v50 }
 0x560   : > { %6805 = vmatpush1.bf16.msra.mxu0 %v14495_v5 }
 0x561   : > { %6806 = vmatprep.subr.bf16.mxu0 %v14494_v50 }
 0x564   : > { %6807 = vmatpush1.bf16.msra.mxu0 %v14495_v5 }
 0x565   : > { %6808 = vmatprep.subr.bf16.mxu0 %v14494_v50 }
 0x568   : > { %6809 = vmatpush1.bf16.msra.mxu0 %v14495_v5 }
 0x569   : > { %6810 = vmatprep.subr.bf16.mxu0 %v14494_v50 }
 0x56c   : > { %6811 = vmatpush1.bf16.msra.mxu0 %v14495_v5 }
 0x56d   : > { %6812 = vmatprep.subr.bf16.mxu0 %v14494_v50 }
 0x570   : > { %6813 = vmatpush1.bf16.msra.mxu0 %v14495_v5 }
 0x571   : > { %6814 = vmatprep.subr.bf16.mxu0 %v14494_v50 }
 0x574   : > { %6815 = vmatpush1.bf16.msra.mxu0 %v14495_v5 }
 0x575   : > { %6816 = vmatprep.subr.bf16.mxu0 %v14494_v50 }
 0x578   : > { %6817 = vmatpush1.bf16.msra.mxu0 %v14495_v5 }
 0x579   : > { %6818 = vmatprep.subr.bf16.mxu0 %v14494_v50 }
 0x57c   : > { %6819 = vmatpush1.bf16.msra.mxu0 %v14495_v5 }
 0x612   : > { %v2732_v25 = vpop.f32.mrb[64].mxu0 }
 0x613   : > { %v2733_v30 = vadd.f32 1e-30, %v2732_v25  ;;  %v2734_v55 = vpop.f32.mrb[65].mxu0 }
 0x614   : > { %v2735_v12 = vadd.f32 1e-30, %v2734_v55 }
 0x615   : > { %7837 = vlog2.f32 %v2733_v30 }
 0x616   : > { %7839 = vlog2.f32 %v2735_v12 }
 0x61f   : > { %v7838_v39 = vpop.eup %7837 }
 0x620   : > { %v7840_v52 = vpop.eup %7839  ;;  %v2738_v59 = vmul.f32 0.6931472, %v7838_v39 }
 0x621   : > { %v2740_v29 = vmul.f32 0.6931472, %v7840_v52 }
 0x623   : > { %v2743_v40 = vcombine.low %v2738_v59, %v2740_v29 }
 0x625   : > { %v2750_v33 = vrot.slane %v2743_v40, %v10396_v26 }
 0x627   : > { %v2757_v3 = vrot.slane %v2750_v33, %v10396_v26 }
 0x629   : > { %v2759_v41 = vsub.f32 %v10399_v7, %v2757_v3 }
 0x62b   : > { %v11187_v10 = vadd.f32 %v2759_v41, %v10403_v13 }
 0x62d   : > { %v11191_v46 = vrot.slane %v11187_v10, %v10037_v4  ;;  %v11195_v21 = vrot.slane %v11187_v10, %v10040_v2 }
 0x62f   : > { %v2772_v23 = vadd.f32 %v11191_v46, %v10705_v15  ;;  %v2773_v57 = vadd.f32 %v11195_v21, %v10710_v45  ;;  %v2775_v25 = vadd.f32 %v11195_v21, %v10724_v36  ;;  %v2774_v13 = vadd.f32 %v11191_v46, %v10719_v14 }
 0x630   : > { %v2777_v12 = vadd.f32 %v11195_v21, %v10738_v24  ;;  %v2776_v15 = vadd.f32 %v11191_v46, %v10733_v20  ;;  %v2779_v45 = vadd.f32 %v11195_v21, %v10752_v19  ;;  %v2778_v14 = vadd.f32 %v11191_v46, %v10747_v51 }
 0x631   : > { %v2836_v30 = vmul.f32 1.442695, %v2772_v23  ;;  %v2838_v55 = vmul.f32 1.442695, %v2773_v57  ;;  %v2842_v39 = vmul.f32 1.442695, %v2775_v25  ;;  %v2781_v24 = vadd.f32 %v11195_v21, %v10766_v32 }
 0x632   : > { %v2840_v52 = vmul.f32 1.442695, %v2774_v13  ;;  %v2846_v36 = vmul.f32 1.442695, %v2777_v12  ;;  %v2844_v59 = vmul.f32 1.442695, %v2776_v15  ;;  %v2780_v20 = vadd.f32 %v11191_v46, %v10761_v42 }
 0x633   : > { %7841 = vpow2.f32 %v2836_v30  ;;  %v2850_v29 = vmul.f32 1.442695, %v2779_v45  ;;  %v2848_v33 = vmul.f32 1.442695, %v2778_v14  ;;  %v2783_v19 = vadd.f32 %v11195_v21, %v10780_v44 }
 0x634   : > { %7843 = vpow2.f32 %v2838_v55  ;;  %v2854_v41 = vmul.f32 1.442695, %v2781_v24  ;;  %v2782_v32 = vadd.f32 %v11191_v46, %v10775_v27  ;;  %v2852_v23 = vmul.f32 1.442695, %v2780_v20 }
 0x635   : > { %7845 = vpow2.f32 %v2842_v39  ;;  %v2785_v42 = vadd.f32 %v11195_v21, %v10794_v34  ;;  %v2858_v57 = vmul.f32 1.442695, %v2783_v19  ;;  %v2784_v44 = vadd.f32 %v11191_v46, %v10789_v60 }
 0x636   : > { %7847 = vpow2.f32 %v2840_v52  ;;  %v2856_v30 = vmul.f32 1.442695, %v2782_v32  ;;  %v2787_v27 = vadd.f32 %v11195_v21, %v10808_v9  ;;  %v2786_v34 = vadd.f32 %v11191_v46, %v10803_v62 }
 0x637   : > { %7849 = vpow2.f32 %v2846_v36  ;;  %v2862_v55 = vmul.f32 1.442695, %v2785_v42  ;;  %v2860_v15 = vmul.f32 1.442695, %v2784_v44  ;;  %v2789_v60 = vadd.f32 %v11195_v21, %v10822_v17 }
 0x638   : > { %7851 = vpow2.f32 %v2844_v59  ;;  %v2866_v52 = vmul.f32 1.442695, %v2787_v27  ;;  %v2788_v9 = vadd.f32 %v11191_v46, %v10817_v11  ;;  %v2864_v14 = vmul.f32 1.442695, %v2786_v34 }
 0x639   : > { %7853 = vpow2.f32 %v2850_v29  ;;  %v2791_v62 = vadd.f32 %v11195_v21, %v10836_v63  ;;  %v2870_v59 = vmul.f32 1.442695, %v2789_v60  ;;  %v2790_v17 = vadd.f32 %v11191_v46, %v10831_v61 }
 0x63a   : > { %7855 = vpow2.f32 %v2848_v33  ;;  %v2793_v11 = vadd.f32 %v11195_v21, %v10850_v0  ;;  %v2792_v63 = vadd.f32 %v11191_v46, %v10845_v49  ;;  %v2795_v61 = vadd.f32 %v11195_v21, %v10864_v22 }
 0x63b   : > { %7857 = vpow2.f32 %v2854_v41  ;;  %v2874_v20 = vmul.f32 1.442695, %v2791_v62  ;;  %v2872_v19 = vmul.f32 1.442695, %v2790_v17  ;;  %v2794_v0 = vadd.f32 %v11191_v46, %v10859_v56 }
 0x63c   : > { %7859 = vpow2.f32 %v2852_v23  ;;  %v2878_v41 = vmul.f32 1.442695, %v2793_v11  ;;  %v2876_v23 = vmul.f32 1.442695, %v2792_v63  ;;  %v2797_v49 = vadd.f32 %v11195_v21, %v10878_v47  ;;  %v14496_v63 = vld [vmem:[#allocation27_spill] sm:$0xff] }
 0x63d   : > { %v7842_v40 = vpop.eup %7841  ;;  %7861 = vpow2.f32 %v2858_v57  ;;  %v2882_v42 = vmul.f32 1.442695, %v2795_v61  ;;  %v2796_v22 = vadd.f32 %v11191_v46, %v10873_v8  ;;  %v2799_v56 = vadd.f32 %v11195_v21, %v10892_v37 }
 0x63e   : > { %v7844_v3 = vpop.eup %7843  ;;  %7863 = vpow2.f32 %v2856_v30  ;;  %v2886_v44 = vmul.f32 1.442695, %v2797_v49  ;;  %v2798_v47 = vadd.f32 %v11191_v46, %v10887_v6  ;;  %v2801_v8 = vadd.f32 %v11195_v21, %v10906_v48 }
 0x63f   : > { %3028 = vmatprep.mubr.f32.mxu0 %v7844_v3  ;;  %v7846_v51 = vpop.eup %7845  ;;  %7865 = vpow2.f32 %v2862_v55  ;;  %v2884_v55 = vmul.f32 1.442695, %v2796_v22  ;;  %v2800_v37 = vadd.f32 %v11191_v46, %v10901_v18  ;;  %v2803_v6 = vadd.f32 %v11195_v21, %v10920_v16 }
 0x640   : > { %3029 = vmatmul.mubr.f32.vlgmr.msra.gmra.mrb[66].mxu0 %v7842_v40  ;;  %v7848_v25 = vpop.eup %7847  ;;  %7867 = vpow2.f32 %v2860_v15  ;;  %v2868_v40 = vmul.f32 1.442695, %v2788_v9  ;;  %v2888_v15 = vmul.f32 1.442695, %v2798_v47  ;;  %v2894_v60 = vmul.f32 1.442695, %v2801_v8 }
 0x641   : > { %3033 = vmatprep.mubr.f32.mxu0 %v7846_v51  ;;  %v7850_v13 = vpop.eup %7849  ;;  %7869 = vpow2.f32 %v2866_v52  ;;  %v2802_v48 = vadd.f32 %v11191_v46, %v10915_v28  ;;  %v2805_v18 = vadd.f32 %v11195_v21, %v10934_v54  ;;  %v2898_v9 = vmul.f32 1.442695, %v2803_v6  ;;  %v14501_v47 = vld [vmem:[#allocation33_spill] sm:$0xff] }
 0x642   : > { %v7852_v12 = vpop.eup %7851  ;;  %7871 = vpow2.f32 %v2864_v14  ;;  %v2804_v16 = vadd.f32 %v11191_v46, %v10929_v58  ;;  %v2807_v28 = vadd.f32 %v11195_v21, %v10948_v1  ;;  %v2806_v54 = vadd.f32 %v11191_v46, %v10943_v31  ;;  %v14503_v6 = vld [vmem:[#allocation37_spill] sm:$0xff] }
 0x643   : > { %v7854_v39 = vpop.eup %7853  ;;  %7873 = vpow2.f32 %v2870_v59  ;;  %v2896_v59 = vmul.f32 1.442695, %v2802_v48  ;;  %v2809_v58 = vadd.f32 %v11195_v21, %v10962_v53  ;;  %v2808_v1 = vadd.f32 %v11191_v46, %v10957_v38  ;;  %v14497_v53 = vld [vmem:[#allocation25_spill] sm:$0xff] }
 0x644   : > { %3034 = vmatmul.mubr.f32.gmra.mrb[68].mxu0 %v7848_v25  ;;  %v7856_v45 = vpop.eup %7855  ;;  %7875 = vpow2.f32 %v2868_v40  ;;  %v2900_v40 = vmul.f32 1.442695, %v2804_v16  ;;  %v2906_v11 = vmul.f32 1.442695, %v2807_v28  ;;  %v2811_v31 = vadd.f32 %v11195_v21, %v14496_v63  ;;  %v14509_v63 = vld [vmem:[#allocation49_spill] sm:$0xff] }
 0x645   : > { %3038 = vmatprep.mubr.f32.mxu0 %v7850_v13  ;;  %v7858_v36 = vpop.eup %7857  ;;  %7877 = vpow2.f32 %v2874_v20  ;;  %v2880_v13 = vmul.f32 1.442695, %v2794_v0  ;;  %v14498_v0 = vld [vmem:[#allocation31_spill] sm:$0xff] }
 0x646   : > { %v7860_v24 = vpop.eup %7859  ;;  %7879 = vpow2.f32 %v2872_v19  ;;  %v2910_v19 = vmul.f32 1.442695, %v2809_v58  ;;  %v2813_v38 = vadd.f32 %v11195_v21, %v14498_v0  ;;  %v14511_v0 = vld [vmem:[#allocation53_spill] sm:$0xff] }
 0x647   : > { %v7862_v29 = vpop.eup %7861  ;;  %7881 = vpow2.f32 %v2878_v41 }
 0x648   : > { %3039 = vmatmul.mubr.f32.gmra.mrb[70].mxu0 %v7852_v12  ;;  %v7864_v33 = vpop.eup %7863  ;;  %7883 = vpow2.f32 %v2876_v23  ;;  %v2890_v12 = vmul.f32 1.442695, %v2799_v56  ;;  %v2914_v23 = vmul.f32 1.442695, %v2811_v31  ;;  %v2822_v31 = vadd.f32 %v11191_v46, %v14509_v63 }
 0x649   : > { %3043 = vmatprep.mubr.f32.mxu0 %v7854_v39  ;;  %v7866_v3 = vpop.eup %7865  ;;  %7885 = vpow2.f32 %v2882_v42 }
 0x64a   : > { %v7868_v51 = vpop.eup %7867  ;;  %7887 = vpow2.f32 %v2880_v13  ;;  %v14500_v13 = vld [vmem:[#allocation35_spill] sm:$0xff] }
 0x64b   : > { %v7870_v32 = vpop.eup %7869  ;;  %7889 = vpow2.f32 %v2886_v44  ;;  %v2815_v56 = vadd.f32 %v11195_v21, %v14500_v13  ;;  %v2918_v44 = vmul.f32 1.442695, %v2813_v38  ;;  %v2824_v38 = vadd.f32 %v11191_v46, %v14511_v0  ;;  %v14513_v13 = vld [vmem:[#allocation57_spill] sm:$0xff] }
 0x64c   : > { %3044 = vmatmul.mubr.f32.gmra.mrb[72].mxu0 %v7856_v45  ;;  %v7872_v57 = vpop.eup %7871  ;;  %7891 = vpow2.f32 %v2884_v55  ;;  %v2814_v55 = vadd.f32 %v11191_v46, %v14501_v47 }
 0x64d   : > { %3048 = vmatprep.mubr.f32.mxu0 %v7858_v36  ;;  %v7874_v25 = vpop.eup %7873  ;;  %7893 = vpow2.f32 %v2890_v12  ;;  %v2892_v36 = vmul.f32 1.442695, %v2800_v37  ;;  %v14502_v12 = vld [vmem:[#allocation39_spill] sm:$0xff] }
 0x64e   : > { %v7876_v30 = vpop.eup %7875  ;;  %7895 = vpow2.f32 %v2888_v15 }
 0x64f   : > { %v7878_v27 = vpop.eup %7877  ;;  %7897 = vpow2.f32 %v2894_v60  ;;  %v2816_v60 = vadd.f32 %v11191_v46, %v14503_v6 }
 0x650   : > { %3049 = vmatmul.mubr.f32.gmra.mrb[74].mxu0 %v7860_v24  ;;  %v7880_v39 = vpop.eup %7879  ;;  %7899 = vpow2.f32 %v2892_v36  ;;  %v2902_v24 = vmul.f32 1.442695, %v2805_v18 }
 0x651   : > { %3053 = vmatprep.mubr.f32.mxu0 %v7862_v29  ;;  %v7882_v34 = vpop.eup %7881  ;;  %7901 = vpow2.f32 %v2898_v9  ;;  %v2924_v16 = vmul.f32 1.442695, %v2816_v60 }
 0x652   : > { %v7884_v52 = vpop.eup %7883  ;;  %7903 = vpow2.f32 %v2896_v59  ;;  %v14506_v59 = vld [vmem:[#allocation47_spill] sm:$0xff] }
 0x653   : > { %v7886_v45 = vpop.eup %7885  ;;  %7905 = vpow2.f32 %v2902_v24  ;;  %v2821_v28 = vadd.f32 %v11195_v21, %v14506_v59  ;;  %v14519_v59 = vld [vmem:[#allocation88_spill] sm:$0xff] }
 0x654   : > { %3054 = vmatmul.mubr.f32.gmra.mrb[76].mxu0 %v7864_v33  ;;  %v7888_v14 = vpop.eup %7887  ;;  %7907 = vpow2.f32 %v2900_v40 }
 0x655   : > { %3058 = vmatprep.mubr.f32.mxu0 %v7866_v3  ;;  %v7890_v62 = vpop.eup %7889  ;;  %v2904_v3 = vmul.f32 1.442695, %v2806_v54  ;;  %7909 = vpow2.f32 %v2906_v11  ;;  %v14507_v54 = vld [vmem:[#allocation45_spill] sm:$0xff]  ;;  %v14508_v11 = vld [vmem:[#allocation51_spill] sm:$0xff] }
 0x656   : > { %v7892_v29 = vpop.eup %7891  ;;  %v2820_v40 = vadd.f32 %v11191_v46, %v14507_v54 }
 0x657   : > { %v7894_v17 = vpop.eup %7893  ;;  %7911 = vpow2.f32 %v2904_v3 }
 0x658   : > { %3059 = vmatmul.mubr.f32.gmra.mrb[78].mxu0 %v7868_v51  ;;  %v7896_v20 = vpop.eup %7895  ;;  %v2810_v51 = vadd.f32 %v11191_v46, %v14497_v53  ;;  %7913 = vpow2.f32 %v2910_v19  ;;  %v2932_v19 = vmul.f32 1.442695, %v2820_v40 }
 0x659   : > { %3063 = vmatprep.mubr.f32.mxu0 %v7870_v32  ;;  %v7898_v33 = vpop.eup %7897  ;;  %v2908_v32 = vmul.f32 1.442695, %v2808_v1 }
 0x65a   : > { %v7900_v61 = vpop.eup %7899  ;;  %v2912_v22 = vmul.f32 1.442695, %v2810_v51 }
 0x65b   : > { %v7902_v41 = vpop.eup %7901  ;;  %7915 = vpow2.f32 %v2908_v32 }
 0x65c   : > { %3064 = vmatmul.mubr.f32.gmra.mrb[80].mxu0 %v7872_v57  ;;  %v7904_v49 = vpop.eup %7903  ;;  %v14499_v57 = vld [vmem:[#allocation29_spill] sm:$0xff]  ;;  %7917 = vpow2.f32 %v2914_v23  ;;  %v2936_v23 = vmul.f32 1.442695, %v2822_v31 }
 0x65d   : > { %3068 = vmatprep.mubr.f32.mxu0 %v7874_v25  ;;  %v7906_v42 = vpop.eup %7905  ;;  %v2812_v25 = vadd.f32 %v11191_v46, %v14499_v57  ;;  %7919 = vpow2.f32 %v2912_v22 }
 0x65e   : > { %7921 = vpow2.f32 %v2918_v44  ;;  %v2940_v44 = vmul.f32 1.442695, %v2824_v38 }
 0x65f   : > { %v2916_v8 = vmul.f32 1.442695, %v2812_v25 }
 0x660   : > { %3069 = vmatmul.mubr.f32.gmra.mrb[82].mxu0 %v7876_v30  ;;  %v7908_v30 = vpop.eup %7907 }
 0x661   : > { %3073 = vmatprep.mubr.f32.mxu0 %v7878_v27  ;;  %v7910_v27 = vpop.eup %7909  ;;  %7923 = vpow2.f32 %v2916_v8 }
 0x662   : > { %v7912_v37 = vpop.eup %7911 }
 0x663   : > { %v7914_v15 = vpop.eup %7913 }
 0x664   : > { %3074 = vmatmul.mubr.f32.gmra.mrb[84].mxu0 %v7880_v39  ;;  %v2817_v39 = vadd.f32 %v11195_v21, %v14502_v12  ;;  %v14515_v12 = vld [vmem:[#allocation61_spill] sm:$0xff] }
 0x665   : > { %3078 = vmatprep.mubr.f32.mxu0 %v7882_v34  ;;  %v2922_v34 = vmul.f32 1.442695, %v2815_v56  ;;  %v7916_v18 = vpop.eup %7915  ;;  %v2826_v56 = vadd.f32 %v11191_v46, %v14513_v13 }
 0x666   : > { %v2926_v36 = vmul.f32 1.442695, %v2817_v39  ;;  %v7918_v9 = vpop.eup %7917  ;;  %v2828_v39 = vadd.f32 %v11191_v46, %v14515_v12 }
 0x667   : > { %7925 = vpow2.f32 %v2922_v34  ;;  %v2944_v34 = vmul.f32 1.442695, %v2826_v56 }
 0x668   : > { %3079 = vmatmul.mubr.f32.gmra.mrb[86].mxu0 %v7884_v52  ;;  %v2920_v52 = vmul.f32 1.442695, %v2814_v55 }
 0x669   : > { %3083 = vmatprep.mubr.f32.mxu0 %v7886_v45  ;;  %v14504_v45 = vld [vmem:[#allocation43_spill] sm:$0xff] }
 0x66a   : > { %v2819_v48 = vadd.f32 %v11195_v21, %v14504_v45  ;;  %7927 = vpow2.f32 %v2920_v52  ;;  %v14517_v45 = vld [vmem:[#allocation65_spill] sm:$0xff] }
 0x66b   : > { %7929 = vpow2.f32 %v2926_v36  ;;  %v2948_v36 = vmul.f32 1.442695, %v2828_v39 }
 0x66c   : > { %3084 = vmatmul.mubr.f32.gmra.mrb[88].mxu0 %v7888_v14  ;;  %v14505_v14 = vld [vmem:[#allocation41_spill] sm:$0xff]  ;;  %v2930_v24 = vmul.f32 1.442695, %v2819_v48  ;;  %7931 = vpow2.f32 %v2924_v16  ;;  %v2830_v48 = vadd.f32 %v11191_v46, %v14517_v45 }
 0x66d   : > { %3088 = vmatprep.mubr.f32.mxu0 %v7890_v62  ;;  %v2818_v62 = vadd.f32 %v11191_v46, %v14505_v14 }
 0x66e   : > { %7933 = vpow2.f32 %v2930_v24  ;;  %v2952_v24 = vmul.f32 1.442695, %v2830_v48 }
 0x66f   : > { %v2928_v58 = vmul.f32 1.442695, %v2818_v62 }
 0x670   : > { %3089 = vmatmul.mubr.f32.gmra.mrb[90].mxu0 %v7892_v29  ;;  %v7920_v29 = vpop.eup %7919 }
 0x671   : > { %3093 = vmatprep.mubr.f32.mxu0 %v7894_v17  ;;  %v7922_v17 = vpop.eup %7921  ;;  %7935 = vpow2.f32 %v2928_v58  ;;  %v14520_v58 = vld [vmem:[#allocation90_spill] sm:$0xff] }
 0x672   : > { %v7924_v1 = vpop.eup %7923 }
 0x673   : > { %v7926_v3 = vpop.eup %7925 }
 0x674   : > { %3094 = vmatmul.mubr.f32.gmra.mrb[92].mxu0 %v7896_v20  ;;  %v2823_v20 = vadd.f32 %v11195_v21, %v14508_v11  ;;  %v7928_v51 = vpop.eup %7927  ;;  %v2834_v11 = vadd.f32 %v11191_v46, %v14520_v58 }
 0x675   : > { %3098 = vmatprep.mubr.f32.mxu0 %v7898_v33  ;;  %v2934_v33 = vmul.f32 1.442695, %v2821_v28  ;;  %v7930_v32 = vpop.eup %7929  ;;  %v2832_v28 = vadd.f32 %v11191_v46, %v14519_v59 }
 0x676   : > { %v2938_v53 = vmul.f32 1.442695, %v2823_v20  ;;  %v7932_v25 = vpop.eup %7931  ;;  %v2960_v63 = vmul.f32 1.442695, %v2834_v11  ;;  %v14530_v11 = vld [vmem:[#allocation8_spill] sm:$0xff] }
 0x677   : > { %7937 = vpow2.f32 %v2934_v33  ;;  %v2956_v20 = vmul.f32 1.442695, %v2832_v28 }
 0x678   : > { %3099 = vmatmul.mubr.f32.gmra.mrb[94].mxu0 %v7900_v61  ;;  %v14510_v61 = vld [vmem:[#allocation55_spill] sm:$0xff]  ;;  %7939 = vpow2.f32 %v2932_v19  ;;  %v7934_v22 = vpop.eup %7933 }
 0x679   : > { %3103 = vmatprep.mubr.f32.mxu0 %v7902_v41  ;;  %v2825_v41 = vadd.f32 %v11195_v21, %v14510_v61  ;;  %7941 = vpow2.f32 %v2938_v53 }
 0x67a   : > { %7943 = vpow2.f32 %v2936_v23 }
 0x67b   : > { %v2942_v57 = vmul.f32 1.442695, %v2825_v41  ;;  %v7936_v55 = vpop.eup %7935 }
 0x67c   : > { %3104 = vmatmul.mubr.f32.gmra.mrb[96].mxu0 %v7904_v49  ;;  %v14512_v49 = vld [vmem:[#allocation59_spill] sm:$0xff] }
 0x67d   : > { %3108 = vmatprep.mubr.f32.mxu0 %v7906_v42  ;;  %v2827_v42 = vadd.f32 %v11195_v21, %v14512_v49  ;;  %7945 = vpow2.f32 %v2942_v57 }
 0x67e   : > { %7947 = vpow2.f32 %v2940_v44 }
 0x67f   : > { %v2946_v47 = vmul.f32 1.442695, %v2827_v42 }
 0x680   : > { %3109 = vmatmul.mubr.f32.gmra.mrb[98].mxu0 %v7908_v30  ;;  %v14514_v30 = vld [vmem:[#allocation63_spill] sm:$0xff] }
 0x681   : > { %3113 = vmatprep.mubr.f32.mxu0 %v7910_v27  ;;  %v2829_v27 = vadd.f32 %v11195_v21, %v14514_v30  ;;  %v7938_v8 = vpop.eup %7937  ;;  %7949 = vpow2.f32 %v2946_v47  ;;  %v14521_v47 = vld [vmem:[#allocation2_spill] sm:$0xff] }
 0x682   : > { %v7940_v60 = vpop.eup %7939  ;;  %7951 = vpow2.f32 %v2944_v34 }
 0x683   : > { %v2950_v6 = vmul.f32 1.442695, %v2829_v27  ;;  %v7942_v52 = vpop.eup %7941 }
 0x684   : > { %3114 = vmatmul.mubr.f32.gmra.mrb[100].mxu0 %v7912_v37  ;;  %v14516_v37 = vld [vmem:[#allocation87_spill] sm:$0xff]  ;;  %v7944_v62 = vpop.eup %7943 }
 0x685   : > { %3118 = vmatprep.mubr.f32.mxu0 %v7914_v15  ;;  %v2831_v15 = vadd.f32 %v11195_v21, %v14516_v37  ;;  %7953 = vpow2.f32 %v2950_v6 }
 0x686   : > { %7955 = vpow2.f32 %v2948_v36 }
 0x687   : > { %v2954_v14 = vmul.f32 1.442695, %v2831_v15  ;;  %v7946_v16 = vpop.eup %7945  ;;  %v14522_v15 = vld [vmem:[#allocation67_spill] sm:$0xff] }
 0x688   : > { %3119 = vmatmul.mubr.f32.gmra.mrb[102].mxu0 %v7916_v18  ;;  %v14518_v18 = vld [vmem:[#allocation89_spill] sm:$0xff]  ;;  %v7948_v54 = vpop.eup %7947 }
 0x689   : > { %3123 = vmatprep.mubr.f32.mxu0 %v7918_v9  ;;  %v2833_v9 = vadd.f32 %v11195_v21, %v14518_v18  ;;  %7957 = vpow2.f32 %v2954_v14  ;;  %v14525_v14 = vld [vmem:[#allocation66_spill] sm:$0xff] }
 0x68a   : > { %7959 = vpow2.f32 %v2952_v24 }
 0x68b   : > { %v7950_v40 = vpop.eup %7949 }
 0x68c   : > { %3124 = vmatmul.mubr.f32.gmra.mrb[104].mxu0 %v7920_v29  ;;  %v2835_v29 = vadd.f32 %v11195_v21, %v11144_v35 }
 0x68d   : > { %3128 = vmatprep.mubr.f32.mxu0 %v7922_v17  ;;  %v2958_v17 = vmul.f32 1.442695, %v2833_v9 }
 0x68e   : > { %v2962_v33 = vmul.f32 1.442695, %v2835_v29 }
 0x68f   : > { %7961 = vpow2.f32 %v2958_v17 }
 0x690   : > { %3129 = vmatmul.mubr.f32.gmra.mrb[106].mxu0 %v7924_v1  ;;  %v7952_v1 = vpop.eup %7951  ;;  %7963 = vpow2.f32 %v2956_v20 }
 0x691   : > { %3133 = vmatprep.mubr.f32.mxu0 %v7926_v3  ;;  %v7954_v3 = vpop.eup %7953  ;;  %7965 = vpow2.f32 %v2962_v33 }
 0x692   : > { %v7956_v35 = vpop.eup %7955  ;;  %7967 = vpow2.f32 %v2960_v63 }
 0x693   : > { %v7958_v31 = vpop.eup %7957 }
 0x694   : > { %3134 = vmatmul.mubr.f32.gmra.mrb[108].mxu0 %v7928_v51  ;;  %v7960_v19 = vpop.eup %7959 }
 0x695   : > { %3138 = vmatprep.mubr.f32.mxu0 %v7930_v32 }
 0x698   : > { %3139 = vmatmul.mubr.f32.gmra.mrb[110].mxu0 %v7932_v25 }
 0x699   : > { %3143 = vmatprep.mubr.f32.mxu0 %v7934_v22  ;;  %v7962_v61 = vpop.eup %7961 }
 0x69a   : > { %v7964_v41 = vpop.eup %7963 }
 0x69b   : > { %v7966_v53 = vpop.eup %7965 }
 0x69c   : > { %3144 = vmatmul.mubr.f32.gmra.mrb[112].mxu0 %v7936_v55  ;;  %v7968_v51 = vpop.eup %7967 }
 0x69d   : > { %3148 = vmatprep.mubr.f32.mxu0 %v7938_v8 }
 0x6a0   : > { %3149 = vmatmul.mubr.f32.gmra.mrb[114].mxu0 %v7940_v60  ;;  %v14524_v60 = vld [vmem:[#allocation4_spill] sm:$0xff] }
 0x6a1   : > { %3153 = vmatprep.mubr.f32.mxu0 %v7942_v52 }
 0x6a4   : > { %3154 = vmatmul.mubr.f32.gmra.mrb[116].mxu0 %v7944_v62 }
 0x6a5   : > { %3158 = vmatprep.mubr.f32.mxu0 %v7946_v16  ;;  %v14527_v16 = vld [vmem:[#allocation6_spill] sm:$0xff] }
 0x6a8   : > { %3159 = vmatmul.mubr.f32.gmra.mrb[118].mxu0 %v7948_v54 }
 0x6a9   : > { %3163 = vmatprep.mubr.f32.mxu0 %v7950_v40  ;;  %v14528_v40 = vld [vmem:[#allocation69_spill] sm:$0xff] }
 0x6ac   : > { %3164 = vmatmul.mubr.f32.gmra.mrb[120].mxu0 %v7952_v1 }
 0x6ad   : > { %3168 = vmatprep.mubr.f32.mxu0 %v7954_v3 }
 0x6b0   : > { %3169 = vmatmul.mubr.f32.gmra.mrb[122].mxu0 %v7956_v35 }
 0x6b1   : > { %3173 = vmatprep.mubr.f32.mxu0 %v7958_v31  ;;  %v14531_v31 = vld [vmem:[#allocation68_spill] sm:$0xff] }
 0x6b4   : > { %3174 = vmatmul.mubr.f32.gmra.mrb[124].mxu0 %v7960_v19 }
 0x6b5   : > { %3178 = vmatprep.mubr.f32.mxu0 %v7962_v61  ;;  %v14533_v61 = vld [vmem:[#allocation10_spill] sm:$0xff] }
 0x6b8   : > { %3179 = vmatmul.mubr.f32.gmra.mrb[126].mxu0 %v7964_v41 }
 0x6b9   : > { %3183 = vmatprep.mubr.f32.mxu0 %v7966_v53 }
 0x6bc   : > { %3184 = vmatmul.mubr.f32.gmra.mrb[128].mxu0 %v7968_v51 }
 0x6bd   : > { %4864 = vmatprep.mubr.f32.mxu0 %v14350_v43 }
 0x713   : > { %v3030_v32 = vpop.f32.mrb[66].mxu0 }
 0x714   : > { %v3031_v0 = vadd.f32 1e-30, %v3030_v32  ;;  %v3032_v38 = vpop.f32.mrb[67].mxu0 }
 0x716   : > { %7969 = vlog2.f32 %v3031_v0 }
 0x717   : > { %v3035_v23 = vpop.f32.mrb[68].mxu0 }
 0x718   : > { %v3036_v49 = vadd.f32 1e-30, %v3035_v23  ;;  %v3037_v42 = vpop.f32.mrb[69].mxu0  ;;  %v14534_v23 = vld [vmem:[#allocation71_spill] sm:$0xff] }
 0x719   : > { %v14536_v42 = vld [vmem:[#allocation12_spill] sm:$0xff] }
 0x71a   : > { %7971 = vlog2.f32 %v3036_v49 }
 0x71b   : > { %v3040_v57 = vpop.f32.mrb[70].mxu0 }
 0x71c   : > { %v3041_v25 = vadd.f32 1e-30, %v3040_v57  ;;  %v3042_v22 = vpop.f32.mrb[71].mxu0 }
 0x71e   : > { %7973 = vlog2.f32 %v3041_v25 }
 0x71f   : > { %v3045_v13 = vpop.f32.mrb[72].mxu0 }
 0x720   : > { %v7970_v56 = vpop.eup %7969  ;;  %v3046_v44 = vadd.f32 1e-30, %v3045_v13  ;;  %v3047_v30 = vpop.f32.mrb[73].mxu0 }
 0x721   : > { %v3190_v27 = vmul.f32 0.6931472, %v7970_v56  ;;  %v14537_v30 = vld [vmem:[#allocation70_spill] sm:$0xff] }
 0x722   : > { %7975 = vlog2.f32 %v3046_v44 }
 0x723   : > { %v3253_v55 = vsub.f32 %v14521_v47, %v3190_v27  ;;  %v3050_v8 = vpop.f32.mrb[74].mxu0 }
 0x724   : > { %v7972_v12 = vpop.eup %7971  ;;  %v3051_v39 = vadd.f32 1e-30, %v3050_v8  ;;  %v3052_v34 = vpop.f32.mrb[75].mxu0 }
 0x725   : > { %v3192_v37 = vmul.f32 0.6931472, %v7972_v12  ;;  %v11328_v6 = vadd.f32 %v3253_v55, %v14522_v15  ;;  %v14539_v55 = vld [vmem:[#allocation14_spill] sm:$0xff] }
 0x726   : > { %7977 = vlog2.f32 %v3051_v39 }
 0x727   : > { %14523 = vst [vmem:[#allocation27_spill] sm:$0xff] %v11328_v6  ;;  %v3254_v52 = vsub.f32 %v14524_v60, %v3192_v37  ;;  %v3055_v45 = vpop.f32.mrb[76].mxu0  ;;  %3319 = vperm.xlu1 %7122, %v11328_v6  }
 0x728   : > { %v7974_v48 = vpop.eup %7973  ;;  %v3056_v36 = vadd.f32 1e-30, %v3055_v45  ;;  %v3057_v18 = vpop.f32.mrb[77].mxu0 }
 0x729   : > { %v3194_v9 = vmul.f32 0.6931472, %v7974_v48  ;;  %v11333_v62 = vadd.f32 %v3254_v52, %v14525_v14  ;;  %v14540_v52 = vld [vmem:[#allocation73_spill] sm:$0xff]  ;;  %v14542_v48 = vld [vmem:[#allocation16_spill] sm:$0xff] }
 0x72a   : > { %7979 = vlog2.f32 %v3056_v36 }
 0x72b   : > { %14526 = vst [vmem:[#allocation25_spill] sm:$0xff] %v11333_v62  ;;  %v3255_v59 = vsub.f32 %v14527_v16, %v3194_v9  ;;  %v3060_v28 = vpop.f32.mrb[78].mxu0  ;;  %3324 = vperm.xlu0 %7121, %v11333_v62  }
 0x72c   : > { %v7976_v24 = vpop.eup %7975  ;;  %v3061_v29 = vadd.f32 1e-30, %v3060_v28  ;;  %v3062_v17 = vpop.f32.mrb[79].mxu0 }
 0x72d   : > { %v3196_v54 = vmul.f32 0.6931472, %v7976_v24  ;;  %v11338_v58 = vadd.f32 %v3255_v59, %v14528_v40  ;;  %v14543_v24 = vld [vmem:[#allocation72_spill] sm:$0xff]  ;;  %v14545_v17 = vld [vmem:[#allocation18_spill] sm:$0xff] }
 0x72e   : > { %7981 = vlog2.f32 %v3061_v29 }
 0x72f   : > { %14529 = vst [vmem:[#allocation31_spill] sm:$0xff] %v11338_v58  ;;  %v3256_v20 = vsub.f32 %v14530_v11, %v3196_v54  ;;  %v3065_v33 = vpop.f32.mrb[80].mxu0  ;;  %3329 = vperm.xlu1 %7122, %v11338_v58  }
 0x730   : > { %v7978_v1 = vpop.eup %7977  ;;  %v3066_v3 = vadd.f32 1e-30, %v3065_v33  ;;  %v3067_v63 = vpop.f32.mrb[81].mxu0 }
 0x731   : > { %v3198_v35 = vmul.f32 0.6931472, %v7978_v1  ;;  %v11343_v19 = vadd.f32 %v3256_v20, %v14531_v31  ;;  %v14546_v63 = vld [vmem:[#allocation75_spill] sm:$0xff]  ;;  %v14548_v31 = vld [vmem:[#allocation20_spill] sm:$0xff] }
 0x732   : > { %7983 = vlog2.f32 %v3066_v3 }
 0x733   : > { %14532 = vst [vmem:[#allocation29_spill] sm:$0xff] %v11343_v19  ;;  %v3257_v41 = vsub.f32 %v14533_v61, %v3198_v35  ;;  %v3070_v53 = vpop.f32.mrb[82].mxu0  ;;  %3334 = vperm.xlu0 %7121, %v11343_v19  }
 0x734   : > { %v7980_v51 = vpop.eup %7979  ;;  %v3071_v32 = vadd.f32 1e-30, %v3070_v53  ;;  %v3072_v0 = vpop.f32.mrb[83].mxu0 }
 0x735   : > { %v3200_v38 = vmul.f32 0.6931472, %v7980_v51  ;;  %v11348_v49 = vadd.f32 %v3257_v41, %v14534_v23  ;;  %v14549_v23 = vld [vmem:[#allocation74_spill] sm:$0xff] }
 0x736   : > { %7985 = vlog2.f32 %v3071_v32 }
 0x737   : > { %14535 = vst [vmem:[#allocation35_spill] sm:$0xff] %v11348_v49  ;;  %v3258_v57 = vsub.f32 %v14536_v42, %v3200_v38  ;;  %v3075_v25 = vpop.f32.mrb[84].mxu0  ;;  %3339 = vperm.xlu1 %7122, %v11348_v49  }
 0x738   : > { %v7982_v22 = vpop.eup %7981  ;;  %v3076_v13 = vadd.f32 1e-30, %v3075_v25  ;;  %v3077_v56 = vpop.f32.mrb[85].mxu0  ;;  %v14551_v25 = vld [vmem:[#allocation22_spill] sm:$0xff] }
 0x739   : > { %v3202_v44 = vmul.f32 0.6931472, %v7982_v22  ;;  %v11353_v27 = vadd.f32 %v3258_v57, %v14537_v30 }
 0x73a   : > { %7987 = vlog2.f32 %v3076_v13 }
 0x73b   : > { %14538 = vst [vmem:[#allocation33_spill] sm:$0xff] %v11353_v27  ;;  %v3259_v8 = vsub.f32 %v14539_v55, %v3202_v44  ;;  %v3080_v12 = vpop.f32.mrb[86].mxu0  ;;  %3344 = vperm.xlu0 %7121, %v11353_v27  }
 0x73c   : > { %v7984_v39 = vpop.eup %7983  ;;  %v3081_v34 = vadd.f32 1e-30, %v3080_v12  ;;  %v3082_v37 = vpop.f32.mrb[87].mxu0  ;;  %v14552_v12 = vld [vmem:[#allocation77_spill] sm:$0xff] }
 0x73d   : > { %v3204_v15 = vmul.f32 0.6931472, %v7984_v39  ;;  %v11358_v45 = vadd.f32 %v3259_v8, %v14540_v52 }
 0x73e   : > { %7989 = vlog2.f32 %v3081_v34  ;;  %v14554_v34 = vld [vmem:[#allocation24_spill] sm:$0xff] }
 0x73f   : > { %14541 = vst [vmem:[#allocation39_spill] sm:$0xff] %v11358_v45  ;;  %v3260_v36 = vsub.f32 %v14542_v48, %v3204_v15  ;;  %v3085_v18 = vpop.f32.mrb[88].mxu0  ;;  %3349 = vperm.xlu1 %7122, %v11358_v45  }
 0x740   : > { %v7986_v9 = vpop.eup %7985  ;;  %v3086_v14 = vadd.f32 1e-30, %v3085_v18  ;;  %v3087_v59 = vpop.f32.mrb[89].mxu0 }
 0x741   : > { %v3206_v28 = vmul.f32 0.6931472, %v7986_v9  ;;  %v11363_v29 = vadd.f32 %v3260_v36, %v14543_v24 }
 0x742   : > { %7991 = vlog2.f32 %v3086_v14  ;;  %v14555_v14 = vld [vmem:[#allocation76_spill] sm:$0xff] }
 0x743   : > { %14544 = vst [vmem:[#allocation37_spill] sm:$0xff] %v11363_v29  ;;  %v3261_v54 = vsub.f32 %v14545_v17, %v3206_v28  ;;  %v3090_v40 = vpop.f32.mrb[90].mxu0  ;;  %3354 = vperm.xlu0 %7121, %v11363_v29   ;;  %v14557_v28 = vld [vmem:[#allocation26_spill] sm:$0xff] }
 0x744   : > { %v7988_v20 = vpop.eup %7987  ;;  %v3091_v33 = vadd.f32 1e-30, %v3090_v40  ;;  %v3092_v1 = vpop.f32.mrb[91].mxu0 }
 0x745   : > { %v3208_v3 = vmul.f32 0.6931472, %v7988_v20  ;;  %v11368_v35 = vadd.f32 %v3261_v54, %v14546_v63 }
 0x746   : > { %7993 = vlog2.f32 %v3091_v33 }
 0x747   : > { %14547 = vst [vmem:[#allocation43_spill] sm:$0xff] %v11368_v35  ;;  %v3262_v41 = vsub.f32 %v14548_v31, %v3208_v3  ;;  %v3095_v53 = vpop.f32.mrb[92].mxu0  ;;  %3359 = vperm.xlu1 %7122, %v11368_v35   ;;  %v14558_v3 = vld [vmem:[#allocation79_spill] sm:$0xff] }
 0x748   : > { %v7990_v51 = vpop.eup %7989  ;;  %v3096_v32 = vadd.f32 1e-30, %v3095_v53  ;;  %v3097_v0 = vpop.f32.mrb[93].mxu0 }
 0x749   : > { %v3210_v38 = vmul.f32 0.6931472, %v7990_v51  ;;  %v11373_v57 = vadd.f32 %v3262_v41, %v14549_v23  ;;  %v14560_v41 = vld [vmem:[#allocation28_spill] sm:$0xff] }
 0x74a   : > { %7995 = vlog2.f32 %v3096_v32 }
 0x74b   : > { %14550 = vst [vmem:[#allocation41_spill] sm:$0xff] %v11373_v57  ;;  %v3263_v22 = vsub.f32 %v14551_v25, %v3210_v38  ;;  %v3100_v13 = vpop.f32.mrb[94].mxu0  ;;  %3364 = vperm.xlu0 %7121, %v11373_v57  }
 0x74c   : > { %v7992_v56 = vpop.eup %7991  ;;  %v3101_v44 = vadd.f32 1e-30, %v3100_v13  ;;  %v3102_v30 = vpop.f32.mrb[95].mxu0 }
 0x74d   : > { %v3212_v8 = vmul.f32 0.6931472, %v7992_v56  ;;  %v11378_v39 = vadd.f32 %v3263_v22, %v14552_v12  ;;  %v14561_v22 = vld [vmem:[#allocation78_spill] sm:$0xff] }
 0x74e   : > { %7997 = vlog2.f32 %v3101_v44  ;;  %v14563_v56 = vld [vmem:[#allocation30_spill] sm:$0xff] }
 0x74f   : > { %14553 = vst [vmem:[#allocation47_spill] sm:$0xff] %v11378_v39  ;;  %v3264_v37 = vsub.f32 %v14554_v34, %v3212_v8  ;;  %v3105_v15 = vpop.f32.mrb[96].mxu0  ;;  %3369 = vperm.xlu1 %7122, %v11378_v39  }
 0x750   : > { %v7994_v52 = vpop.eup %7993  ;;  %v3106_v36 = vadd.f32 1e-30, %v3105_v15  ;;  %v3107_v18 = vpop.f32.mrb[97].mxu0 }
 0x751   : > { %v3214_v9 = vmul.f32 0.6931472, %v7994_v52  ;;  %v11383_v59 = vadd.f32 %v3264_v37, %v14555_v14  ;;  %v14564_v52 = vld [vmem:[#allocation81_spill] sm:$0xff]  ;;  %v14566_v18 = vld [vmem:[#allocation32_spill] sm:$0xff] }
 0x752   : > { %7999 = vlog2.f32 %v3106_v36 }
 0x753   : > { %14556 = vst [vmem:[#allocation45_spill] sm:$0xff] %v11383_v59  ;;  %v3265_v24 = vsub.f32 %v14557_v28, %v3214_v9  ;;  %v3110_v54 = vpop.f32.mrb[98].mxu0  ;;  %3374 = vperm.xlu0 %7121, %v11383_v59  }
 0x754   : > { %v7996_v40 = vpop.eup %7995  ;;  %v3111_v20 = vadd.f32 1e-30, %v3110_v54  ;;  %v3112_v33 = vpop.f32.mrb[99].mxu0 }
 0x755   : > { %v3216_v1 = vmul.f32 0.6931472, %v7996_v40  ;;  %v11388_v63 = vadd.f32 %v3265_v24, %v14558_v3  ;;  %v14567_v33 = vld [vmem:[#allocation80_spill] sm:$0xff]  ;;  %v14569_v3 = vld [vmem:[#allocation34_spill] sm:$0xff] }
 0x756   : > { %8001 = vlog2.f32 %v3111_v20 }
 0x757   : > { %14559 = vst [vmem:[#allocation51_spill] sm:$0xff] %v11388_v63  ;;  %v3266_v53 = vsub.f32 %v14560_v41, %v3216_v1  ;;  %v3115_v51 = vpop.f32.mrb[100].mxu0  ;;  %3379 = vperm.xlu1 %7122, %v11388_v63  }
 0x758   : > { %v7998_v32 = vpop.eup %7997  ;;  %v3116_v0 = vadd.f32 1e-30, %v3115_v51  ;;  %v3117_v38 = vpop.f32.mrb[101].mxu0 }
 0x759   : > { %v3218_v23 = vmul.f32 0.6931472, %v7998_v32  ;;  %v11393_v13 = vadd.f32 %v3266_v53, %v14561_v22  ;;  %v14570_v22 = vld [vmem:[#allocation83_spill] sm:$0xff] }
 0x75a   : > { %8003 = vlog2.f32 %v3116_v0 }
 0x75b   : > { %14562 = vst [vmem:[#allocation49_spill] sm:$0xff] %v11393_v13  ;;  %v3267_v44 = vsub.f32 %v14563_v56, %v3218_v23  ;;  %v3120_v30 = vpop.f32.mrb[102].mxu0  ;;  %3384 = vperm.xlu0 %7121, %v11393_v13  }
 0x75c   : > { %v8000_v8 = vpop.eup %7999  ;;  %v3121_v12 = vadd.f32 1e-30, %v3120_v30  ;;  %v3122_v37 = vpop.f32.mrb[103].mxu0  ;;  %v14572_v30 = vld [vmem:[#allocation36_spill] sm:$0xff] }
 0x75d   : > { %v3220_v15 = vmul.f32 0.6931472, %v8000_v8  ;;  %v11398_v36 = vadd.f32 %v3267_v44, %v14564_v52 }
 0x75e   : > { %8005 = vlog2.f32 %v3121_v12 }
 0x75f   : > { %14565 = vst [vmem:[#allocation55_spill] sm:$0xff] %v11398_v36  ;;  %v3268_v9 = vsub.f32 %v14566_v18, %v3220_v15  ;;  %v3125_v14 = vpop.f32.mrb[104].mxu0  ;;  %3389 = vperm.xlu1 %7122, %v11398_v36  }
 0x760   : > { %v8002_v24 = vpop.eup %8001  ;;  %v3126_v54 = vadd.f32 1e-30, %v3125_v14  ;;  %v3127_v40 = vpop.f32.mrb[105].mxu0  ;;  %v14573_v14 = vld [vmem:[#allocation82_spill] sm:$0xff] }
 0x761   : > { %v3222_v20 = vmul.f32 0.6931472, %v8002_v24  ;;  %v11403_v1 = vadd.f32 %v3268_v9, %v14567_v33 }
 0x762   : > { %8007 = vlog2.f32 %v3126_v54  ;;  %v14575_v54 = vld [vmem:[#allocation38_spill] sm:$0xff] }
 0x763   : > { %14568 = vst [vmem:[#allocation53_spill] sm:$0xff] %v11403_v1  ;;  %v3269_v53 = vsub.f32 %v14569_v3, %v3222_v20  ;;  %v3130_v51 = vpop.f32.mrb[106].mxu0  ;;  %3394 = vperm.xlu0 %7121, %v11403_v1   ;;  %v9079_v1 = vld [vmem:[%s13871_s0 + $0x50] sm:$0xff] }
 0x764   : > { %v8004_v32 = vpop.eup %8003  ;;  %v3131_v0 = vadd.f32 1e-30, %v3130_v51  ;;  %v3132_v38 = vpop.f32.mrb[107].mxu0 }
 0x765   : > { %v3224_v23 = vmul.f32 0.6931472, %v8004_v32  ;;  %v11408_v44 = vadd.f32 %v3269_v53, %v14570_v22 }
 0x766   : > { %8009 = vlog2.f32 %v3131_v0  ;;  %v14576_v0 = vld [vmem:[#allocation85_spill] sm:$0xff] }
 0x767   : > { %14571 = vst [vmem:[#allocation59_spill] sm:$0xff] %v11408_v44  ;;  %v3270_v8 = vsub.f32 %v14572_v30, %v3224_v23  ;;  %v3135_v12 = vpop.f32.mrb[108].mxu0  ;;  %3399 = vperm.xlu1 %7122, %v11408_v44   ;;  %v14578_v23 = vld [vmem:[#allocation40_spill] sm:$0xff] }
 0x768   : > { %v8006_v37 = vpop.eup %8005  ;;  %v3136_v15 = vadd.f32 1e-30, %v3135_v12  ;;  %v3137_v52 = vpop.f32.mrb[109].mxu0 }
 0x769   : > { %v3226_v9 = vmul.f32 0.6931472, %v8006_v37  ;;  %v11413_v24 = vadd.f32 %v3270_v8, %v14573_v14 }
 0x76a   : > { %8011 = vlog2.f32 %v3136_v15 }
 0x76b   : > { %14574 = vst [vmem:[#allocation57_spill] sm:$0xff] %v11413_v24  ;;  %v3271_v40 = vsub.f32 %v14575_v54, %v3226_v9  ;;  %v3140_v20 = vpop.f32.mrb[110].mxu0  ;;  %3404 = vperm.xlu0 %7121, %v11413_v24   ;;  %v14579_v9 = vld [vmem:[#allocation84_spill] sm:$0xff] }
 0x76c   : > { %v8008_v33 = vpop.eup %8007  ;;  %v3141_v53 = vadd.f32 1e-30, %v3140_v20  ;;  %v3142_v51 = vpop.f32.mrb[111].mxu0  ;;  %v14581_v20 = vld [vmem:[#allocation42_spill] sm:$0xff] }
 0x76d   : > { %v3228_v32 = vmul.f32 0.6931472, %v8008_v33  ;;  %v11418_v38 = vadd.f32 %v3271_v40, %v14576_v0 }
 0x76e   : > { %8013 = vlog2.f32 %v3141_v53 }
 0x76f   : > { %14577 = vst [vmem:[#allocation63_spill] sm:$0xff] %v11418_v38  ;;  %v3272_v22 = vsub.f32 %v14578_v23, %v3228_v32  ;;  %v3145_v12 = vpop.f32.mrb[112].mxu0  ;;  %3409 = vperm.xlu1 %7122, %v11418_v38   ;;  %v14582_v23 = vld [vmem:[#allocation86_spill] sm:$0xff] }
 0x770   : > { %v8010_v8 = vpop.eup %8009  ;;  %v3146_v37 = vadd.f32 1e-30, %v3145_v12  ;;  %v3147_v15 = vpop.f32.mrb[113].mxu0  ;;  %v14584_v12 = vld [vmem:[#allocation44_spill] sm:$0xff] }
 0x771   : > { %v3230_v52 = vmul.f32 0.6931472, %v8010_v8  ;;  %v11423_v14 = vadd.f32 %v3272_v22, %v14579_v9 }
 0x772   : > { %8015 = vlog2.f32 %v3146_v37 }
 0x773   : > { %14580 = vst [vmem:[#allocation61_spill] sm:$0xff] %v11423_v14  ;;  %v3273_v51 = vsub.f32 %v14581_v20, %v3230_v52  ;;  %v3150_v33 = vpop.f32.mrb[114].mxu0  ;;  %3414 = vperm.xlu0 %7121, %v11423_v14   ;;  %v14585_v20 = vld [vmem:[#allocation3_spill] sm:$0xff] }
 0x774   : > { %v8012_v40 = vpop.eup %8011  ;;  %v3151_v53 = vadd.f32 1e-30, %v3150_v33  ;;  %v3152_v0 = vpop.f32.mrb[115].mxu0  ;;  %v14587_v33 = vld [vmem:[#allocation46_spill] sm:$0xff] }
 0x775   : > { %v3232_v32 = vmul.f32 0.6931472, %v8012_v40  ;;  %v11428_v54 = vadd.f32 %v3273_v51, %v14582_v23 }
 0x776   : > { %8017 = vlog2.f32 %v3151_v53 }
 0x777   : > { %14583 = vst [vmem:[#allocation87_spill] sm:$0xff] %v11428_v54  ;;  %v3274_v15 = vsub.f32 %v14584_v12, %v3232_v32  ;;  %v3155_v8 = vpop.f32.mrb[116].mxu0  ;;  %3419 = vperm.xlu1 %7122, %v11428_v54   ;;  %v14588_v12 = vld [vmem:[#allocation5_spill] sm:$0xff] }
 0x778   : > { %v8014_v22 = vpop.eup %8013  ;;  %v3156_v37 = vadd.f32 1e-30, %v3155_v8  ;;  %v3157_v9 = vpop.f32.mrb[117].mxu0  ;;  %v14590_v8 = vld [vmem:[#allocation48_spill] sm:$0xff] }
 0x779   : > { %v3234_v52 = vmul.f32 0.6931472, %v8014_v22  ;;  %v11433_v38 = vadd.f32 %v3274_v15, %v14585_v20 }
 0x77a   : > { %8019 = vlog2.f32 %v3156_v37 }
 0x77b   : > { %14586 = vst [vmem:[#allocation65_spill] sm:$0xff] %v11433_v38  ;;  %v3275_v0 = vsub.f32 %v14587_v33, %v3234_v52  ;;  %v3160_v40 = vpop.f32.mrb[118].mxu0  ;;  %3424 = vperm.xlu0 %7121, %v11433_v38   ;;  %v14591_v33 = vld [vmem:[#allocation7_spill] sm:$0xff] }
 0x77c   : > { %v8016_v23 = vpop.eup %8015  ;;  %v3161_v51 = vadd.f32 1e-30, %v3160_v40  ;;  %v3162_v53 = vpop.f32.mrb[119].mxu0  ;;  %v14593_v40 = vld [vmem:[#allocation50_spill] sm:$0xff] }
 0x77d   : > { %v3236_v32 = vmul.f32 0.6931472, %v8016_v23  ;;  %v11438_v14 = vadd.f32 %v3275_v0, %v14588_v12 }
 0x77e   : > { %8021 = vlog2.f32 %v3161_v51 }
 0x77f   : > { %14589 = vst [vmem:[#allocation89_spill] sm:$0xff] %v11438_v14  ;;  %v3276_v9 = vsub.f32 %v14590_v8, %v3236_v32  ;;  %v3165_v22 = vpop.f32.mrb[120].mxu0  ;;  %3429 = vperm.xlu1 %7122, %v11438_v14   ;;  %v14594_v8 = vld [vmem:[#allocation9_spill] sm:$0xff] }
 0x780   : > { %v8018_v20 = vpop.eup %8017  ;;  %v3166_v15 = vadd.f32 1e-30, %v3165_v22  ;;  %v3167_v37 = vpop.f32.mrb[121].mxu0  ;;  %v14596_v22 = vld [vmem:[#allocation52_spill] sm:$0xff] }
 0x781   : > { %v3238_v52 = vmul.f32 0.6931472, %v8018_v20  ;;  %v11443_v54 = vadd.f32 %v3276_v9, %v14591_v33 }
 0x782   : > { %8023 = vlog2.f32 %v3166_v15 }
 0x783   : > { %14592 = vst [vmem:[#allocation88_spill] sm:$0xff] %v11443_v54  ;;  %v3277_v53 = vsub.f32 %v14593_v40, %v3238_v52  ;;  %v3170_v23 = vpop.f32.mrb[122].mxu0  ;;  %3434 = vperm.xlu0 %7121, %v11443_v54   ;;  %v14597_v40 = vld [vmem:[#allocation11_spill] sm:$0xff] }
 0x784   : > { %v8020_v12 = vpop.eup %8019  ;;  %v3171_v0 = vadd.f32 1e-30, %v3170_v23  ;;  %v3172_v51 = vpop.f32.mrb[123].mxu0  ;;  %v14599_v23 = vld [vmem:[#allocation54_spill] sm:$0xff] }
 0x785   : > { %v3240_v32 = vmul.f32 0.6931472, %v8020_v12  ;;  %v11448_v38 = vadd.f32 %v3277_v53, %v14594_v8 }
 0x786   : > { %8025 = vlog2.f32 %v3171_v0 }
 0x787   : > { %14595 = vst [vmem:[#allocation90_spill] sm:$0xff] %v11448_v38  ;;  %v3278_v37 = vsub.f32 %v14596_v22, %v3240_v32  ;;  %v3175_v20 = vpop.f32.mrb[124].mxu0  ;;  %3439 = vperm.xlu1 %7122, %v11448_v38   ;;  %v14600_v22 = vld [vmem:[#allocation13_spill] sm:$0xff] }
 0x788   : > { %v8022_v33 = vpop.eup %8021  ;;  %v3176_v9 = vadd.f32 1e-30, %v3175_v20  ;;  %v3177_v15 = vpop.f32.mrb[125].mxu0  ;;  %v14602_v20 = vld [vmem:[#allocation56_spill] sm:$0xff] }
 0x789   : > { %v3242_v52 = vmul.f32 0.6931472, %v8022_v33  ;;  %v11453_v14 = vadd.f32 %v3278_v37, %v14597_v40 }
 0x78a   : > { %8027 = vlog2.f32 %v3176_v9 }
 0x78b   : > { %14598 = vst [vmem:[#allocation67_spill] sm:$0xff] %v11453_v14  ;;  %v3279_v51 = vsub.f32 %v14599_v23, %v3242_v52  ;;  %v3180_v12 = vpop.f32.mrb[126].mxu0  ;;  %3444 = vperm.xlu0 %7121, %v11453_v14   ;;  %v14603_v23 = vld [vmem:[#allocation15_spill] sm:$0xff] }
 0x78c   : > { %v8024_v8 = vpop.eup %8023  ;;  %v3181_v53 = vadd.f32 1e-30, %v3180_v12  ;;  %v3182_v0 = vpop.f32.mrb[127].mxu0  ;;  %v14605_v12 = vld [vmem:[#allocation58_spill] sm:$0xff] }
 0x78d   : > { %v3244_v32 = vmul.f32 0.6931472, %v8024_v8  ;;  %v11458_v54 = vadd.f32 %v3279_v51, %v14600_v22  ;;  %v14606_v8 = vld [vmem:[#allocation17_spill] sm:$0xff] }
 0x78e   : > { %8029 = vlog2.f32 %v3181_v53 }
 0x78f   : > { %14601 = vst [vmem:[#allocation66_spill] sm:$0xff] %v11458_v54  ;;  %v3280_v15 = vsub.f32 %v14602_v20, %v3244_v32  ;;  %v3185_v33 = vpop.f32.mrb[128].mxu0  ;;  %3449 = vperm.xlu1 %7122, %v11458_v54   ;;  %v14608_v32 = vld [vmem:[#allocation60_spill] sm:$0xff] }
 0x790   : > { %v8026_v40 = vpop.eup %8025  ;;  %v3186_v37 = vadd.f32 1e-30, %v3185_v33  ;;  %v3187_v9 = vpop.f32.mrb[129].mxu0 }
 0x791   : > { %v3246_v52 = vmul.f32 0.6931472, %v8026_v40  ;;  %v11463_v38 = vadd.f32 %v3280_v15, %v14603_v23  ;;  %v14609_v40 = vld [vmem:[#allocation19_spill] sm:$0xff]  ;;  %v14611_v23 = vld [vmem:[#allocation62_spill] sm:$0xff] }
 0x792   : > { %8031 = vlog2.f32 %v3186_v37 }
 0x793   : > { %14604 = vst [vmem:[#allocation69_spill] sm:$0xff] %v11463_v38  ;;  %v3281_v0 = vsub.f32 %v14605_v12, %v3246_v52  ;;  %3454 = vperm.xlu0 %7121, %v11463_v38   ;;  %v14612_v12 = vld [vmem:[#allocation21_spill] sm:$0xff] }
 0x794   : > { %v8028_v22 = vpop.eup %8027 }
 0x795   : > { %v3248_v51 = vmul.f32 0.6931472, %v8028_v22  ;;  %v11468_v53 = vadd.f32 %v3281_v0, %v14606_v8  ;;  %v14614_v0 = vld [vmem:[#allocation64_spill] sm:$0xff] }
 0x797   : > { %14607 = vst [vmem:[#allocation68_spill] sm:$0xff] %v11468_v53  ;;  %v3282_v20 = vsub.f32 %v14608_v32, %v3248_v51  ;;  %3459 = vperm.xlu1 %7122, %v11468_v53   ;;  %v14615_v51 = vld [vmem:[#allocation23_spill] sm:$0xff] }
 0x798   : > { %v8030_v33 = vpop.eup %8029 }
 0x799   : > { %v3250_v9 = vmul.f32 0.6931472, %v8030_v33  ;;  %v11473_v54 = vadd.f32 %v3282_v20, %v14609_v40  ;;  %v9069_v33 = vld [vmem:[%s13871_s0] sm:$0xff] }
 0x79b   : > { %14610 = vst [vmem:[#allocation71_spill] sm:$0xff] %v11473_v54  ;;  %v3283_v15 = vsub.f32 %v14611_v23, %v3250_v9  ;;  %3464 = vperm.xlu0 %7121, %v11473_v54  }
 0x79c   : > { %v8032_v37 = vpop.eup %8031 }
 0x79d   : > { %v3252_v52 = vmul.f32 0.6931472, %v8032_v37  ;;  %v11478_v22 = vadd.f32 %v3283_v15, %v14612_v12  ;;  %v9070_v12 = vld [vmem:[%s13871_s0 + $0x8] sm:$0xff] }
 0x79f   : > { %14613 = vst [vmem:[#allocation70_spill] sm:$0xff] %v11478_v22  ;;  %v3284_v8 = vsub.f32 %v14614_v0, %v3252_v52  ;;  %3469 = vperm.xlu1 %7122, %v11478_v22  }
 0x7a1   : > { %v11483_v32 = vadd.f32 %v3284_v8, %v14615_v51  ;;  %v9071_v51 = vld [vmem:[%s13871_s0 + $0x10] sm:$0xff] }
 0x7a3   : > { %14616 = vst [vmem:[#allocation73_spill] sm:$0xff] %v11483_v32  ;;  %3474 = vperm.xlu0 %7121, %v11483_v32   ;;  %v9072_v32 = vld [vmem:[%s13871_s0 + $0x18] sm:$0xff] }
 0x7a6   : > { %v3320_v20 = vpop.permute.xlu1 %3319 }
 0x7a7   : > { %v11489_v9 = vadd.f32 %v9069_v33, %v3320_v20  ;;  %v11494_v40 = vadd.f32 %v9070_v12, %v3320_v20 }
 0x7a9   : > { %v3541_v15 = vadd.f32 %v11489_v9, %v11191_v46  ;;  %v3542_v37 = vadd.f32 %v11494_v40, %v11195_v21 }
 0x7aa   : > { %v3325_v52 = vpop.permute.xlu0 %3324 }
 0x7ab   : > { %v3605_v8 = vmul.f32 1.442695, %v3541_v15  ;;  %v11503_v33 = vadd.f32 %v9071_v51, %v3325_v52  ;;  %v11508_v20 = vadd.f32 %v9072_v32, %v3325_v52  ;;  %v3607_v12 = vmul.f32 1.442695, %v3542_v37  ;;  %v9073_v51 = vld [vmem:[%s13871_s0 + $0x20] sm:$0xff]  ;;  %v9074_v32 = vld [vmem:[%s13871_s0 + $0x28] sm:$0xff] }
 0x7ad   : > { %v3543_v0 = vadd.f32 %v11503_v33, %v11191_v46  ;;  %v3544_v22 = vadd.f32 %v11508_v20, %v11195_v21  ;;  %8033 = vpow2.f32 %v3605_v8 }
 0x7ae   : > { %v3330_v15 = vpop.permute.xlu1 %3329  ;;  %8035 = vpow2.f32 %v3607_v12  ;;  %v9076_v12 = vld [vmem:[%s13871_s0 + $0x38] sm:$0xff] }
 0x7af   : > { %v3609_v23 = vmul.f32 1.442695, %v3543_v0  ;;  %v3611_v54 = vmul.f32 1.442695, %v3544_v22  ;;  %v11517_v53 = vadd.f32 %v9073_v51, %v3330_v15  ;;  %v11522_v37 = vadd.f32 %v9074_v32, %v3330_v15  ;;  %v9075_v51 = vld [vmem:[%s13871_s0 + $0x30] sm:$0xff] }
 0x7b1   : > { %8037 = vpow2.f32 %v3609_v23  ;;  %v3545_v52 = vadd.f32 %v11517_v53, %v11191_v46  ;;  %v3546_v22 = vadd.f32 %v11522_v37, %v11195_v21 }
 0x7b2   : > { %8039 = vpow2.f32 %v3611_v54  ;;  %v3335_v0 = vpop.permute.xlu0 %3334 }
 0x7b3   : > { %v3613_v8 = vmul.f32 1.442695, %v3545_v52  ;;  %v11531_v38 = vadd.f32 %v9075_v51, %v3335_v0  ;;  %v11536_v23 = vadd.f32 %v9076_v12, %v3335_v0  ;;  %v3615_v15 = vmul.f32 1.442695, %v3546_v22  ;;  %v9077_v51 = vld [vmem:[%s13871_s0 + $0x40] sm:$0xff]  ;;  %v9078_v22 = vld [vmem:[%s13871_s0 + $0x48] sm:$0xff] }
 0x7b5   : > { %v3547_v32 = vadd.f32 %v11531_v38, %v11191_v46  ;;  %v3548_v54 = vadd.f32 %v11536_v23, %v11195_v21  ;;  %8041 = vpow2.f32 %v3613_v8 }
 0x7b6   : > { %v3340_v52 = vpop.permute.xlu1 %3339  ;;  %8043 = vpow2.f32 %v3615_v15 }
 0x7b7   : > { %v3617_v14 = vmul.f32 1.442695, %v3547_v32  ;;  %v3619_v24 = vmul.f32 1.442695, %v3548_v54  ;;  %v11545_v30 = vadd.f32 %v9077_v51, %v3340_v52  ;;  %v11550_v0 = vadd.f32 %v9078_v22, %v3340_v52  ;;  %v8034_v12 = vpop.eup %8033 }
 0x7b8   : > { %v8036_v54 = vpop.eup %8035 }
 0x7b9   : > { %8045 = vpow2.f32 %v3617_v14  ;;  %v3549_v8 = vadd.f32 %v11545_v30, %v11191_v46  ;;  %v3550_v32 = vadd.f32 %v11550_v0, %v11195_v21  ;;  %v9080_v14 = vld [vmem:[%s13871_s0 + $0x58] sm:$0xff] }
 0x7ba   : > { %8047 = vpow2.f32 %v3619_v24  ;;  %v3345_v44 = vpop.permute.xlu0 %3344 }
 0x7bb   : > { %v8038_v51 = vpop.eup %8037  ;;  %v3621_v3 = vmul.f32 1.442695, %v3549_v8  ;;  %v11559_v52 = vadd.f32 %v9079_v1, %v3345_v44  ;;  %v11564_v15 = vadd.f32 %v9080_v14, %v3345_v44  ;;  %v3623_v18 = vmul.f32 1.442695, %v3550_v32  ;;  %v9081_v44 = vld [vmem:[%s13871_s0 + $0x60] sm:$0xff] }
 0x7bc   : > { %v8040_v22 = vpop.eup %8039  ;;  %v6822_v36 = vpack.c.bf16 %v8038_v51, %v8034_v12  ;;  %v9082_v12 = vld [vmem:[%s13871_s0 + $0x68] sm:$0xff] }
 0x7bd   : > { %v3551_v24 = vadd.f32 %v11559_v52, %v11191_v46  ;;  %v3552_v8 = vadd.f32 %v11564_v15, %v11195_v21  ;;  %v6820_v56 = vpack.c.bf16 %v8040_v22, %v8036_v54  ;;  %8049 = vpow2.f32 %v3621_v3 }
 0x7be   : > { %v3350_v13 = vpop.permute.xlu1 %3349  ;;  %8051 = vpow2.f32 %v3623_v18 }
 0x7bf   : > { %v3625_v1 = vmul.f32 1.442695, %v3551_v24  ;;  %v3627_v41 = vmul.f32 1.442695, %v3552_v8  ;;  %6821 = vmatprep.subr.bf16.mxu1 %v6820_v56  ;;  %v11573_v14 = vadd.f32 %v9081_v44, %v3350_v13  ;;  %v11578_v32 = vadd.f32 %v9082_v12, %v3350_v13  ;;  %v8042_v51 = vpop.eup %8041  ;;  %v9083_v13 = vld [vmem:[%s13871_s0 + $0x70] sm:$0xff] }
 0x7c0   : > { %6823 = vmatpush1.bf16.msra.mxu1 %v6822_v36  ;;  %v8044_v54 = vpop.eup %8043  ;;  %v9084_v36 = vld [vmem:[%s13871_s0 + $0x78] sm:$0xff] }
 0x7c1   : > { %8053 = vpow2.f32 %v3625_v1  ;;  %v3553_v3 = vadd.f32 %v11573_v14, %v11191_v46  ;;  %v3554_v56 = vadd.f32 %v11578_v32, %v11195_v21 }
 0x7c2   : > { %8055 = vpow2.f32 %v3627_v41  ;;  %v3355_v22 = vpop.permute.xlu0 %3354 }
 0x7c3   : > { %v8046_v24 = vpop.eup %8045  ;;  %v3629_v8 = vmul.f32 1.442695, %v3553_v3  ;;  %v11587_v44 = vadd.f32 %v9083_v13, %v3355_v22  ;;  %v11592_v18 = vadd.f32 %v9084_v36, %v3355_v22  ;;  %v3631_v12 = vmul.f32 1.442695, %v3554_v56  ;;  %v9085_v22 = vld [vmem:[%s13871_s0 + $0x80] sm:$0xff] }
 0x7c4   : > { %v8048_v1 = vpop.eup %8047  ;;  %v6826_v63 = vpack.c.bf16 %v8046_v24, %v8042_v51  ;;  %v9086_v51 = vld [vmem:[%s13871_s0 + $0x88] sm:$0xff] }
 0x7c5   : > { %v3555_v41 = vadd.f32 %v11587_v44, %v11191_v46  ;;  %v3556_v3 = vadd.f32 %v11592_v18, %v11195_v21  ;;  %v6824_v28 = vpack.c.bf16 %v8048_v1, %v8044_v54  ;;  %8057 = vpow2.f32 %v3629_v8 }
 0x7c6   : > { %v3360_v59 = vpop.permute.xlu1 %3359  ;;  %8059 = vpow2.f32 %v3631_v12 }
 0x7c7   : > { %v3633_v13 = vmul.f32 1.442695, %v3555_v41  ;;  %v3635_v34 = vmul.f32 1.442695, %v3556_v3  ;;  %6825 = vmatprep.subr.bf16.mxu1 %v6824_v28  ;;  %v11601_v36 = vadd.f32 %v9085_v22, %v3360_v59  ;;  %v11606_v56 = vadd.f32 %v9086_v51, %v3360_v59  ;;  %v8050_v24 = vpop.eup %8049  ;;  %v9087_v59 = vld [vmem:[%s13871_s0 + $0x90] sm:$0xff] }
 0x7c8   : > { %6827 = vmatpush1.bf16.msra.mxu1 %v6826_v63  ;;  %v8052_v8 = vpop.eup %8051  ;;  %v9088_v63 = vld [vmem:[%s13871_s0 + $0x98] sm:$0xff] }
 0x7c9   : > { %8061 = vpow2.f32 %v3633_v13  ;;  %v3557_v54 = vadd.f32 %v11601_v36, %v11191_v46  ;;  %v3558_v28 = vadd.f32 %v11606_v56, %v11195_v21 }
 0x7ca   : > { %8063 = vpow2.f32 %v3635_v34  ;;  %v3365_v1 = vpop.permute.xlu0 %3364 }
 0x7cb   : > { %v8054_v41 = vpop.eup %8053  ;;  %v3637_v3 = vmul.f32 1.442695, %v3557_v54  ;;  %v11615_v22 = vadd.f32 %v9087_v59, %v3365_v1  ;;  %v11620_v12 = vadd.f32 %v9088_v63, %v3365_v1  ;;  %v3639_v51 = vmul.f32 1.442695, %v3558_v28  ;;  %v9089_v1 = vld [vmem:[%s13871_s0 + $0xa0] sm:$0xff] }
 0x7cc   : > { %v8056_v13 = vpop.eup %8055  ;;  %v6830_v39 = vpack.c.bf16 %v8054_v41, %v8050_v24  ;;  %v9090_v24 = vld [vmem:[%s13871_s0 + $0xa8] sm:$0xff] }
 0x7cd   : > { %v3559_v34 = vadd.f32 %v11615_v22, %v11191_v46  ;;  %v3560_v54 = vadd.f32 %v11620_v12, %v11195_v21  ;;  %v6828_v25 = vpack.c.bf16 %v8056_v13, %v8052_v8  ;;  %8065 = vpow2.f32 %v3637_v3 }
 0x7ce   : > { %v3370_v57 = vpop.permute.xlu1 %3369  ;;  %8067 = vpow2.f32 %v3639_v51 }
 0x7cf   : > { %v3641_v59 = vmul.f32 1.442695, %v3559_v34  ;;  %v3643_v31 = vmul.f32 1.442695, %v3560_v54  ;;  %6829 = vmatprep.subr.bf16.mxu1 %v6828_v25  ;;  %v11629_v63 = vadd.f32 %v9089_v1, %v3370_v57  ;;  %v11634_v28 = vadd.f32 %v9090_v24, %v3370_v57  ;;  %v8058_v41 = vpop.eup %8057  ;;  %v9091_v57 = vld [vmem:[%s13871_s0 + $0xb0] sm:$0xff] }
 0x7d0   : > { %6831 = vmatpush1.bf16.msra.mxu1 %v6830_v39  ;;  %v8060_v3 = vpop.eup %8059  ;;  %v9092_v39 = vld [vmem:[%s13871_s0 + $0xb8] sm:$0xff] }
 0x7d1   : > { %8069 = vpow2.f32 %v3641_v59  ;;  %v3561_v8 = vadd.f32 %v11629_v63, %v11191_v46  ;;  %v3562_v25 = vadd.f32 %v11634_v28, %v11195_v21 }
 0x7d2   : > { %8071 = vpow2.f32 %v3643_v31  ;;  %v3375_v13 = vpop.permute.xlu0 %3374 }
 0x7d3   : > { %v8062_v34 = vpop.eup %8061  ;;  %v3645_v54 = vmul.f32 1.442695, %v3561_v8  ;;  %v11643_v1 = vadd.f32 %v9091_v57, %v3375_v13  ;;  %v11648_v51 = vadd.f32 %v9092_v39, %v3375_v13  ;;  %v3647_v24 = vmul.f32 1.442695, %v3562_v25  ;;  %v9093_v13 = vld [vmem:[%s13871_s0 + $0xc0] sm:$0xff] }
 0x7d4   : > { %v8064_v59 = vpop.eup %8063  ;;  %v6834_v35 = vpack.c.bf16 %v8062_v34, %v8058_v41  ;;  %v9094_v41 = vld [vmem:[%s13871_s0 + $0xc8] sm:$0xff] }
 0x7d5   : > { %v3563_v31 = vadd.f32 %v11643_v1, %v11191_v46  ;;  %v3564_v8 = vadd.f32 %v11648_v51, %v11195_v21  ;;  %v6832_v17 = vpack.c.bf16 %v8064_v59, %v8060_v3  ;;  %8073 = vpow2.f32 %v3645_v54 }
 0x7d6   : > { %v3380_v29 = vpop.permute.xlu1 %3379  ;;  %8075 = vpow2.f32 %v3647_v24 }
 0x7d7   : > { %v3649_v57 = vmul.f32 1.442695, %v3563_v31  ;;  %v3651_v48 = vmul.f32 1.442695, %v3564_v8  ;;  %6833 = vmatprep.subr.bf16.mxu1 %v6832_v17  ;;  %v11657_v39 = vadd.f32 %v9093_v13, %v3380_v29  ;;  %v11662_v25 = vadd.f32 %v9094_v41, %v3380_v29  ;;  %v8066_v34 = vpop.eup %8065  ;;  %v9095_v29 = vld [vmem:[%s13871_s0 + $0xd0] sm:$0xff] }
 0x7d8   : > { %6835 = vmatpush1.bf16.msra.mxu1 %v6834_v35  ;;  %v8068_v54 = vpop.eup %8067  ;;  %v9096_v35 = vld [vmem:[%s13871_s0 + $0xd8] sm:$0xff] }
 0x7d9   : > { %8077 = vpow2.f32 %v3649_v57  ;;  %v3565_v3 = vadd.f32 %v11657_v39, %v11191_v46  ;;  %v3566_v17 = vadd.f32 %v11662_v25, %v11195_v21 }
 0x7da   : > { %8079 = vpow2.f32 %v3651_v48  ;;  %v3385_v59 = vpop.permute.xlu0 %3384 }
 0x7db   : > { %v8070_v31 = vpop.eup %8069  ;;  %v3653_v8 = vmul.f32 1.442695, %v3565_v3  ;;  %v11671_v13 = vadd.f32 %v9095_v29, %v3385_v59  ;;  %v11676_v24 = vadd.f32 %v9096_v35, %v3385_v59  ;;  %v3655_v41 = vmul.f32 1.442695, %v3566_v17  ;;  %v9097_v59 = vld [vmem:[%s13871_s0 + $0xe0] sm:$0xff] }
 0x7dc   : > { %v8072_v57 = vpop.eup %8071  ;;  %v6838_v45 = vpack.c.bf16 %v8070_v31, %v8066_v34  ;;  %v9098_v34 = vld [vmem:[%s13871_s0 + $0xe8] sm:$0xff] }
 0x7dd   : > { %v3567_v48 = vadd.f32 %v11671_v13, %v11191_v46  ;;  %v3568_v3 = vadd.f32 %v11676_v24, %v11195_v21  ;;  %v6836_v55 = vpack.c.bf16 %v8072_v57, %v8068_v54  ;;  %8081 = vpow2.f32 %v3653_v8 }
 0x7de   : > { %v3390_v27 = vpop.permute.xlu1 %3389  ;;  %8083 = vpow2.f32 %v3655_v41 }
 0x7df   : > { %v3657_v29 = vmul.f32 1.442695, %v3567_v48  ;;  %v3659_v42 = vmul.f32 1.442695, %v3568_v3  ;;  %6837 = vmatprep.subr.bf16.mxu1 %v6836_v55  ;;  %v11685_v35 = vadd.f32 %v9097_v59, %v3390_v27  ;;  %v11690_v17 = vadd.f32 %v9098_v34, %v3390_v27  ;;  %v8074_v31 = vpop.eup %8073  ;;  %v9099_v27 = vld [vmem:[%s13871_s0 + $0xf0] sm:$0xff] }
 0x7e0   : > { %6839 = vmatpush1.bf16.msra.mxu1 %v6838_v45  ;;  %v8076_v8 = vpop.eup %8075  ;;  %v9100_v45 = vld [vmem:[%s13871_s0 + $0xf8] sm:$0xff] }
 0x7e1   : > { %8085 = vpow2.f32 %v3657_v29  ;;  %v3569_v54 = vadd.f32 %v11685_v35, %v11191_v46  ;;  %v3570_v55 = vadd.f32 %v11690_v17, %v11195_v21 }
 0x7e2   : > { %8087 = vpow2.f32 %v3659_v42  ;;  %v3395_v57 = vpop.permute.xlu0 %3394 }
 0x7e3   : > { %v8078_v48 = vpop.eup %8077  ;;  %v3661_v3 = vmul.f32 1.442695, %v3569_v54  ;;  %v11699_v59 = vadd.f32 %v9099_v27, %v3395_v57  ;;  %v11704_v41 = vadd.f32 %v9100_v45, %v3395_v57  ;;  %v3663_v34 = vmul.f32 1.442695, %v3570_v55  ;;  %v9101_v57 = vld [vmem:[%s13871_s0 + $0x100] sm:$0xff] }
 0x7e4   : > { %v8080_v29 = vpop.eup %8079  ;;  %v6842_v49 = vpack.c.bf16 %v8078_v48, %v8074_v31  ;;  %v9102_v31 = vld [vmem:[%s13871_s0 + $0x108] sm:$0xff] }
 0x7e5   : > { %v3571_v42 = vadd.f32 %v11699_v59, %v11191_v46  ;;  %v3572_v54 = vadd.f32 %v11704_v41, %v11195_v21  ;;  %v6840_v61 = vpack.c.bf16 %v8080_v29, %v8076_v8  ;;  %8089 = vpow2.f32 %v3661_v3 }
 0x7e6   : > { %v3400_v19 = vpop.permute.xlu1 %3399  ;;  %8091 = vpow2.f32 %v3663_v34 }
 0x7e7   : > { %v3665_v27 = vmul.f32 1.442695, %v3571_v42  ;;  %v3667_v11 = vmul.f32 1.442695, %v3572_v54  ;;  %6841 = vmatprep.subr.bf16.mxu1 %v6840_v61  ;;  %v11713_v45 = vadd.f32 %v9101_v57, %v3400_v19  ;;  %v11718_v55 = vadd.f32 %v9102_v31, %v3400_v19  ;;  %v8082_v48 = vpop.eup %8081  ;;  %v9103_v19 = vld [vmem:[%s13871_s0 + $0x110] sm:$0xff] }
 0x7e8   : > { %6843 = vmatpush1.bf16.msra.mxu1 %v6842_v49  ;;  %v8084_v3 = vpop.eup %8083  ;;  %v9104_v49 = vld [vmem:[%s13871_s0 + $0x118] sm:$0xff] }
 0x7e9   : > { %8093 = vpow2.f32 %v3665_v27  ;;  %v3573_v8 = vadd.f32 %v11713_v45, %v11191_v46  ;;  %v3574_v61 = vadd.f32 %v11718_v55, %v11195_v21 }
 0x7ea   : > { %8095 = vpow2.f32 %v3667_v11  ;;  %v3405_v29 = vpop.permute.xlu0 %3404 }
 0x7eb   : > { %v8086_v42 = vpop.eup %8085  ;;  %v3669_v54 = vmul.f32 1.442695, %v3573_v8  ;;  %v11727_v57 = vadd.f32 %v9103_v19, %v3405_v29  ;;  %v11732_v34 = vadd.f32 %v9104_v49, %v3405_v29  ;;  %v3671_v31 = vmul.f32 1.442695, %v3574_v61  ;;  %v9105_v29 = vld [vmem:[%s13871_s0 + $0x120] sm:$0xff] }
 0x7ec   : > { %v8088_v27 = vpop.eup %8087  ;;  %v6846_v58 = vpack.c.bf16 %v8086_v42, %v8082_v48  ;;  %v9106_v48 = vld [vmem:[%s13871_s0 + $0x128] sm:$0xff] }
 0x7ed   : > { %v3575_v11 = vadd.f32 %v11727_v57, %v11191_v46  ;;  %v3576_v8 = vadd.f32 %v11732_v34, %v11195_v21  ;;  %v6844_v16 = vpack.c.bf16 %v8088_v27, %v8084_v3  ;;  %8097 = vpow2.f32 %v3669_v54 }
 0x7ee   : > { %v3410_v62 = vpop.permute.xlu1 %3409  ;;  %8099 = vpow2.f32 %v3671_v31 }
 0x7ef   : > { %v3673_v19 = vmul.f32 1.442695, %v3575_v11  ;;  %v3675_v60 = vmul.f32 1.442695, %v3576_v8  ;;  %6845 = vmatprep.subr.bf16.mxu1 %v6844_v16  ;;  %v11741_v49 = vadd.f32 %v9105_v29, %v3410_v62  ;;  %v11746_v61 = vadd.f32 %v9106_v48, %v3410_v62  ;;  %v8090_v42 = vpop.eup %8089  ;;  %v9107_v62 = vld [vmem:[%s13871_s0 + $0x130] sm:$0xff] }
 0x7f0   : > { %6847 = vmatpush1.bf16.msra.mxu1 %v6846_v58  ;;  %v8092_v54 = vpop.eup %8091  ;;  %v9108_v58 = vld [vmem:[%s13871_s0 + $0x138] sm:$0xff] }
 0x7f1   : > { %14617 = vst [vmem:[#allocation72_spill] sm:$0xff] %v11741_v49  ;;  %14618 = vst [vmem:[#allocation75_spill] sm:$0xff] %v11746_v61  ;;  %8101 = vpow2.f32 %v3673_v19  ;;  %v3577_v3 = vadd.f32 %v11741_v49, %v11191_v46  ;;  %v3578_v16 = vadd.f32 %v11746_v61, %v11195_v21 }
 0x7f2   : > { %8103 = vpow2.f32 %v3675_v60  ;;  %v3415_v27 = vpop.permute.xlu0 %3414 }
 0x7f3   : > { %v8094_v11 = vpop.eup %8093  ;;  %v3677_v8 = vmul.f32 1.442695, %v3577_v3  ;;  %v11755_v29 = vadd.f32 %v9107_v62, %v3415_v27  ;;  %v11760_v31 = vadd.f32 %v9108_v58, %v3415_v27  ;;  %v3679_v48 = vmul.f32 1.442695, %v3578_v16  ;;  %v9109_v27 = vld [vmem:[%s13871_s0 + $0x140] sm:$0xff] }
 0x7f4   : > { %v8096_v19 = vpop.eup %8095  ;;  %v6850_v6 = vpack.c.bf16 %v8094_v11, %v8090_v42  ;;  %v9110_v42 = vld [vmem:[%s13871_s0 + $0x148] sm:$0xff] }
 0x7f5   : > { %14619 = vst [vmem:[#allocation74_spill] sm:$0xff] %v11755_v29  ;;  %14620 = vst [vmem:[#allocation77_spill] sm:$0xff] %v11760_v31  ;;  %v3579_v60 = vadd.f32 %v11755_v29, %v11191_v46  ;;  %v3580_v3 = vadd.f32 %v11760_v31, %v11195_v21  ;;  %v6848_v47 = vpack.c.bf16 %v8096_v19, %v8092_v54  ;;  %8105 = vpow2.f32 %v3677_v8 }
 0x7f6   : > { %v3420_v49 = vpop.permute.xlu1 %3419  ;;  %8107 = vpow2.f32 %v3679_v48 }
 0x7f7   : > { %v3681_v62 = vmul.f32 1.442695, %v3579_v60  ;;  %v3683_v61 = vmul.f32 1.442695, %v3580_v3  ;;  %6849 = vmatprep.subr.bf16.mxu1 %v6848_v47  ;;  %v11769_v58 = vadd.f32 %v9109_v27, %v3420_v49  ;;  %v11774_v16 = vadd.f32 %v9110_v42, %v3420_v49  ;;  %v8098_v11 = vpop.eup %8097  ;;  %v9111_v49 = vld [vmem:[%s13871_s0 + $0x150] sm:$0xff] }
 0x7f8   : > { %6851 = vmatpush1.bf16.msra.mxu1 %v6850_v6  ;;  %v8100_v8 = vpop.eup %8099  ;;  %v9112_v6 = vld [vmem:[%s13871_s0 + $0x158] sm:$0xff] }
 0x7f9   : > { %14621 = vst [vmem:[#allocation76_spill] sm:$0xff] %v11769_v58  ;;  %14622 = vst [vmem:[#allocation79_spill] sm:$0xff] %v11774_v16  ;;  %8109 = vpow2.f32 %v3681_v62  ;;  %v3581_v54 = vadd.f32 %v11769_v58, %v11191_v46  ;;  %v3582_v47 = vadd.f32 %v11774_v16, %v11195_v21 }
 0x7fa   : > { %8111 = vpow2.f32 %v3683_v61  ;;  %v3425_v19 = vpop.permute.xlu0 %3424 }
 0x7fb   : > { %v8102_v60 = vpop.eup %8101  ;;  %v3685_v3 = vmul.f32 1.442695, %v3581_v54  ;;  %v11783_v27 = vadd.f32 %v9111_v49, %v3425_v19  ;;  %v11788_v48 = vadd.f32 %v9112_v6, %v3425_v19  ;;  %v3687_v42 = vmul.f32 1.442695, %v3582_v47  ;;  %v9113_v19 = vld [vmem:[%s13871_s0 + $0x160] sm:$0xff] }
 0x7fc   : > { %v8104_v62 = vpop.eup %8103  ;;  %v6854_v58 = vpack.c.bf16 %v8102_v60, %v8098_v11  ;;  %v9114_v11 = vld [vmem:[%s13871_s0 + $0x168] sm:$0xff] }
 0x7fd   : > { %14623 = vst [vmem:[#allocation78_spill] sm:$0xff] %v11783_v27  ;;  %14624 = vst [vmem:[#allocation81_spill] sm:$0xff] %v11788_v48  ;;  %v3583_v61 = vadd.f32 %v11783_v27, %v11191_v46  ;;  %v3584_v54 = vadd.f32 %v11788_v48, %v11195_v21  ;;  %v6852_v16 = vpack.c.bf16 %v8104_v62, %v8100_v8  ;;  %8113 = vpow2.f32 %v3685_v3 }
 0x7fe   : > { %v3430_v29 = vpop.permute.xlu1 %3429  ;;  %8115 = vpow2.f32 %v3687_v42 }
 0x7ff   : > { %v3689_v49 = vmul.f32 1.442695, %v3583_v61  ;;  %v3691_v31 = vmul.f32 1.442695, %v3584_v54  ;;  %6853 = vmatprep.subr.bf16.mxu1 %v6852_v16  ;;  %v11797_v6 = vadd.f32 %v9113_v19, %v3430_v29  ;;  %v11802_v47 = vadd.f32 %v9114_v11, %v3430_v29  ;;  %v8106_v60 = vpop.eup %8105  ;;  %v9115_v29 = vld [vmem:[%s13871_s0 + $0x170] sm:$0xff] }
 0x800   : > { %6855 = vmatpush1.bf16.msra.mxu1 %v6854_v58  ;;  %v8108_v3 = vpop.eup %8107  ;;  %v9116_v58 = vld [vmem:[%s13871_s0 + $0x178] sm:$0xff] }
 0x801   : > { %14625 = vst [vmem:[#allocation80_spill] sm:$0xff] %v11797_v6  ;;  %14626 = vst [vmem:[#allocation83_spill] sm:$0xff] %v11802_v47  ;;  %8117 = vpow2.f32 %v3689_v49  ;;  %v3585_v8 = vadd.f32 %v11797_v6, %v11191_v46  ;;  %v3586_v16 = vadd.f32 %v11802_v47, %v11195_v21 }
 0x802   : > { %8119 = vpow2.f32 %v3691_v31  ;;  %v3435_v62 = vpop.permute.xlu0 %3434 }
 0x803   : > { %v8110_v61 = vpop.eup %8109  ;;  %v3693_v54 = vmul.f32 1.442695, %v3585_v8  ;;  %v11811_v19 = vadd.f32 %v9115_v29, %v3435_v62  ;;  %v11816_v42 = vadd.f32 %v9116_v58, %v3435_v62  ;;  %v3695_v11 = vmul.f32 1.442695, %v3586_v16  ;;  %v9117_v62 = vld [vmem:[%s13871_s0 + $0x180] sm:$0xff] }
 0x804   : > { %v8112_v49 = vpop.eup %8111  ;;  %v6858_v6 = vpack.c.bf16 %v8110_v61, %v8106_v60  ;;  %v9118_v60 = vld [vmem:[%s13871_s0 + $0x188] sm:$0xff] }
 0x805   : > { %14627 = vst [vmem:[#allocation82_spill] sm:$0xff] %v11811_v19  ;;  %14628 = vst [vmem:[#allocation85_spill] sm:$0xff] %v11816_v42  ;;  %v3587_v31 = vadd.f32 %v11811_v19, %v11191_v46  ;;  %v3588_v8 = vadd.f32 %v11816_v42, %v11195_v21  ;;  %v6856_v47 = vpack.c.bf16 %v8112_v49, %v8108_v3  ;;  %8121 = vpow2.f32 %v3693_v54 }
 0x806   : > { %v3440_v27 = vpop.permute.xlu1 %3439  ;;  %8123 = vpow2.f32 %v3695_v11 }
 0x807   : > { %v3697_v29 = vmul.f32 1.442695, %v3587_v31  ;;  %v3699_v48 = vmul.f32 1.442695, %v3588_v8  ;;  %6857 = vmatprep.subr.bf16.mxu1 %v6856_v47  ;;  %v11825_v58 = vadd.f32 %v9117_v62, %v3440_v27  ;;  %v11830_v16 = vadd.f32 %v9118_v60, %v3440_v27  ;;  %v8114_v61 = vpop.eup %8113  ;;  %v9119_v27 = vld [vmem:[%s13871_s0 + $0x190] sm:$0xff] }
 0x808   : > { %6859 = vmatpush1.bf16.msra.mxu1 %v6858_v6  ;;  %v8116_v54 = vpop.eup %8115  ;;  %v9120_v6 = vld [vmem:[%s13871_s0 + $0x198] sm:$0xff] }
 0x809   : > { %14629 = vst [vmem:[#allocation84_spill] sm:$0xff] %v11825_v58  ;;  %14630 = vst [vmem:[#allocation86_spill] sm:$0xff] %v11830_v16  ;;  %8125 = vpow2.f32 %v3697_v29  ;;  %v3589_v3 = vadd.f32 %v11825_v58, %v11191_v46  ;;  %v3590_v47 = vadd.f32 %v11830_v16, %v11195_v21 }
 0x80a   : > { %8127 = vpow2.f32 %v3699_v48  ;;  %v3445_v49 = vpop.permute.xlu0 %3444 }
 0x80b   : > { %v8118_v31 = vpop.eup %8117  ;;  %v3701_v8 = vmul.f32 1.442695, %v3589_v3  ;;  %v11839_v62 = vadd.f32 %v9119_v27, %v3445_v49  ;;  %v11844_v11 = vadd.f32 %v9120_v6, %v3445_v49  ;;  %v3703_v60 = vmul.f32 1.442695, %v3590_v47  ;;  %v9121_v49 = vld [vmem:[%s13871_s0 + $0x1a0] sm:$0xff] }
 0x80c   : > { %v8120_v29 = vpop.eup %8119  ;;  %v6862_v58 = vpack.c.bf16 %v8118_v31, %v8114_v61  ;;  %v9122_v61 = vld [vmem:[%s13871_s0 + $0x1a8] sm:$0xff] }
 0x80d   : > { %14631 = vst [vmem:[#allocation3_spill] sm:$0xff] %v11839_v62  ;;  %14632 = vst [vmem:[#allocation5_spill] sm:$0xff] %v11844_v11  ;;  %v3591_v48 = vadd.f32 %v11839_v62, %v11191_v46  ;;  %v3592_v3 = vadd.f32 %v11844_v11, %v11195_v21  ;;  %v6860_v16 = vpack.c.bf16 %v8120_v29, %v8116_v54  ;;  %8129 = vpow2.f32 %v3701_v8 }
 0x80e   : > { %v3450_v19 = vpop.permute.xlu1 %3449  ;;  %8131 = vpow2.f32 %v3703_v60 }
 0x80f   : > { %v3705_v27 = vmul.f32 1.442695, %v3591_v48  ;;  %v3707_v42 = vmul.f32 1.442695, %v3592_v3  ;;  %6861 = vmatprep.subr.bf16.mxu1 %v6860_v16  ;;  %v11853_v6 = vadd.f32 %v9121_v49, %v3450_v19  ;;  %v11858_v47 = vadd.f32 %v9122_v61, %v3450_v19  ;;  %v8122_v31 = vpop.eup %8121  ;;  %v9123_v19 = vld [vmem:[%s13871_s0 + $0x1b0] sm:$0xff] }
 0x810   : > { %6863 = vmatpush1.bf16.msra.mxu1 %v6862_v58  ;;  %v8124_v8 = vpop.eup %8123  ;;  %v9124_v58 = vld [vmem:[%s13871_s0 + $0x1b8] sm:$0xff] }
 0x811   : > { %14633 = vst [vmem:[#allocation7_spill] sm:$0xff] %v11853_v6  ;;  %14634 = vst [vmem:[#allocation9_spill] sm:$0xff] %v11858_v47  ;;  %8133 = vpow2.f32 %v3705_v27  ;;  %v3593_v54 = vadd.f32 %v11853_v6, %v11191_v46  ;;  %v3594_v16 = vadd.f32 %v11858_v47, %v11195_v21 }
 0x812   : > { %8135 = vpow2.f32 %v3707_v42  ;;  %v3455_v29 = vpop.permute.xlu0 %3454 }
 0x813   : > { %v8126_v48 = vpop.eup %8125  ;;  %v3709_v3 = vmul.f32 1.442695, %v3593_v54  ;;  %v11867_v49 = vadd.f32 %v9123_v19, %v3455_v29  ;;  %v11872_v60 = vadd.f32 %v9124_v58, %v3455_v29  ;;  %v3711_v61 = vmul.f32 1.442695, %v3594_v16  ;;  %v9125_v29 = vld [vmem:[%s13871_s0 + $0x1c0] sm:$0xff] }
 0x814   : > { %v8128_v27 = vpop.eup %8127  ;;  %v6866_v6 = vpack.c.bf16 %v8126_v48, %v8122_v31  ;;  %v9126_v31 = vld [vmem:[%s13871_s0 + $0x1c8] sm:$0xff] }
 0x815   : > { %14635 = vst [vmem:[#allocation11_spill] sm:$0xff] %v11867_v49  ;;  %14636 = vst [vmem:[#allocation13_spill] sm:$0xff] %v11872_v60  ;;  %v3595_v42 = vadd.f32 %v11867_v49, %v11191_v46  ;;  %v3596_v54 = vadd.f32 %v11872_v60, %v11195_v21  ;;  %v6864_v47 = vpack.c.bf16 %v8128_v27, %v8124_v8  ;;  %8137 = vpow2.f32 %v3709_v3 }
 0x816   : > { %v3460_v62 = vpop.permute.xlu1 %3459  ;;  %8139 = vpow2.f32 %v3711_v61 }
 0x817   : > { %v3713_v19 = vmul.f32 1.442695, %v3595_v42  ;;  %v3715_v11 = vmul.f32 1.442695, %v3596_v54  ;;  %6865 = vmatprep.subr.bf16.mxu1 %v6864_v47  ;;  %v11881_v58 = vadd.f32 %v9125_v29, %v3460_v62  ;;  %v11886_v16 = vadd.f32 %v9126_v31, %v3460_v62  ;;  %v8130_v48 = vpop.eup %8129  ;;  %v9127_v62 = vld [vmem:[%s13871_s0 + $0x1d0] sm:$0xff] }
 0x818   : > { %6867 = vmatpush1.bf16.msra.mxu1 %v6866_v6  ;;  %v8132_v3 = vpop.eup %8131  ;;  %v9128_v6 = vld [vmem:[%s13871_s0 + $0x1d8] sm:$0xff] }
 0x819   : > { %14637 = vst [vmem:[#allocation15_spill] sm:$0xff] %v11881_v58  ;;  %14638 = vst [vmem:[#allocation17_spill] sm:$0xff] %v11886_v16  ;;  %8141 = vpow2.f32 %v3713_v19  ;;  %v3597_v8 = vadd.f32 %v11881_v58, %v11191_v46  ;;  %v3598_v47 = vadd.f32 %v11886_v16, %v11195_v21 }
 0x81a   : > { %8143 = vpow2.f32 %v3715_v11  ;;  %v3465_v27 = vpop.permute.xlu0 %3464 }
 0x81b   : > { %v8134_v42 = vpop.eup %8133  ;;  %v3717_v54 = vmul.f32 1.442695, %v3597_v8  ;;  %v11895_v29 = vadd.f32 %v9127_v62, %v3465_v27  ;;  %v11900_v61 = vadd.f32 %v9128_v6, %v3465_v27  ;;  %v3719_v31 = vmul.f32 1.442695, %v3598_v47  ;;  %v9129_v27 = vld [vmem:[%s13871_s0 + $0x1e0] sm:$0xff] }
 0x81c   : > { %v8136_v19 = vpop.eup %8135  ;;  %v6870_v58 = vpack.c.bf16 %v8134_v42, %v8130_v48  ;;  %v9130_v48 = vld [vmem:[%s13871_s0 + $0x1e8] sm:$0xff] }
 0x81d   : > { %14639 = vst [vmem:[#allocation19_spill] sm:$0xff] %v11895_v29  ;;  %14640 = vst [vmem:[#allocation21_spill] sm:$0xff] %v11900_v61  ;;  %v3599_v11 = vadd.f32 %v11895_v29, %v11191_v46  ;;  %v3600_v8 = vadd.f32 %v11900_v61, %v11195_v21  ;;  %v6868_v16 = vpack.c.bf16 %v8136_v19, %v8132_v3  ;;  %8145 = vpow2.f32 %v3717_v54 }
 0x81e   : > { %v3470_v49 = vpop.permute.xlu1 %3469  ;;  %8147 = vpow2.f32 %v3719_v31 }
 0x81f   : > { %v3721_v62 = vmul.f32 1.442695, %v3599_v11  ;;  %v3723_v60 = vmul.f32 1.442695, %v3600_v8  ;;  %6869 = vmatprep.subr.bf16.mxu1 %v6868_v16  ;;  %v11909_v6 = vadd.f32 %v9129_v27, %v3470_v49  ;;  %v11914_v47 = vadd.f32 %v9130_v48, %v3470_v49  ;;  %v8138_v42 = vpop.eup %8137  ;;  %v9131_v49 = vld [vmem:[%s13871_s0 + $0x1f0] sm:$0xff] }
 0x820   : > { %6871 = vmatpush1.bf16.msra.mxu1 %v6870_v58  ;;  %v8140_v54 = vpop.eup %8139  ;;  %v9132_v58 = vld [vmem:[%s13871_s0 + $0x1f8] sm:$0xff] }
 0x821   : > { %14641 = vst [vmem:[#allocation23_spill] sm:$0xff] %v11909_v6  ;;  %14642 = vst [vmem:[#allocation91_spill] sm:$0xff] %v11914_v47  ;;  %8149 = vpow2.f32 %v3721_v62  ;;  %v3601_v3 = vadd.f32 %v11909_v6, %v11191_v46  ;;  %v3602_v16 = vadd.f32 %v11914_v47, %v11195_v21 }
 0x822   : > { %8151 = vpow2.f32 %v3723_v60  ;;  %v3475_v19 = vpop.permute.xlu0 %3474 }
 0x823   : > { %v8142_v11 = vpop.eup %8141  ;;  %v3725_v8 = vmul.f32 1.442695, %v3601_v3  ;;  %v11923_v27 = vadd.f32 %v9131_v49, %v3475_v19  ;;  %v11928_v31 = vadd.f32 %v9132_v58, %v3475_v19  ;;  %v3727_v48 = vmul.f32 1.442695, %v3602_v16 }
 0x824   : > { %v8144_v62 = vpop.eup %8143  ;;  %v6874_v6 = vpack.c.bf16 %v8142_v11, %v8138_v42 }
 0x825   : > { %14643 = vst [vmem:[#allocation92_spill] sm:$0xff] %v11923_v27  ;;  %v3603_v60 = vadd.f32 %v11923_v27, %v11191_v46  ;;  %v3604_v3 = vadd.f32 %v11928_v31, %v11195_v21  ;;  %v6872_v47 = vpack.c.bf16 %v8144_v62, %v8140_v54  ;;  %8153 = vpow2.f32 %v3725_v8 }
 0x826   : > { %8155 = vpow2.f32 %v3727_v48 }
 0x827   : > { %v3729_v29 = vmul.f32 1.442695, %v3603_v60  ;;  %v3731_v49 = vmul.f32 1.442695, %v3604_v3  ;;  %6873 = vmatprep.subr.bf16.mxu1 %v6872_v47  ;;  %v8146_v61 = vpop.eup %8145 }
 0x828   : > { %6875 = vmatpush1.bf16.msra.mxu1 %v6874_v6  ;;  %v8148_v19 = vpop.eup %8147 }
 0x829   : > { %8157 = vpow2.f32 %v3729_v29 }
 0x82a   : > { %8159 = vpow2.f32 %v3731_v49 }
 0x82b   : > { %v8150_v58 = vpop.eup %8149 }
 0x82c   : > { %v8152_v16 = vpop.eup %8151  ;;  %v6878_v42 = vpack.c.bf16 %v8150_v58, %v8146_v61 }
 0x82d   : > { %v6876_v11 = vpack.c.bf16 %v8152_v16, %v8148_v19 }
 0x82f   : > { %6877 = vmatprep.subr.bf16.mxu1 %v6876_v11  ;;  %v8154_v46 = vpop.eup %8153 }
 0x830   : > { %6879 = vmatpush1.bf16.msra.mxu1 %v6878_v42  ;;  %v8156_v27 = vpop.eup %8155 }
 0x833   : > { %v8158_v21 = vpop.eup %8157 }
 0x834   : > { %v8160_v54 = vpop.eup %8159  ;;  %v6882_v8 = vpack.c.bf16 %v8158_v21, %v8154_v46 }
 0x835   : > { %v6880_v62 = vpack.c.bf16 %v8160_v54, %v8156_v27 }
 0x837   : > { %6881 = vmatprep.subr.bf16.mxu1 %v6880_v62 }
 0x838   : > { %6883 = vmatpush1.bf16.msra.mxu1 %v6882_v8 }
 0x839   : > { %6884 = vmatprep.subr.bf16.mxu1 %v14494_v50 }
 0x83b   : > { %3798 = vmatmul.mubr.f32.vlgmr.msra.gmra.mrb[66].mxu1 %v14350_v43 }
 0x83c   : > { %6885 = vmatpush1.bf16.msra.mxu1 %v14495_v5 }
 0x83d   : > { %6886 = vmatprep.subr.bf16.mxu1 %v14494_v50 }
 0x840   : > { %6887 = vmatpush1.bf16.msra.mxu1 %v14495_v5 }
 0x841   : > { %6888 = vmatprep.subr.bf16.mxu1 %v14494_v50 }
 0x844   : > { %6889 = vmatpush1.bf16.msra.mxu1 %v14495_v5 }
 0x845   : > { %6890 = vmatprep.subr.bf16.mxu1 %v14494_v50 }
 0x848   : > { %6891 = vmatpush1.bf16.msra.mxu1 %v14495_v5 }
 0x849   : > { %6892 = vmatprep.subr.bf16.mxu1 %v14494_v50 }
 0x84c   : > { %6893 = vmatpush1.bf16.msra.mxu1 %v14495_v5 }
 0x84d   : > { %6894 = vmatprep.subr.bf16.mxu1 %v14494_v50 }
 0x850   : > { %6895 = vmatpush1.bf16.msra.mxu1 %v14495_v5 }
 0x851   : > { %6896 = vmatprep.subr.bf16.mxu1 %v14494_v50 }
 0x854   : > { %6897 = vmatpush1.bf16.msra.mxu1 %v14495_v5 }
 0x855   : > { %6898 = vmatprep.subr.bf16.mxu1 %v14494_v50 }
 0x858   : > { %6899 = vmatpush1.bf16.msra.mxu1 %v14495_v5 }
 0x859   : > { %6900 = vmatprep.subr.bf16.mxu1 %v14494_v50 }
 0x85c   : > { %6901 = vmatpush1.bf16.msra.mxu1 %v14495_v5 }
 0x85d   : > { %6902 = vmatprep.subr.bf16.mxu1 %v14494_v50 }
 0x860   : > { %6903 = vmatpush1.bf16.msra.mxu1 %v14495_v5 }
 0x861   : > { %6904 = vmatprep.subr.bf16.mxu1 %v14494_v50 }
 0x864   : > { %6905 = vmatpush1.bf16.msra.mxu1 %v14495_v5 }
 0x865   : > { %6906 = vmatprep.subr.bf16.mxu1 %v14494_v50 }
 0x868   : > { %6907 = vmatpush1.bf16.msra.mxu1 %v14495_v5 }
 0x869   : > { %6908 = vmatprep.subr.bf16.mxu1 %v14494_v50 }
 0x86c   : > { %6909 = vmatpush1.bf16.msra.mxu1 %v14495_v5 }
 0x86d   : > { %6910 = vmatprep.subr.bf16.mxu1 %v14494_v50 }
 0x870   : > { %6911 = vmatpush1.bf16.msra.mxu1 %v14495_v5 }
 0x871   : > { %6912 = vmatprep.subr.bf16.mxu1 %v14494_v50 }
 0x874   : > { %6913 = vmatpush1.bf16.msra.mxu1 %v14495_v5 }
 0x875   : > { %6914 = vmatprep.subr.bf16.mxu1 %v14494_v50 }
 0x878   : > { %6915 = vmatpush1.bf16.msra.mxu1 %v14495_v5 }
 0x879   : > { %7076 = vmatprep.subr.bf16.mxu1 %v14494_v50 }
 0x90e   : > { %v3799_v29 = vpop.f32.mrb[66].mxu1 }
 0x90f   : > { %v3800_v61 = vadd.f32 1e-30, %v3799_v29  ;;  %v3801_v6 = vpop.f32.mrb[67].mxu1 }
 0x910   : > { %v3802_v47 = vadd.f32 1e-30, %v3801_v6 }
 0x911   : > { %8161 = vlog2.f32 %v3800_v61 }
 0x912   : > { %8163 = vlog2.f32 %v3802_v47 }
 0x91b   : > { %v8162_v27 = vpop.eup %8161 }
 0x91c   : > { %v8164_v48 = vpop.eup %8163  ;;  %v3805_v60 = vmul.f32 0.6931472, %v8162_v27 }
 0x91d   : > { %v3807_v3 = vmul.f32 0.6931472, %v8164_v48 }
 0x91f   : > { %v3810_v49 = vcombine.low %v3805_v60, %v3807_v3 }
 0x921   : > { %v3817_v19 = vrot.slane %v3810_v49, %v10396_v26 }
 0x923   : > { %v3824_v58 = vrot.slane %v3817_v19, %v10396_v26 }
 0x925   : > { %v3826_v16 = vsub.f32 %v10399_v7, %v3824_v58 }
 0x927   : > { %v11972_v42 = vadd.f32 %v3826_v16, %v11187_v10 }
 0x929   : > { %v11976_v11 = vrot.slane %v11972_v42, %v10037_v4  ;;  %v11980_v46 = vrot.slane %v11972_v42, %v10040_v2 }
 0x92b   : > { %v3839_v21 = vadd.f32 %v11976_v11, %v11489_v9  ;;  %v3840_v54 = vadd.f32 %v11980_v46, %v11494_v40  ;;  %v3842_v8 = vadd.f32 %v11980_v46, %v11508_v20  ;;  %v3841_v10 = vadd.f32 %v11976_v11, %v11503_v33 }
 0x92c   : > { %v3844_v61 = vadd.f32 %v11980_v46, %v11522_v37  ;;  %v3843_v9 = vadd.f32 %v11976_v11, %v11517_v53  ;;  %v3846_v40 = vadd.f32 %v11980_v46, %v11536_v23  ;;  %v3845_v33 = vadd.f32 %v11976_v11, %v11531_v38 }
 0x92d   : > { %v3903_v62 = vmul.f32 1.442695, %v3839_v21  ;;  %v3905_v29 = vmul.f32 1.442695, %v3840_v54  ;;  %v3909_v6 = vmul.f32 1.442695, %v3842_v8  ;;  %v3848_v37 = vadd.f32 %v11980_v46, %v11550_v0 }
 0x92e   : > { %v3907_v47 = vmul.f32 1.442695, %v3841_v10  ;;  %v3913_v20 = vmul.f32 1.442695, %v3844_v61  ;;  %v3911_v27 = vmul.f32 1.442695, %v3843_v9  ;;  %v3847_v53 = vadd.f32 %v11976_v11, %v11545_v30 }
 0x92f   : > { %8165 = vpow2.f32 %v3903_v62  ;;  %v3917_v48 = vmul.f32 1.442695, %v3846_v40  ;;  %v3915_v3 = vmul.f32 1.442695, %v3845_v33  ;;  %v3850_v23 = vadd.f32 %v11980_v46, %v11564_v15 }
 0x930   : > { %8167 = vpow2.f32 %v3905_v29  ;;  %v3921_v19 = vmul.f32 1.442695, %v3848_v37  ;;  %v3849_v0 = vadd.f32 %v11976_v11, %v11559_v52  ;;  %v3919_v58 = vmul.f32 1.442695, %v3847_v53 }
 0x931   : > { %8169 = vpow2.f32 %v3909_v6  ;;  %v3852_v30 = vadd.f32 %v11980_v46, %v11578_v32  ;;  %v3925_v16 = vmul.f32 1.442695, %v3850_v23  ;;  %v3851_v54 = vadd.f32 %v11976_v11, %v11573_v14 }
 0x932   : > { %8171 = vpow2.f32 %v3907_v47  ;;  %v3923_v52 = vmul.f32 1.442695, %v3849_v0  ;;  %v3854_v8 = vadd.f32 %v11980_v46, %v11592_v18  ;;  %v3853_v29 = vadd.f32 %v11976_v11, %v11587_v44 }
 0x933   : > { %8173 = vpow2.f32 %v3913_v20  ;;  %v3929_v32 = vmul.f32 1.442695, %v3852_v30  ;;  %v3927_v14 = vmul.f32 1.442695, %v3851_v54  ;;  %v3856_v61 = vadd.f32 %v11980_v46, %v11606_v56 }
 0x934   : > { %8175 = vpow2.f32 %v3911_v27  ;;  %v3933_v18 = vmul.f32 1.442695, %v3854_v8  ;;  %v3855_v47 = vadd.f32 %v11976_v11, %v11601_v36  ;;  %v3931_v44 = vmul.f32 1.442695, %v3853_v29 }
 0x935   : > { %8177 = vpow2.f32 %v3917_v48  ;;  %v3858_v40 = vadd.f32 %v11980_v46, %v11620_v12  ;;  %v3937_v56 = vmul.f32 1.442695, %v3856_v61  ;;  %v3857_v27 = vadd.f32 %v11976_v11, %v11615_v22 }
 0x936   : > { %8179 = vpow2.f32 %v3915_v3  ;;  %v3935_v36 = vmul.f32 1.442695, %v3855_v47  ;;  %v3860_v37 = vadd.f32 %v11980_v46, %v11634_v28  ;;  %v3859_v53 = vadd.f32 %v11976_v11, %v11629_v63 }
 0x937   : > { %8181 = vpow2.f32 %v3921_v19  ;;  %v3941_v12 = vmul.f32 1.442695, %v3858_v40  ;;  %v3939_v22 = vmul.f32 1.442695, %v3857_v27  ;;  %v3862_v3 = vadd.f32 %v11980_v46, %v11648_v51 }
 0x938   : > { %8183 = vpow2.f32 %v3919_v58  ;;  %v3945_v28 = vmul.f32 1.442695, %v3860_v37  ;;  %v3861_v19 = vadd.f32 %v11976_v11, %v11643_v1  ;;  %v3943_v63 = vmul.f32 1.442695, %v3859_v53 }
 0x939   : > { %v8166_v60 = vpop.eup %8165  ;;  %8185 = vpow2.f32 %v3925_v16  ;;  %v3949_v51 = vmul.f32 1.442695, %v3862_v3  ;;  %v3863_v30 = vadd.f32 %v11976_v11, %v11657_v39  ;;  %v3866_v16 = vadd.f32 %v11980_v46, %v11676_v24 }
 0x93a   : > { %v8168_v49 = vpop.eup %8167  ;;  %8187 = vpow2.f32 %v3923_v52  ;;  %v3947_v1 = vmul.f32 1.442695, %v3861_v19  ;;  %v3865_v54 = vadd.f32 %v11976_v11, %v11671_v13  ;;  %v3868_v52 = vadd.f32 %v11980_v46, %v11690_v17 }
 0x93b   : > { %4095 = vmatprep.mubr.f32.mxu1 %v8168_v49  ;;  %v8170_v38 = vpop.eup %8169  ;;  %8189 = vpow2.f32 %v3929_v32  ;;  %v3951_v39 = vmul.f32 1.442695, %v3863_v30  ;;  %v3957_v24 = vmul.f32 1.442695, %v3866_v16  ;;  %v3869_v61 = vadd.f32 %v11976_v11, %v11699_v59  ;;  %v14649_v30 = vld [vmem:[#allocation76_spill] sm:$0xff] }
 0x93c   : > { %4096 = vmatmul.mubr.f32.vlgmr.msra.gmra.mrb[68].mxu1 %v8166_v60  ;;  %v8172_v15 = vpop.eup %8171  ;;  %8191 = vpow2.f32 %v3927_v14  ;;  %v3955_v13 = vmul.f32 1.442695, %v3865_v54  ;;  %v3961_v17 = vmul.f32 1.442695, %v3868_v52  ;;  %v3871_v47 = vadd.f32 %v11976_v11, %v11713_v45  ;;  %v14651_v52 = vld [vmem:[#allocation78_spill] sm:$0xff] }
 0x93d   : > { %4100 = vmatprep.mubr.f32.mxu1 %v8170_v38  ;;  %7077 = vmatpush1.bf16.msra.mxu1 %v14495_v5  ;;  %v8174_v21 = vpop.eup %8173  ;;  %8193 = vpow2.f32 %v3933_v18  ;;  %v3864_v38 = vadd.f32 %v11980_v46, %v11662_v25  ;;  %v3872_v18 = vadd.f32 %v11980_v46, %v11718_v55  ;;  %v3963_v59 = vmul.f32 1.442695, %v3869_v61 }
 0x93e   : > { %7078 = vmatprep.subr.bf16.mxu1 %v14494_v50  ;;  %v8176_v10 = vpop.eup %8175  ;;  %8195 = vpow2.f32 %v3931_v44  ;;  %v3874_v44 = vadd.f32 %v11980_v46, %v11732_v34  ;;  %v3967_v45 = vmul.f32 1.442695, %v3871_v47  ;;  %v14655_v47 = vld [vmem:[#allocation82_spill] sm:$0xff] }
 0x93f   : > { %v8178_v62 = vpop.eup %8177  ;;  %8197 = vpow2.f32 %v3937_v56  ;;  %v3953_v25 = vmul.f32 1.442695, %v3864_v38  ;;  %v3969_v55 = vmul.f32 1.442695, %v3872_v18 }
 0x940   : > { %4101 = vmatmul.mubr.f32.gmra.mrb[70].mxu1 %v8172_v15  ;;  %v8180_v6 = vpop.eup %8179  ;;  %8199 = vpow2.f32 %v3935_v36  ;;  %v3973_v34 = vmul.f32 1.442695, %v3874_v44 }
 0x941   : > { %4105 = vmatprep.mubr.f32.mxu1 %v8174_v21  ;;  %7079 = vmatpush1.bf16.msra.mxu1 %v14495_v5  ;;  %v8182_v9 = vpop.eup %8181  ;;  %8201 = vpow2.f32 %v3941_v12  ;;  %v14645_v12 = vld [vmem:[#allocation72_spill] sm:$0xff] }
 0x942   : > { %7080 = vmatprep.subr.bf16.mxu1 %v14494_v50  ;;  %v8184_v20 = vpop.eup %8183  ;;  %8203 = vpow2.f32 %v3939_v22 }
 0x943   : > { %v8186_v33 = vpop.eup %8185  ;;  %8205 = vpow2.f32 %v3945_v28 }
 0x944   : > { %4106 = vmatmul.mubr.f32.gmra.mrb[72].mxu1 %v8176_v10  ;;  %v8188_v48 = vpop.eup %8187  ;;  %8207 = vpow2.f32 %v3943_v63  ;;  %v3867_v10 = vadd.f32 %v11976_v11, %v11685_v35  ;;  %v14648_v63 = vld [vmem:[#allocation79_spill] sm:$0xff] }
 0x945   : > { %4110 = vmatprep.mubr.f32.mxu1 %v8178_v62  ;;  %7081 = vmatpush1.bf16.msra.mxu1 %v14495_v5  ;;  %v8190_v60 = vpop.eup %8189  ;;  %8209 = vpow2.f32 %v3949_v51  ;;  %v3870_v62 = vadd.f32 %v11980_v46, %v11704_v41  ;;  %v3880_v38 = vadd.f32 %v11980_v46, %v14648_v63  ;;  %v14661_v63 = vld [vmem:[#allocation7_spill] sm:$0xff] }
 0x946   : > { %7082 = vmatprep.subr.bf16.mxu1 %v14494_v50  ;;  %v8192_v49 = vpop.eup %8191  ;;  %8211 = vpow2.f32 %v3947_v1  ;;  %v3959_v35 = vmul.f32 1.442695, %v3867_v10  ;;  %v3879_v1 = vadd.f32 %v11976_v11, %v14649_v30 }
 0x947   : > { %v8194_v23 = vpop.eup %8193  ;;  %8213 = vpow2.f32 %v3953_v25  ;;  %v3965_v41 = vmul.f32 1.442695, %v3870_v62  ;;  %v14650_v25 = vld [vmem:[#allocation81_spill] sm:$0xff] }
 0x948   : > { %4111 = vmatmul.mubr.f32.gmra.mrb[74].mxu1 %v8180_v6  ;;  %v8196_v0 = vpop.eup %8195  ;;  %8215 = vpow2.f32 %v3951_v39 }
 0x949   : > { %4115 = vmatprep.mubr.f32.mxu1 %v8182_v9  ;;  %7083 = vmatpush1.bf16.msra.mxu1 %v14495_v5  ;;  %v8198_v58 = vpop.eup %8197  ;;  %8217 = vpow2.f32 %v3957_v24  ;;  %v3881_v24 = vadd.f32 %v11976_v11, %v14651_v52 }
 0x94a   : > { %7084 = vmatprep.subr.bf16.mxu1 %v14494_v50  ;;  %v8200_v15 = vpop.eup %8199  ;;  %8219 = vpow2.f32 %v3955_v13 }
 0x94b   : > { %v8202_v21 = vpop.eup %8201  ;;  %8221 = vpow2.f32 %v3961_v17  ;;  %v3987_v61 = vmul.f32 1.442695, %v3881_v24 }
 0x94c   : > { %4116 = vmatmul.mubr.f32.gmra.mrb[76].mxu1 %v8184_v20  ;;  %v8204_v8 = vpop.eup %8203  ;;  %8223 = vpow2.f32 %v3959_v35  ;;  %v3873_v20 = vadd.f32 %v11976_v11, %v11727_v57  ;;  %v14654_v35 = vld [vmem:[#allocation85_spill] sm:$0xff] }
 0x94d   : > { %4120 = vmatprep.mubr.f32.mxu1 %v8186_v33  ;;  %7085 = vmatpush1.bf16.msra.mxu1 %v14495_v5  ;;  %v8206_v32 = vpop.eup %8205  ;;  %8225 = vpow2.f32 %v3965_v41  ;;  %v14644_v33 = vld [vmem:[#allocation75_spill] sm:$0xff]  ;;  %v3886_v18 = vadd.f32 %v11980_v46, %v14654_v35 }
 0x94e   : > { %7086 = vmatprep.subr.bf16.mxu1 %v14494_v50  ;;  %v8208_v29 = vpop.eup %8207  ;;  %8227 = vpow2.f32 %v3963_v59  ;;  %v3876_v27 = vadd.f32 %v11980_v46, %v14644_v33  ;;  %v3971_v57 = vmul.f32 1.442695, %v3873_v20  ;;  %v3885_v59 = vadd.f32 %v11976_v11, %v14655_v47  ;;  %v14657_v33 = vld [vmem:[#allocation84_spill] sm:$0xff]  ;;  %v14667_v35 = vld [vmem:[#allocation19_spill] sm:$0xff] }
 0x94f   : > { %v8210_v14 = vpop.eup %8209  ;;  %8229 = vpow2.f32 %v3969_v55  ;;  %v14656_v55 = vld [vmem:[#allocation86_spill] sm:$0xff] }
 0x950   : > { %4121 = vmatmul.mubr.f32.gmra.mrb[78].mxu1 %v8188_v48  ;;  %v8212_v6 = vpop.eup %8211  ;;  %v3875_v48 = vadd.f32 %v11976_v11, %v14645_v12  ;;  %8231 = vpow2.f32 %v3967_v45  ;;  %v3977_v22 = vmul.f32 1.442695, %v3876_v27  ;;  %v3887_v27 = vadd.f32 %v11976_v11, %v14657_v33 }
 0x951   : > { %4125 = vmatprep.mubr.f32.mxu1 %v8190_v60  ;;  %7087 = vmatpush1.bf16.msra.mxu1 %v14495_v5  ;;  %v8214_v9 = vpop.eup %8213  ;;  %v14646_v60 = vld [vmem:[#allocation77_spill] sm:$0xff]  ;;  %8233 = vpow2.f32 %v3973_v34  ;;  %v3995_v34 = vmul.f32 1.442695, %v3885_v59 }
 0x952   : > { %7088 = vmatprep.subr.bf16.mxu1 %v14494_v50  ;;  %v8216_v40 = vpop.eup %8215  ;;  %v3878_v53 = vadd.f32 %v11980_v46, %v14646_v60  ;;  %8235 = vpow2.f32 %v3971_v57  ;;  %v3975_v19 = vmul.f32 1.442695, %v3875_v48  ;;  %v14659_v60 = vld [vmem:[#allocation3_spill] sm:$0xff] }
 0x953   : > { %v8218_v56 = vpop.eup %8217  ;;  %8237 = vpow2.f32 %v3977_v22  ;;  %v3999_v22 = vmul.f32 1.442695, %v3887_v27 }
 0x954   : > { %4126 = vmatmul.mubr.f32.gmra.mrb[80].mxu1 %v8192_v49  ;;  %v8220_v36 = vpop.eup %8219  ;;  %v14647_v49 = vld [vmem:[#allocation74_spill] sm:$0xff]  ;;  %v3981_v51 = vmul.f32 1.442695, %v3878_v53  ;;  %8239 = vpow2.f32 %v3975_v19  ;;  %v3889_v53 = vadd.f32 %v11976_v11, %v14659_v60 }
 0x955   : > { %4130 = vmatprep.mubr.f32.mxu1 %v8194_v23  ;;  %7089 = vmatpush1.bf16.msra.mxu1 %v14495_v5  ;;  %v8222_v37 = vpop.eup %8221  ;;  %v3877_v23 = vadd.f32 %v11976_v11, %v14647_v49 }
 0x956   : > { %7090 = vmatprep.subr.bf16.mxu1 %v14494_v50  ;;  %v8224_v3 = vpop.eup %8223  ;;  %8241 = vpow2.f32 %v3981_v51  ;;  %v4003_v51 = vmul.f32 1.442695, %v3889_v53 }
 0x957   : > { %v8226_v28 = vpop.eup %8225  ;;  %v3979_v16 = vmul.f32 1.442695, %v3877_v23 }
 0x958   : > { %4131 = vmatmul.mubr.f32.gmra.mrb[82].mxu1 %v8196_v0  ;;  %v8228_v0 = vpop.eup %8227 }
 0x959   : > { %4135 = vmatprep.mubr.f32.mxu1 %v8198_v58  ;;  %7091 = vmatpush1.bf16.msra.mxu1 %v14495_v5  ;;  %v8230_v58 = vpop.eup %8229  ;;  %8243 = vpow2.f32 %v3979_v16 }
 0x95a   : > { %7092 = vmatprep.subr.bf16.mxu1 %v14494_v50  ;;  %v8232_v54 = vpop.eup %8231 }
 0x95b   : > { %v8234_v39 = vpop.eup %8233 }
 0x95c   : > { %4136 = vmatmul.mubr.f32.gmra.mrb[84].mxu1 %v8200_v15  ;;  %v3882_v15 = vadd.f32 %v11980_v46, %v14650_v25  ;;  %v8236_v62 = vpop.eup %8235  ;;  %v14663_v25 = vld [vmem:[#allocation11_spill] sm:$0xff] }
 0x95d   : > { %4140 = vmatprep.mubr.f32.mxu1 %v8202_v21  ;;  %7093 = vmatpush1.bf16.msra.mxu1 %v14495_v5  ;;  %v3985_v21 = vmul.f32 1.442695, %v3880_v38  ;;  %v8238_v17 = vpop.eup %8237  ;;  %v3891_v38 = vadd.f32 %v11976_v11, %v14661_v63 }
 0x95e   : > { %7094 = vmatprep.subr.bf16.mxu1 %v14494_v50  ;;  %v3989_v13 = vmul.f32 1.442695, %v3882_v15  ;;  %v3893_v15 = vadd.f32 %v11976_v11, %v14663_v25 }
 0x95f   : > { %8245 = vpow2.f32 %v3985_v21  ;;  %v4007_v21 = vmul.f32 1.442695, %v3891_v38 }
 0x960   : > { %4141 = vmatmul.mubr.f32.gmra.mrb[86].mxu1 %v8204_v8  ;;  %v3983_v8 = vmul.f32 1.442695, %v3879_v1 }
 0x961   : > { %4145 = vmatprep.mubr.f32.mxu1 %v8206_v32  ;;  %7095 = vmatpush1.bf16.msra.mxu1 %v14495_v5  ;;  %v14652_v32 = vld [vmem:[#allocation83_spill] sm:$0xff] }
 0x962   : > { %7096 = vmatprep.subr.bf16.mxu1 %v14494_v50  ;;  %v3884_v10 = vadd.f32 %v11980_v46, %v14652_v32  ;;  %8247 = vpow2.f32 %v3983_v8  ;;  %v14665_v32 = vld [vmem:[#allocation15_spill] sm:$0xff] }
 0x963   : > { %8249 = vpow2.f32 %v3989_v13  ;;  %v4011_v13 = vmul.f32 1.442695, %v3893_v15 }
 0x964   : > { %4146 = vmatmul.mubr.f32.gmra.mrb[88].mxu1 %v8208_v29  ;;  %v14653_v29 = vld [vmem:[#allocation80_spill] sm:$0xff]  ;;  %v3993_v41 = vmul.f32 1.442695, %v3884_v10  ;;  %8251 = vpow2.f32 %v3987_v61  ;;  %v3895_v10 = vadd.f32 %v11976_v11, %v14665_v32 }
 0x965   : > { %4150 = vmatprep.mubr.f32.mxu1 %v8210_v14  ;;  %7097 = vmatpush1.bf16.msra.mxu1 %v14495_v5  ;;  %v3883_v14 = vadd.f32 %v11976_v11, %v14653_v29 }
 0x966   : > { %7098 = vmatprep.subr.bf16.mxu1 %v14494_v50  ;;  %8253 = vpow2.f32 %v3993_v41  ;;  %v4015_v41 = vmul.f32 1.442695, %v3895_v10 }
 0x967   : > { %v3991_v44 = vmul.f32 1.442695, %v3883_v14 }
 0x968   : > { %4151 = vmatmul.mubr.f32.gmra.mrb[90].mxu1 %v8212_v6  ;;  %v8240_v6 = vpop.eup %8239 }
 0x969   : > { %4155 = vmatprep.mubr.f32.mxu1 %v8214_v9  ;;  %7099 = vmatpush1.bf16.msra.mxu1 %v14495_v5  ;;  %v8242_v9 = vpop.eup %8241  ;;  %8255 = vpow2.f32 %v3991_v44 }
 0x96a   : > { %7100 = vmatprep.subr.bf16.mxu1 %v14494_v50  ;;  %v8244_v20 = vpop.eup %8243 }
 0x96b   : > { %v8246_v45 = vpop.eup %8245 }
 0x96c   : > { %4156 = vmatmul.mubr.f32.gmra.mrb[92].mxu1 %v8216_v40  ;;  %v3888_v40 = vadd.f32 %v11980_v46, %v14656_v55  ;;  %v8248_v48 = vpop.eup %8247  ;;  %v14669_v55 = vld [vmem:[#allocation23_spill] sm:$0xff] }
 0x96d   : > { %4160 = vmatprep.mubr.f32.mxu1 %v8218_v56  ;;  %7101 = vmatpush1.bf16.msra.mxu1 %v14495_v5  ;;  %v3997_v56 = vmul.f32 1.442695, %v3886_v18  ;;  %v8250_v57 = vpop.eup %8249  ;;  %v3897_v18 = vadd.f32 %v11976_v11, %v14667_v35 }
 0x96e   : > { %7102 = vmatprep.subr.bf16.mxu1 %v14494_v50  ;;  %v4001_v12 = vmul.f32 1.442695, %v3888_v40  ;;  %v8252_v23 = vpop.eup %8251  ;;  %v3899_v40 = vadd.f32 %v11976_v11, %v14669_v55 }
 0x96f   : > { %8257 = vpow2.f32 %v3997_v56  ;;  %v4019_v56 = vmul.f32 1.442695, %v3897_v18 }
 0x970   : > { %4161 = vmatmul.mubr.f32.gmra.mrb[94].mxu1 %v8220_v36  ;;  %v14658_v36 = vld [vmem:[#allocation5_spill] sm:$0xff]  ;;  %8259 = vpow2.f32 %v3995_v34  ;;  %v8254_v19 = vpop.eup %8253  ;;  %v14670_v34 = vld [vmem:[#allocation92_spill] sm:$0xff] }
 0x971   : > { %4165 = vmatprep.mubr.f32.mxu1 %v8222_v37  ;;  %7103 = vmatpush1.bf16.msra.mxu1 %v14495_v5  ;;  %v3890_v37 = vadd.f32 %v11980_v46, %v14658_v36  ;;  %8261 = vpow2.f32 %v4001_v12  ;;  %v3901_v36 = vadd.f32 %v11976_v11, %v14670_v34 }
 0x972   : > { %7104 = vmatprep.subr.bf16.mxu1 %v14494_v50  ;;  %8263 = vpow2.f32 %v3999_v22 }
 0x973   : > { %v4005_v49 = vmul.f32 1.442695, %v3890_v37  ;;  %v8256_v1 = vpop.eup %8255  ;;  %v4023_v37 = vmul.f32 1.442695, %v3899_v40  ;;  %v4027_v60 = vmul.f32 1.442695, %v3901_v36 }
 0x974   : > { %4166 = vmatmul.mubr.f32.gmra.mrb[96].mxu1 %v8224_v3  ;;  %v14660_v3 = vld [vmem:[#allocation9_spill] sm:$0xff]  ;;  %v14680_v36 = vld [vmem:[#allocation8_spill] sm:$0xff] }
 0x975   : > { %4170 = vmatprep.mubr.f32.mxu1 %v8226_v28  ;;  %7105 = vmatpush1.bf16.msra.mxu1 %v14495_v5  ;;  %v3892_v28 = vadd.f32 %v11980_v46, %v14660_v3  ;;  %8265 = vpow2.f32 %v4005_v49 }
 0x976   : > { %7106 = vmatprep.subr.bf16.mxu1 %v14494_v50  ;;  %8267 = vpow2.f32 %v4003_v51 }
 0x977   : > { %v4009_v30 = vmul.f32 1.442695, %v3892_v28 }
 0x978   : > { %4171 = vmatmul.mubr.f32.gmra.mrb[98].mxu1 %v8228_v0  ;;  %v14662_v0 = vld [vmem:[#allocation13_spill] sm:$0xff] }
 0x979   : > { %4175 = vmatprep.mubr.f32.mxu1 %v8230_v58  ;;  %7107 = vmatpush1.bf16.msra.mxu1 %v14495_v5  ;;  %v3894_v58 = vadd.f32 %v11980_v46, %v14662_v0  ;;  %v8258_v16 = vpop.eup %8257  ;;  %8269 = vpow2.f32 %v4009_v30 }
 0x97a   : > { %v8260_v24 = vpop.eup %8259  ;;  %8271 = vpow2.f32 %v4007_v21 }
 0x97b   : > { %v4013_v52 = vmul.f32 1.442695, %v3894_v58  ;;  %v8262_v8 = vpop.eup %8261 }
 0x97c   : > { %4176 = vmatmul.mubr.f32.gmra.mrb[100].mxu1 %v8232_v54  ;;  %v14664_v54 = vld [vmem:[#allocation17_spill] sm:$0xff]  ;;  %v8264_v14 = vpop.eup %8263 }
 0x97d   : > { %4180 = vmatprep.mubr.f32.mxu1 %v8234_v39  ;;  %v3896_v39 = vadd.f32 %v11980_v46, %v14664_v54  ;;  %8273 = vpow2.f32 %v4013_v52  ;;  %v14671_v52 = vld [vmem:[#allocation2_spill] sm:$0xff] }
 0x97e   : > { %8275 = vpow2.f32 %v4011_v13 }
 0x97f   : > { %v4017_v29 = vmul.f32 1.442695, %v3896_v39  ;;  %v8266_v61 = vpop.eup %8265 }
 0x980   : > { %4181 = vmatmul.mubr.f32.gmra.mrb[102].mxu1 %v8236_v62  ;;  %v14666_v62 = vld [vmem:[#allocation21_spill] sm:$0xff]  ;;  %v8268_v59 = vpop.eup %8267 }
 0x981   : > { %4185 = vmatprep.mubr.f32.mxu1 %v8238_v17  ;;  %v3898_v17 = vadd.f32 %v11980_v46, %v14666_v62  ;;  %8277 = vpow2.f32 %v4017_v29 }
 0x982   : > { %8279 = vpow2.f32 %v4015_v41 }
 0x983   : > { %v4021_v47 = vmul.f32 1.442695, %v3898_v17  ;;  %v8270_v44 = vpop.eup %8269  ;;  %v14672_v17 = vld [vmem:[#allocation27_spill] sm:$0xff] }
 0x984   : > { %4186 = vmatmul.mubr.f32.gmra.mrb[104].mxu1 %v8240_v6  ;;  %v14668_v6 = vld [vmem:[#allocation91_spill] sm:$0xff]  ;;  %v8272_v33 = vpop.eup %8271 }
 0x985   : > { %4190 = vmatprep.mubr.f32.mxu1 %v8242_v9  ;;  %v3900_v9 = vadd.f32 %v11980_v46, %v14668_v6  ;;  %8281 = vpow2.f32 %v4021_v47  ;;  %v14675_v47 = vld [vmem:[#allocation25_spill] sm:$0xff] }
 0x986   : > { %8283 = vpow2.f32 %v4019_v56 }
 0x987   : > { %v8274_v27 = vpop.eup %8273 }
 0x988   : > { %4191 = vmatmul.mubr.f32.gmra.mrb[106].mxu1 %v8244_v20  ;;  %v3902_v20 = vadd.f32 %v11980_v46, %v11928_v31 }
 0x989   : > { %4195 = vmatprep.mubr.f32.mxu1 %v8246_v45  ;;  %v4025_v45 = vmul.f32 1.442695, %v3900_v9 }
 0x98a   : > { %v4029_v12 = vmul.f32 1.442695, %v3902_v20 }
 0x98b   : > { %8285 = vpow2.f32 %v4025_v45 }
 0x98c   : > { %4196 = vmatmul.mubr.f32.gmra.mrb[108].mxu1 %v8248_v48  ;;  %v8276_v48 = vpop.eup %8275  ;;  %8287 = vpow2.f32 %v4023_v37 }
 0x98d   : > { %4200 = vmatprep.mubr.f32.mxu1 %v8250_v57  ;;  %v8278_v57 = vpop.eup %8277  ;;  %8289 = vpow2.f32 %v4029_v12 }
 0x98e   : > { %v8280_v31 = vpop.eup %8279  ;;  %8291 = vpow2.f32 %v4027_v60 }
 0x98f   : > { %v8282_v53 = vpop.eup %8281 }
 0x990   : > { %4201 = vmatmul.mubr.f32.gmra.mrb[110].mxu1 %v8252_v23  ;;  %v8284_v22 = vpop.eup %8283 }
 0x991   : > { %4205 = vmatprep.mubr.f32.mxu1 %v8254_v19 }
 0x994   : > { %4206 = vmatmul.mubr.f32.gmra.mrb[112].mxu1 %v8256_v1 }
 0x995   : > { %4210 = vmatprep.mubr.f32.mxu1 %v8258_v16  ;;  %v8286_v3 = vpop.eup %8285 }
 0x996   : > { %v8288_v28 = vpop.eup %8287 }
 0x997   : > { %v8290_v49 = vpop.eup %8289 }
 0x998   : > { %4211 = vmatmul.mubr.f32.gmra.mrb[114].mxu1 %v8260_v24  ;;  %v8292_v23 = vpop.eup %8291 }
 0x999   : > { %4215 = vmatprep.mubr.f32.mxu1 %v8262_v8 }
 0x99c   : > { %4216 = vmatmul.mubr.f32.gmra.mrb[116].mxu1 %v8264_v14  ;;  %v14674_v14 = vld [vmem:[#allocation4_spill] sm:$0xff] }
 0x99d   : > { %4220 = vmatprep.mubr.f32.mxu1 %v8266_v61 }
 0x9a0   : > { %4221 = vmatmul.mubr.f32.gmra.mrb[118].mxu1 %v8268_v59 }
 0x9a1   : > { %4225 = vmatprep.mubr.f32.mxu1 %v8270_v44  ;;  %v14677_v44 = vld [vmem:[#allocation6_spill] sm:$0xff] }
 0x9a4   : > { %4226 = vmatmul.mubr.f32.gmra.mrb[120].mxu1 %v8272_v33 }
 0x9a5   : > { %4230 = vmatprep.mubr.f32.mxu1 %v8274_v27  ;;  %v14678_v27 = vld [vmem:[#allocation31_spill] sm:$0xff] }
 0x9a8   : > { %4231 = vmatmul.mubr.f32.gmra.mrb[122].mxu1 %v8276_v48 }
 0x9a9   : > { %4235 = vmatprep.mubr.f32.mxu1 %v8278_v57 }
 0x9ac   : > { %4236 = vmatmul.mubr.f32.gmra.mrb[124].mxu1 %v8280_v31 }
 0x9ad   : > { %4240 = vmatprep.mubr.f32.mxu1 %v8282_v53  ;;  %v14681_v53 = vld [vmem:[#allocation29_spill] sm:$0xff] }
 0x9b0   : > { %4241 = vmatmul.mubr.f32.gmra.mrb[126].mxu1 %v8284_v22 }
 0x9b1   : > { %4245 = vmatprep.mubr.f32.mxu1 %v8286_v3  ;;  %v14683_v3 = vld [vmem:[#allocation10_spill] sm:$0xff] }
 0x9b4   : > { %4246 = vmatmul.mubr.f32.gmra.mrb[128].mxu1 %v8288_v28 }
 0x9b5   : > { %4250 = vmatprep.mubr.f32.mxu1 %v8290_v49 }
 0x9b8   : > { %4251 = vmatmul.mubr.f32.gmra.mrb[130].mxu1 %v8292_v23 }
 0xa0f   : > { %v4097_v19 = vpop.f32.mrb[68].mxu1 }
 0xa10   : > { %v4098_v63 = vadd.f32 1e-30, %v4097_v19  ;;  %v4099_v38 = vpop.f32.mrb[69].mxu1 }
 0xa12   : > { %8293 = vlog2.f32 %v4098_v63 }
 0xa13   : > { %v4102_v51 = vpop.f32.mrb[70].mxu1 }
 0xa14   : > { %v4103_v0 = vadd.f32 1e-30, %v4102_v51  ;;  %v4104_v58 = vpop.f32.mrb[71].mxu1  ;;  %v14684_v51 = vld [vmem:[#allocation35_spill] sm:$0xff] }
 0xa15   : > { %v14686_v58 = vld [vmem:[#allocation12_spill] sm:$0xff] }
 0xa16   : > { %8295 = vlog2.f32 %v4103_v0 }
 0xa17   : > { %v4107_v30 = vpop.f32.mrb[72].mxu1 }
 0xa18   : > { %v4108_v1 = vadd.f32 1e-30, %v4107_v30  ;;  %v4109_v16 = vpop.f32.mrb[73].mxu1 }
 0xa1a   : > { %8297 = vlog2.f32 %v4108_v1 }
 0xa1b   : > { %v4112_v25 = vpop.f32.mrb[74].mxu1 }
 0xa1c   : > { %v8294_v15 = vpop.eup %8293  ;;  %v4113_v21 = vadd.f32 1e-30, %v4112_v25  ;;  %v4114_v54 = vpop.f32.mrb[75].mxu1 }
 0xa1d   : > { %v4257_v39 = vmul.f32 0.6931472, %v8294_v15  ;;  %v14687_v54 = vld [vmem:[#allocation33_spill] sm:$0xff] }
 0xa1e   : > { %8299 = vlog2.f32 %v4113_v21 }
 0xa1f   : > { %v4320_v24 = vsub.f32 %v14671_v52, %v4257_v39  ;;  %v4117_v8 = vpop.f32.mrb[76].mxu1 }
 0xa20   : > { %v8296_v32 = vpop.eup %8295  ;;  %v4118_v10 = vadd.f32 1e-30, %v4117_v8  ;;  %v4119_v13 = vpop.f32.mrb[77].mxu1 }
 0xa21   : > { %v4259_v62 = vmul.f32 0.6931472, %v8296_v32  ;;  %v12143_v29 = vadd.f32 %v4320_v24, %v14672_v17  ;;  %v14689_v24 = vld [vmem:[#allocation14_spill] sm:$0xff] }
 0xa22   : > { %8301 = vlog2.f32 %v4118_v10 }
 0xa23   : > { %14673 = vst [vmem:[#allocation75_spill] sm:$0xff] %v12143_v29  ;;  %v4321_v61 = vsub.f32 %v14674_v14, %v4259_v62  ;;  %v4122_v35 = vpop.f32.mrb[78].mxu1  ;;  %4386 = vperm.xlu1 %7122, %v12143_v29  }
 0xa24   : > { %v8298_v18 = vpop.eup %8297  ;;  %v4123_v41 = vadd.f32 1e-30, %v4122_v35  ;;  %v4124_v6 = vpop.f32.mrb[79].mxu1 }
 0xa25   : > { %v4261_v9 = vmul.f32 0.6931472, %v8298_v18  ;;  %v12148_v59 = vadd.f32 %v4321_v61, %v14675_v47  ;;  %v14690_v61 = vld [vmem:[#allocation39_spill] sm:$0xff]  ;;  %v14692_v18 = vld [vmem:[#allocation16_spill] sm:$0xff] }
 0xa26   : > { %8303 = vlog2.f32 %v4123_v41 }
 0xa27   : > { %14676 = vst [vmem:[#allocation72_spill] sm:$0xff] %v12148_v59  ;;  %v4322_v55 = vsub.f32 %v14677_v44, %v4261_v9  ;;  %v4127_v40 = vpop.f32.mrb[80].mxu1  ;;  %4391 = vperm.xlu0 %7121, %v12148_v59  }
 0xa28   : > { %v8300_v56 = vpop.eup %8299  ;;  %v4128_v20 = vadd.f32 1e-30, %v4127_v40  ;;  %v4129_v45 = vpop.f32.mrb[81].mxu1 }
 0xa29   : > { %v4263_v33 = vmul.f32 0.6931472, %v8300_v56  ;;  %v12153_v34 = vadd.f32 %v4322_v55, %v14678_v27  ;;  %v14693_v56 = vld [vmem:[#allocation37_spill] sm:$0xff]  ;;  %v14695_v45 = vld [vmem:[#allocation18_spill] sm:$0xff] }
 0xa2a   : > { %8305 = vlog2.f32 %v4128_v20 }
 0xa2b   : > { %14679 = vst [vmem:[#allocation77_spill] sm:$0xff] %v12153_v34  ;;  %v4323_v37 = vsub.f32 %v14680_v36, %v4263_v33  ;;  %v4132_v12 = vpop.f32.mrb[82].mxu1  ;;  %4396 = vperm.xlu1 %7122, %v12153_v34  }
 0xa2c   : > { %v8302_v48 = vpop.eup %8301  ;;  %v4133_v57 = vadd.f32 1e-30, %v4132_v12  ;;  %v4134_v60 = vpop.f32.mrb[83].mxu1 }
 0xa2d   : > { %v4265_v31 = vmul.f32 0.6931472, %v8302_v48  ;;  %v12158_v22 = vadd.f32 %v4323_v37, %v14681_v53  ;;  %v14696_v60 = vld [vmem:[#allocation43_spill] sm:$0xff]  ;;  %v14698_v53 = vld [vmem:[#allocation20_spill] sm:$0xff] }
 0xa2e   : > { %8307 = vlog2.f32 %v4133_v57 }
 0xa2f   : > { %14682 = vst [vmem:[#allocation74_spill] sm:$0xff] %v12158_v22  ;;  %v4324_v28 = vsub.f32 %v14683_v3, %v4265_v31  ;;  %v4137_v49 = vpop.f32.mrb[84].mxu1  ;;  %4401 = vperm.xlu0 %7121, %v12158_v22  }
 0xa30   : > { %v8304_v23 = vpop.eup %8303  ;;  %v4138_v19 = vadd.f32 1e-30, %v4137_v49  ;;  %v4139_v63 = vpop.f32.mrb[85].mxu1 }
 0xa31   : > { %v4267_v38 = vmul.f32 0.6931472, %v8304_v23  ;;  %v12163_v0 = vadd.f32 %v4324_v28, %v14684_v51  ;;  %v14699_v51 = vld [vmem:[#allocation41_spill] sm:$0xff] }
 0xa32   : > { %8309 = vlog2.f32 %v4138_v19 }
 0xa33   : > { %14685 = vst [vmem:[#allocation79_spill] sm:$0xff] %v12163_v0  ;;  %v4325_v30 = vsub.f32 %v14686_v58, %v4267_v38  ;;  %v4142_v1 = vpop.f32.mrb[86].mxu1  ;;  %4406 = vperm.xlu1 %7122, %v12163_v0  }
 0xa34   : > { %v8306_v16 = vpop.eup %8305  ;;  %v4143_v25 = vadd.f32 1e-30, %v4142_v1  ;;  %v4144_v15 = vpop.f32.mrb[87].mxu1  ;;  %v14701_v1 = vld [vmem:[#allocation22_spill] sm:$0xff] }
 0xa35   : > { %v4269_v21 = vmul.f32 0.6931472, %v8306_v16  ;;  %v12168_v39 = vadd.f32 %v4325_v30, %v14687_v54 }
 0xa36   : > { %8311 = vlog2.f32 %v4143_v25 }
 0xa37   : > { %14688 = vst [vmem:[#allocation76_spill] sm:$0xff] %v12168_v39  ;;  %v4326_v8 = vsub.f32 %v14689_v24, %v4269_v21  ;;  %v4147_v32 = vpop.f32.mrb[88].mxu1  ;;  %4411 = vperm.xlu0 %7121, %v12168_v39  }
 0xa38   : > { %v8308_v10 = vpop.eup %8307  ;;  %v4148_v13 = vadd.f32 1e-30, %v4147_v32  ;;  %v4149_v62 = vpop.f32.mrb[89].mxu1  ;;  %v14702_v32 = vld [vmem:[#allocation47_spill] sm:$0xff] }
 0xa39   : > { %v4271_v17 = vmul.f32 0.6931472, %v8308_v10  ;;  %v12173_v35 = vadd.f32 %v4326_v8, %v14690_v61 }
 0xa3a   : > { %8313 = vlog2.f32 %v4148_v13  ;;  %v14704_v13 = vld [vmem:[#allocation24_spill] sm:$0xff] }
 0xa3b   : > { %14691 = vst [vmem:[#allocation81_spill] sm:$0xff] %v12173_v35  ;;  %v4327_v41 = vsub.f32 %v14692_v18, %v4271_v17  ;;  %v4152_v6 = vpop.f32.mrb[90].mxu1  ;;  %4416 = vperm.xlu1 %7122, %v12173_v35  }
 0xa3c   : > { %v8310_v9 = vpop.eup %8309  ;;  %v4153_v47 = vadd.f32 1e-30, %v4152_v6  ;;  %v4154_v55 = vpop.f32.mrb[91].mxu1 }
 0xa3d   : > { %v4273_v40 = vmul.f32 0.6931472, %v8310_v9  ;;  %v12178_v20 = vadd.f32 %v4327_v41, %v14693_v56 }
 0xa3e   : > { %8315 = vlog2.f32 %v4153_v47  ;;  %v14705_v47 = vld [vmem:[#allocation45_spill] sm:$0xff] }
 0xa3f   : > { %14694 = vst [vmem:[#allocation78_spill] sm:$0xff] %v12178_v20  ;;  %v4328_v33 = vsub.f32 %v14695_v45, %v4273_v40  ;;  %v4157_v27 = vpop.f32.mrb[92].mxu1  ;;  %4421 = vperm.xlu0 %7121, %v12178_v20   ;;  %v14707_v40 = vld [vmem:[#allocation26_spill] sm:$0xff] }
 0xa40   : > { %v8312_v37 = vpop.eup %8311  ;;  %v4158_v12 = vadd.f32 1e-30, %v4157_v27  ;;  %v4159_v48 = vpop.f32.mrb[93].mxu1 }
 0xa41   : > { %v4275_v57 = vmul.f32 0.6931472, %v8312_v37  ;;  %v12183_v31 = vadd.f32 %v4328_v33, %v14696_v60 }
 0xa42   : > { %8317 = vlog2.f32 %v4158_v12 }
 0xa43   : > { %14697 = vst [vmem:[#allocation83_spill] sm:$0xff] %v12183_v31  ;;  %v4329_v28 = vsub.f32 %v14698_v53, %v4275_v57  ;;  %v4162_v49 = vpop.f32.mrb[94].mxu1  ;;  %4426 = vperm.xlu1 %7122, %v12183_v31   ;;  %v14708_v57 = vld [vmem:[#allocation51_spill] sm:$0xff] }
 0xa44   : > { %v8314_v23 = vpop.eup %8313  ;;  %v4163_v19 = vadd.f32 1e-30, %v4162_v49  ;;  %v4164_v63 = vpop.f32.mrb[95].mxu1 }
 0xa45   : > { %v4277_v38 = vmul.f32 0.6931472, %v8314_v23  ;;  %v12188_v30 = vadd.f32 %v4329_v28, %v14699_v51  ;;  %v14710_v28 = vld [vmem:[#allocation28_spill] sm:$0xff] }
 0xa46   : > { %8319 = vlog2.f32 %v4163_v19 }
 0xa47   : > { %14700 = vst [vmem:[#allocation80_spill] sm:$0xff] %v12188_v30  ;;  %v4330_v16 = vsub.f32 %v14701_v1, %v4277_v38  ;;  %v4167_v25 = vpop.f32.mrb[96].mxu1  ;;  %4431 = vperm.xlu0 %7121, %v12188_v30  }
 0xa48   : > { %v8316_v15 = vpop.eup %8315  ;;  %v4168_v21 = vadd.f32 1e-30, %v4167_v25  ;;  %v4169_v54 = vpop.f32.mrb[97].mxu1 }
 0xa49   : > { %v4279_v8 = vmul.f32 0.6931472, %v8316_v15  ;;  %v12193_v10 = vadd.f32 %v4330_v16, %v14702_v32  ;;  %v14711_v16 = vld [vmem:[#allocation49_spill] sm:$0xff]  ;;  %v14713_v15 = vld [vmem:[#allocation30_spill] sm:$0xff] }
 0xa4a   : > { %8321 = vlog2.f32 %v4168_v21 }
 0xa4b   : > { %14703 = vst [vmem:[#allocation85_spill] sm:$0xff] %v12193_v10  ;;  %v4331_v62 = vsub.f32 %v14704_v13, %v4279_v8  ;;  %v4172_v17 = vpop.f32.mrb[98].mxu1  ;;  %4436 = vperm.xlu1 %7122, %v12193_v10  }
 0xa4c   : > { %v8318_v61 = vpop.eup %8317  ;;  %v4173_v41 = vadd.f32 1e-30, %v4172_v17  ;;  %v4174_v6 = vpop.f32.mrb[99].mxu1 }
 0xa4d   : > { %v4281_v9 = vmul.f32 0.6931472, %v8318_v61  ;;  %v12198_v55 = vadd.f32 %v4331_v62, %v14705_v47  ;;  %v14714_v61 = vld [vmem:[#allocation55_spill] sm:$0xff]  ;;  %v14716_v6 = vld [vmem:[#allocation32_spill] sm:$0xff] }
 0xa4e   : > { %8323 = vlog2.f32 %v4173_v41 }
 0xa4f   : > { %14706 = vst [vmem:[#allocation82_spill] sm:$0xff] %v12198_v55  ;;  %v4332_v56 = vsub.f32 %v14707_v40, %v4281_v9  ;;  %v4177_v33 = vpop.f32.mrb[100].mxu1  ;;  %4441 = vperm.xlu0 %7121, %v12198_v55  }
 0xa50   : > { %v8320_v27 = vpop.eup %8319  ;;  %v4178_v37 = vadd.f32 1e-30, %v4177_v33  ;;  %v4179_v12 = vpop.f32.mrb[101].mxu1 }
 0xa51   : > { %v4283_v48 = vmul.f32 0.6931472, %v8320_v27  ;;  %v12203_v60 = vadd.f32 %v4332_v56, %v14708_v57  ;;  %v14717_v12 = vld [vmem:[#allocation53_spill] sm:$0xff]  ;;  %v14719_v57 = vld [vmem:[#allocation34_spill] sm:$0xff] }
 0xa52   : > { %8325 = vlog2.f32 %v4178_v37 }
 0xa53   : > { %14709 = vst [vmem:[#allocation86_spill] sm:$0xff] %v12203_v60  ;;  %v4333_v49 = vsub.f32 %v14710_v28, %v4283_v48  ;;  %v4182_v23 = vpop.f32.mrb[102].mxu1  ;;  %4446 = vperm.xlu1 %7122, %v12203_v60  }
 0xa54   : > { %v8322_v19 = vpop.eup %8321  ;;  %v4183_v63 = vadd.f32 1e-30, %v4182_v23  ;;  %v4184_v38 = vpop.f32.mrb[103].mxu1 }
 0xa55   : > { %v4285_v51 = vmul.f32 0.6931472, %v8322_v19  ;;  %v12208_v25 = vadd.f32 %v4333_v49, %v14711_v16  ;;  %v14720_v16 = vld [vmem:[#allocation59_spill] sm:$0xff] }
 0xa56   : > { %8327 = vlog2.f32 %v4183_v63 }
 0xa57   : > { %14712 = vst [vmem:[#allocation84_spill] sm:$0xff] %v12208_v25  ;;  %v4334_v21 = vsub.f32 %v14713_v15, %v4285_v51  ;;  %v4187_v54 = vpop.f32.mrb[104].mxu1  ;;  %4451 = vperm.xlu0 %7121, %v12208_v25  }
 0xa58   : > { %v8324_v8 = vpop.eup %8323  ;;  %v4188_v32 = vadd.f32 1e-30, %v4187_v54  ;;  %v4189_v62 = vpop.f32.mrb[105].mxu1  ;;  %v14722_v54 = vld [vmem:[#allocation36_spill] sm:$0xff] }
 0xa59   : > { %v4287_v17 = vmul.f32 0.6931472, %v8324_v8  ;;  %v12213_v41 = vadd.f32 %v4334_v21, %v14714_v61 }
 0xa5a   : > { %8329 = vlog2.f32 %v4188_v32 }
 0xa5b   : > { %14715 = vst [vmem:[#allocation5_spill] sm:$0xff] %v12213_v41  ;;  %v4335_v9 = vsub.f32 %v14716_v6, %v4287_v17  ;;  %v4192_v47 = vpop.f32.mrb[106].mxu1  ;;  %4456 = vperm.xlu1 %7122, %v12213_v41  }
 0xa5c   : > { %v8326_v56 = vpop.eup %8325  ;;  %v4193_v33 = vadd.f32 1e-30, %v4192_v47  ;;  %v4194_v27 = vpop.f32.mrb[107].mxu1  ;;  %v14723_v47 = vld [vmem:[#allocation57_spill] sm:$0xff] }
 0xa5d   : > { %v4289_v37 = vmul.f32 0.6931472, %v8326_v56  ;;  %v12218_v48 = vadd.f32 %v4335_v9, %v14717_v12 }
 0xa5e   : > { %8331 = vlog2.f32 %v4193_v33  ;;  %v14725_v33 = vld [vmem:[#allocation38_spill] sm:$0xff] }
 0xa5f   : > { %14718 = vst [vmem:[#allocation3_spill] sm:$0xff] %v12218_v48  ;;  %v4336_v49 = vsub.f32 %v14719_v57, %v4289_v37  ;;  %v4197_v23 = vpop.f32.mrb[108].mxu1  ;;  %4461 = vperm.xlu0 %7121, %v12218_v48   ;;  %v9143_v48 = vld [vmem:[%s13871_s0 + $0x50] sm:$0xff] }
 0xa60   : > { %v8328_v19 = vpop.eup %8327  ;;  %v4198_v63 = vadd.f32 1e-30, %v4197_v23  ;;  %v4199_v38 = vpop.f32.mrb[109].mxu1 }
 0xa61   : > { %v4291_v51 = vmul.f32 0.6931472, %v8328_v19  ;;  %v12223_v21 = vadd.f32 %v4336_v49, %v14720_v16 }
 0xa62   : > { %8333 = vlog2.f32 %v4198_v63  ;;  %v14726_v63 = vld [vmem:[#allocation63_spill] sm:$0xff] }
 0xa63   : > { %14721 = vst [vmem:[#allocation9_spill] sm:$0xff] %v12223_v21  ;;  %v4337_v8 = vsub.f32 %v14722_v54, %v4291_v51  ;;  %v4202_v32 = vpop.f32.mrb[110].mxu1  ;;  %4466 = vperm.xlu1 %7122, %v12223_v21   ;;  %v14728_v51 = vld [vmem:[#allocation40_spill] sm:$0xff] }
 0xa64   : > { %v8330_v62 = vpop.eup %8329  ;;  %v4203_v17 = vadd.f32 1e-30, %v4202_v32  ;;  %v4204_v61 = vpop.f32.mrb[111].mxu1 }
 0xa65   : > { %v4293_v9 = vmul.f32 0.6931472, %v8330_v62  ;;  %v12228_v56 = vadd.f32 %v4337_v8, %v14723_v47 }
 0xa66   : > { %8335 = vlog2.f32 %v4203_v17 }
 0xa67   : > { %14724 = vst [vmem:[#allocation7_spill] sm:$0xff] %v12228_v56  ;;  %v4338_v27 = vsub.f32 %v14725_v33, %v4293_v9  ;;  %v4207_v37 = vpop.f32.mrb[112].mxu1  ;;  %4471 = vperm.xlu0 %7121, %v12228_v56   ;;  %v14729_v9 = vld [vmem:[#allocation61_spill] sm:$0xff] }
 0xa68   : > { %v8332_v12 = vpop.eup %8331  ;;  %v4208_v49 = vadd.f32 1e-30, %v4207_v37  ;;  %v4209_v23 = vpop.f32.mrb[113].mxu1  ;;  %v14731_v37 = vld [vmem:[#allocation42_spill] sm:$0xff] }
 0xa69   : > { %v4295_v19 = vmul.f32 0.6931472, %v8332_v12  ;;  %v12233_v38 = vadd.f32 %v4338_v27, %v14726_v63 }
 0xa6a   : > { %8337 = vlog2.f32 %v4208_v49 }
 0xa6b   : > { %14727 = vst [vmem:[#allocation13_spill] sm:$0xff] %v12233_v38  ;;  %v4339_v16 = vsub.f32 %v14728_v51, %v4295_v19  ;;  %v4212_v32 = vpop.f32.mrb[114].mxu1  ;;  %4476 = vperm.xlu1 %7122, %v12233_v38   ;;  %v14732_v51 = vld [vmem:[#allocation87_spill] sm:$0xff] }
 0xa6c   : > { %v8334_v8 = vpop.eup %8333  ;;  %v4213_v62 = vadd.f32 1e-30, %v4212_v32  ;;  %v4214_v17 = vpop.f32.mrb[115].mxu1  ;;  %v14734_v32 = vld [vmem:[#allocation44_spill] sm:$0xff] }
 0xa6d   : > { %v4297_v61 = vmul.f32 0.6931472, %v8334_v8  ;;  %v12238_v47 = vadd.f32 %v4339_v16, %v14729_v9 }
 0xa6e   : > { %8339 = vlog2.f32 %v4213_v62 }
 0xa6f   : > { %14730 = vst [vmem:[#allocation11_spill] sm:$0xff] %v12238_v47  ;;  %v4340_v23 = vsub.f32 %v14731_v37, %v4297_v61  ;;  %v4217_v12 = vpop.f32.mrb[116].mxu1  ;;  %4481 = vperm.xlu0 %7121, %v12238_v47   ;;  %v14735_v37 = vld [vmem:[#allocation65_spill] sm:$0xff] }
 0xa70   : > { %v8336_v27 = vpop.eup %8335  ;;  %v4218_v49 = vadd.f32 1e-30, %v4217_v12  ;;  %v4219_v63 = vpop.f32.mrb[117].mxu1  ;;  %v14737_v12 = vld [vmem:[#allocation46_spill] sm:$0xff] }
 0xa71   : > { %v4299_v19 = vmul.f32 0.6931472, %v8336_v27  ;;  %v12243_v33 = vadd.f32 %v4340_v23, %v14732_v51 }
 0xa72   : > { %8341 = vlog2.f32 %v4218_v49 }
 0xa73   : > { %14733 = vst [vmem:[#allocation17_spill] sm:$0xff] %v12243_v33  ;;  %v4341_v17 = vsub.f32 %v14734_v32, %v4299_v19  ;;  %v4222_v8 = vpop.f32.mrb[118].mxu1  ;;  %4486 = vperm.xlu1 %7122, %v12243_v33   ;;  %v14738_v32 = vld [vmem:[#allocation89_spill] sm:$0xff] }
 0xa74   : > { %v8338_v16 = vpop.eup %8337  ;;  %v4223_v62 = vadd.f32 1e-30, %v4222_v8  ;;  %v4224_v9 = vpop.f32.mrb[119].mxu1  ;;  %v14740_v8 = vld [vmem:[#allocation48_spill] sm:$0xff] }
 0xa75   : > { %v4301_v61 = vmul.f32 0.6931472, %v8338_v16  ;;  %v12248_v38 = vadd.f32 %v4341_v17, %v14735_v37 }
 0xa76   : > { %8343 = vlog2.f32 %v4223_v62 }
 0xa77   : > { %14736 = vst [vmem:[#allocation15_spill] sm:$0xff] %v12248_v38  ;;  %v4342_v63 = vsub.f32 %v14737_v12, %v4301_v61  ;;  %v4227_v27 = vpop.f32.mrb[120].mxu1  ;;  %4491 = vperm.xlu0 %7121, %v12248_v38   ;;  %v14741_v12 = vld [vmem:[#allocation88_spill] sm:$0xff] }
 0xa78   : > { %v8340_v51 = vpop.eup %8339  ;;  %v4228_v23 = vadd.f32 1e-30, %v4227_v27  ;;  %v4229_v49 = vpop.f32.mrb[121].mxu1  ;;  %v14743_v27 = vld [vmem:[#allocation50_spill] sm:$0xff] }
 0xa79   : > { %v4303_v19 = vmul.f32 0.6931472, %v8340_v51  ;;  %v12253_v47 = vadd.f32 %v4342_v63, %v14738_v32 }
 0xa7a   : > { %8345 = vlog2.f32 %v4228_v23 }
 0xa7b   : > { %14739 = vst [vmem:[#allocation21_spill] sm:$0xff] %v12253_v47  ;;  %v4343_v9 = vsub.f32 %v14740_v8, %v4303_v19  ;;  %v4232_v16 = vpop.f32.mrb[122].mxu1  ;;  %4496 = vperm.xlu1 %7122, %v12253_v47   ;;  %v14744_v8 = vld [vmem:[#allocation90_spill] sm:$0xff] }
 0xa7c   : > { %v8342_v37 = vpop.eup %8341  ;;  %v4233_v17 = vadd.f32 1e-30, %v4232_v16  ;;  %v4234_v62 = vpop.f32.mrb[123].mxu1  ;;  %v14746_v16 = vld [vmem:[#allocation52_spill] sm:$0xff] }
 0xa7d   : > { %v4305_v61 = vmul.f32 0.6931472, %v8342_v37  ;;  %v12258_v33 = vadd.f32 %v4343_v9, %v14741_v12 }
 0xa7e   : > { %8347 = vlog2.f32 %v4233_v17 }
 0xa7f   : > { %14742 = vst [vmem:[#allocation19_spill] sm:$0xff] %v12258_v33  ;;  %v4344_v49 = vsub.f32 %v14743_v27, %v4305_v61  ;;  %v4237_v51 = vpop.f32.mrb[124].mxu1  ;;  %4501 = vperm.xlu0 %7121, %v12258_v33   ;;  %v14747_v27 = vld [vmem:[#allocation67_spill] sm:$0xff] }
 0xa80   : > { %v8344_v32 = vpop.eup %8343  ;;  %v4238_v63 = vadd.f32 1e-30, %v4237_v51  ;;  %v4239_v23 = vpop.f32.mrb[125].mxu1  ;;  %v14749_v51 = vld [vmem:[#allocation54_spill] sm:$0xff] }
 0xa81   : > { %v4307_v19 = vmul.f32 0.6931472, %v8344_v32  ;;  %v12263_v38 = vadd.f32 %v4344_v49, %v14744_v8 }
 0xa82   : > { %8349 = vlog2.f32 %v4238_v63 }
 0xa83   : > { %14745 = vst [vmem:[#allocation91_spill] sm:$0xff] %v12263_v38  ;;  %v4345_v62 = vsub.f32 %v14746_v16, %v4307_v19  ;;  %v4242_v37 = vpop.f32.mrb[126].mxu1  ;;  %4506 = vperm.xlu1 %7122, %v12263_v38   ;;  %v14750_v16 = vld [vmem:[#allocation66_spill] sm:$0xff] }
 0xa84   : > { %v8346_v12 = vpop.eup %8345  ;;  %v4243_v9 = vadd.f32 1e-30, %v4242_v37  ;;  %v4244_v17 = vpop.f32.mrb[127].mxu1  ;;  %v14752_v37 = vld [vmem:[#allocation56_spill] sm:$0xff] }
 0xa85   : > { %v4309_v61 = vmul.f32 0.6931472, %v8346_v12  ;;  %v12268_v47 = vadd.f32 %v4345_v62, %v14747_v27 }
 0xa86   : > { %8351 = vlog2.f32 %v4243_v9 }
 0xa87   : > { %14748 = vst [vmem:[#allocation23_spill] sm:$0xff] %v12268_v47  ;;  %v4346_v23 = vsub.f32 %v14749_v51, %v4309_v61  ;;  %v4247_v32 = vpop.f32.mrb[128].mxu1  ;;  %4511 = vperm.xlu0 %7121, %v12268_v47   ;;  %v14753_v51 = vld [vmem:[#allocation69_spill] sm:$0xff] }
 0xa88   : > { %v8348_v8 = vpop.eup %8347  ;;  %v4248_v49 = vadd.f32 1e-30, %v4247_v32  ;;  %v4249_v63 = vpop.f32.mrb[129].mxu1  ;;  %v14755_v32 = vld [vmem:[#allocation58_spill] sm:$0xff] }
 0xa89   : > { %v4311_v19 = vmul.f32 0.6931472, %v8348_v8  ;;  %v12273_v33 = vadd.f32 %v4346_v23, %v14750_v16  ;;  %v14756_v8 = vld [vmem:[#allocation68_spill] sm:$0xff] }
 0xa8a   : > { %8353 = vlog2.f32 %v4248_v49 }
 0xa8b   : > { %14751 = vst [vmem:[#allocation92_spill] sm:$0xff] %v12273_v33  ;;  %v4347_v17 = vsub.f32 %v14752_v37, %v4311_v19  ;;  %v4252_v12 = vpop.f32.mrb[130].mxu1  ;;  %4516 = vperm.xlu1 %7122, %v12273_v33   ;;  %v14758_v19 = vld [vmem:[#allocation60_spill] sm:$0xff] }
 0xa8c   : > { %v8350_v27 = vpop.eup %8349  ;;  %v4253_v62 = vadd.f32 1e-30, %v4252_v12  ;;  %v4254_v9 = vpop.f32.mrb[131].mxu1 }
 0xa8d   : > { %v4313_v61 = vmul.f32 0.6931472, %v8350_v27  ;;  %v12278_v38 = vadd.f32 %v4347_v17, %v14753_v51  ;;  %v14759_v27 = vld [vmem:[#allocation71_spill] sm:$0xff]  ;;  %v14761_v51 = vld [vmem:[#allocation62_spill] sm:$0xff] }
 0xa8e   : > { %8355 = vlog2.f32 %v4253_v62 }
 0xa8f   : > { %14754 = vst [vmem:[#allocation27_spill] sm:$0xff] %v12278_v38  ;;  %v4348_v63 = vsub.f32 %v14755_v32, %v4313_v61  ;;  %4521 = vperm.xlu0 %7121, %v12278_v38   ;;  %v14762_v32 = vld [vmem:[#allocation70_spill] sm:$0xff] }
 0xa90   : > { %v8352_v16 = vpop.eup %8351 }
 0xa91   : > { %v4315_v23 = vmul.f32 0.6931472, %v8352_v16  ;;  %v12283_v49 = vadd.f32 %v4348_v63, %v14756_v8  ;;  %v14764_v63 = vld [vmem:[#allocation64_spill] sm:$0xff] }
 0xa93   : > { %14757 = vst [vmem:[#allocation25_spill] sm:$0xff] %v12283_v49  ;;  %v4349_v37 = vsub.f32 %v14758_v19, %v4315_v23  ;;  %4526 = vperm.xlu1 %7122, %v12283_v49   ;;  %v14765_v23 = vld [vmem:[#allocation73_spill] sm:$0xff] }
 0xa94   : > { %v8354_v12 = vpop.eup %8353 }
 0xa95   : > { %v4317_v9 = vmul.f32 0.6931472, %v8354_v12  ;;  %v12288_v33 = vadd.f32 %v4349_v37, %v14759_v27  ;;  %v9133_v12 = vld [vmem:[%s13871_s0] sm:$0xff] }
 0xa97   : > { %14760 = vst [vmem:[#allocation31_spill] sm:$0xff] %v12288_v33  ;;  %v4350_v17 = vsub.f32 %v14761_v51, %v4317_v9  ;;  %4531 = vperm.xlu0 %7121, %v12288_v33  }
 0xa98   : > { %v8356_v62 = vpop.eup %8355 }
 0xa99   : > { %v4319_v61 = vmul.f32 0.6931472, %v8356_v62  ;;  %v12293_v16 = vadd.f32 %v4350_v17, %v14762_v32  ;;  %v9134_v32 = vld [vmem:[%s13871_s0 + $0x8] sm:$0xff] }
 0xa9b   : > { %14763 = vst [vmem:[#allocation29_spill] sm:$0xff] %v12293_v16  ;;  %v4351_v8 = vsub.f32 %v14764_v63, %v4319_v61  ;;  %4536 = vperm.xlu1 %7122, %v12293_v16  }
 0xa9d   : > { %v12298_v19 = vadd.f32 %v4351_v8, %v14765_v23  ;;  %v9135_v23 = vld [vmem:[%s13871_s0 + $0x10] sm:$0xff] }
 0xa9f   : > { %14766 = vst [vmem:[#allocation35_spill] sm:$0xff] %v12298_v19  ;;  %4541 = vperm.xlu0 %7121, %v12298_v19   ;;  %v9136_v19 = vld [vmem:[%s13871_s0 + $0x18] sm:$0xff] }
 0xaa2   : > { %v4387_v37 = vpop.permute.xlu1 %4386 }
 0xaa3   : > { %v12304_v9 = vadd.f32 %v9133_v12, %v4387_v37  ;;  %v12309_v27 = vadd.f32 %v9134_v32, %v4387_v37 }
 0xaa5   : > { %v4608_v17 = vadd.f32 %v12304_v9, %v11976_v11  ;;  %v4609_v62 = vadd.f32 %v12309_v27, %v11980_v46 }
 0xaa6   : > { %v4392_v61 = vpop.permute.xlu0 %4391 }
 0xaa7   : > { %v4672_v8 = vmul.f32 1.442695, %v4608_v17  ;;  %v12318_v12 = vadd.f32 %v9135_v23, %v4392_v61  ;;  %v12323_v37 = vadd.f32 %v9136_v19, %v4392_v61  ;;  %v4674_v32 = vmul.f32 1.442695, %v4609_v62  ;;  %v9137_v23 = vld [vmem:[%s13871_s0 + $0x20] sm:$0xff]  ;;  %v9138_v19 = vld [vmem:[%s13871_s0 + $0x28] sm:$0xff] }
 0xaa9   : > { %v4610_v63 = vadd.f32 %v12318_v12, %v11976_v11  ;;  %v4611_v16 = vadd.f32 %v12323_v37, %v11980_v46  ;;  %8357 = vpow2.f32 %v4672_v8 }
 0xaaa   : > { %v4397_v17 = vpop.permute.xlu1 %4396  ;;  %8359 = vpow2.f32 %v4674_v32  ;;  %v9140_v32 = vld [vmem:[%s13871_s0 + $0x38] sm:$0xff] }
 0xaab   : > { %v4676_v51 = vmul.f32 1.442695, %v4610_v63  ;;  %v4678_v33 = vmul.f32 1.442695, %v4611_v16  ;;  %v12332_v49 = vadd.f32 %v9137_v23, %v4397_v17  ;;  %v12337_v62 = vadd.f32 %v9138_v19, %v4397_v17  ;;  %v9139_v23 = vld [vmem:[%s13871_s0 + $0x30] sm:$0xff] }
 0xaad   : > { %8361 = vpow2.f32 %v4676_v51  ;;  %v4612_v61 = vadd.f32 %v12332_v49, %v11976_v11  ;;  %v4613_v16 = vadd.f32 %v12337_v62, %v11980_v46 }
 0xaae   : > { %8363 = vpow2.f32 %v4678_v33  ;;  %v4402_v63 = vpop.permute.xlu0 %4401 }
 0xaaf   : > { %v4680_v8 = vmul.f32 1.442695, %v4612_v61  ;;  %v12346_v38 = vadd.f32 %v9139_v23, %v4402_v63  ;;  %v12351_v51 = vadd.f32 %v9140_v32, %v4402_v63  ;;  %v4682_v17 = vmul.f32 1.442695, %v4613_v16  ;;  %v9141_v23 = vld [vmem:[%s13871_s0 + $0x40] sm:$0xff]  ;;  %v9142_v16 = vld [vmem:[%s13871_s0 + $0x48] sm:$0xff] }
 0xab1   : > { %v4614_v19 = vadd.f32 %v12346_v38, %v11976_v11  ;;  %v4615_v33 = vadd.f32 %v12351_v51, %v11980_v46  ;;  %8365 = vpow2.f32 %v4680_v8 }
 0xab2   : > { %v4407_v61 = vpop.permute.xlu1 %4406  ;;  %8367 = vpow2.f32 %v4682_v17 }
 0xab3   : > { %v4684_v47 = vmul.f32 1.442695, %v4614_v19  ;;  %v4686_v56 = vmul.f32 1.442695, %v4615_v33  ;;  %v12360_v54 = vadd.f32 %v9141_v23, %v4407_v61  ;;  %v12365_v63 = vadd.f32 %v9142_v16, %v4407_v61  ;;  %v8358_v32 = vpop.eup %8357 }
 0xab4   : > { %v8360_v33 = vpop.eup %8359 }
 0xab5   : > { %8369 = vpow2.f32 %v4684_v47  ;;  %v4616_v8 = vadd.f32 %v12360_v54, %v11976_v11  ;;  %v4617_v19 = vadd.f32 %v12365_v63, %v11980_v46  ;;  %v9144_v47 = vld [vmem:[%s13871_s0 + $0x58] sm:$0xff] }
 0xab6   : > { %8371 = vpow2.f32 %v4686_v56  ;;  %v4412_v21 = vpop.permute.xlu0 %4411 }
 0xab7   : > { %v8362_v23 = vpop.eup %8361  ;;  %v4688_v57 = vmul.f32 1.442695, %v4616_v8  ;;  %v12374_v61 = vadd.f32 %v9143_v48, %v4412_v21  ;;  %v12379_v17 = vadd.f32 %v9144_v47, %v4412_v21  ;;  %v4690_v6 = vmul.f32 1.442695, %v4617_v19  ;;  %v9145_v21 = vld [vmem:[%s13871_s0 + $0x60] sm:$0xff] }
 0xab8   : > { %v8364_v16 = vpop.eup %8363  ;;  %v6918_v41 = vpack.c.bf16 %v8362_v23, %v8358_v32  ;;  %v9146_v32 = vld [vmem:[%s13871_s0 + $0x68] sm:$0xff] }
 0xab9   : > { %v4618_v56 = vadd.f32 %v12374_v61, %v11976_v11  ;;  %v4619_v8 = vadd.f32 %v12379_v17, %v11980_v46  ;;  %v6916_v15 = vpack.c.bf16 %v8364_v16, %v8360_v33  ;;  %8373 = vpow2.f32 %v4688_v57 }
 0xaba   : > { %v4417_v25 = vpop.permute.xlu1 %4416  ;;  %8375 = vpow2.f32 %v4690_v6 }
 0xabb   : > { %v4692_v48 = vmul.f32 1.442695, %v4618_v56  ;;  %v4694_v28 = vmul.f32 1.442695, %v4619_v8  ;;  %6917 = vmatprep.subr.bf16.mxu0 %v6916_v15  ;;  %v12388_v47 = vadd.f32 %v9145_v21, %v4417_v25  ;;  %v12393_v19 = vadd.f32 %v9146_v32, %v4417_v25  ;;  %v8366_v23 = vpop.eup %8365  ;;  %v9147_v25 = vld [vmem:[%s13871_s0 + $0x70] sm:$0xff] }
 0xabc   : > { %6919 = vmatpush1.bf16.msra.mxu0 %v6918_v41  ;;  %v8368_v33 = vpop.eup %8367  ;;  %v9148_v41 = vld [vmem:[%s13871_s0 + $0x78] sm:$0xff] }
 0xabd   : > { %8377 = vpow2.f32 %v4692_v48  ;;  %v4620_v57 = vadd.f32 %v12388_v47, %v11976_v11  ;;  %v4621_v15 = vadd.f32 %v12393_v19, %v11980_v46 }
 0xabe   : > { %8379 = vpow2.f32 %v4694_v28  ;;  %v4422_v16 = vpop.permute.xlu0 %4421 }
 0xabf   : > { %v8370_v56 = vpop.eup %8369  ;;  %v4696_v8 = vmul.f32 1.442695, %v4620_v57  ;;  %v12402_v21 = vadd.f32 %v9147_v25, %v4422_v16  ;;  %v12407_v6 = vadd.f32 %v9148_v41, %v4422_v16  ;;  %v4698_v32 = vmul.f32 1.442695, %v4621_v15  ;;  %v9149_v16 = vld [vmem:[%s13871_s0 + $0x80] sm:$0xff] }
 0xac0   : > { %v8372_v48 = vpop.eup %8371  ;;  %v6922_v60 = vpack.c.bf16 %v8370_v56, %v8366_v23  ;;  %v9150_v23 = vld [vmem:[%s13871_s0 + $0x88] sm:$0xff] }
 0xac1   : > { %v4622_v28 = vadd.f32 %v12402_v21, %v11976_v11  ;;  %v4623_v57 = vadd.f32 %v12407_v6, %v11980_v46  ;;  %v6920_v40 = vpack.c.bf16 %v8372_v48, %v8368_v33  ;;  %8381 = vpow2.f32 %v4696_v8 }
 0xac2   : > { %v4427_v55 = vpop.permute.xlu1 %4426  ;;  %8383 = vpow2.f32 %v4698_v32 }
 0xac3   : > { %v4700_v25 = vmul.f32 1.442695, %v4622_v28  ;;  %v4702_v13 = vmul.f32 1.442695, %v4623_v57  ;;  %6921 = vmatprep.subr.bf16.mxu0 %v6920_v40  ;;  %v12416_v41 = vadd.f32 %v9149_v16, %v4427_v55  ;;  %v12421_v15 = vadd.f32 %v9150_v23, %v4427_v55  ;;  %v8374_v56 = vpop.eup %8373  ;;  %v9151_v55 = vld [vmem:[%s13871_s0 + $0x90] sm:$0xff] }
 0xac4   : > { %6923 = vmatpush1.bf16.msra.mxu0 %v6922_v60  ;;  %v8376_v8 = vpop.eup %8375  ;;  %v9152_v60 = vld [vmem:[%s13871_s0 + $0x98] sm:$0xff] }
 0xac5   : > { %8385 = vpow2.f32 %v4700_v25  ;;  %v4624_v33 = vadd.f32 %v12416_v41, %v11976_v11  ;;  %v4625_v40 = vadd.f32 %v12421_v15, %v11980_v46 }
 0xac6   : > { %8387 = vpow2.f32 %v4702_v13  ;;  %v4432_v48 = vpop.permute.xlu0 %4431 }
 0xac7   : > { %v8378_v28 = vpop.eup %8377  ;;  %v4704_v57 = vmul.f32 1.442695, %v4624_v33  ;;  %v12430_v16 = vadd.f32 %v9151_v55, %v4432_v48  ;;  %v12435_v32 = vadd.f32 %v9152_v60, %v4432_v48  ;;  %v4706_v23 = vmul.f32 1.442695, %v4625_v40  ;;  %v9153_v48 = vld [vmem:[%s13871_s0 + $0xa0] sm:$0xff] }
 0xac8   : > { %v8380_v25 = vpop.eup %8379  ;;  %v6926_v10 = vpack.c.bf16 %v8378_v28, %v8374_v56  ;;  %v9154_v56 = vld [vmem:[%s13871_s0 + $0xa8] sm:$0xff] }
 0xac9   : > { %v4626_v13 = vadd.f32 %v12430_v16, %v11976_v11  ;;  %v4627_v33 = vadd.f32 %v12435_v32, %v11980_v46  ;;  %v6924_v1 = vpack.c.bf16 %v8380_v25, %v8376_v8  ;;  %8389 = vpow2.f32 %v4704_v57 }
 0xaca   : > { %v4437_v30 = vpop.permute.xlu1 %4436  ;;  %8391 = vpow2.f32 %v4706_v23 }
 0xacb   : > { %v4708_v55 = vmul.f32 1.442695, %v4626_v13  ;;  %v4710_v53 = vmul.f32 1.442695, %v4627_v33  ;;  %6925 = vmatprep.subr.bf16.mxu0 %v6924_v1  ;;  %v12444_v60 = vadd.f32 %v9153_v48, %v4437_v30  ;;  %v12449_v40 = vadd.f32 %v9154_v56, %v4437_v30  ;;  %v8382_v28 = vpop.eup %8381  ;;  %v9155_v30 = vld [vmem:[%s13871_s0 + $0xb0] sm:$0xff] }
 0xacc   : > { %6927 = vmatpush1.bf16.msra.mxu0 %v6926_v10  ;;  %v8384_v57 = vpop.eup %8383  ;;  %v9156_v10 = vld [vmem:[%s13871_s0 + $0xb8] sm:$0xff] }
 0xacd   : > { %8393 = vpow2.f32 %v4708_v55  ;;  %v4628_v8 = vadd.f32 %v12444_v60, %v11976_v11  ;;  %v4629_v1 = vadd.f32 %v12449_v40, %v11980_v46 }
 0xace   : > { %8395 = vpow2.f32 %v4710_v53  ;;  %v4442_v25 = vpop.permute.xlu0 %4441 }
 0xacf   : > { %v8386_v13 = vpop.eup %8385  ;;  %v4712_v33 = vmul.f32 1.442695, %v4628_v8  ;;  %v12458_v48 = vadd.f32 %v9155_v30, %v4442_v25  ;;  %v12463_v23 = vadd.f32 %v9156_v10, %v4442_v25  ;;  %v4714_v56 = vmul.f32 1.442695, %v4629_v1  ;;  %v9157_v25 = vld [vmem:[%s13871_s0 + $0xc0] sm:$0xff] }
 0xad0   : > { %v8388_v55 = vpop.eup %8387  ;;  %v6930_v31 = vpack.c.bf16 %v8386_v13, %v8382_v28  ;;  %v9158_v28 = vld [vmem:[%s13871_s0 + $0xc8] sm:$0xff] }
 0xad1   : > { %v4630_v53 = vadd.f32 %v12458_v48, %v11976_v11  ;;  %v4631_v8 = vadd.f32 %v12463_v23, %v11980_v46  ;;  %v6928_v45 = vpack.c.bf16 %v8388_v55, %v8384_v57  ;;  %8397 = vpow2.f32 %v4712_v33 }
 0xad2   : > { %v4447_v20 = vpop.permute.xlu1 %4446  ;;  %8399 = vpow2.f32 %v4714_v56 }
 0xad3   : > { %v4716_v30 = vmul.f32 1.442695, %v4630_v53  ;;  %v4718_v18 = vmul.f32 1.442695, %v4631_v8  ;;  %6929 = vmatprep.subr.bf16.mxu0 %v6928_v45  ;;  %v12472_v10 = vadd.f32 %v9157_v25, %v4447_v20  ;;  %v12477_v1 = vadd.f32 %v9158_v28, %v4447_v20  ;;  %v8390_v13 = vpop.eup %8389  ;;  %v9159_v20 = vld [vmem:[%s13871_s0 + $0xd0] sm:$0xff] }
 0xad4   : > { %6931 = vmatpush1.bf16.msra.mxu0 %v6930_v31  ;;  %v8392_v33 = vpop.eup %8391  ;;  %v9160_v31 = vld [vmem:[%s13871_s0 + $0xd8] sm:$0xff] }
 0xad5   : > { %8401 = vpow2.f32 %v4716_v30  ;;  %v4632_v57 = vadd.f32 %v12472_v10, %v11976_v11  ;;  %v4633_v45 = vadd.f32 %v12477_v1, %v11980_v46 }
 0xad6   : > { %8403 = vpow2.f32 %v4718_v18  ;;  %v4452_v55 = vpop.permute.xlu0 %4451 }
 0xad7   : > { %v8394_v53 = vpop.eup %8393  ;;  %v4720_v8 = vmul.f32 1.442695, %v4632_v57  ;;  %v12486_v25 = vadd.f32 %v9159_v20, %v4452_v55  ;;  %v12491_v56 = vadd.f32 %v9160_v31, %v4452_v55  ;;  %v4722_v28 = vmul.f32 1.442695, %v4633_v45  ;;  %v9161_v55 = vld [vmem:[%s13871_s0 + $0xe0] sm:$0xff] }
 0xad8   : > { %v8396_v30 = vpop.eup %8395  ;;  %v6934_v35 = vpack.c.bf16 %v8394_v53, %v8390_v13  ;;  %v9162_v13 = vld [vmem:[%s13871_s0 + $0xe8] sm:$0xff] }
 0xad9   : > { %v4634_v18 = vadd.f32 %v12486_v25, %v11976_v11  ;;  %v4635_v57 = vadd.f32 %v12491_v56, %v11980_v46  ;;  %v6932_v24 = vpack.c.bf16 %v8396_v30, %v8392_v33  ;;  %8405 = vpow2.f32 %v4720_v8 }
 0xada   : > { %v4457_v39 = vpop.permute.xlu1 %4456  ;;  %8407 = vpow2.f32 %v4722_v28 }
 0xadb   : > { %v4724_v20 = vmul.f32 1.442695, %v4634_v18  ;;  %v4726_v58 = vmul.f32 1.442695, %v4635_v57  ;;  %6933 = vmatprep.subr.bf16.mxu0 %v6932_v24  ;;  %v12500_v31 = vadd.f32 %v9161_v55, %v4457_v39  ;;  %v12505_v45 = vadd.f32 %v9162_v13, %v4457_v39  ;;  %v8398_v53 = vpop.eup %8397  ;;  %v9163_v39 = vld [vmem:[%s13871_s0 + $0xf0] sm:$0xff] }
 0xadc   : > { %6935 = vmatpush1.bf16.msra.mxu0 %v6934_v35  ;;  %v8400_v8 = vpop.eup %8399  ;;  %v9164_v35 = vld [vmem:[%s13871_s0 + $0xf8] sm:$0xff] }
 0xadd   : > { %8409 = vpow2.f32 %v4724_v20  ;;  %v4636_v33 = vadd.f32 %v12500_v31, %v11976_v11  ;;  %v4637_v24 = vadd.f32 %v12505_v45, %v11980_v46 }
 0xade   : > { %8411 = vpow2.f32 %v4726_v58  ;;  %v4462_v30 = vpop.permute.xlu0 %4461 }
 0xadf   : > { %v8402_v18 = vpop.eup %8401  ;;  %v4728_v57 = vmul.f32 1.442695, %v4636_v33  ;;  %v12514_v55 = vadd.f32 %v9163_v39, %v4462_v30  ;;  %v12519_v28 = vadd.f32 %v9164_v35, %v4462_v30  ;;  %v4730_v13 = vmul.f32 1.442695, %v4637_v24  ;;  %v9165_v30 = vld [vmem:[%s13871_s0 + $0x100] sm:$0xff] }
 0xae0   : > { %v8404_v20 = vpop.eup %8403  ;;  %v6938_v0 = vpack.c.bf16 %v8402_v18, %v8398_v53  ;;  %v9166_v53 = vld [vmem:[%s13871_s0 + $0x108] sm:$0xff] }
 0xae1   : > { %v4638_v58 = vadd.f32 %v12514_v55, %v11976_v11  ;;  %v4639_v33 = vadd.f32 %v12519_v28, %v11980_v46  ;;  %v6936_v3 = vpack.c.bf16 %v8404_v20, %v8400_v8  ;;  %8413 = vpow2.f32 %v4728_v57 }
 0xae2   : > { %v4467_v22 = vpop.permute.xlu1 %4466  ;;  %8415 = vpow2.f32 %v4730_v13 }
 0xae3   : > { %v4732_v39 = vmul.f32 1.442695, %v4638_v58  ;;  %v4734_v36 = vmul.f32 1.442695, %v4639_v33  ;;  %6937 = vmatprep.subr.bf16.mxu0 %v6936_v3  ;;  %v12528_v35 = vadd.f32 %v9165_v30, %v4467_v22  ;;  %v12533_v24 = vadd.f32 %v9166_v53, %v4467_v22  ;;  %v8406_v18 = vpop.eup %8405  ;;  %v9167_v22 = vld [vmem:[%s13871_s0 + $0x110] sm:$0xff] }
 0xae4   : > { %6939 = vmatpush1.bf16.msra.mxu0 %v6938_v0  ;;  %v8408_v57 = vpop.eup %8407  ;;  %v9168_v0 = vld [vmem:[%s13871_s0 + $0x118] sm:$0xff] }
 0xae5   : > { %8417 = vpow2.f32 %v4732_v39  ;;  %v4640_v8 = vadd.f32 %v12528_v35, %v11976_v11  ;;  %v4641_v3 = vadd.f32 %v12533_v24, %v11980_v46 }
 0xae6   : > { %8419 = vpow2.f32 %v4734_v36  ;;  %v4472_v20 = vpop.permute.xlu0 %4471 }
 0xae7   : > { %v8410_v58 = vpop.eup %8409  ;;  %v4736_v33 = vmul.f32 1.442695, %v4640_v8  ;;  %v12542_v30 = vadd.f32 %v9167_v22, %v4472_v20  ;;  %v12547_v13 = vadd.f32 %v9168_v0, %v4472_v20  ;;  %v4738_v53 = vmul.f32 1.442695, %v4641_v3  ;;  %v9169_v20 = vld [vmem:[%s13871_s0 + $0x120] sm:$0xff] }
 0xae8   : > { %v8412_v39 = vpop.eup %8411  ;;  %v6942_v34 = vpack.c.bf16 %v8410_v58, %v8406_v18  ;;  %v9170_v18 = vld [vmem:[%s13871_s0 + $0x128] sm:$0xff] }
 0xae9   : > { %v4642_v36 = vadd.f32 %v12542_v30, %v11976_v11  ;;  %v4643_v8 = vadd.f32 %v12547_v13, %v11980_v46  ;;  %v6940_v44 = vpack.c.bf16 %v8412_v39, %v8408_v57  ;;  %8421 = vpow2.f32 %v4736_v33 }
 0xaea   : > { %v4477_v59 = vpop.permute.xlu1 %4476  ;;  %8423 = vpow2.f32 %v4738_v53 }
 0xaeb   : > { %v4740_v22 = vmul.f32 1.442695, %v4642_v36  ;;  %v4742_v14 = vmul.f32 1.442695, %v4643_v8  ;;  %6941 = vmatprep.subr.bf16.mxu0 %v6940_v44  ;;  %v12556_v0 = vadd.f32 %v9169_v20, %v4477_v59  ;;  %v12561_v3 = vadd.f32 %v9170_v18, %v4477_v59  ;;  %v8414_v58 = vpop.eup %8413  ;;  %v9171_v59 = vld [vmem:[%s13871_s0 + $0x130] sm:$0xff] }
 0xaec   : > { %6943 = vmatpush1.bf16.msra.mxu0 %v6942_v34  ;;  %v8416_v33 = vpop.eup %8415  ;;  %v9172_v34 = vld [vmem:[%s13871_s0 + $0x138] sm:$0xff] }
 0xaed   : > { %14767 = vst [vmem:[#allocation33_spill] sm:$0xff] %v12556_v0  ;;  %14768 = vst [vmem:[#allocation39_spill] sm:$0xff] %v12561_v3  ;;  %8425 = vpow2.f32 %v4740_v22  ;;  %v4644_v57 = vadd.f32 %v12556_v0, %v11976_v11  ;;  %v4645_v44 = vadd.f32 %v12561_v3, %v11980_v46 }
 0xaee   : > { %8427 = vpow2.f32 %v4742_v14  ;;  %v4482_v39 = vpop.permute.xlu0 %4481 }
 0xaef   : > { %v8418_v36 = vpop.eup %8417  ;;  %v4744_v8 = vmul.f32 1.442695, %v4644_v57  ;;  %v12570_v20 = vadd.f32 %v9171_v59, %v4482_v39  ;;  %v12575_v53 = vadd.f32 %v9172_v34, %v4482_v39  ;;  %v4746_v18 = vmul.f32 1.442695, %v4645_v44  ;;  %v9173_v39 = vld [vmem:[%s13871_s0 + $0x140] sm:$0xff] }
 0xaf0   : > { %v8420_v22 = vpop.eup %8419  ;;  %v6946_v29 = vpack.c.bf16 %v8418_v36, %v8414_v58  ;;  %v9174_v58 = vld [vmem:[%s13871_s0 + $0x148] sm:$0xff] }
 0xaf1   : > { %14769 = vst [vmem:[#allocation37_spill] sm:$0xff] %v12570_v20  ;;  %14770 = vst [vmem:[#allocation43_spill] sm:$0xff] %v12575_v53  ;;  %v4646_v14 = vadd.f32 %v12570_v20, %v11976_v11  ;;  %v4647_v57 = vadd.f32 %v12575_v53, %v11980_v46  ;;  %v6944_v52 = vpack.c.bf16 %v8420_v22, %v8416_v33  ;;  %8429 = vpow2.f32 %v4744_v8 }
 0xaf2   : > { %v4487_v0 = vpop.permute.xlu1 %4486  ;;  %8431 = vpow2.f32 %v4746_v18 }
 0xaf3   : > { %v4748_v59 = vmul.f32 1.442695, %v4646_v14  ;;  %v4750_v3 = vmul.f32 1.442695, %v4647_v57  ;;  %6945 = vmatprep.subr.bf16.mxu0 %v6944_v52  ;;  %v12584_v34 = vadd.f32 %v9173_v39, %v4487_v0  ;;  %v12589_v44 = vadd.f32 %v9174_v58, %v4487_v0  ;;  %v8422_v36 = vpop.eup %8421  ;;  %v9175_v0 = vld [vmem:[%s13871_s0 + $0x150] sm:$0xff] }
 0xaf4   : > { %6947 = vmatpush1.bf16.msra.mxu0 %v6946_v29  ;;  %v8424_v8 = vpop.eup %8423  ;;  %v9176_v29 = vld [vmem:[%s13871_s0 + $0x158] sm:$0xff] }
 0xaf5   : > { %14771 = vst [vmem:[#allocation41_spill] sm:$0xff] %v12584_v34  ;;  %14772 = vst [vmem:[#allocation47_spill] sm:$0xff] %v12589_v44  ;;  %8433 = vpow2.f32 %v4748_v59  ;;  %v4648_v33 = vadd.f32 %v12584_v34, %v11976_v11  ;;  %v4649_v52 = vadd.f32 %v12589_v44, %v11980_v46 }
 0xaf6   : > { %8435 = vpow2.f32 %v4750_v3  ;;  %v4492_v22 = vpop.permute.xlu0 %4491 }
 0xaf7   : > { %v8426_v14 = vpop.eup %8425  ;;  %v4752_v57 = vmul.f32 1.442695, %v4648_v33  ;;  %v12598_v39 = vadd.f32 %v9175_v0, %v4492_v22  ;;  %v12603_v18 = vadd.f32 %v9176_v29, %v4492_v22  ;;  %v4754_v58 = vmul.f32 1.442695, %v4649_v52  ;;  %v9177_v22 = vld [vmem:[%s13871_s0 + $0x160] sm:$0xff] }
 0xaf8   : > { %v8428_v59 = vpop.eup %8427  ;;  %v6950_v34 = vpack.c.bf16 %v8426_v14, %v8422_v36  ;;  %v9178_v36 = vld [vmem:[%s13871_s0 + $0x168] sm:$0xff] }
 0xaf9   : > { %14773 = vst [vmem:[#allocation45_spill] sm:$0xff] %v12598_v39  ;;  %14774 = vst [vmem:[#allocation51_spill] sm:$0xff] %v12603_v18  ;;  %v4650_v3 = vadd.f32 %v12598_v39, %v11976_v11  ;;  %v4651_v33 = vadd.f32 %v12603_v18, %v11980_v46  ;;  %v6948_v44 = vpack.c.bf16 %v8428_v59, %v8424_v8  ;;  %8437 = vpow2.f32 %v4752_v57 }
 0xafa   : > { %v4497_v20 = vpop.permute.xlu1 %4496  ;;  %8439 = vpow2.f32 %v4754_v58 }
 0xafb   : > { %v4756_v0 = vmul.f32 1.442695, %v4650_v3  ;;  %v4758_v53 = vmul.f32 1.442695, %v4651_v33  ;;  %6949 = vmatprep.subr.bf16.mxu0 %v6948_v44  ;;  %v12612_v29 = vadd.f32 %v9177_v22, %v4497_v20  ;;  %v12617_v52 = vadd.f32 %v9178_v36, %v4497_v20  ;;  %v8430_v14 = vpop.eup %8429  ;;  %v9179_v20 = vld [vmem:[%s13871_s0 + $0x170] sm:$0xff] }
 0xafc   : > { %6951 = vmatpush1.bf16.msra.mxu0 %v6950_v34  ;;  %v8432_v57 = vpop.eup %8431  ;;  %v9180_v34 = vld [vmem:[%s13871_s0 + $0x178] sm:$0xff] }
 0xafd   : > { %14775 = vst [vmem:[#allocation49_spill] sm:$0xff] %v12612_v29  ;;  %14776 = vst [vmem:[#allocation55_spill] sm:$0xff] %v12617_v52  ;;  %8441 = vpow2.f32 %v4756_v0  ;;  %v4652_v8 = vadd.f32 %v12612_v29, %v11976_v11  ;;  %v4653_v44 = vadd.f32 %v12617_v52, %v11980_v46 }
 0xafe   : > { %8443 = vpow2.f32 %v4758_v53  ;;  %v4502_v59 = vpop.permute.xlu0 %4501 }
 0xaff   : > { %v8434_v3 = vpop.eup %8433  ;;  %v4760_v33 = vmul.f32 1.442695, %v4652_v8  ;;  %v12626_v22 = vadd.f32 %v9179_v20, %v4502_v59  ;;  %v12631_v58 = vadd.f32 %v9180_v34, %v4502_v59  ;;  %v4762_v36 = vmul.f32 1.442695, %v4653_v44  ;;  %v9181_v59 = vld [vmem:[%s13871_s0 + $0x180] sm:$0xff] }
 0xb00   : > { %v8436_v0 = vpop.eup %8435  ;;  %v6954_v29 = vpack.c.bf16 %v8434_v3, %v8430_v14  ;;  %v9182_v14 = vld [vmem:[%s13871_s0 + $0x188] sm:$0xff] }
 0xb01   : > { %14777 = vst [vmem:[#allocation53_spill] sm:$0xff] %v12626_v22  ;;  %14778 = vst [vmem:[#allocation59_spill] sm:$0xff] %v12631_v58  ;;  %v4654_v53 = vadd.f32 %v12626_v22, %v11976_v11  ;;  %v4655_v8 = vadd.f32 %v12631_v58, %v11980_v46  ;;  %v6952_v52 = vpack.c.bf16 %v8436_v0, %v8432_v57  ;;  %8445 = vpow2.f32 %v4760_v33 }
 0xb02   : > { %v4507_v39 = vpop.permute.xlu1 %4506  ;;  %8447 = vpow2.f32 %v4762_v36 }
 0xb03   : > { %v4764_v20 = vmul.f32 1.442695, %v4654_v53  ;;  %v4766_v18 = vmul.f32 1.442695, %v4655_v8  ;;  %6953 = vmatprep.subr.bf16.mxu0 %v6952_v52  ;;  %v12640_v34 = vadd.f32 %v9181_v59, %v4507_v39  ;;  %v12645_v44 = vadd.f32 %v9182_v14, %v4507_v39  ;;  %v8438_v3 = vpop.eup %8437  ;;  %v9183_v39 = vld [vmem:[%s13871_s0 + $0x190] sm:$0xff] }
 0xb04   : > { %6955 = vmatpush1.bf16.msra.mxu0 %v6954_v29  ;;  %v8440_v33 = vpop.eup %8439  ;;  %v9184_v29 = vld [vmem:[%s13871_s0 + $0x198] sm:$0xff] }
 0xb05   : > { %14779 = vst [vmem:[#allocation57_spill] sm:$0xff] %v12640_v34  ;;  %14780 = vst [vmem:[#allocation63_spill] sm:$0xff] %v12645_v44  ;;  %8449 = vpow2.f32 %v4764_v20  ;;  %v4656_v57 = vadd.f32 %v12640_v34, %v11976_v11  ;;  %v4657_v52 = vadd.f32 %v12645_v44, %v11980_v46 }
 0xb06   : > { %8451 = vpow2.f32 %v4766_v18  ;;  %v4512_v0 = vpop.permute.xlu0 %4511 }
 0xb07   : > { %v8442_v53 = vpop.eup %8441  ;;  %v4768_v8 = vmul.f32 1.442695, %v4656_v57  ;;  %v12654_v59 = vadd.f32 %v9183_v39, %v4512_v0  ;;  %v12659_v36 = vadd.f32 %v9184_v29, %v4512_v0  ;;  %v4770_v14 = vmul.f32 1.442695, %v4657_v52  ;;  %v9185_v0 = vld [vmem:[%s13871_s0 + $0x1a0] sm:$0xff] }
 0xb08   : > { %v8444_v20 = vpop.eup %8443  ;;  %v6958_v34 = vpack.c.bf16 %v8442_v53, %v8438_v3  ;;  %v9186_v3 = vld [vmem:[%s13871_s0 + $0x1a8] sm:$0xff] }
 0xb09   : > { %14781 = vst [vmem:[#allocation61_spill] sm:$0xff] %v12654_v59  ;;  %14782 = vst [vmem:[#allocation87_spill] sm:$0xff] %v12659_v36  ;;  %v4658_v18 = vadd.f32 %v12654_v59, %v11976_v11  ;;  %v4659_v57 = vadd.f32 %v12659_v36, %v11980_v46  ;;  %v6956_v44 = vpack.c.bf16 %v8444_v20, %v8440_v33  ;;  %8453 = vpow2.f32 %v4768_v8 }
 0xb0a   : > { %v4517_v22 = vpop.permute.xlu1 %4516  ;;  %8455 = vpow2.f32 %v4770_v14 }
 0xb0b   : > { %v4772_v39 = vmul.f32 1.442695, %v4658_v18  ;;  %v4774_v58 = vmul.f32 1.442695, %v4659_v57  ;;  %6957 = vmatprep.subr.bf16.mxu0 %v6956_v44  ;;  %v12668_v29 = vadd.f32 %v9185_v0, %v4517_v22  ;;  %v12673_v52 = vadd.f32 %v9186_v3, %v4517_v22  ;;  %v8446_v53 = vpop.eup %8445  ;;  %v9187_v22 = vld [vmem:[%s13871_s0 + $0x1b0] sm:$0xff] }
 0xb0c   : > { %6959 = vmatpush1.bf16.msra.mxu0 %v6958_v34  ;;  %v8448_v8 = vpop.eup %8447  ;;  %v9188_v34 = vld [vmem:[%s13871_s0 + $0x1b8] sm:$0xff] }
 0xb0d   : > { %14783 = vst [vmem:[#allocation65_spill] sm:$0xff] %v12668_v29  ;;  %14784 = vst [vmem:[#allocation89_spill] sm:$0xff] %v12673_v52  ;;  %8457 = vpow2.f32 %v4772_v39  ;;  %v4660_v33 = vadd.f32 %v12668_v29, %v11976_v11  ;;  %v4661_v44 = vadd.f32 %v12673_v52, %v11980_v46 }
 0xb0e   : > { %8459 = vpow2.f32 %v4774_v58  ;;  %v4522_v20 = vpop.permute.xlu0 %4521 }
 0xb0f   : > { %v8450_v18 = vpop.eup %8449  ;;  %v4776_v57 = vmul.f32 1.442695, %v4660_v33  ;;  %v12682_v0 = vadd.f32 %v9187_v22, %v4522_v20  ;;  %v12687_v14 = vadd.f32 %v9188_v34, %v4522_v20  ;;  %v4778_v3 = vmul.f32 1.442695, %v4661_v44  ;;  %v9189_v20 = vld [vmem:[%s13871_s0 + $0x1c0] sm:$0xff] }
 0xb10   : > { %v8452_v39 = vpop.eup %8451  ;;  %v6962_v29 = vpack.c.bf16 %v8450_v18, %v8446_v53  ;;  %v9190_v53 = vld [vmem:[%s13871_s0 + $0x1c8] sm:$0xff] }
 0xb11   : > { %14785 = vst [vmem:[#allocation88_spill] sm:$0xff] %v12682_v0  ;;  %14786 = vst [vmem:[#allocation90_spill] sm:$0xff] %v12687_v14  ;;  %v4662_v58 = vadd.f32 %v12682_v0, %v11976_v11  ;;  %v4663_v33 = vadd.f32 %v12687_v14, %v11980_v46  ;;  %v6960_v52 = vpack.c.bf16 %v8452_v39, %v8448_v8  ;;  %8461 = vpow2.f32 %v4776_v57 }
 0xb12   : > { %v4527_v59 = vpop.permute.xlu1 %4526  ;;  %8463 = vpow2.f32 %v4778_v3 }
 0xb13   : > { %v4780_v22 = vmul.f32 1.442695, %v4662_v58  ;;  %v4782_v36 = vmul.f32 1.442695, %v4663_v33  ;;  %6961 = vmatprep.subr.bf16.mxu0 %v6960_v52  ;;  %v12696_v34 = vadd.f32 %v9189_v20, %v4527_v59  ;;  %v12701_v44 = vadd.f32 %v9190_v53, %v4527_v59  ;;  %v8454_v18 = vpop.eup %8453  ;;  %v9191_v59 = vld [vmem:[%s13871_s0 + $0x1d0] sm:$0xff] }
 0xb14   : > { %6963 = vmatpush1.bf16.msra.mxu0 %v6962_v29  ;;  %v8456_v57 = vpop.eup %8455  ;;  %v9192_v29 = vld [vmem:[%s13871_s0 + $0x1d8] sm:$0xff] }
 0xb15   : > { %14787 = vst [vmem:[#allocation67_spill] sm:$0xff] %v12696_v34  ;;  %14788 = vst [vmem:[#allocation66_spill] sm:$0xff] %v12701_v44  ;;  %8465 = vpow2.f32 %v4780_v22  ;;  %v4664_v8 = vadd.f32 %v12696_v34, %v11976_v11  ;;  %v4665_v52 = vadd.f32 %v12701_v44, %v11980_v46 }
 0xb16   : > { %8467 = vpow2.f32 %v4782_v36  ;;  %v4532_v39 = vpop.permute.xlu0 %4531 }
 0xb17   : > { %v8458_v58 = vpop.eup %8457  ;;  %v4784_v33 = vmul.f32 1.442695, %v4664_v8  ;;  %v12710_v20 = vadd.f32 %v9191_v59, %v4532_v39  ;;  %v12715_v3 = vadd.f32 %v9192_v29, %v4532_v39  ;;  %v4786_v53 = vmul.f32 1.442695, %v4665_v52  ;;  %v9193_v39 = vld [vmem:[%s13871_s0 + $0x1e0] sm:$0xff] }
 0xb18   : > { %v8460_v22 = vpop.eup %8459  ;;  %v6966_v34 = vpack.c.bf16 %v8458_v58, %v8454_v18  ;;  %v9194_v18 = vld [vmem:[%s13871_s0 + $0x1e8] sm:$0xff] }
 0xb19   : > { %14789 = vst [vmem:[#allocation69_spill] sm:$0xff] %v12710_v20  ;;  %14790 = vst [vmem:[#allocation68_spill] sm:$0xff] %v12715_v3  ;;  %v4666_v36 = vadd.f32 %v12710_v20, %v11976_v11  ;;  %v4667_v8 = vadd.f32 %v12715_v3, %v11980_v46  ;;  %v6964_v44 = vpack.c.bf16 %v8460_v22, %v8456_v57  ;;  %8469 = vpow2.f32 %v4784_v33 }
 0xb1a   : > { %v4537_v0 = vpop.permute.xlu1 %4536  ;;  %8471 = vpow2.f32 %v4786_v53 }
 0xb1b   : > { %v4788_v59 = vmul.f32 1.442695, %v4666_v36  ;;  %v4790_v14 = vmul.f32 1.442695, %v4667_v8  ;;  %6965 = vmatprep.subr.bf16.mxu0 %v6964_v44  ;;  %v12724_v29 = vadd.f32 %v9193_v39, %v4537_v0  ;;  %v12729_v52 = vadd.f32 %v9194_v18, %v4537_v0  ;;  %v8462_v58 = vpop.eup %8461  ;;  %v9195_v0 = vld [vmem:[%s13871_s0 + $0x1f0] sm:$0xff] }
 0xb1c   : > { %6967 = vmatpush1.bf16.msra.mxu0 %v6966_v34  ;;  %v8464_v33 = vpop.eup %8463  ;;  %v9196_v34 = vld [vmem:[%s13871_s0 + $0x1f8] sm:$0xff] }
 0xb1d   : > { %14791 = vst [vmem:[#allocation71_spill] sm:$0xff] %v12724_v29  ;;  %14792 = vst [vmem:[#allocation70_spill] sm:$0xff] %v12729_v52  ;;  %8473 = vpow2.f32 %v4788_v59  ;;  %v4668_v57 = vadd.f32 %v12724_v29, %v11976_v11  ;;  %v4669_v44 = vadd.f32 %v12729_v52, %v11980_v46 }
 0xb1e   : > { %8475 = vpow2.f32 %v4790_v14  ;;  %v4542_v22 = vpop.permute.xlu0 %4541 }
 0xb1f   : > { %v8466_v36 = vpop.eup %8465  ;;  %v4792_v8 = vmul.f32 1.442695, %v4668_v57  ;;  %v12738_v39 = vadd.f32 %v9195_v0, %v4542_v22  ;;  %v12743_v53 = vadd.f32 %v9196_v34, %v4542_v22  ;;  %v4794_v18 = vmul.f32 1.442695, %v4669_v44 }
 0xb20   : > { %v8468_v59 = vpop.eup %8467  ;;  %v6970_v29 = vpack.c.bf16 %v8466_v36, %v8462_v58 }
 0xb21   : > { %14793 = vst [vmem:[#allocation73_spill] sm:$0xff] %v12738_v39  ;;  %v4670_v14 = vadd.f32 %v12738_v39, %v11976_v11  ;;  %v4671_v57 = vadd.f32 %v12743_v53, %v11980_v46  ;;  %v6968_v52 = vpack.c.bf16 %v8468_v59, %v8464_v33  ;;  %8477 = vpow2.f32 %v4792_v8 }
 0xb22   : > { %8479 = vpow2.f32 %v4794_v18 }
 0xb23   : > { %v4796_v20 = vmul.f32 1.442695, %v4670_v14  ;;  %v4798_v0 = vmul.f32 1.442695, %v4671_v57  ;;  %6969 = vmatprep.subr.bf16.mxu0 %v6968_v52  ;;  %v8470_v3 = vpop.eup %8469 }
 0xb24   : > { %6971 = vmatpush1.bf16.msra.mxu0 %v6970_v29  ;;  %v8472_v22 = vpop.eup %8471 }
 0xb25   : > { %8481 = vpow2.f32 %v4796_v20 }
 0xb26   : > { %8483 = vpow2.f32 %v4798_v0 }
 0xb27   : > { %v8474_v34 = vpop.eup %8473 }
 0xb28   : > { %v8476_v44 = vpop.eup %8475  ;;  %v6974_v58 = vpack.c.bf16 %v8474_v34, %v8470_v3 }
 0xb29   : > { %v6972_v36 = vpack.c.bf16 %v8476_v44, %v8472_v22 }
 0xb2b   : > { %6973 = vmatprep.subr.bf16.mxu0 %v6972_v36  ;;  %v8478_v11 = vpop.eup %8477 }
 0xb2c   : > { %6975 = vmatpush1.bf16.msra.mxu0 %v6974_v58  ;;  %v8480_v39 = vpop.eup %8479 }
 0xb2f   : > { %v8482_v46 = vpop.eup %8481 }
 0xb30   : > { %v8484_v33 = vpop.eup %8483  ;;  %v6978_v8 = vpack.c.bf16 %v8482_v46, %v8478_v11 }
 0xb31   : > { %v6976_v59 = vpack.c.bf16 %v8484_v33, %v8480_v39 }
 0xb33   : > { %6977 = vmatprep.subr.bf16.mxu0 %v6976_v59 }
 0xb34   : > { %6979 = vmatpush1.bf16.msra.mxu0 %v6978_v8 }
 0xb35   : > { %6980 = vmatprep.subr.bf16.mxu0 %v14494_v50 }
 0xb37   : > { %4865 = vmatmul.mubr.f32.vlgmr.msra.gmra.mrb[130].mxu0 %v14350_v43 }
 0xb38   : > { %6981 = vmatpush1.bf16.msra.mxu0 %v14495_v5 }
 0xb39   : > { %6982 = vmatprep.subr.bf16.mxu0 %v14494_v50 }
 0xb3c   : > { %6983 = vmatpush1.bf16.msra.mxu0 %v14495_v5 }
 0xb3d   : > { %6984 = vmatprep.subr.bf16.mxu0 %v14494_v50 }
 0xb40   : > { %6985 = vmatpush1.bf16.msra.mxu0 %v14495_v5 }
 0xb41   : > { %6986 = vmatprep.subr.bf16.mxu0 %v14494_v50 }
 0xb44   : > { %6987 = vmatpush1.bf16.msra.mxu0 %v14495_v5 }
 0xb45   : > { %6988 = vmatprep.subr.bf16.mxu0 %v14494_v50 }
 0xb48   : > { %6989 = vmatpush1.bf16.msra.mxu0 %v14495_v5 }
 0xb49   : > { %6990 = vmatprep.subr.bf16.mxu0 %v14494_v50 }
 0xb4c   : > { %6991 = vmatpush1.bf16.msra.mxu0 %v14495_v5 }
 0xb4d   : > { %6992 = vmatprep.subr.bf16.mxu0 %v14494_v50 }
 0xb50   : > { %6993 = vmatpush1.bf16.msra.mxu0 %v14495_v5 }
 0xb51   : > { %6994 = vmatprep.subr.bf16.mxu0 %v14494_v50 }
 0xb54   : > { %6995 = vmatpush1.bf16.msra.mxu0 %v14495_v5 }
 0xb55   : > { %6996 = vmatprep.subr.bf16.mxu0 %v14494_v50 }
 0xb58   : > { %6997 = vmatpush1.bf16.msra.mxu0 %v14495_v5 }
 0xb59   : > { %6998 = vmatprep.subr.bf16.mxu0 %v14494_v50 }
 0xb5c   : > { %6999 = vmatpush1.bf16.msra.mxu0 %v14495_v5 }
 0xb5d   : > { %7000 = vmatprep.subr.bf16.mxu0 %v14494_v50 }
 0xb60   : > { %7001 = vmatpush1.bf16.msra.mxu0 %v14495_v5 }
 0xb61   : > { %7002 = vmatprep.subr.bf16.mxu0 %v14494_v50 }
 0xb64   : > { %7003 = vmatpush1.bf16.msra.mxu0 %v14495_v5 }
 0xb65   : > { %7004 = vmatprep.subr.bf16.mxu0 %v14494_v50 }
 0xb68   : > { %7005 = vmatpush1.bf16.msra.mxu0 %v14495_v5 }
 0xb69   : > { %7006 = vmatprep.subr.bf16.mxu0 %v14494_v50 }
 0xb6c   : > { %7007 = vmatpush1.bf16.msra.mxu0 %v14495_v5 }
 0xb6d   : > { %7008 = vmatprep.subr.bf16.mxu0 %v14494_v50 }
 0xb70   : > { %7009 = vmatpush1.bf16.msra.mxu0 %v14495_v5 }
 0xb71   : > { %7010 = vmatprep.subr.bf16.mxu0 %v14494_v50 }
 0xb74   : > { %7011 = vmatpush1.bf16.msra.mxu0 %v14495_v5 }
 0xc0a   : > { %v4866_v20 = vpop.f32.mrb[130].mxu0 }
 0xc0b   : > { %v4867_v3 = vadd.f32 1e-30, %v4866_v20  ;;  %v4868_v29 = vpop.f32.mrb[131].mxu0 }
 0xc0c   : > { %v4869_v52 = vadd.f32 1e-30, %v4868_v29 }
 0xc0d   : > { %8485 = vlog2.f32 %v4867_v3 }
 0xc0e   : > { %8487 = vlog2.f32 %v4869_v52 }
 0xc17   : > { %v8486_v39 = vpop.eup %8485 }
 0xc18   : > { %v8488_v18 = vpop.eup %8487  ;;  %v4872_v14 = vmul.f32 0.6931472, %v8486_v39 }
 0xc19   : > { %v4874_v57 = vmul.f32 0.6931472, %v8488_v18 }
 0xc1b   : > { %v4877_v0 = vcombine.low %v4872_v14, %v4874_v57 }
 0xc1d   : > { %v4884_v22 = vrot.slane %v4877_v0, %v10396_v26 }
 0xc1f   : > { %v4891_v34 = vrot.slane %v4884_v22, %v10396_v26 }
 0xc21   : > { %v4893_v44 = vsub.f32 %v10399_v7, %v4891_v34 }
 0xc23   : > { %v12786_v50 = vadd.f32 %v4893_v44, %v11972_v42 }
 0xc25   : > { %v12790_v5 = vrot.slane %v12786_v50, %v10037_v4  ;;  %v12794_v58 = vrot.slane %v12786_v50, %v10040_v2 }
 0xc27   : > { %v4906_v36 = vadd.f32 %v12790_v5, %v12304_v9  ;;  %v4907_v11 = vadd.f32 %v12794_v58, %v12309_v27  ;;  %v4909_v46 = vadd.f32 %v12794_v58, %v12323_v37  ;;  %v4908_v42 = vadd.f32 %v12790_v5, %v12318_v12 }
 0xc28   : > { %v4911_v59 = vadd.f32 %v12794_v58, %v12337_v62  ;;  %v4910_v9 = vadd.f32 %v12790_v5, %v12332_v49  ;;  %v4913_v27 = vadd.f32 %v12794_v58, %v12351_v51  ;;  %v4912_v12 = vadd.f32 %v12790_v5, %v12346_v38 }
 0xc29   : > { %v4970_v33 = vmul.f32 1.442695, %v4906_v36  ;;  %v4972_v8 = vmul.f32 1.442695, %v4907_v11  ;;  %v4976_v20 = vmul.f32 1.442695, %v4909_v46  ;;  %v4915_v62 = vadd.f32 %v12794_v58, %v12365_v63 }
 0xc2a   : > { %v4974_v3 = vmul.f32 1.442695, %v4908_v42  ;;  %v4980_v37 = vmul.f32 1.442695, %v4911_v59  ;;  %v4978_v29 = vmul.f32 1.442695, %v4910_v9  ;;  %v4914_v49 = vadd.f32 %v12790_v5, %v12360_v54 }
 0xc2b   : > { %8489 = vpow2.f32 %v4970_v33  ;;  %v4984_v52 = vmul.f32 1.442695, %v4913_v27  ;;  %v4982_v18 = vmul.f32 1.442695, %v4912_v12  ;;  %v4917_v51 = vadd.f32 %v12794_v58, %v12379_v17 }
 0xc2c   : > { %8491 = vpow2.f32 %v4972_v8  ;;  %v4988_v57 = vmul.f32 1.442695, %v4915_v62  ;;  %v4916_v63 = vadd.f32 %v12790_v5, %v12374_v61  ;;  %v4986_v0 = vmul.f32 1.442695, %v4914_v49 }
 0xc2d   : > { %8493 = vpow2.f32 %v4976_v20  ;;  %v4919_v54 = vadd.f32 %v12794_v58, %v12393_v19  ;;  %v4992_v22 = vmul.f32 1.442695, %v4917_v51  ;;  %v4918_v17 = vadd.f32 %v12790_v5, %v12388_v47 }
 0xc2e   : > { %8495 = vpow2.f32 %v4974_v3  ;;  %v4990_v36 = vmul.f32 1.442695, %v4916_v63  ;;  %v4921_v61 = vadd.f32 %v12794_v58, %v12407_v6  ;;  %v4920_v19 = vadd.f32 %v12790_v5, %v12402_v21 }
 0xc2f   : > { %8497 = vpow2.f32 %v4980_v37  ;;  %v4996_v11 = vmul.f32 1.442695, %v4919_v54  ;;  %v4994_v33 = vmul.f32 1.442695, %v4918_v17  ;;  %v4923_v47 = vadd.f32 %v12794_v58, %v12421_v15 }
 0xc30   : > { %8499 = vpow2.f32 %v4978_v29  ;;  %v5000_v8 = vmul.f32 1.442695, %v4921_v61  ;;  %v4922_v6 = vadd.f32 %v12790_v5, %v12416_v41  ;;  %v4998_v9 = vmul.f32 1.442695, %v4920_v19 }
 0xc31   : > { %8501 = vpow2.f32 %v4984_v52  ;;  %v4925_v21 = vadd.f32 %v12794_v58, %v12435_v32  ;;  %v5004_v3 = vmul.f32 1.442695, %v4923_v47  ;;  %v4924_v15 = vadd.f32 %v12790_v5, %v12430_v16 }
 0xc32   : > { %8503 = vpow2.f32 %v4982_v18  ;;  %v5002_v12 = vmul.f32 1.442695, %v4922_v6  ;;  %v4927_v41 = vadd.f32 %v12794_v58, %v12449_v40  ;;  %v4926_v32 = vadd.f32 %v12790_v5, %v12444_v60 }
 0xc33   : > { %8505 = vpow2.f32 %v4988_v57  ;;  %v5008_v29 = vmul.f32 1.442695, %v4925_v21  ;;  %v4929_v16 = vadd.f32 %v12794_v58, %v12463_v23  ;;  %v4928_v40 = vadd.f32 %v12790_v5, %v12458_v48 }
 0xc34   : > { %8507 = vpow2.f32 %v4986_v0  ;;  %v5012_v49 = vmul.f32 1.442695, %v4927_v41  ;;  %v5010_v51 = vmul.f32 1.442695, %v4926_v32  ;;  %v4931_v60 = vadd.f32 %v12794_v58, %v12477_v1 }
 0xc35   : > { %v8490_v39 = vpop.eup %8489  ;;  %8509 = vpow2.f32 %v4992_v22  ;;  %v5016_v57 = vmul.f32 1.442695, %v4929_v16  ;;  %v4930_v23 = vadd.f32 %v12790_v5, %v12472_v10  ;;  %v5014_v0 = vmul.f32 1.442695, %v4928_v40  ;;  %v14797_v16 = vld [vmem:[#allocation37_spill] sm:$0xff] }
 0xc36   : > { %v8492_v14 = vpop.eup %8491  ;;  %8511 = vpow2.f32 %v4990_v36  ;;  %v4933_v48 = vadd.f32 %v12794_v58, %v12491_v56  ;;  %v5020_v54 = vmul.f32 1.442695, %v4931_v60  ;;  %v4932_v1 = vadd.f32 %v12790_v5, %v12486_v25 }
 0xc37   : > { %5162 = vmatprep.mubr.f32.mxu0 %v8492_v14  ;;  %v8494_v38 = vpop.eup %8493  ;;  %8513 = vpow2.f32 %v4996_v11  ;;  %v4935_v10 = vadd.f32 %v12794_v58, %v12505_v45  ;;  %v4934_v56 = vadd.f32 %v12790_v5, %v12500_v31  ;;  %v4937_v25 = vadd.f32 %v12794_v58, %v12519_v28 }
 0xc38   : > { %5163 = vmatmul.mubr.f32.vlgmr.msra.gmra.mrb[132].mxu0 %v8490_v39  ;;  %v8496_v34 = vpop.eup %8495  ;;  %8515 = vpow2.f32 %v4994_v33  ;;  %v5006_v39 = vmul.f32 1.442695, %v4924_v15  ;;  %v5024_v17 = vmul.f32 1.442695, %v4933_v48  ;;  %v5022_v11 = vmul.f32 1.442695, %v4932_v1 }
 0xc39   : > { %5167 = vmatprep.mubr.f32.mxu0 %v8494_v38  ;;  %v8498_v44 = vpop.eup %8497  ;;  %8517 = vpow2.f32 %v5000_v8  ;;  %v4936_v45 = vadd.f32 %v12790_v5, %v12514_v55  ;;  %v5026_v33 = vmul.f32 1.442695, %v4934_v56  ;;  %v4939_v31 = vadd.f32 %v12794_v58, %v12533_v24  ;;  %v14801_v1 = vld [vmem:[#allocation45_spill] sm:$0xff] }
 0xc3a   : > { %v8500_v46 = vpop.eup %8499  ;;  %8519 = vpow2.f32 %v4998_v9  ;;  %v5032_v47 = vmul.f32 1.442695, %v4937_v25  ;;  %v4938_v28 = vadd.f32 %v12790_v5, %v12528_v35  ;;  %v4941_v55 = vadd.f32 %v12794_v58, %v12547_v13  ;;  %v14795_v13 = vld [vmem:[#allocation33_spill] sm:$0xff] }
 0xc3b   : > { %v8502_v42 = vpop.eup %8501  ;;  %8521 = vpow2.f32 %v5004_v3  ;;  %v5036_v6 = vmul.f32 1.442695, %v4939_v31  ;;  %v4940_v24 = vadd.f32 %v12790_v5, %v12542_v30  ;;  %v4942_v41 = vadd.f32 %v12790_v5, %v14795_v13  ;;  %v14803_v25 = vld [vmem:[#allocation49_spill] sm:$0xff] }
 0xc3c   : > { %5168 = vmatmul.mubr.f32.gmra.mrb[134].mxu0 %v8496_v34  ;;  %v8504_v59 = vpop.eup %8503  ;;  %8523 = vpow2.f32 %v5002_v12  ;;  %v5034_v3 = vmul.f32 1.442695, %v4938_v28 }
 0xc3d   : > { %5172 = vmatprep.mubr.f32.mxu0 %v8498_v44  ;;  %v8506_v20 = vpop.eup %8505  ;;  %8525 = vpow2.f32 %v5008_v29  ;;  %v5018_v44 = vmul.f32 1.442695, %v4930_v23  ;;  %v5038_v29 = vmul.f32 1.442695, %v4940_v24  ;;  %v14807_v24 = vld [vmem:[#allocation57_spill] sm:$0xff] }
 0xc3e   : > { %v8508_v27 = vpop.eup %8507  ;;  %8527 = vpow2.f32 %v5006_v39 }
 0xc3f   : > { %v8510_v37 = vpop.eup %8509  ;;  %8529 = vpow2.f32 %v5012_v49  ;;  %v4944_v49 = vadd.f32 %v12790_v5, %v14797_v16 }
 0xc40   : > { %5173 = vmatmul.mubr.f32.gmra.mrb[136].mxu0 %v8500_v46  ;;  %v8512_v62 = vpop.eup %8511  ;;  %8531 = vpow2.f32 %v5010_v51  ;;  %v5028_v46 = vmul.f32 1.442695, %v4935_v10 }
 0xc41   : > { %5177 = vmatprep.mubr.f32.mxu0 %v8502_v42  ;;  %v8514_v52 = vpop.eup %8513  ;;  %8533 = vpow2.f32 %v5016_v57  ;;  %v5046_v23 = vmul.f32 1.442695, %v4944_v49  ;;  %v14811_v49 = vld [vmem:[#allocation65_spill] sm:$0xff] }
 0xc42   : > { %v8516_v18 = vpop.eup %8515  ;;  %8535 = vpow2.f32 %v5014_v0  ;;  %v14800_v0 = vld [vmem:[#allocation51_spill] sm:$0xff] }
 0xc43   : > { %v8518_v14 = vpop.eup %8517  ;;  %8537 = vpow2.f32 %v5020_v54  ;;  %v4949_v48 = vadd.f32 %v12794_v58, %v14800_v0 }
 0xc44   : > { %5178 = vmatmul.mubr.f32.gmra.mrb[138].mxu0 %v8504_v59  ;;  %v8520_v38 = vpop.eup %8519  ;;  %8539 = vpow2.f32 %v5018_v44  ;;  %v4948_v44 = vadd.f32 %v12790_v5, %v14801_v1 }
 0xc45   : > { %5182 = vmatprep.mubr.f32.mxu0 %v8506_v20  ;;  %v8522_v63 = vpop.eup %8521  ;;  %8541 = vpow2.f32 %v5024_v17  ;;  %v5030_v20 = vmul.f32 1.442695, %v4936_v45  ;;  %v14802_v17 = vld [vmem:[#allocation55_spill] sm:$0xff] }
 0xc46   : > { %v8524_v22 = vpop.eup %8523  ;;  %8543 = vpow2.f32 %v5022_v11 }
 0xc47   : > { %v8526_v34 = vpop.eup %8525  ;;  %8545 = vpow2.f32 %v5028_v46  ;;  %v4950_v46 = vadd.f32 %v12790_v5, %v14803_v25 }
 0xc48   : > { %5183 = vmatmul.mubr.f32.gmra.mrb[140].mxu0 %v8508_v27  ;;  %v8528_v36 = vpop.eup %8527  ;;  %8547 = vpow2.f32 %v5026_v33  ;;  %v14794_v27 = vld [vmem:[#allocation39_spill] sm:$0xff] }
 0xc49   : > { %5187 = vmatprep.mubr.f32.mxu0 %v8510_v37  ;;  %v8530_v61 = vpop.eup %8529  ;;  %8549 = vpow2.f32 %v5032_v47  ;;  %v4943_v35 = vadd.f32 %v12794_v58, %v14794_v27  ;;  %v5040_v37 = vmul.f32 1.442695, %v4941_v55  ;;  %v5058_v28 = vmul.f32 1.442695, %v4950_v46  ;;  %v14817_v46 = vld [vmem:[#allocation69_spill] sm:$0xff] }
 0xc4a   : > { %v8532_v42 = vpop.eup %8531  ;;  %8551 = vpow2.f32 %v5030_v20  ;;  %v14806_v20 = vld [vmem:[#allocation63_spill] sm:$0xff] }
 0xc4b   : > { %v8534_v19 = vpop.eup %8533  ;;  %8553 = vpow2.f32 %v5036_v6  ;;  %v4955_v55 = vadd.f32 %v12794_v58, %v14806_v20 }
 0xc4c   : > { %5188 = vmatmul.mubr.f32.gmra.mrb[142].mxu0 %v8512_v62  ;;  %v8536_v8 = vpop.eup %8535  ;;  %8555 = vpow2.f32 %v5034_v3  ;;  %v14796_v62 = vld [vmem:[#allocation43_spill] sm:$0xff]  ;;  %v4954_v3 = vadd.f32 %v12790_v5, %v14807_v24  ;;  %v14820_v24 = vld [vmem:[#allocation73_spill] sm:$0xff] }
 0xc4d   : > { %5192 = vmatprep.mubr.f32.mxu0 %v8514_v52  ;;  %v8538_v59 = vpop.eup %8537  ;;  %v4945_v30 = vadd.f32 %v12794_v58, %v14796_v62  ;;  %8557 = vpow2.f32 %v5040_v37  ;;  %v5044_v52 = vmul.f32 1.442695, %v4943_v35  ;;  %v14808_v35 = vld [vmem:[#allocation87_spill] sm:$0xff] }
 0xc4e   : > { %v8540_v9 = vpop.eup %8539  ;;  %8559 = vpow2.f32 %v5038_v29  ;;  %v4957_v37 = vadd.f32 %v12794_v58, %v14808_v35  ;;  %v5066_v62 = vmul.f32 1.442695, %v4954_v3  ;;  %v4968_v3 = vadd.f32 %v12790_v5, %v14820_v24 }
 0xc4f   : > { %v8542_v21 = vpop.eup %8541  ;;  %8561 = vpow2.f32 %v5044_v52  ;;  %v5048_v51 = vmul.f32 1.442695, %v4945_v30  ;;  %v14810_v30 = vld [vmem:[#allocation89_spill] sm:$0xff] }
 0xc50   : > { %5193 = vmatmul.mubr.f32.gmra.mrb[144].mxu0 %v8516_v18  ;;  %v8544_v15 = vpop.eup %8543  ;;  %v5042_v18 = vmul.f32 1.442695, %v4942_v41  ;;  %v14809_v41 = vld [vmem:[#allocation61_spill] sm:$0xff]  ;;  %v4959_v52 = vadd.f32 %v12794_v58, %v14810_v30 }
 0xc51   : > { %5197 = vmatprep.mubr.f32.mxu0 %v8518_v14  ;;  %v8546_v12 = vpop.eup %8545  ;;  %v14798_v14 = vld [vmem:[#allocation47_spill] sm:$0xff]  ;;  %v4956_v29 = vadd.f32 %v12790_v5, %v14809_v41 }
 0xc52   : > { %v8548_v32 = vpop.eup %8547  ;;  %v4947_v40 = vadd.f32 %v12794_v58, %v14798_v14  ;;  %8563 = vpow2.f32 %v5042_v18  ;;  %v4958_v18 = vadd.f32 %v12790_v5, %v14811_v49 }
 0xc53   : > { %v8550_v39 = vpop.eup %8549  ;;  %8565 = vpow2.f32 %v5048_v51  ;;  %v5070_v14 = vmul.f32 1.442695, %v4956_v29 }
 0xc54   : > { %5198 = vmatmul.mubr.f32.gmra.mrb[146].mxu0 %v8520_v38  ;;  %v8552_v60 = vpop.eup %8551  ;;  %v14799_v38 = vld [vmem:[#allocation41_spill] sm:$0xff]  ;;  %v5052_v54 = vmul.f32 1.442695, %v4947_v40  ;;  %8567 = vpow2.f32 %v5046_v23  ;;  %v14812_v40 = vld [vmem:[#allocation90_spill] sm:$0xff]  ;;  %v5074_v0 = vmul.f32 1.442695, %v4958_v18 }
 0xc55   : > { %5202 = vmatprep.mubr.f32.mxu0 %v8522_v63  ;;  %v8554_v57 = vpop.eup %8553  ;;  %v4946_v63 = vadd.f32 %v12790_v5, %v14799_v38  ;;  %v4961_v51 = vadd.f32 %v12794_v58, %v14812_v40 }
 0xc56   : > { %8569 = vpow2.f32 %v5052_v54 }
 0xc57   : > { %v5050_v10 = vmul.f32 1.442695, %v4946_v63  ;;  %v14813_v63 = vld [vmem:[#allocation88_spill] sm:$0xff] }
 0xc58   : > { %5203 = vmatmul.mubr.f32.gmra.mrb[148].mxu0 %v8524_v22  ;;  %v8556_v22 = vpop.eup %8555  ;;  %v4960_v23 = vadd.f32 %v12790_v5, %v14813_v63 }
 0xc59   : > { %5207 = vmatprep.mubr.f32.mxu0 %v8526_v34  ;;  %v8558_v34 = vpop.eup %8557  ;;  %8571 = vpow2.f32 %v5050_v10 }
 0xc5a   : > { %v8560_v56 = vpop.eup %8559 }
 0xc5b   : > { %v8562_v11 = vpop.eup %8561 }
 0xc5c   : > { %5208 = vmatmul.mubr.f32.gmra.mrb[150].mxu0 %v8528_v36  ;;  %v4951_v36 = vadd.f32 %v12794_v58, %v14802_v17  ;;  %v8564_v31 = vpop.eup %8563  ;;  %v5078_v17 = vmul.f32 1.442695, %v4960_v23 }
 0xc5d   : > { %5212 = vmatprep.mubr.f32.mxu0 %v8530_v61  ;;  %v5056_v61 = vmul.f32 1.442695, %v4949_v48  ;;  %v8566_v47 = vpop.eup %8565  ;;  %v14814_v48 = vld [vmem:[#allocation66_spill] sm:$0xff] }
 0xc5e   : > { %v5060_v33 = vmul.f32 1.442695, %v4951_v36  ;;  %v4963_v54 = vadd.f32 %v12794_v58, %v14814_v48  ;;  %v14816_v36 = vld [vmem:[#allocation68_spill] sm:$0xff]  ;;  %v14821_v48 = vld [vmem:[#allocation2_spill] sm:$0xff] }
 0xc5f   : > { %8573 = vpow2.f32 %v5056_v61  ;;  %v4965_v61 = vadd.f32 %v12794_v58, %v14816_v36 }
 0xc60   : > { %5213 = vmatmul.mubr.f32.gmra.mrb[152].mxu0 %v8532_v42  ;;  %v5054_v42 = vmul.f32 1.442695, %v4948_v44  ;;  %v14815_v44 = vld [vmem:[#allocation67_spill] sm:$0xff] }
 0xc61   : > { %5217 = vmatprep.mubr.f32.mxu0 %v8534_v19  ;;  %v14804_v19 = vld [vmem:[#allocation59_spill] sm:$0xff]  ;;  %v4962_v10 = vadd.f32 %v12790_v5, %v14815_v44 }
 0xc62   : > { %v4953_v45 = vadd.f32 %v12794_v58, %v14804_v19  ;;  %8575 = vpow2.f32 %v5054_v42  ;;  %v4964_v42 = vadd.f32 %v12790_v5, %v14817_v46 }
 0xc63   : > { %8577 = vpow2.f32 %v5060_v33  ;;  %v5082_v19 = vmul.f32 1.442695, %v4962_v10 }
 0xc64   : > { %5218 = vmatmul.mubr.f32.gmra.mrb[154].mxu0 %v8536_v8  ;;  %v14805_v8 = vld [vmem:[#allocation53_spill] sm:$0xff]  ;;  %v5064_v6 = vmul.f32 1.442695, %v4953_v45  ;;  %8579 = vpow2.f32 %v5058_v28  ;;  %v14818_v45 = vld [vmem:[#allocation70_spill] sm:$0xff]  ;;  %v5086_v20 = vmul.f32 1.442695, %v4964_v42 }
 0xc65   : > { %5222 = vmatprep.mubr.f32.mxu0 %v8538_v59  ;;  %v4952_v59 = vadd.f32 %v12790_v5, %v14805_v8  ;;  %v4967_v33 = vadd.f32 %v12794_v58, %v14818_v45  ;;  %v14824_v45 = vld [vmem:[#allocation72_spill] sm:$0xff] }
 0xc66   : > { %8581 = vpow2.f32 %v5064_v6 }
 0xc67   : > { %v5062_v27 = vmul.f32 1.442695, %v4952_v59  ;;  %v14819_v59 = vld [vmem:[#allocation71_spill] sm:$0xff]  ;;  %v5092_v6 = vmul.f32 1.442695, %v4967_v33 }
 0xc68   : > { %5223 = vmatmul.mubr.f32.gmra.mrb[156].mxu0 %v8540_v9  ;;  %v8568_v9 = vpop.eup %8567  ;;  %v4966_v28 = vadd.f32 %v12790_v5, %v14819_v59 }
 0xc69   : > { %5227 = vmatprep.mubr.f32.mxu0 %v8542_v21  ;;  %v8570_v21 = vpop.eup %8569  ;;  %8583 = vpow2.f32 %v5062_v27 }
 0xc6a   : > { %v5090_v27 = vmul.f32 1.442695, %v4966_v28 }
 0xc6c   : > { %5228 = vmatmul.mubr.f32.gmra.mrb[158].mxu0 %v8544_v15  ;;  %v5068_v15 = vmul.f32 1.442695, %v4955_v55  ;;  %v4969_v55 = vadd.f32 %v12794_v58, %v12743_v53 }
 0xc6d   : > { %5232 = vmatprep.mubr.f32.mxu0 %v8546_v12  ;;  %v8572_v12 = vpop.eup %8571 }
 0xc6e   : > { %v8574_v13 = vpop.eup %8573  ;;  %8585 = vpow2.f32 %v5068_v15  ;;  %v5096_v35 = vmul.f32 1.442695, %v4969_v55 }
 0xc6f   : > { %8587 = vpow2.f32 %v5066_v62 }
 0xc70   : > { %5233 = vmatmul.mubr.f32.gmra.mrb[160].mxu0 %v8548_v32  ;;  %v5072_v32 = vmul.f32 1.442695, %v4957_v37 }
 0xc71   : > { %5237 = vmatprep.mubr.f32.mxu0 %v8550_v39  ;;  %v8576_v39 = vpop.eup %8575 }
 0xc72   : > { %v8578_v16 = vpop.eup %8577  ;;  %8589 = vpow2.f32 %v5072_v32 }
 0xc73   : > { %8591 = vpow2.f32 %v5070_v14 }
 0xc74   : > { %5238 = vmatmul.mubr.f32.gmra.mrb[162].mxu0 %v8552_v60  ;;  %v5076_v60 = vmul.f32 1.442695, %v4959_v52 }
 0xc75   : > { %5242 = vmatprep.mubr.f32.mxu0 %v8554_v57  ;;  %v8580_v57 = vpop.eup %8579 }
 0xc76   : > { %v8582_v38 = vpop.eup %8581  ;;  %8593 = vpow2.f32 %v5076_v60 }
 0xc77   : > { %8595 = vpow2.f32 %v5074_v0 }
 0xc78   : > { %5243 = vmatmul.mubr.f32.gmra.mrb[164].mxu0 %v8556_v22  ;;  %v5080_v22 = vmul.f32 1.442695, %v4961_v51 }
 0xc79   : > { %5247 = vmatprep.mubr.f32.mxu0 %v8558_v34  ;;  %v8584_v34 = vpop.eup %8583 }
 0xc7a   : > { %v8586_v1 = vpop.eup %8585  ;;  %8597 = vpow2.f32 %v5080_v22 }
 0xc7b   : > { %8599 = vpow2.f32 %v5078_v17  ;;  %v14822_v17 = vld [vmem:[#allocation75_spill] sm:$0xff] }
 0xc7c   : > { %5248 = vmatmul.mubr.f32.gmra.mrb[166].mxu0 %v8560_v56  ;;  %v5084_v56 = vmul.f32 1.442695, %v4963_v54 }
 0xc7d   : > { %5252 = vmatprep.mubr.f32.mxu0 %v8562_v11  ;;  %v8588_v11 = vpop.eup %8587 }
 0xc7e   : > { %v8590_v25 = vpop.eup %8589  ;;  %8601 = vpow2.f32 %v5084_v56 }
 0xc7f   : > { %8603 = vpow2.f32 %v5082_v19 }
 0xc80   : > { %5253 = vmatmul.mubr.f32.gmra.mrb[168].mxu0 %v8564_v31  ;;  %v5088_v31 = vmul.f32 1.442695, %v4965_v61  ;;  %v14823_v61 = vld [vmem:[#allocation4_spill] sm:$0xff] }
 0xc81   : > { %5257 = vmatprep.mubr.f32.mxu0 %v8566_v47  ;;  %v8592_v47 = vpop.eup %8591 }
 0xc82   : > { %v8594_v8 = vpop.eup %8593  ;;  %8605 = vpow2.f32 %v5088_v31  ;;  %v14825_v31 = vld [vmem:[#allocation6_spill] sm:$0xff] }
 0xc83   : > { %8607 = vpow2.f32 %v5086_v20 }
 0xc84   : > { %5258 = vmatmul.mubr.f32.gmra.mrb[170].mxu0 %v8568_v9  ;;  %v8596_v9 = vpop.eup %8595  ;;  %8609 = vpow2.f32 %v5092_v6  ;;  %v14826_v6 = vld [vmem:[#allocation77_spill] sm:$0xff] }
 0xc85   : > { %5262 = vmatprep.mubr.f32.mxu0 %v8570_v21  ;;  %v8598_v21 = vpop.eup %8597  ;;  %8611 = vpow2.f32 %v5090_v27 }
 0xc86   : > { %v8600_v37 = vpop.eup %8599  ;;  %8613 = vpow2.f32 %v5096_v35 }
 0xc88   : > { %5263 = vmatmul.mubr.f32.gmra.mrb[172].mxu0 %v8572_v12  ;;  %v8602_v15 = vpop.eup %8601  ;;  %v5094_v12 = vmul.f32 1.442695, %v4968_v3 }
 0xc89   : > { %5267 = vmatprep.mubr.f32.mxu0 %v8574_v13  ;;  %v8604_v53 = vpop.eup %8603 }
 0xc8a   : > { %8615 = vpow2.f32 %v5094_v12  ;;  %v14828_v12 = vld [vmem:[#allocation74_spill] sm:$0xff] }
 0xc8c   : > { %5268 = vmatmul.mubr.f32.gmra.mrb[174].mxu0 %v8576_v39  ;;  %v8606_v13 = vpop.eup %8605 }
 0xc8d   : > { %5272 = vmatprep.mubr.f32.mxu0 %v8578_v16  ;;  %v8608_v41 = vpop.eup %8607 }
 0xc8e   : > { %v8610_v29 = vpop.eup %8609 }
 0xc8f   : > { %v8612_v62 = vpop.eup %8611 }
 0xc90   : > { %5273 = vmatmul.mubr.f32.gmra.mrb[176].mxu0 %v8580_v57  ;;  %v8614_v30 = vpop.eup %8613 }
 0xc91   : > { %5277 = vmatprep.mubr.f32.mxu0 %v8582_v38 }
 0xc94   : > { %5278 = vmatmul.mubr.f32.gmra.mrb[178].mxu0 %v8584_v34  ;;  %v8616_v52 = vpop.eup %8615 }
 0xc95   : > { %5282 = vmatprep.mubr.f32.mxu0 %v8586_v1 }
 0xc98   : > { %5283 = vmatmul.mubr.f32.gmra.mrb[180].mxu0 %v8588_v11 }
 0xc99   : > { %5287 = vmatprep.mubr.f32.mxu0 %v8590_v25 }
 0xc9c   : > { %5288 = vmatmul.mubr.f32.gmra.mrb[182].mxu0 %v8592_v47 }
 0xc9d   : > { %5292 = vmatprep.mubr.f32.mxu0 %v8594_v8 }
 0xca0   : > { %5293 = vmatmul.mubr.f32.gmra.mrb[184].mxu0 %v8596_v9 }
 0xca1   : > { %5297 = vmatprep.mubr.f32.mxu0 %v8598_v21  ;;  %v14827_v21 = vld [vmem:[#allocation8_spill] sm:$0xff] }
 0xca4   : > { %5298 = vmatmul.mubr.f32.gmra.mrb[186].mxu0 %v8600_v37 }
 0xca5   : > { %5302 = vmatprep.mubr.f32.mxu0 %v8602_v15 }
 0xca8   : > { %5303 = vmatmul.mubr.f32.gmra.mrb[188].mxu0 %v8604_v53 }
 0xca9   : > { %5307 = vmatprep.mubr.f32.mxu0 %v8606_v13  ;;  %v14829_v13 = vld [vmem:[#allocation10_spill] sm:$0xff] }
 0xcac   : > { %5308 = vmatmul.mubr.f32.gmra.mrb[190].mxu0 %v8608_v41 }
 0xcad   : > { %5312 = vmatprep.mubr.f32.mxu0 %v8610_v29 }
 0xcb0   : > { %5313 = vmatmul.mubr.f32.gmra.mrb[192].mxu0 %v8612_v62 }
 0xcb1   : > { %5317 = vmatprep.mubr.f32.mxu0 %v8614_v30 }
 0xcb4   : > { %5318 = vmatmul.mubr.f32.gmra.mrb[194].mxu0 %v8616_v52 }
 0xcb5   : > { %5931 = vmatprep.mubr.f32.mxu0 %v14350_v43 }
 0xd0b   : > { %v5164_v32 = vpop.f32.mrb[132].mxu0 }
 0xd0c   : > { %v5165_v39 = vadd.f32 1e-30, %v5164_v32  ;;  %v5166_v16 = vpop.f32.mrb[133].mxu0 }
 0xd0e   : > { %8617 = vlog2.f32 %v5165_v39  ;;  %v14830_v39 = vld [vmem:[#allocation79_spill] sm:$0xff] }
 0xd0f   : > { %v5169_v49 = vpop.f32.mrb[134].mxu0 }
 0xd10   : > { %v5170_v18 = vadd.f32 1e-30, %v5169_v49  ;;  %v5171_v14 = vpop.f32.mrb[135].mxu0  ;;  %v14831_v49 = vld [vmem:[#allocation12_spill] sm:$0xff] }
 0xd12   : > { %8619 = vlog2.f32 %v5170_v18 }
 0xd13   : > { %v5174_v40 = vpop.f32.mrb[136].mxu0 }
 0xd14   : > { %v5175_v51 = vadd.f32 1e-30, %v5174_v40  ;;  %v5176_v60 = vpop.f32.mrb[137].mxu0 }
 0xd16   : > { %8621 = vlog2.f32 %v5175_v51 }
 0xd17   : > { %v5179_v57 = vpop.f32.mrb[138].mxu0 }
 0xd18   : > { %v8618_v38 = vpop.eup %8617  ;;  %v5180_v63 = vadd.f32 1e-30, %v5179_v57  ;;  %v5181_v23 = vpop.f32.mrb[139].mxu0 }
 0xd19   : > { %v5324_v0 = vmul.f32 0.6931472, %v8618_v38  ;;  %v14832_v38 = vld [vmem:[#allocation76_spill] sm:$0xff]  ;;  %v14833_v23 = vld [vmem:[#allocation14_spill] sm:$0xff] }
 0xd1a   : > { %8623 = vlog2.f32 %v5180_v63 }
 0xd1b   : > { %v5387_v54 = vsub.f32 %v14821_v48, %v5324_v0  ;;  %v5184_v22 = vpop.f32.mrb[140].mxu0 }
 0xd1c   : > { %v8620_v34 = vpop.eup %8619  ;;  %v5185_v1 = vadd.f32 1e-30, %v5184_v22  ;;  %v5186_v44 = vpop.f32.mrb[141].mxu0 }
 0xd1d   : > { %v5326_v10 = vmul.f32 0.6931472, %v8620_v34  ;;  %v5419_v36 = vadd.f32 %v5387_v54, %v14822_v17  ;;  %v14834_v44 = vld [vmem:[#allocation81_spill] sm:$0xff]  ;;  %v14835_v17 = vld [vmem:[#allocation16_spill] sm:$0xff] }
 0xd1e   : > { %8625 = vlog2.f32 %v5185_v1 }
 0xd1f   : > { %v5388_v56 = vsub.f32 %v14823_v61, %v5326_v10  ;;  %v5189_v11 = vpop.f32.mrb[142].mxu0  ;;  %5453 = vperm.xlu1 %7122, %v5419_v36  }
 0xd20   : > { %v8622_v25 = vpop.eup %8621  ;;  %v5190_v46 = vadd.f32 1e-30, %v5189_v11  ;;  %v5191_v42 = vpop.f32.mrb[143].mxu0 }
 0xd21   : > { %v5328_v19 = vmul.f32 0.6931472, %v8622_v25  ;;  %v5420_v33 = vadd.f32 %v5388_v56, %v14824_v45  ;;  %v14836_v42 = vld [vmem:[#allocation78_spill] sm:$0xff] }
 0xd22   : > { %8627 = vlog2.f32 %v5190_v46  ;;  %v14837_v45 = vld [vmem:[#allocation18_spill] sm:$0xff] }
 0xd23   : > { %v5389_v47 = vsub.f32 %v14825_v31, %v5328_v19  ;;  %v5194_v8 = vpop.f32.mrb[144].mxu0  ;;  %5458 = vperm.xlu0 %7121, %v5420_v33  }
 0xd24   : > { %v8624_v59 = vpop.eup %8623  ;;  %v5195_v28 = vadd.f32 1e-30, %v5194_v8  ;;  %v5196_v20 = vpop.f32.mrb[145].mxu0 }
 0xd25   : > { %v5330_v55 = vmul.f32 0.6931472, %v8624_v59  ;;  %v5421_v9 = vadd.f32 %v5389_v47, %v14826_v6  ;;  %v14838_v20 = vld [vmem:[#allocation83_spill] sm:$0xff]  ;;  %v14839_v6 = vld [vmem:[#allocation20_spill] sm:$0xff] }
 0xd26   : > { %8629 = vlog2.f32 %v5195_v28 }
 0xd27   : > { %v5390_v24 = vsub.f32 %v14827_v21, %v5330_v55  ;;  %v5199_v3 = vpop.f32.mrb[146].mxu0  ;;  %5463 = vperm.xlu1 %7122, %v5421_v9  }
 0xd28   : > { %v8626_v27 = vpop.eup %8625  ;;  %v5200_v35 = vadd.f32 1e-30, %v5199_v3  ;;  %v5201_v37 = vpop.f32.mrb[147].mxu0 }
 0xd29   : > { %v5332_v15 = vmul.f32 0.6931472, %v8626_v27  ;;  %v5422_v53 = vadd.f32 %v5390_v24, %v14828_v12  ;;  %v14840_v37 = vld [vmem:[#allocation80_spill] sm:$0xff]  ;;  %v14841_v12 = vld [vmem:[#allocation22_spill] sm:$0xff] }
 0xd2a   : > { %8631 = vlog2.f32 %v5200_v35 }
 0xd2b   : > { %v5391_v41 = vsub.f32 %v14829_v13, %v5332_v15  ;;  %v5204_v29 = vpop.f32.mrb[148].mxu0  ;;  %5468 = vperm.xlu0 %7121, %v5422_v53  }
 0xd2c   : > { %v8628_v62 = vpop.eup %8627  ;;  %v5205_v30 = vadd.f32 1e-30, %v5204_v29  ;;  %v5206_v52 = vpop.f32.mrb[149].mxu0 }
 0xd2d   : > { %v5334_v32 = vmul.f32 0.6931472, %v8628_v62  ;;  %v5423_v16 = vadd.f32 %v5391_v41, %v14830_v39  ;;  %v14842_v52 = vld [vmem:[#allocation85_spill] sm:$0xff]  ;;  %v14843_v39 = vld [vmem:[#allocation24_spill] sm:$0xff] }
 0xd2e   : > { %8633 = vlog2.f32 %v5205_v30 }
 0xd2f   : > { %v5392_v18 = vsub.f32 %v14831_v49, %v5334_v32  ;;  %v5209_v14 = vpop.f32.mrb[150].mxu0  ;;  %5473 = vperm.xlu1 %7122, %v5423_v16  }
 0xd30   : > { %v8630_v40 = vpop.eup %8629  ;;  %v5210_v51 = vadd.f32 1e-30, %v5209_v14  ;;  %v5211_v60 = vpop.f32.mrb[151].mxu0 }
 0xd31   : > { %v5336_v57 = vmul.f32 0.6931472, %v8630_v40  ;;  %v5424_v63 = vadd.f32 %v5392_v18, %v14832_v38  ;;  %v14844_v60 = vld [vmem:[#allocation82_spill] sm:$0xff] }
 0xd32   : > { %8635 = vlog2.f32 %v5210_v51  ;;  %v14845_v38 = vld [vmem:[#allocation26_spill] sm:$0xff] }
 0xd33   : > { %v5393_v0 = vsub.f32 %v14833_v23, %v5336_v57  ;;  %v5214_v48 = vpop.f32.mrb[152].mxu0  ;;  %5478 = vperm.xlu0 %7121, %v5424_v63  }
 0xd34   : > { %v8632_v54 = vpop.eup %8631  ;;  %v5215_v22 = vadd.f32 1e-30, %v5214_v48  ;;  %v5216_v34 = vpop.f32.mrb[153].mxu0 }
 0xd35   : > { %v5338_v1 = vmul.f32 0.6931472, %v8632_v54  ;;  %v5425_v10 = vadd.f32 %v5393_v0, %v14834_v44  ;;  %v14846_v34 = vld [vmem:[#allocation86_spill] sm:$0xff]  ;;  %v14847_v44 = vld [vmem:[#allocation28_spill] sm:$0xff] }
 0xd36   : > { %8637 = vlog2.f32 %v5215_v22 }
 0xd37   : > { %v5394_v36 = vsub.f32 %v14835_v17, %v5338_v1  ;;  %v5219_v61 = vpop.f32.mrb[154].mxu0  ;;  %5483 = vperm.xlu1 %7122, %v5425_v10  }
 0xd38   : > { %v8634_v56 = vpop.eup %8633  ;;  %v5220_v11 = vadd.f32 1e-30, %v5219_v61  ;;  %v5221_v25 = vpop.f32.mrb[155].mxu0 }
 0xd39   : > { %v5340_v46 = vmul.f32 0.6931472, %v8634_v56  ;;  %v5426_v19 = vadd.f32 %v5394_v36, %v14836_v42  ;;  %v14848_v25 = vld [vmem:[#allocation84_spill] sm:$0xff]  ;;  %v14849_v42 = vld [vmem:[#allocation30_spill] sm:$0xff] }
 0xd3a   : > { %8639 = vlog2.f32 %v5220_v11 }
 0xd3b   : > { %v5395_v33 = vsub.f32 %v14837_v45, %v5340_v46  ;;  %v5224_v31 = vpop.f32.mrb[156].mxu0  ;;  %5488 = vperm.xlu0 %7121, %v5426_v19  }
 0xd3c   : > { %v8636_v47 = vpop.eup %8635  ;;  %v5225_v8 = vadd.f32 1e-30, %v5224_v31  ;;  %v5226_v59 = vpop.f32.mrb[157].mxu0 }
 0xd3d   : > { %v5342_v28 = vmul.f32 0.6931472, %v8636_v47  ;;  %v5427_v55 = vadd.f32 %v5395_v33, %v14838_v20  ;;  %v14850_v59 = vld [vmem:[#allocation5_spill] sm:$0xff]  ;;  %v14851_v20 = vld [vmem:[#allocation32_spill] sm:$0xff] }
 0xd3e   : > { %8641 = vlog2.f32 %v5225_v8 }
 0xd3f   : > { %v5396_v9 = vsub.f32 %v14839_v6, %v5342_v28  ;;  %v5229_v21 = vpop.f32.mrb[158].mxu0  ;;  %5493 = vperm.xlu1 %7122, %v5427_v55  }
 0xd40   : > { %v8638_v24 = vpop.eup %8637  ;;  %v5230_v3 = vadd.f32 1e-30, %v5229_v21  ;;  %v5231_v27 = vpop.f32.mrb[159].mxu0 }
 0xd41   : > { %v5344_v35 = vmul.f32 0.6931472, %v8638_v24  ;;  %v5428_v15 = vadd.f32 %v5396_v9, %v14840_v37  ;;  %v14852_v27 = vld [vmem:[#allocation3_spill] sm:$0xff]  ;;  %v14853_v37 = vld [vmem:[#allocation34_spill] sm:$0xff] }
 0xd42   : > { %8643 = vlog2.f32 %v5230_v3 }
 0xd43   : > { %v5397_v53 = vsub.f32 %v14841_v12, %v5344_v35  ;;  %v5234_v13 = vpop.f32.mrb[160].mxu0  ;;  %5498 = vperm.xlu0 %7121, %v5428_v15  }
 0xd44   : > { %v8640_v41 = vpop.eup %8639  ;;  %v5235_v29 = vadd.f32 1e-30, %v5234_v13  ;;  %v5236_v62 = vpop.f32.mrb[161].mxu0 }
 0xd45   : > { %v5346_v30 = vmul.f32 0.6931472, %v8640_v41  ;;  %v5429_v32 = vadd.f32 %v5397_v53, %v14842_v52  ;;  %v14854_v62 = vld [vmem:[#allocation9_spill] sm:$0xff]  ;;  %v14855_v52 = vld [vmem:[#allocation36_spill] sm:$0xff] }
 0xd46   : > { %8645 = vlog2.f32 %v5235_v29 }
 0xd47   : > { %v5398_v16 = vsub.f32 %v14843_v39, %v5346_v30  ;;  %v5239_v49 = vpop.f32.mrb[162].mxu0  ;;  %5503 = vperm.xlu1 %7122, %v5429_v32  }
 0xd48   : > { %v8642_v18 = vpop.eup %8641  ;;  %v5240_v14 = vadd.f32 1e-30, %v5239_v49  ;;  %v5241_v40 = vpop.f32.mrb[163].mxu0 }
 0xd49   : > { %v5348_v51 = vmul.f32 0.6931472, %v8642_v18  ;;  %v5430_v57 = vadd.f32 %v5398_v16, %v14844_v60  ;;  %v14856_v40 = vld [vmem:[#allocation7_spill] sm:$0xff]  ;;  %v14857_v60 = vld [vmem:[#allocation38_spill] sm:$0xff] }
 0xd4a   : > { %8647 = vlog2.f32 %v5240_v14 }
 0xd4b   : > { %v5399_v63 = vsub.f32 %v14845_v38, %v5348_v51  ;;  %v5244_v23 = vpop.f32.mrb[164].mxu0  ;;  %5508 = vperm.xlu0 %7121, %v5430_v57  }
 0xd4c   : > { %v8644_v0 = vpop.eup %8643  ;;  %v5245_v48 = vadd.f32 1e-30, %v5244_v23  ;;  %v5246_v54 = vpop.f32.mrb[165].mxu0 }
 0xd4d   : > { %v5350_v22 = vmul.f32 0.6931472, %v8644_v0  ;;  %v5431_v1 = vadd.f32 %v5399_v63, %v14846_v34  ;;  %v14858_v54 = vld [vmem:[#allocation13_spill] sm:$0xff]  ;;  %v14859_v34 = vld [vmem:[#allocation40_spill] sm:$0xff] }
 0xd4e   : > { %8649 = vlog2.f32 %v5245_v48 }
 0xd4f   : > { %v5400_v10 = vsub.f32 %v14847_v44, %v5350_v22  ;;  %v5249_v17 = vpop.f32.mrb[166].mxu0  ;;  %5513 = vperm.xlu1 %7122, %v5431_v1  }
 0xd50   : > { %v8646_v36 = vpop.eup %8645  ;;  %v5250_v61 = vadd.f32 1e-30, %v5249_v17  ;;  %v5251_v56 = vpop.f32.mrb[167].mxu0 }
 0xd51   : > { %v5352_v11 = vmul.f32 0.6931472, %v8646_v36  ;;  %v5432_v46 = vadd.f32 %v5400_v10, %v14848_v25  ;;  %v14860_v56 = vld [vmem:[#allocation11_spill] sm:$0xff]  ;;  %v14861_v25 = vld [vmem:[#allocation42_spill] sm:$0xff] }
 0xd52   : > { %8651 = vlog2.f32 %v5250_v61 }
 0xd53   : > { %v5401_v19 = vsub.f32 %v14849_v42, %v5352_v11  ;;  %v5254_v45 = vpop.f32.mrb[168].mxu0  ;;  %5518 = vperm.xlu0 %7121, %v5432_v46  }
 0xd54   : > { %v8648_v33 = vpop.eup %8647  ;;  %v5255_v31 = vadd.f32 1e-30, %v5254_v45  ;;  %v5256_v47 = vpop.f32.mrb[169].mxu0 }
 0xd55   : > { %v5354_v8 = vmul.f32 0.6931472, %v8648_v33  ;;  %v5433_v28 = vadd.f32 %v5401_v19, %v14850_v59  ;;  %v14862_v47 = vld [vmem:[#allocation17_spill] sm:$0xff]  ;;  %v14863_v59 = vld [vmem:[#allocation44_spill] sm:$0xff] }
 0xd56   : > { %8653 = vlog2.f32 %v5255_v31 }
 0xd57   : > { %v5402_v55 = vsub.f32 %v14851_v20, %v5354_v8  ;;  %v5259_v6 = vpop.f32.mrb[170].mxu0  ;;  %5523 = vperm.xlu1 %7122, %v5433_v28  }
 0xd58   : > { %v8650_v9 = vpop.eup %8649  ;;  %v5260_v21 = vadd.f32 1e-30, %v5259_v6  ;;  %v5261_v24 = vpop.f32.mrb[171].mxu0 }
 0xd59   : > { %v5356_v3 = vmul.f32 0.6931472, %v8650_v9  ;;  %v5434_v35 = vadd.f32 %v5402_v55, %v14852_v27  ;;  %v14864_v24 = vld [vmem:[#allocation15_spill] sm:$0xff]  ;;  %v14865_v27 = vld [vmem:[#allocation46_spill] sm:$0xff] }
 0xd5a   : > { %8655 = vlog2.f32 %v5260_v21 }
 0xd5b   : > { %v5403_v15 = vsub.f32 %v14853_v37, %v5356_v3  ;;  %v5264_v12 = vpop.f32.mrb[172].mxu0  ;;  %5528 = vperm.xlu0 %7121, %v5434_v35  }
 0xd5c   : > { %v8652_v53 = vpop.eup %8651  ;;  %v5265_v13 = vadd.f32 1e-30, %v5264_v12  ;;  %v5266_v41 = vpop.f32.mrb[173].mxu0 }
 0xd5d   : > { %v5358_v29 = vmul.f32 0.6931472, %v8652_v53  ;;  %v5435_v30 = vadd.f32 %v5403_v15, %v14854_v62  ;;  %v14866_v41 = vld [vmem:[#allocation21_spill] sm:$0xff]  ;;  %v14867_v62 = vld [vmem:[#allocation48_spill] sm:$0xff] }
 0xd5e   : > { %8657 = vlog2.f32 %v5265_v13 }
 0xd5f   : > { %v5404_v32 = vsub.f32 %v14855_v52, %v5358_v29  ;;  %v5269_v39 = vpop.f32.mrb[174].mxu0  ;;  %5533 = vperm.xlu1 %7122, %v5435_v30  }
 0xd60   : > { %v8654_v16 = vpop.eup %8653  ;;  %v5270_v49 = vadd.f32 1e-30, %v5269_v39  ;;  %v5271_v18 = vpop.f32.mrb[175].mxu0 }
 0xd61   : > { %v5360_v14 = vmul.f32 0.6931472, %v8654_v16  ;;  %v5436_v51 = vadd.f32 %v5404_v32, %v14856_v40  ;;  %v14868_v18 = vld [vmem:[#allocation19_spill] sm:$0xff]  ;;  %v14869_v40 = vld [vmem:[#allocation50_spill] sm:$0xff] }
 0xd62   : > { %8659 = vlog2.f32 %v5270_v49 }
 0xd63   : > { %v5405_v57 = vsub.f32 %v14857_v60, %v5360_v14  ;;  %v5274_v38 = vpop.f32.mrb[176].mxu0  ;;  %5538 = vperm.xlu0 %7121, %v5436_v51  }
 0xd64   : > { %v8656_v63 = vpop.eup %8655  ;;  %v5275_v23 = vadd.f32 1e-30, %v5274_v38  ;;  %v5276_v0 = vpop.f32.mrb[177].mxu0 }
 0xd65   : > { %v5362_v48 = vmul.f32 0.6931472, %v8656_v63  ;;  %v5437_v22 = vadd.f32 %v5405_v57, %v14858_v54  ;;  %v14870_v0 = vld [vmem:[#allocation91_spill] sm:$0xff]  ;;  %v14871_v54 = vld [vmem:[#allocation52_spill] sm:$0xff] }
 0xd66   : > { %8661 = vlog2.f32 %v5275_v23 }
 0xd67   : > { %v5406_v1 = vsub.f32 %v14859_v34, %v5362_v48  ;;  %v5279_v44 = vpop.f32.mrb[178].mxu0  ;;  %5543 = vperm.xlu1 %7122, %v5437_v22  }
 0xd68   : > { %v8658_v10 = vpop.eup %8657  ;;  %v5280_v17 = vadd.f32 1e-30, %v5279_v44  ;;  %v5281_v36 = vpop.f32.mrb[179].mxu0 }
 0xd69   : > { %v5364_v61 = vmul.f32 0.6931472, %v8658_v10  ;;  %v5438_v11 = vadd.f32 %v5406_v1, %v14860_v56  ;;  %v14872_v36 = vld [vmem:[#allocation23_spill] sm:$0xff]  ;;  %v14873_v56 = vld [vmem:[#allocation54_spill] sm:$0xff] }
 0xd6a   : > { %8663 = vlog2.f32 %v5280_v17 }
 0xd6b   : > { %v5407_v46 = vsub.f32 %v14861_v25, %v5364_v61  ;;  %v5284_v42 = vpop.f32.mrb[180].mxu0  ;;  %5548 = vperm.xlu0 %7121, %v5438_v11  }
 0xd6c   : > { %v8660_v19 = vpop.eup %8659  ;;  %v5285_v45 = vadd.f32 1e-30, %v5284_v42  ;;  %v5286_v33 = vpop.f32.mrb[181].mxu0 }
 0xd6d   : > { %v5366_v31 = vmul.f32 0.6931472, %v8660_v19  ;;  %v5439_v8 = vadd.f32 %v5407_v46, %v14862_v47  ;;  %v14874_v33 = vld [vmem:[#allocation92_spill] sm:$0xff] }
 0xd6e   : > { %8665 = vlog2.f32 %v5285_v45  ;;  %v14875_v47 = vld [vmem:[#allocation56_spill] sm:$0xff] }
 0xd6f   : > { %v5408_v28 = vsub.f32 %v14863_v59, %v5366_v31  ;;  %v5289_v20 = vpop.f32.mrb[182].mxu0  ;;  %5553 = vperm.xlu1 %7122, %v5439_v8  }
 0xd70   : > { %v8662_v55 = vpop.eup %8661  ;;  %v5290_v6 = vadd.f32 1e-30, %v5289_v20  ;;  %v5291_v9 = vpop.f32.mrb[183].mxu0 }
 0xd71   : > { %v5368_v21 = vmul.f32 0.6931472, %v8662_v55  ;;  %v5440_v3 = vadd.f32 %v5408_v28, %v14864_v24  ;;  %v14876_v9 = vld [vmem:[#allocation27_spill] sm:$0xff]  ;;  %v14877_v24 = vld [vmem:[#allocation58_spill] sm:$0xff] }
 0xd72   : > { %8667 = vlog2.f32 %v5290_v6 }
 0xd73   : > { %v5409_v35 = vsub.f32 %v14865_v27, %v5368_v21  ;;  %v5294_v37 = vpop.f32.mrb[184].mxu0  ;;  %5558 = vperm.xlu0 %7121, %v5440_v3  }
 0xd74   : > { %v8664_v15 = vpop.eup %8663  ;;  %v5295_v12 = vadd.f32 1e-30, %v5294_v37  ;;  %v5296_v53 = vpop.f32.mrb[185].mxu0  ;;  %v14878_v37 = vld [vmem:[#allocation25_spill] sm:$0xff] }
 0xd75   : > { %v5370_v13 = vmul.f32 0.6931472, %v8664_v15  ;;  %v5441_v29 = vadd.f32 %v5409_v35, %v14866_v41 }
 0xd76   : > { %8669 = vlog2.f32 %v5295_v12  ;;  %v14879_v12 = vld [vmem:[#allocation60_spill] sm:$0xff] }
 0xd77   : > { %v5410_v30 = vsub.f32 %v14867_v62, %v5370_v13  ;;  %v5299_v52 = vpop.f32.mrb[186].mxu0  ;;  %5563 = vperm.xlu1 %7122, %v5441_v29   ;;  %v14880_v29 = vld [vmem:[#allocation31_spill] sm:$0xff] }
 0xd78   : > { %v8666_v32 = vpop.eup %8665  ;;  %v5300_v39 = vadd.f32 1e-30, %v5299_v52  ;;  %v5301_v16 = vpop.f32.mrb[187].mxu0 }
 0xd79   : > { %v5372_v49 = vmul.f32 0.6931472, %v8666_v32  ;;  %v5442_v14 = vadd.f32 %v5410_v30, %v14868_v18  ;;  %v14881_v30 = vld [vmem:[#allocation62_spill] sm:$0xff]  ;;  %v14882_v16 = vld [vmem:[#allocation29_spill] sm:$0xff]  ;;  %v14883_v18 = vld [vmem:[#allocation64_spill] sm:$0xff] }
 0xd7a   : > { %8671 = vlog2.f32 %v5300_v39 }
 0xd7b   : > { %v5411_v51 = vsub.f32 %v14869_v40, %v5372_v49  ;;  %v5304_v60 = vpop.f32.mrb[188].mxu0  ;;  %5568 = vperm.xlu0 %7121, %v5442_v14   ;;  %v14884_v40 = vld [vmem:[#allocation35_spill] sm:$0xff] }
 0xd7c   : > { %v8668_v57 = vpop.eup %8667  ;;  %v5305_v38 = vadd.f32 1e-30, %v5304_v60  ;;  %v5306_v63 = vpop.f32.mrb[189].mxu0 }
 0xd7d   : > { %v5374_v23 = vmul.f32 0.6931472, %v8668_v57  ;;  %v5443_v48 = vadd.f32 %v5411_v51, %v14870_v0  ;;  %v12992_v57 = vld [vmem:[%s13871_s0] sm:$0xff]  ;;  %v13000_v63 = vld [vmem:[%s13871_s0 + $0x8] sm:$0xff] }
 0xd7e   : > { %8673 = vlog2.f32 %v5305_v38 }
 0xd7f   : > { %v5412_v22 = vsub.f32 %v14871_v54, %v5374_v23  ;;  %v5309_v34 = vpop.f32.mrb[190].mxu0  ;;  %5573 = vperm.xlu1 %7122, %v5443_v48  }
 0xd80   : > { %v8670_v1 = vpop.eup %8669  ;;  %v5310_v44 = vadd.f32 1e-30, %v5309_v34  ;;  %v5311_v10 = vpop.f32.mrb[191].mxu0  ;;  %v13012_v34 = vld [vmem:[%s13871_s0 + $0x10] sm:$0xff] }
 0xd81   : > { %v5376_v17 = vmul.f32 0.6931472, %v8670_v1  ;;  %v5444_v61 = vadd.f32 %v5412_v22, %v14872_v36 }
 0xd82   : > { %8675 = vlog2.f32 %v5310_v44  ;;  %v13020_v44 = vld [vmem:[%s13871_s0 + $0x18] sm:$0xff] }
 0xd83   : > { %v5413_v11 = vsub.f32 %v14873_v56, %v5376_v17  ;;  %v5314_v25 = vpop.f32.mrb[192].mxu0  ;;  %5578 = vperm.xlu0 %7121, %v5444_v61  }
 0xd84   : > { %v8672_v46 = vpop.eup %8671  ;;  %v5315_v42 = vadd.f32 1e-30, %v5314_v25  ;;  %v5316_v19 = vpop.f32.mrb[193].mxu0 }
 0xd85   : > { %v5378_v45 = vmul.f32 0.6931472, %v8672_v46  ;;  %v5445_v31 = vadd.f32 %v5413_v11, %v14874_v33  ;;  %v13032_v46 = vld [vmem:[%s13871_s0 + $0x20] sm:$0xff]  ;;  %v13040_v19 = vld [vmem:[%s13871_s0 + $0x28] sm:$0xff] }
 0xd86   : > { %8677 = vlog2.f32 %v5315_v42 }
 0xd87   : > { %v5414_v8 = vsub.f32 %v14875_v47, %v5378_v45  ;;  %v5319_v59 = vpop.f32.mrb[194].mxu0  ;;  %5583 = vperm.xlu1 %7122, %v5445_v31  }
 0xd88   : > { %v8674_v28 = vpop.eup %8673  ;;  %v5320_v20 = vadd.f32 1e-30, %v5319_v59  ;;  %v5321_v55 = vpop.f32.mrb[195].mxu0  ;;  %v13052_v59 = vld [vmem:[%s13871_s0 + $0x30] sm:$0xff] }
 0xd89   : > { %v5380_v6 = vmul.f32 0.6931472, %v8674_v28  ;;  %v5446_v21 = vadd.f32 %v5414_v8, %v14876_v9 }
 0xd8a   : > { %8679 = vlog2.f32 %v5320_v20  ;;  %v13060_v20 = vld [vmem:[%s13871_s0 + $0x38] sm:$0xff] }
 0xd8b   : > { %v5415_v3 = vsub.f32 %v14877_v24, %v5380_v6  ;;  %5588 = vperm.xlu0 %7121, %v5446_v21  }
 0xd8c   : > { %v8676_v27 = vpop.eup %8675 }
 0xd8d   : > { %v5382_v35 = vmul.f32 0.6931472, %v8676_v27  ;;  %v5447_v15 = vadd.f32 %v5415_v3, %v14878_v37 }
 0xd8f   : > { %v5416_v53 = vsub.f32 %v14879_v12, %v5382_v35  ;;  %5593 = vperm.xlu1 %7122, %v5447_v15   ;;  %v13072_v35 = vld [vmem:[%s13871_s0 + $0x40] sm:$0xff]  ;;  %v13080_v15 = vld [vmem:[%s13871_s0 + $0x48] sm:$0xff] }
 0xd90   : > { %v8678_v13 = vpop.eup %8677 }
 0xd91   : > { %v5384_v41 = vmul.f32 0.6931472, %v8678_v13  ;;  %v5448_v62 = vadd.f32 %v5416_v53, %v14880_v29 }
 0xd93   : > { %v5417_v52 = vsub.f32 %v14881_v30, %v5384_v41  ;;  %5598 = vperm.xlu0 %7121, %v5448_v62  }
 0xd94   : > { %v8680_v32 = vpop.eup %8679 }
 0xd95   : > { %v5386_v39 = vmul.f32 0.6931472, %v8680_v32  ;;  %v5449_v49 = vadd.f32 %v5417_v52, %v14882_v16  ;;  %v13092_v32 = vld [vmem:[%s13871_s0 + $0x50] sm:$0xff]  ;;  %v13100_v16 = vld [vmem:[%s13871_s0 + $0x58] sm:$0xff] }
 0xd97   : > { %v5418_v14 = vsub.f32 %v14883_v18, %v5386_v39  ;;  %5603 = vperm.xlu1 %7122, %v5449_v49  }
 0xd99   : > { %v5450_v51 = vadd.f32 %v5418_v14, %v14884_v40 }
 0xd9b   : > { %5608 = vperm.xlu0 %7121, %v5450_v51  }
 0xd9e   : > { %v5454_v60 = vpop.permute.xlu1 %5453 }
 0xd9f   : > { %v12995_v38 = vadd.f32 %v12992_v57, %v5454_v60  ;;  %v13003_v23 = vadd.f32 %v13000_v63, %v5454_v60 }
 0xda1   : > { %v5675_v0 = vadd.f32 %v12995_v38, %v12790_v5  ;;  %v5676_v48 = vadd.f32 %v13003_v23, %v12794_v58 }
 0xda2   : > { %v5459_v54 = vpop.permute.xlu0 %5458 }
 0xda3   : > { %v5739_v22 = vmul.f32 1.442695, %v5675_v0  ;;  %v13015_v1 = vadd.f32 %v13012_v34, %v5459_v54  ;;  %v13023_v10 = vadd.f32 %v13020_v44, %v5459_v54  ;;  %v5741_v17 = vmul.f32 1.442695, %v5676_v48 }
 0xda5   : > { %v5677_v36 = vadd.f32 %v13015_v1, %v12790_v5  ;;  %v5678_v61 = vadd.f32 %v13023_v10, %v12794_v58  ;;  %8681 = vpow2.f32 %v5739_v22 }
 0xda6   : > { %v5464_v56 = vpop.permute.xlu1 %5463  ;;  %8683 = vpow2.f32 %v5741_v17  ;;  %v13112_v17 = vld [vmem:[%s13871_s0 + $0x60] sm:$0xff] }
 0xda7   : > { %v5743_v11 = vmul.f32 1.442695, %v5677_v36  ;;  %v5745_v25 = vmul.f32 1.442695, %v5678_v61  ;;  %v13035_v42 = vadd.f32 %v13032_v46, %v5464_v56  ;;  %v13043_v45 = vadd.f32 %v13040_v19, %v5464_v56  ;;  %14885 = vst [vmem:[#allocation39_spill] sm:$0xff] %v13112_v17  ;;  %v13120_v61 = vld [vmem:[%s13871_s0 + $0x68] sm:$0xff] }
 0xda9   : > { %8685 = vpow2.f32 %v5743_v11  ;;  %v5679_v33 = vadd.f32 %v13035_v42, %v12790_v5  ;;  %v5680_v31 = vadd.f32 %v13043_v45, %v12794_v58 }
 0xdaa   : > { %8687 = vpow2.f32 %v5745_v25  ;;  %v5469_v47 = vpop.permute.xlu0 %5468 }
 0xdab   : > { %v5747_v8 = vmul.f32 1.442695, %v5679_v33  ;;  %v13055_v28 = vadd.f32 %v13052_v59, %v5469_v47  ;;  %v13063_v55 = vadd.f32 %v13060_v20, %v5469_v47  ;;  %v5749_v6 = vmul.f32 1.442695, %v5680_v31 }
 0xdad   : > { %v5681_v9 = vadd.f32 %v13055_v28, %v12790_v5  ;;  %v5682_v21 = vadd.f32 %v13063_v55, %v12794_v58  ;;  %8689 = vpow2.f32 %v5747_v8 }
 0xdae   : > { %v5474_v24 = vpop.permute.xlu1 %5473  ;;  %8691 = vpow2.f32 %v5749_v6 }
 0xdaf   : > { %v5751_v3 = vmul.f32 1.442695, %v5681_v9  ;;  %v5753_v27 = vmul.f32 1.442695, %v5682_v21  ;;  %v13075_v37 = vadd.f32 %v13072_v35, %v5474_v24  ;;  %v13083_v12 = vadd.f32 %v13080_v15, %v5474_v24  ;;  %v8682_v53 = vpop.eup %8681  ;;  %v13132_v9 = vld [vmem:[%s13871_s0 + $0x70] sm:$0xff]  ;;  %v13140_v24 = vld [vmem:[%s13871_s0 + $0x78] sm:$0xff] }
 0xdb0   : > { %v8684_v29 = vpop.eup %8683  ;;  %14886 = vst [vmem:[#allocation33_spill] sm:$0xff] %v13132_v9  ;;  %14887 = vst [vmem:[#allocation43_spill] sm:$0xff] %v13140_v24 }
 0xdb1   : > { %8693 = vpow2.f32 %v5751_v3  ;;  %v5683_v13 = vadd.f32 %v13075_v37, %v12790_v5  ;;  %v5684_v41 = vadd.f32 %v13083_v12, %v12794_v58 }
 0xdb2   : > { %8695 = vpow2.f32 %v5753_v27  ;;  %v5479_v62 = vpop.permute.xlu0 %5478 }
 0xdb3   : > { %v8686_v30 = vpop.eup %8685  ;;  %v5755_v52 = vmul.f32 1.442695, %v5683_v13  ;;  %v13095_v39 = vadd.f32 %v13092_v32, %v5479_v62  ;;  %v13103_v49 = vadd.f32 %v13100_v16, %v5479_v62  ;;  %v5757_v14 = vmul.f32 1.442695, %v5684_v41 }
 0xdb4   : > { %v8688_v18 = vpop.eup %8687  ;;  %v7014_v40 = vpack.c.bf16 %v8686_v30, %v8682_v53 }
 0xdb5   : > { %v5685_v51 = vadd.f32 %v13095_v39, %v12790_v5  ;;  %v5686_v60 = vadd.f32 %v13103_v49, %v12794_v58  ;;  %v7012_v0 = vpack.c.bf16 %v8688_v18, %v8684_v29  ;;  %8697 = vpow2.f32 %v5755_v52 }
 0xdb6   : > { %v5484_v48 = vpop.permute.xlu1 %5483  ;;  %8699 = vpow2.f32 %v5757_v14  ;;  %v13152_v14 = vld [vmem:[%s13871_s0 + $0x80] sm:$0xff] }
 0xdb7   : > { %v5759_v54 = vmul.f32 1.442695, %v5685_v51  ;;  %v5761_v22 = vmul.f32 1.442695, %v5686_v60  ;;  %7013 = vmatprep.subr.bf16.mxu0 %v7012_v0  ;;  %v13115_v36 = vadd.f32 %v13112_v17, %v5484_v48  ;;  %v13123_v56 = vadd.f32 %v13120_v61, %v5484_v48  ;;  %v8690_v11 = vpop.eup %8689  ;;  %14888 = vst [vmem:[#allocation37_spill] sm:$0xff] %v13152_v14  ;;  %v13160_v51 = vld [vmem:[%s13871_s0 + $0x88] sm:$0xff] }
 0xdb8   : > { %7015 = vmatpush1.bf16.msra.mxu0 %v7014_v40  ;;  %v8692_v31 = vpop.eup %8691  ;;  %14889 = vst [vmem:[#allocation47_spill] sm:$0xff] %v13160_v51 }
 0xdb9   : > { %8701 = vpow2.f32 %v5759_v54  ;;  %v5687_v25 = vadd.f32 %v13115_v36, %v12790_v5  ;;  %v5688_v33 = vadd.f32 %v13123_v56, %v12794_v58 }
 0xdba   : > { %8703 = vpow2.f32 %v5761_v22  ;;  %v5489_v47 = vpop.permute.xlu0 %5488 }
 0xdbb   : > { %v8694_v8 = vpop.eup %8693  ;;  %v5763_v6 = vmul.f32 1.442695, %v5687_v25  ;;  %v13135_v21 = vadd.f32 %v13132_v9, %v5489_v47  ;;  %v13143_v3 = vadd.f32 %v13140_v24, %v5489_v47  ;;  %v5765_v53 = vmul.f32 1.442695, %v5688_v33 }
 0xdbc   : > { %v8696_v27 = vpop.eup %8695  ;;  %v7018_v13 = vpack.c.bf16 %v8694_v8, %v8690_v11  ;;  %v13180_v8 = vld [vmem:[%s13871_s0 + $0x98] sm:$0xff] }
 0xdbd   : > { %v5689_v41 = vadd.f32 %v13135_v21, %v12790_v5  ;;  %v5690_v29 = vadd.f32 %v13143_v3, %v12794_v58  ;;  %v7016_v62 = vpack.c.bf16 %v8696_v27, %v8692_v31  ;;  %8705 = vpow2.f32 %v5763_v6  ;;  %v13172_v31 = vld [vmem:[%s13871_s0 + $0x90] sm:$0xff]  ;;  %14891 = vst [vmem:[#allocation51_spill] sm:$0xff] %v13180_v8 }
 0xdbe   : > { %v5494_v30 = vpop.permute.xlu1 %5493  ;;  %8707 = vpow2.f32 %v5765_v53  ;;  %14890 = vst [vmem:[#allocation41_spill] sm:$0xff] %v13172_v31 }
 0xdbf   : > { %v5767_v52 = vmul.f32 1.442695, %v5689_v41  ;;  %v5769_v18 = vmul.f32 1.442695, %v5690_v29  ;;  %7017 = vmatprep.subr.bf16.mxu0 %v7016_v62  ;;  %v13155_v40 = vadd.f32 %v13152_v14, %v5494_v30  ;;  %v13163_v60 = vadd.f32 %v13160_v51, %v5494_v30  ;;  %v8698_v0 = vpop.eup %8697 }
 0xdc0   : > { %7019 = vmatpush1.bf16.msra.mxu0 %v7018_v13  ;;  %v8700_v22 = vpop.eup %8699 }
 0xdc1   : > { %8709 = vpow2.f32 %v5767_v52  ;;  %v5691_v48 = vadd.f32 %v13155_v40, %v12790_v5  ;;  %v5692_v54 = vadd.f32 %v13163_v60, %v12794_v58 }
 0xdc2   : > { %8711 = vpow2.f32 %v5769_v18  ;;  %v5499_v11 = vpop.permute.xlu0 %5498 }
 0xdc3   : > { %v8702_v25 = vpop.eup %8701  ;;  %v5771_v33 = vmul.f32 1.442695, %v5691_v48  ;;  %v13175_v47 = vadd.f32 %v13172_v31, %v5499_v11  ;;  %v13183_v6 = vadd.f32 %v13180_v8, %v5499_v11  ;;  %v5773_v53 = vmul.f32 1.442695, %v5692_v54  ;;  %v13192_v48 = vld [vmem:[%s13871_s0 + $0xa0] sm:$0xff] }
 0xdc4   : > { %v8704_v27 = vpop.eup %8703  ;;  %v7022_v13 = vpack.c.bf16 %v8702_v25, %v8698_v0  ;;  %14892 = vst [vmem:[#allocation45_spill] sm:$0xff] %v13192_v48  ;;  %v13200_v0 = vld [vmem:[%s13871_s0 + $0xa8] sm:$0xff] }
 0xdc5   : > { %v5693_v41 = vadd.f32 %v13175_v47, %v12790_v5  ;;  %v5694_v29 = vadd.f32 %v13183_v6, %v12794_v58  ;;  %v7020_v62 = vpack.c.bf16 %v8704_v27, %v8700_v22  ;;  %8713 = vpow2.f32 %v5771_v33  ;;  %14893 = vst [vmem:[#allocation55_spill] sm:$0xff] %v13200_v0 }
 0xdc6   : > { %v5504_v30 = vpop.permute.xlu1 %5503  ;;  %8715 = vpow2.f32 %v5773_v53 }
 0xdc7   : > { %v5775_v52 = vmul.f32 1.442695, %v5693_v41  ;;  %v5777_v18 = vmul.f32 1.442695, %v5694_v29  ;;  %7021 = vmatprep.subr.bf16.mxu0 %v7020_v62  ;;  %v13195_v54 = vadd.f32 %v13192_v48, %v5504_v30  ;;  %v13203_v22 = vadd.f32 %v13200_v0, %v5504_v30  ;;  %v8706_v11 = vpop.eup %8705  ;;  %v13212_v30 = vld [vmem:[%s13871_s0 + $0xb0] sm:$0xff] }
 0xdc8   : > { %7023 = vmatpush1.bf16.msra.mxu0 %v7022_v13  ;;  %v8708_v27 = vpop.eup %8707  ;;  %14894 = vst [vmem:[#allocation49_spill] sm:$0xff] %v13212_v30  ;;  %v13220_v13 = vld [vmem:[%s13871_s0 + $0xb8] sm:$0xff] }
 0xdc9   : > { %8717 = vpow2.f32 %v5775_v52  ;;  %v5695_v25 = vadd.f32 %v13195_v54, %v12790_v5  ;;  %v5696_v33 = vadd.f32 %v13203_v22, %v12794_v58  ;;  %14895 = vst [vmem:[#allocation59_spill] sm:$0xff] %v13220_v13 }
 0xdca   : > { %8719 = vpow2.f32 %v5777_v18  ;;  %v5509_v41 = vpop.permute.xlu0 %5508 }
 0xdcb   : > { %v8710_v29 = vpop.eup %8709  ;;  %v5779_v62 = vmul.f32 1.442695, %v5695_v25  ;;  %v13215_v53 = vadd.f32 %v13212_v30, %v5509_v41  ;;  %v13223_v52 = vadd.f32 %v13220_v13, %v5509_v41  ;;  %v5781_v48 = vmul.f32 1.442695, %v5696_v33  ;;  %v13232_v41 = vld [vmem:[%s13871_s0 + $0xc0] sm:$0xff] }
 0xdcc   : > { %v8712_v18 = vpop.eup %8711  ;;  %v7026_v0 = vpack.c.bf16 %v8710_v29, %v8706_v11  ;;  %14896 = vst [vmem:[#allocation53_spill] sm:$0xff] %v13232_v41  ;;  %v13240_v11 = vld [vmem:[%s13871_s0 + $0xc8] sm:$0xff] }
 0xdcd   : > { %v5697_v25 = vadd.f32 %v13215_v53, %v12790_v5  ;;  %v5698_v31 = vadd.f32 %v13223_v52, %v12794_v58  ;;  %v7024_v8 = vpack.c.bf16 %v8712_v18, %v8708_v27  ;;  %8721 = vpow2.f32 %v5779_v62  ;;  %14898 = vst [vmem:[#allocation57_spill] sm:$0xff] %v13240_v11 }
 0xdce   : > { %v5514_v30 = vpop.permute.xlu1 %5513  ;;  %8723 = vpow2.f32 %v5781_v48 }
 0xdcf   : > { %v5783_v14 = vmul.f32 1.442695, %v5697_v25  ;;  %v5785_v51 = vmul.f32 1.442695, %v5698_v31  ;;  %7025 = vmatprep.subr.bf16.mxu0 %v7024_v8  ;;  %v13235_v33 = vadd.f32 %v13232_v41, %v5514_v30  ;;  %v13243_v27 = vadd.f32 %v13240_v11, %v5514_v30  ;;  %v8714_v29 = vpop.eup %8713  ;;  %v13252_v30 = vld [vmem:[%s13871_s0 + $0xd0] sm:$0xff] }
 0xdd0   : > { %7027 = vmatpush1.bf16.msra.mxu0 %v7026_v0  ;;  %v8716_v62 = vpop.eup %8715  ;;  %14899 = vst [vmem:[#allocation87_spill] sm:$0xff] %v13252_v30 }
 0xdd1   : > { %14897 = vst [vmem:[#allocation63_spill] sm:$0xff] %v13235_v33  ;;  %8725 = vpow2.f32 %v5783_v14  ;;  %v5699_v31 = vadd.f32 %v13235_v33, %v12790_v5  ;;  %v5700_v8 = vadd.f32 %v13243_v27, %v12794_v58  ;;  %v13260_v14 = vld [vmem:[%s13871_s0 + $0xd8] sm:$0xff] }
 0xdd2   : > { %8727 = vpow2.f32 %v5785_v51  ;;  %v5519_v18 = vpop.permute.xlu0 %5518  ;;  %14901 = vst [vmem:[#allocation89_spill] sm:$0xff] %v13260_v14 }
 0xdd3   : > { %v8718_v25 = vpop.eup %8717  ;;  %v5787_v41 = vmul.f32 1.442695, %v5699_v31  ;;  %v13255_v48 = vadd.f32 %v13252_v30, %v5519_v18  ;;  %v13263_v0 = vadd.f32 %v13260_v14, %v5519_v18  ;;  %v5789_v11 = vmul.f32 1.442695, %v5700_v8  ;;  %v13272_v18 = vld [vmem:[%s13871_s0 + $0xe0] sm:$0xff] }
 0xdd4   : > { %v8720_v51 = vpop.eup %8719  ;;  %v7030_v13 = vpack.c.bf16 %v8718_v25, %v8714_v29  ;;  %14903 = vst [vmem:[#allocation90_spill] sm:$0xff] %v13272_v18  ;;  %v13280_v29 = vld [vmem:[%s13871_s0 + $0xe8] sm:$0xff] }
 0xdd5   : > { %14900 = vst [vmem:[#allocation61_spill] sm:$0xff] %v13255_v48  ;;  %14902 = vst [vmem:[#allocation65_spill] sm:$0xff] %v13263_v0  ;;  %v5701_v31 = vadd.f32 %v13255_v48, %v12790_v5  ;;  %v5702_v9 = vadd.f32 %v13263_v0, %v12794_v58  ;;  %v7028_v33 = vpack.c.bf16 %v8720_v51, %v8716_v62  ;;  %8729 = vpow2.f32 %v5787_v41 }
 0xdd6   : > { %v5524_v30 = vpop.permute.xlu1 %5523  ;;  %14905 = vst [vmem:[#allocation66_spill] sm:$0xff] %v13280_v29  ;;  %8731 = vpow2.f32 %v5789_v11 }
 0xdd7   : > { %v5791_v24 = vmul.f32 1.442695, %v5701_v31  ;;  %v5793_v17 = vmul.f32 1.442695, %v5702_v9  ;;  %7029 = vmatprep.subr.bf16.mxu0 %v7028_v33  ;;  %v13275_v8 = vadd.f32 %v13272_v18, %v5524_v30  ;;  %v13283_v62 = vadd.f32 %v13280_v29, %v5524_v30  ;;  %v8722_v41 = vpop.eup %8721  ;;  %v13292_v30 = vld [vmem:[%s13871_s0 + $0xf0] sm:$0xff] }
 0xdd8   : > { %7031 = vmatpush1.bf16.msra.mxu0 %v7030_v13  ;;  %v8724_v25 = vpop.eup %8723  ;;  %14907 = vst [vmem:[#allocation68_spill] sm:$0xff] %v13292_v30 }
 0xdd9   : > { %14904 = vst [vmem:[#allocation88_spill] sm:$0xff] %v13275_v8  ;;  %14906 = vst [vmem:[#allocation67_spill] sm:$0xff] %v13283_v62  ;;  %8733 = vpow2.f32 %v5791_v24  ;;  %v5703_v9 = vadd.f32 %v13275_v8, %v12790_v5  ;;  %v5704_v33 = vadd.f32 %v13283_v62, %v12794_v58  ;;  %v13300_v24 = vld [vmem:[%s13871_s0 + $0xf8] sm:$0xff] }
 0xdda   : > { %8735 = vpow2.f32 %v5793_v17  ;;  %v5529_v51 = vpop.permute.xlu0 %5528  ;;  %14909 = vst [vmem:[#allocation70_spill] sm:$0xff] %v13300_v24 }
 0xddb   : > { %v8726_v31 = vpop.eup %8725  ;;  %v5795_v18 = vmul.f32 1.442695, %v5703_v9  ;;  %v13295_v11 = vadd.f32 %v13292_v30, %v5529_v51  ;;  %v13303_v13 = vadd.f32 %v13300_v24, %v5529_v51  ;;  %v5797_v29 = vmul.f32 1.442695, %v5704_v33  ;;  %v13312_v51 = vld [vmem:[%s13871_s0 + $0x100] sm:$0xff] }
 0xddc   : > { %v8728_v17 = vpop.eup %8727  ;;  %v7034_v14 = vpack.c.bf16 %v8726_v31, %v8722_v41  ;;  %14911 = vst [vmem:[#allocation73_spill] sm:$0xff] %v13312_v51  ;;  %v13320_v41 = vld [vmem:[%s13871_s0 + $0x108] sm:$0xff] }
 0xddd   : > { %14908 = vst [vmem:[#allocation69_spill] sm:$0xff] %v13295_v11  ;;  %14910 = vst [vmem:[#allocation71_spill] sm:$0xff] %v13303_v13  ;;  %v5705_v9 = vadd.f32 %v13295_v11, %v12790_v5  ;;  %v5706_v8 = vadd.f32 %v13303_v13, %v12794_v58  ;;  %v7032_v62 = vpack.c.bf16 %v8728_v17, %v8724_v25  ;;  %8737 = vpow2.f32 %v5795_v18 }
 0xdde   : > { %v5534_v30 = vpop.permute.xlu1 %5533  ;;  %14913 = vst [vmem:[#allocation75_spill] sm:$0xff] %v13320_v41  ;;  %8739 = vpow2.f32 %v5797_v29 }
 0xddf   : > { %v5799_v48 = vmul.f32 1.442695, %v5705_v9  ;;  %v5801_v0 = vmul.f32 1.442695, %v5706_v8  ;;  %7033 = vmatprep.subr.bf16.mxu0 %v7032_v62  ;;  %v13315_v33 = vadd.f32 %v13312_v51, %v5534_v30  ;;  %v13323_v25 = vadd.f32 %v13320_v41, %v5534_v30  ;;  %v8730_v18 = vpop.eup %8729  ;;  %v13332_v30 = vld [vmem:[%s13871_s0 + $0x110] sm:$0xff] }
 0xde0   : > { %7035 = vmatpush1.bf16.msra.mxu0 %v7034_v14  ;;  %v8732_v31 = vpop.eup %8731  ;;  %14915 = vst [vmem:[#allocation72_spill] sm:$0xff] %v13332_v30 }
 0xde1   : > { %14912 = vst [vmem:[#allocation2_spill] sm:$0xff] %v13315_v33  ;;  %14914 = vst [vmem:[#allocation4_spill] sm:$0xff] %v13323_v25  ;;  %8741 = vpow2.f32 %v5799_v48  ;;  %v5707_v8 = vadd.f32 %v13315_v33, %v12790_v5  ;;  %v5708_v62 = vadd.f32 %v13323_v25, %v12794_v58  ;;  %v13340_v48 = vld [vmem:[%s13871_s0 + $0x118] sm:$0xff] }
 0xde2   : > { %8743 = vpow2.f32 %v5801_v0  ;;  %v5539_v17 = vpop.permute.xlu0 %5538  ;;  %14917 = vst [vmem:[#allocation77_spill] sm:$0xff] %v13340_v48 }
 0xde3   : > { %v8734_v9 = vpop.eup %8733  ;;  %v5803_v51 = vmul.f32 1.442695, %v5707_v8  ;;  %v13335_v29 = vadd.f32 %v13332_v30, %v5539_v17  ;;  %v13343_v14 = vadd.f32 %v13340_v48, %v5539_v17  ;;  %v5805_v41 = vmul.f32 1.442695, %v5708_v62  ;;  %v13352_v17 = vld [vmem:[%s13871_s0 + $0x120] sm:$0xff] }
 0xde4   : > { %v8736_v0 = vpop.eup %8735  ;;  %v7038_v24 = vpack.c.bf16 %v8734_v9, %v8730_v18  ;;  %14919 = vst [vmem:[#allocation74_spill] sm:$0xff] %v13352_v17  ;;  %v13360_v18 = vld [vmem:[%s13871_s0 + $0x128] sm:$0xff] }
 0xde5   : > { %14916 = vst [vmem:[#allocation6_spill] sm:$0xff] %v13335_v29  ;;  %14918 = vst [vmem:[#allocation8_spill] sm:$0xff] %v13343_v14  ;;  %v5709_v8 = vadd.f32 %v13335_v29, %v12790_v5  ;;  %v5710_v33 = vadd.f32 %v13343_v14, %v12794_v58  ;;  %v7036_v25 = vpack.c.bf16 %v8736_v0, %v8732_v31  ;;  %8745 = vpow2.f32 %v5803_v51 }
 0xde6   : > { %v5544_v30 = vpop.permute.xlu1 %5543  ;;  %14921 = vst [vmem:[#allocation79_spill] sm:$0xff] %v13360_v18  ;;  %8747 = vpow2.f32 %v5805_v41 }
 0xde7   : > { %v5807_v11 = vmul.f32 1.442695, %v5709_v8  ;;  %v5809_v13 = vmul.f32 1.442695, %v5710_v33  ;;  %7037 = vmatprep.subr.bf16.mxu0 %v7036_v25  ;;  %v13355_v62 = vadd.f32 %v13352_v17, %v5544_v30  ;;  %v13363_v31 = vadd.f32 %v13360_v18, %v5544_v30  ;;  %v8738_v51 = vpop.eup %8737  ;;  %v13372_v30 = vld [vmem:[%s13871_s0 + $0x130] sm:$0xff] }
 0xde8   : > { %7039 = vmatpush1.bf16.msra.mxu0 %v7038_v24  ;;  %v8740_v9 = vpop.eup %8739  ;;  %14923 = vst [vmem:[#allocation76_spill] sm:$0xff] %v13372_v30 }
 0xde9   : > { %14920 = vst [vmem:[#allocation10_spill] sm:$0xff] %v13355_v62  ;;  %14922 = vst [vmem:[#allocation12_spill] sm:$0xff] %v13363_v31  ;;  %8749 = vpow2.f32 %v5807_v11  ;;  %v5711_v33 = vadd.f32 %v13355_v62, %v12790_v5  ;;  %v5712_v25 = vadd.f32 %v13363_v31, %v12794_v58  ;;  %v13380_v11 = vld [vmem:[%s13871_s0 + $0x138] sm:$0xff] }
 0xdea   : > { %8751 = vpow2.f32 %v5809_v13  ;;  %v5549_v0 = vpop.permute.xlu0 %5548  ;;  %14925 = vst [vmem:[#allocation81_spill] sm:$0xff] %v13380_v11 }
 0xdeb   : > { %v8742_v8 = vpop.eup %8741  ;;  %v5811_v17 = vmul.f32 1.442695, %v5711_v33  ;;  %v13375_v41 = vadd.f32 %v13372_v30, %v5549_v0  ;;  %v13383_v24 = vadd.f32 %v13380_v11, %v5549_v0  ;;  %v5813_v18 = vmul.f32 1.442695, %v5712_v25  ;;  %v13392_v0 = vld [vmem:[%s13871_s0 + $0x140] sm:$0xff] }
 0xdec   : > { %v8744_v13 = vpop.eup %8743  ;;  %v7042_v48 = vpack.c.bf16 %v8742_v8, %v8738_v51  ;;  %14927 = vst [vmem:[#allocation78_spill] sm:$0xff] %v13392_v0  ;;  %v13400_v51 = vld [vmem:[%s13871_s0 + $0x148] sm:$0xff] }
 0xded   : > { %14924 = vst [vmem:[#allocation14_spill] sm:$0xff] %v13375_v41  ;;  %14926 = vst [vmem:[#allocation16_spill] sm:$0xff] %v13383_v24  ;;  %v5713_v33 = vadd.f32 %v13375_v41, %v12790_v5  ;;  %v5714_v62 = vadd.f32 %v13383_v24, %v12794_v58  ;;  %v7040_v31 = vpack.c.bf16 %v8744_v13, %v8740_v9  ;;  %8753 = vpow2.f32 %v5811_v17 }
 0xdee   : > { %v5554_v30 = vpop.permute.xlu1 %5553  ;;  %14929 = vst [vmem:[#allocation83_spill] sm:$0xff] %v13400_v51  ;;  %8755 = vpow2.f32 %v5813_v18 }
 0xdef   : > { %v5815_v29 = vmul.f32 1.442695, %v5713_v33  ;;  %v5817_v14 = vmul.f32 1.442695, %v5714_v62  ;;  %7041 = vmatprep.subr.bf16.mxu0 %v7040_v31  ;;  %v13395_v25 = vadd.f32 %v13392_v0, %v5554_v30  ;;  %v13403_v9 = vadd.f32 %v13400_v51, %v5554_v30  ;;  %v8746_v17 = vpop.eup %8745  ;;  %v13412_v30 = vld [vmem:[%s13871_s0 + $0x150] sm:$0xff] }
 0xdf0   : > { %7043 = vmatpush1.bf16.msra.mxu0 %v7042_v48  ;;  %v8748_v8 = vpop.eup %8747  ;;  %14931 = vst [vmem:[#allocation80_spill] sm:$0xff] %v13412_v30 }
 0xdf1   : > { %14928 = vst [vmem:[#allocation18_spill] sm:$0xff] %v13395_v25  ;;  %14930 = vst [vmem:[#allocation20_spill] sm:$0xff] %v13403_v9  ;;  %8757 = vpow2.f32 %v5815_v29  ;;  %v5715_v62 = vadd.f32 %v13395_v25, %v12790_v5  ;;  %v5716_v31 = vadd.f32 %v13403_v9, %v12794_v58  ;;  %v13420_v29 = vld [vmem:[%s13871_s0 + $0x158] sm:$0xff] }
 0xdf2   : > { %8759 = vpow2.f32 %v5817_v14  ;;  %v5559_v13 = vpop.permute.xlu0 %5558  ;;  %14933 = vst [vmem:[#allocation85_spill] sm:$0xff] %v13420_v29 }
 0xdf3   : > { %v8750_v33 = vpop.eup %8749  ;;  %v5819_v0 = vmul.f32 1.442695, %v5715_v62  ;;  %v13415_v18 = vadd.f32 %v13412_v30, %v5559_v13  ;;  %v13423_v48 = vadd.f32 %v13420_v29, %v5559_v13  ;;  %v5821_v51 = vmul.f32 1.442695, %v5716_v31  ;;  %v13432_v13 = vld [vmem:[%s13871_s0 + $0x160] sm:$0xff] }
 0xdf4   : > { %v8752_v14 = vpop.eup %8751  ;;  %v7046_v11 = vpack.c.bf16 %v8750_v33, %v8746_v17  ;;  %14935 = vst [vmem:[#allocation82_spill] sm:$0xff] %v13432_v13  ;;  %v13440_v17 = vld [vmem:[%s13871_s0 + $0x168] sm:$0xff] }
 0xdf5   : > { %14932 = vst [vmem:[#allocation22_spill] sm:$0xff] %v13415_v18  ;;  %14934 = vst [vmem:[#allocation24_spill] sm:$0xff] %v13423_v48  ;;  %v5717_v62 = vadd.f32 %v13415_v18, %v12790_v5  ;;  %v5718_v25 = vadd.f32 %v13423_v48, %v12794_v58  ;;  %v7044_v9 = vpack.c.bf16 %v8752_v14, %v8748_v8  ;;  %8761 = vpow2.f32 %v5819_v0 }
 0xdf6   : > { %v5564_v30 = vpop.permute.xlu1 %5563  ;;  %14937 = vst [vmem:[#allocation86_spill] sm:$0xff] %v13440_v17  ;;  %8763 = vpow2.f32 %v5821_v51 }
 0xdf7   : > { %v5823_v41 = vmul.f32 1.442695, %v5717_v62  ;;  %v5825_v24 = vmul.f32 1.442695, %v5718_v25  ;;  %7045 = vmatprep.subr.bf16.mxu0 %v7044_v9  ;;  %v13435_v31 = vadd.f32 %v13432_v13, %v5564_v30  ;;  %v13443_v8 = vadd.f32 %v13440_v17, %v5564_v30  ;;  %v8754_v0 = vpop.eup %8753  ;;  %v13452_v30 = vld [vmem:[%s13871_s0 + $0x170] sm:$0xff] }
 0xdf8   : > { %7047 = vmatpush1.bf16.msra.mxu0 %v7046_v11  ;;  %v8756_v33 = vpop.eup %8755  ;;  %14939 = vst [vmem:[#allocation84_spill] sm:$0xff] %v13452_v30 }
 0xdf9   : > { %14936 = vst [vmem:[#allocation26_spill] sm:$0xff] %v13435_v31  ;;  %14938 = vst [vmem:[#allocation28_spill] sm:$0xff] %v13443_v8  ;;  %8765 = vpow2.f32 %v5823_v41  ;;  %v5719_v25 = vadd.f32 %v13435_v31, %v12790_v5  ;;  %v5720_v9 = vadd.f32 %v13443_v8, %v12794_v58  ;;  %v13460_v41 = vld [vmem:[%s13871_s0 + $0x178] sm:$0xff] }
 0xdfa   : > { %8767 = vpow2.f32 %v5825_v24  ;;  %v5569_v14 = vpop.permute.xlu0 %5568  ;;  %14941 = vst [vmem:[#allocation5_spill] sm:$0xff] %v13460_v41 }
 0xdfb   : > { %v8758_v62 = vpop.eup %8757  ;;  %v5827_v13 = vmul.f32 1.442695, %v5719_v25  ;;  %v13455_v51 = vadd.f32 %v13452_v30, %v5569_v14  ;;  %v13463_v11 = vadd.f32 %v13460_v41, %v5569_v14  ;;  %v5829_v17 = vmul.f32 1.442695, %v5720_v9  ;;  %v13472_v14 = vld [vmem:[%s13871_s0 + $0x180] sm:$0xff] }
 0xdfc   : > { %v8760_v24 = vpop.eup %8759  ;;  %v7050_v29 = vpack.c.bf16 %v8758_v62, %v8754_v0  ;;  %14943 = vst [vmem:[#allocation3_spill] sm:$0xff] %v13472_v14  ;;  %v13480_v0 = vld [vmem:[%s13871_s0 + $0x188] sm:$0xff] }
 0xdfd   : > { %14940 = vst [vmem:[#allocation30_spill] sm:$0xff] %v13455_v51  ;;  %14942 = vst [vmem:[#allocation32_spill] sm:$0xff] %v13463_v11  ;;  %v5721_v25 = vadd.f32 %v13455_v51, %v12790_v5  ;;  %v5722_v31 = vadd.f32 %v13463_v11, %v12794_v58  ;;  %v7048_v8 = vpack.c.bf16 %v8760_v24, %v8756_v33  ;;  %8769 = vpow2.f32 %v5827_v13 }
 0xdfe   : > { %v5574_v30 = vpop.permute.xlu1 %5573  ;;  %14945 = vst [vmem:[#allocation9_spill] sm:$0xff] %v13480_v0  ;;  %8771 = vpow2.f32 %v5829_v17 }
 0xdff   : > { %v5831_v18 = vmul.f32 1.442695, %v5721_v25  ;;  %v5833_v48 = vmul.f32 1.442695, %v5722_v31  ;;  %7049 = vmatprep.subr.bf16.mxu0 %v7048_v8  ;;  %v13475_v9 = vadd.f32 %v13472_v14, %v5574_v30  ;;  %v13483_v33 = vadd.f32 %v13480_v0, %v5574_v30  ;;  %v8762_v13 = vpop.eup %8761  ;;  %v13492_v30 = vld [vmem:[%s13871_s0 + $0x190] sm:$0xff] }
 0xe00   : > { %7051 = vmatpush1.bf16.msra.mxu0 %v7050_v29  ;;  %v8764_v62 = vpop.eup %8763  ;;  %14947 = vst [vmem:[#allocation7_spill] sm:$0xff] %v13492_v30 }
 0xe01   : > { %14944 = vst [vmem:[#allocation34_spill] sm:$0xff] %v13475_v9  ;;  %14946 = vst [vmem:[#allocation36_spill] sm:$0xff] %v13483_v33  ;;  %8773 = vpow2.f32 %v5831_v18  ;;  %v5723_v31 = vadd.f32 %v13475_v9, %v12790_v5  ;;  %v5724_v8 = vadd.f32 %v13483_v33, %v12794_v58  ;;  %v13500_v18 = vld [vmem:[%s13871_s0 + $0x198] sm:$0xff] }
 0xe02   : > { %8775 = vpow2.f32 %v5833_v48  ;;  %v5579_v24 = vpop.permute.xlu0 %5578  ;;  %14949 = vst [vmem:[#allocation13_spill] sm:$0xff] %v13500_v18 }
 0xe03   : > { %v8766_v25 = vpop.eup %8765  ;;  %v5835_v14 = vmul.f32 1.442695, %v5723_v31  ;;  %v13495_v17 = vadd.f32 %v13492_v30, %v5579_v24  ;;  %v13503_v29 = vadd.f32 %v13500_v18, %v5579_v24  ;;  %v5837_v0 = vmul.f32 1.442695, %v5724_v8  ;;  %v13512_v24 = vld [vmem:[%s13871_s0 + $0x1a0] sm:$0xff] }
 0xe04   : > { %v8768_v48 = vpop.eup %8767  ;;  %v7054_v41 = vpack.c.bf16 %v8766_v25, %v8762_v13  ;;  %14951 = vst [vmem:[#allocation11_spill] sm:$0xff] %v13512_v24  ;;  %v13520_v13 = vld [vmem:[%s13871_s0 + $0x1a8] sm:$0xff] }
 0xe05   : > { %14948 = vst [vmem:[#allocation38_spill] sm:$0xff] %v13495_v17  ;;  %14950 = vst [vmem:[#allocation40_spill] sm:$0xff] %v13503_v29  ;;  %v5725_v31 = vadd.f32 %v13495_v17, %v12790_v5  ;;  %v5726_v9 = vadd.f32 %v13503_v29, %v12794_v58  ;;  %v7052_v33 = vpack.c.bf16 %v8768_v48, %v8764_v62  ;;  %8777 = vpow2.f32 %v5835_v14 }
 0xe06   : > { %v5584_v30 = vpop.permute.xlu1 %5583  ;;  %14953 = vst [vmem:[#allocation17_spill] sm:$0xff] %v13520_v13  ;;  %8779 = vpow2.f32 %v5837_v0 }
 0xe07   : > { %v5839_v51 = vmul.f32 1.442695, %v5725_v31  ;;  %v5841_v11 = vmul.f32 1.442695, %v5726_v9  ;;  %7053 = vmatprep.subr.bf16.mxu0 %v7052_v33  ;;  %v13515_v8 = vadd.f32 %v13512_v24, %v5584_v30  ;;  %v13523_v62 = vadd.f32 %v13520_v13, %v5584_v30  ;;  %v8770_v14 = vpop.eup %8769  ;;  %v13532_v30 = vld [vmem:[%s13871_s0 + $0x1b0] sm:$0xff] }
 0xe08   : > { %7055 = vmatpush1.bf16.msra.mxu0 %v7054_v41  ;;  %v8772_v25 = vpop.eup %8771  ;;  %14955 = vst [vmem:[#allocation15_spill] sm:$0xff] %v13532_v30 }
 0xe09   : > { %14952 = vst [vmem:[#allocation42_spill] sm:$0xff] %v13515_v8  ;;  %14954 = vst [vmem:[#allocation44_spill] sm:$0xff] %v13523_v62  ;;  %8781 = vpow2.f32 %v5839_v51  ;;  %v5727_v9 = vadd.f32 %v13515_v8, %v12790_v5  ;;  %v5728_v33 = vadd.f32 %v13523_v62, %v12794_v58  ;;  %v13540_v51 = vld [vmem:[%s13871_s0 + $0x1b8] sm:$0xff] }
 0xe0a   : > { %8783 = vpow2.f32 %v5841_v11  ;;  %v5589_v48 = vpop.permute.xlu0 %5588  ;;  %14957 = vst [vmem:[#allocation21_spill] sm:$0xff] %v13540_v51 }
 0xe0b   : > { %v8774_v31 = vpop.eup %8773  ;;  %v5843_v24 = vmul.f32 1.442695, %v5727_v9  ;;  %v13535_v0 = vadd.f32 %v13532_v30, %v5589_v48  ;;  %v13543_v41 = vadd.f32 %v13540_v51, %v5589_v48  ;;  %v5845_v13 = vmul.f32 1.442695, %v5728_v33  ;;  %v13552_v48 = vld [vmem:[%s13871_s0 + $0x1c0] sm:$0xff] }
 0xe0c   : > { %v8776_v11 = vpop.eup %8775  ;;  %v7058_v18 = vpack.c.bf16 %v8774_v31, %v8770_v14  ;;  %14959 = vst [vmem:[#allocation19_spill] sm:$0xff] %v13552_v48  ;;  %v13560_v14 = vld [vmem:[%s13871_s0 + $0x1c8] sm:$0xff] }
 0xe0d   : > { %14956 = vst [vmem:[#allocation46_spill] sm:$0xff] %v13535_v0  ;;  %14958 = vst [vmem:[#allocation48_spill] sm:$0xff] %v13543_v41  ;;  %v5729_v9 = vadd.f32 %v13535_v0, %v12790_v5  ;;  %v5730_v8 = vadd.f32 %v13543_v41, %v12794_v58  ;;  %v7056_v62 = vpack.c.bf16 %v8776_v11, %v8772_v25  ;;  %8785 = vpow2.f32 %v5843_v24 }
 0xe0e   : > { %v5594_v30 = vpop.permute.xlu1 %5593  ;;  %14961 = vst [vmem:[#allocation91_spill] sm:$0xff] %v13560_v14  ;;  %8787 = vpow2.f32 %v5845_v13 }
 0xe0f   : > { %v5847_v17 = vmul.f32 1.442695, %v5729_v9  ;;  %v5849_v29 = vmul.f32 1.442695, %v5730_v8  ;;  %7057 = vmatprep.subr.bf16.mxu0 %v7056_v62  ;;  %v13555_v33 = vadd.f32 %v13552_v48, %v5594_v30  ;;  %v13563_v25 = vadd.f32 %v13560_v14, %v5594_v30  ;;  %v8778_v24 = vpop.eup %8777  ;;  %v13572_v30 = vld [vmem:[%s13871_s0 + $0x1d0] sm:$0xff] }
 0xe10   : > { %7059 = vmatpush1.bf16.msra.mxu0 %v7058_v18  ;;  %v8780_v31 = vpop.eup %8779  ;;  %14963 = vst [vmem:[#allocation23_spill] sm:$0xff] %v13572_v30 }
 0xe11   : > { %14960 = vst [vmem:[#allocation50_spill] sm:$0xff] %v13555_v33  ;;  %14962 = vst [vmem:[#allocation52_spill] sm:$0xff] %v13563_v25  ;;  %8789 = vpow2.f32 %v5847_v17  ;;  %v5731_v8 = vadd.f32 %v13555_v33, %v12790_v5  ;;  %v5732_v62 = vadd.f32 %v13563_v25, %v12794_v58  ;;  %v13580_v17 = vld [vmem:[%s13871_s0 + $0x1d8] sm:$0xff] }
 0xe12   : > { %8791 = vpow2.f32 %v5849_v29  ;;  %v5599_v11 = vpop.permute.xlu0 %5598  ;;  %14965 = vst [vmem:[#allocation92_spill] sm:$0xff] %v13580_v17 }
 0xe13   : > { %v8782_v9 = vpop.eup %8781  ;;  %v5851_v48 = vmul.f32 1.442695, %v5731_v8  ;;  %v13575_v13 = vadd.f32 %v13572_v30, %v5599_v11  ;;  %v13583_v18 = vadd.f32 %v13580_v17, %v5599_v11  ;;  %v5853_v14 = vmul.f32 1.442695, %v5732_v62  ;;  %v13592_v11 = vld [vmem:[%s13871_s0 + $0x1e0] sm:$0xff] }
 0xe14   : > { %v8784_v29 = vpop.eup %8783  ;;  %v7062_v51 = vpack.c.bf16 %v8782_v9, %v8778_v24  ;;  %14967 = vst [vmem:[#allocation27_spill] sm:$0xff] %v13592_v11  ;;  %v13600_v24 = vld [vmem:[%s13871_s0 + $0x1e8] sm:$0xff] }
 0xe15   : > { %14964 = vst [vmem:[#allocation54_spill] sm:$0xff] %v13575_v13  ;;  %14966 = vst [vmem:[#allocation56_spill] sm:$0xff] %v13583_v18  ;;  %v5733_v8 = vadd.f32 %v13575_v13, %v12790_v5  ;;  %v5734_v33 = vadd.f32 %v13583_v18, %v12794_v58  ;;  %v7060_v25 = vpack.c.bf16 %v8784_v29, %v8780_v31  ;;  %8793 = vpow2.f32 %v5851_v48 }
 0xe16   : > { %v5604_v30 = vpop.permute.xlu1 %5603  ;;  %14969 = vst [vmem:[#allocation25_spill] sm:$0xff] %v13600_v24  ;;  %8795 = vpow2.f32 %v5853_v14 }
 0xe17   : > { %v5855_v0 = vmul.f32 1.442695, %v5733_v8  ;;  %v5857_v41 = vmul.f32 1.442695, %v5734_v33  ;;  %7061 = vmatprep.subr.bf16.mxu0 %v7060_v25  ;;  %v13595_v62 = vadd.f32 %v13592_v11, %v5604_v30  ;;  %v13603_v31 = vadd.f32 %v13600_v24, %v5604_v30  ;;  %v8786_v48 = vpop.eup %8785  ;;  %v13612_v30 = vld [vmem:[%s13871_s0 + $0x1f0] sm:$0xff] }
 0xe18   : > { %7063 = vmatpush1.bf16.msra.mxu0 %v7062_v51  ;;  %v8788_v9 = vpop.eup %8787  ;;  %14971 = vst [vmem:[#allocation31_spill] sm:$0xff] %v13612_v30 }
 0xe19   : > { %14968 = vst [vmem:[#allocation58_spill] sm:$0xff] %v13595_v62  ;;  %14970 = vst [vmem:[#allocation60_spill] sm:$0xff] %v13603_v31  ;;  %8797 = vpow2.f32 %v5855_v0  ;;  %v5735_v33 = vadd.f32 %v13595_v62, %v12790_v5  ;;  %v5736_v25 = vadd.f32 %v13603_v31, %v12794_v58  ;;  %v13620_v0 = vld [vmem:[%s13871_s0 + $0x1f8] sm:$0xff] }
 0xe1a   : > { %8799 = vpow2.f32 %v5857_v41  ;;  %v5609_v29 = vpop.permute.xlu0 %5608  ;;  %14973 = vst [vmem:[#allocation29_spill] sm:$0xff] %v13620_v0 }
 0xe1b   : > { %v8790_v8 = vpop.eup %8789  ;;  %v5859_v11 = vmul.f32 1.442695, %v5735_v33  ;;  %v13615_v14 = vadd.f32 %v13612_v30, %v5609_v29  ;;  %v13623_v51 = vadd.f32 %v13620_v0, %v5609_v29  ;;  %v5861_v24 = vmul.f32 1.442695, %v5736_v25 }
 0xe1c   : > { %v8792_v41 = vpop.eup %8791  ;;  %v7066_v17 = vpack.c.bf16 %v8790_v8, %v8786_v48 }
 0xe1d   : > { %14972 = vst [vmem:[#allocation62_spill] sm:$0xff] %v13615_v14  ;;  %v5737_v33 = vadd.f32 %v13615_v14, %v12790_v5  ;;  %v5738_v62 = vadd.f32 %v13623_v51, %v12794_v58  ;;  %v7064_v31 = vpack.c.bf16 %v8792_v41, %v8788_v9  ;;  %8801 = vpow2.f32 %v5859_v11 }
 0xe1e   : > { %8803 = vpow2.f32 %v5861_v24 }
 0xe1f   : > { %v5863_v30 = vmul.f32 1.442695, %v5737_v33  ;;  %v5865_v13 = vmul.f32 1.442695, %v5738_v62  ;;  %7065 = vmatprep.subr.bf16.mxu0 %v7064_v31  ;;  %v8794_v18 = vpop.eup %8793 }
 0xe20   : > { %7067 = vmatpush1.bf16.msra.mxu0 %v7066_v17  ;;  %v8796_v29 = vpop.eup %8795 }
 0xe21   : > { %8805 = vpow2.f32 %v5863_v30 }
 0xe22   : > { %8807 = vpow2.f32 %v5865_v13 }
 0xe23   : > { %v8798_v0 = vpop.eup %8797 }
 0xe24   : > { %v8800_v25 = vpop.eup %8799  ;;  %v7070_v48 = vpack.c.bf16 %v8798_v0, %v8794_v18 }
 0xe25   : > { %v7068_v8 = vpack.c.bf16 %v8800_v25, %v8796_v29 }
 0xe27   : > { %7069 = vmatprep.subr.bf16.mxu0 %v7068_v8  ;;  %v8802_v5 = vpop.eup %8801 }
 0xe28   : > { %7071 = vmatpush1.bf16.msra.mxu0 %v7070_v48  ;;  %v8804_v14 = vpop.eup %8803 }
 0xe2b   : > { %v8806_v58 = vpop.eup %8805 }
 0xe2c   : > { %v8808_v9 = vpop.eup %8807  ;;  %v7074_v11 = vpack.c.bf16 %v8806_v58, %v8802_v5 }
 0xe2d   : > { %v7072_v41 = vpack.c.bf16 %v8808_v9, %v8804_v14 }
 0xe2f   : > { %7073 = vmatprep.subr.bf16.mxu0 %v7072_v41 }
 0xe30   : > { %7075 = vmatpush1.bf16.msra.mxu0 %v7074_v11 }
 0xe33   : > { %5932 = vmatmul.mubr.f32.vlgmr.msra.gmra.mrb[196].mxu0 %v14350_v43 }
 0xf06   : > { %v5933_v17 = vpop.f32.mrb[196].mxu0 }
 0xf07   : > { %v5934_v62 = vadd.f32 1e-30, %v5933_v17  ;;  %v5935_v24 = vpop.f32.mrb[197].mxu0 }
 0xf08   : > { %v5936_v13 = vadd.f32 1e-30, %v5935_v24 }
 0xf09   : > { %8809 = vlog2.f32 %v5934_v62 }
 0xf0a   : > { %8811 = vlog2.f32 %v5936_v13 }
 0xf13   : > { %v8810_v18 = vpop.eup %8809 }
 0xf14   : > { %v8812_v31 = vpop.eup %8811  ;;  %v5939_v30 = vmul.f32 0.6931472, %v8810_v18 }
 0xf15   : > { %v5941_v0 = vmul.f32 0.6931472, %v8812_v31 }
 0xf17   : > { %v5944_v33 = vcombine.low %v5939_v30, %v5941_v0 }
 0xf19   : > { %v5951_v29 = vrot.slane %v5944_v33, %v10396_v26 }
 0xf1b   : > { %v5958_v25 = vrot.slane %v5951_v29, %v10396_v26 }
 0xf1d   : > { %v5960_v14 = vsub.f32 %v10399_v7, %v5958_v25 }
 0xf1f   : > { %v5961_v48 = vadd.f32 %v5960_v14, %v12786_v50 }
 0xf21   : > { %v13635_v43 = vrot.slane %v5961_v48, %v10037_v4  ;;  %v13638_v8 = vrot.slane %v5961_v48, %v10040_v2 }
 0xf23   : > { %v5973_v5 = vadd.f32 %v13635_v43, %v12995_v38  ;;  %v5974_v58 = vadd.f32 %v13638_v8, %v13003_v23  ;;  %v5976_v9 = vadd.f32 %v13638_v8, %v13023_v10  ;;  %v5975_v7 = vadd.f32 %v13635_v43, %v13015_v1 }
 0xf24   : > { %v5978_v4 = vadd.f32 %v13638_v8, %v13043_v45  ;;  %v5977_v2 = vadd.f32 %v13635_v43, %v13035_v42  ;;  %v5980_v23 = vadd.f32 %v13638_v8, %v13063_v55  ;;  %v5979_v41 = vadd.f32 %v13635_v43, %v13055_v28 }
 0xf25   : > { %v6037_v26 = vmul.f32 1.442695, %v5973_v5  ;;  %v6039_v11 = vmul.f32 1.442695, %v5974_v58  ;;  %v6043_v50 = vmul.f32 1.442695, %v5976_v9  ;;  %v5982_v45 = vadd.f32 %v13638_v8, %v13083_v12 }
 0xf26   : > { %v6041_v38 = vmul.f32 1.442695, %v5975_v7  ;;  %v6047_v10 = vmul.f32 1.442695, %v5978_v4  ;;  %v6045_v1 = vmul.f32 1.442695, %v5977_v2  ;;  %v5981_v42 = vadd.f32 %v13635_v43, %v13075_v37 }
 0xf27   : > { %8813 = vpow2.f32 %v6037_v26  ;;  %v6051_v17 = vmul.f32 1.442695, %v5980_v23  ;;  %v6049_v24 = vmul.f32 1.442695, %v5979_v41  ;;  %v5984_v55 = vadd.f32 %v13638_v8, %v13103_v49 }
 0xf28   : > { %8815 = vpow2.f32 %v6039_v11  ;;  %v6055_v18 = vmul.f32 1.442695, %v5982_v45  ;;  %v5983_v31 = vadd.f32 %v13635_v43, %v13095_v39  ;;  %v6053_v12 = vmul.f32 1.442695, %v5981_v42 }
 0xf29   : > { %8817 = vpow2.f32 %v6043_v50  ;;  %v5986_v37 = vadd.f32 %v13638_v8, %v13123_v56  ;;  %v6059_v33 = vmul.f32 1.442695, %v5984_v55  ;;  %v5985_v39 = vadd.f32 %v13635_v43, %v13115_v36 }
 0xf2a   : > { %8819 = vpow2.f32 %v6041_v38  ;;  %v6057_v14 = vmul.f32 1.442695, %v5983_v31  ;;  %v5990_v9 = vadd.f32 %v13638_v8, %v13163_v60  ;;  %v5992_v4 = vadd.f32 %v13638_v8, %v13183_v6 }
 0xf2b   : > { %8821 = vpow2.f32 %v6047_v10  ;;  %v6061_v36 = vmul.f32 1.442695, %v5985_v39  ;;  %v5994_v23 = vadd.f32 %v13638_v8, %v13203_v22  ;;  %v5996_v45 = vadd.f32 %v13638_v8, %v13223_v52 }
 0xf2c   : > { %8823 = vpow2.f32 %v6045_v1  ;;  %v6071_v60 = vmul.f32 1.442695, %v5990_v9  ;;  %v6075_v6 = vmul.f32 1.442695, %v5992_v4  ;;  %v14983_v9 = vld [vmem:[#allocation51_spill] sm:$0xff] }
 0xf2d   : > { %8825 = vpow2.f32 %v6051_v17  ;;  %v6079_v22 = vmul.f32 1.442695, %v5994_v23  ;;  %v6083_v52 = vmul.f32 1.442695, %v5996_v45  ;;  %v14991_v45 = vld [vmem:[#allocation59_spill] sm:$0xff] }
 0xf2e   : > { %8827 = vpow2.f32 %v6049_v24  ;;  %v5998_v24 = vadd.f32 %v13638_v8, %v13243_v27 }
 0xf2f   : > { %8829 = vpow2.f32 %v6055_v18 }
 0xf30   : > { %8831 = vpow2.f32 %v6053_v12  ;;  %v6087_v27 = vmul.f32 1.442695, %v5998_v24 }
 0xf31   : > { %v8814_v62 = vpop.eup %8813  ;;  %8833 = vpow2.f32 %v6059_v33 }
 0xf32   : > { %v8816_v13 = vpop.eup %8815  ;;  %v6165_v0 = vmul.f32 %v12992_v57, %v8814_v62  ;;  %v5988_v57 = vadd.f32 %v13638_v8, %v13143_v3  ;;  %8835 = vpow2.f32 %v6057_v14  ;;  %v14980_v14 = vld [vmem:[#allocation61_spill] sm:$0xff] }
 0xf33   : > { %v8818_v28 = vpop.eup %8817  ;;  %v6166_v30 = vmul.f32 %v13000_v63, %v8816_v13  ;;  %v6063_v63 = vmul.f32 1.442695, %v5986_v37  ;;  %v14974_v13 = vld [vmem:[#allocation39_spill] sm:$0xff]  ;;  %v14978_v37 = vld [vmem:[#allocation33_spill] sm:$0xff] }
 0xf34   : > { %v8820_v29 = vpop.eup %8819  ;;  %v6168_v49 = vmul.f32 %v13020_v44, %v8818_v28  ;;  %v5987_v44 = vadd.f32 %v13635_v43, %v13135_v21  ;;  %v6067_v3 = vmul.f32 1.442695, %v5988_v57  ;;  %v5999_v57 = vadd.f32 %v13635_v43, %v14980_v14 }
 0xf35   : > { %6293 = vmatprep.mubr.f32.mxu1 %v6166_v30  ;;  %v8822_v25 = vpop.eup %8821  ;;  %v6167_v56 = vmul.f32 %v13012_v34, %v8820_v29  ;;  %8837 = vpow2.f32 %v6063_v63  ;;  %v14977_v30 = vld [vmem:[#allocation65_spill] sm:$0xff] }
 0xf36   : > { %6294 = vmatmul.mubr.f32.vlgmr.msra.gmra.mrb[132].mxu1 %v6165_v0  ;;  %v8824_v48 = vpop.eup %8823  ;;  %v6170_v5 = vmul.f32 %v13040_v19, %v8822_v25  ;;  %v5989_v19 = vadd.f32 %v13635_v43, %v13155_v40  ;;  %8839 = vpow2.f32 %v6061_v36  ;;  %v6065_v21 = vmul.f32 1.442695, %v5987_v44 }
 0xf37   : > { %6298 = vmatprep.mubr.f32.mxu1 %v6168_v49  ;;  %v8826_v58 = vpop.eup %8825  ;;  %v6169_v26 = vmul.f32 %v13032_v46, %v8824_v48  ;;  %8841 = vpow2.f32 %v6067_v3  ;;  %v6000_v0 = vadd.f32 %v13638_v8, %v14977_v30  ;;  %v14979_v49 = vld [vmem:[#allocation47_spill] sm:$0xff] }
 0xf38   : > { %v8828_v11 = vpop.eup %8827  ;;  %v6172_v34 = vmul.f32 %v13060_v20, %v8826_v58  ;;  %v5991_v20 = vadd.f32 %v13635_v43, %v13175_v47  ;;  %8843 = vpow2.f32 %v6065_v21  ;;  %v6069_v40 = vmul.f32 1.442695, %v5989_v19  ;;  %v14982_v58 = vld [vmem:[#allocation37_spill] sm:$0xff]  ;;  %v14985_v19 = vld [vmem:[#allocation71_spill] sm:$0xff] }
 0xf39   : > { %v8830_v7 = vpop.eup %8829  ;;  %v6171_v50 = vmul.f32 %v13052_v59, %v8828_v11  ;;  %8845 = vpow2.f32 %v6071_v60  ;;  %v14984_v11 = vld [vmem:[#allocation88_spill] sm:$0xff]  ;;  %v6004_v21 = vadd.f32 %v13638_v8, %v14985_v19  ;;  %v14986_v60 = vld [vmem:[#allocation41_spill] sm:$0xff] }
 0xf3a   : > { %6299 = vmatmul.mubr.f32.gmra.mrb[134].mxu1 %v6167_v56  ;;  %v8832_v2 = vpop.eup %8831  ;;  %v6174_v46 = vmul.f32 %v13080_v15, %v8830_v7  ;;  %v5993_v15 = vadd.f32 %v13635_v43, %v13195_v54  ;;  %8847 = vpow2.f32 %v6069_v40  ;;  %v6073_v47 = vmul.f32 1.442695, %v5991_v20  ;;  %v14981_v56 = vld [vmem:[#allocation67_spill] sm:$0xff]  ;;  %v14988_v40 = vld [vmem:[#allocation69_spill] sm:$0xff] }
 0xf3b   : > { %6303 = vmatprep.mubr.f32.mxu1 %v6170_v5  ;;  %v8834_v38 = vpop.eup %8833  ;;  %v6173_v10 = vmul.f32 %v13072_v35, %v8832_v2  ;;  %8849 = vpow2.f32 %v6075_v6  ;;  %v6002_v48 = vadd.f32 %v13638_v8, %v14981_v56  ;;  %v6091_v5 = vmul.f32 1.442695, %v6000_v0 }
 0xf3c   : > { %v8836_v41 = vpop.eup %8835  ;;  %v6176_v59 = vmul.f32 %v13100_v16, %v8834_v38  ;;  %v5995_v16 = vadd.f32 %v13635_v43, %v13215_v53  ;;  %8851 = vpow2.f32 %v6073_v47  ;;  %v6077_v54 = vmul.f32 1.442695, %v5993_v15 }
 0xf3d   : > { %v6175_v17 = vmul.f32 %v13092_v32, %v8836_v41  ;;  %8853 = vpow2.f32 %v6079_v22  ;;  %v14975_v32 = vld [vmem:[#allocation43_spill] sm:$0xff]  ;;  %v6089_v7 = vmul.f32 1.442695, %v5999_v57  ;;  %v6095_v4 = vmul.f32 1.442695, %v6002_v48 }
 0xf3e   : > { %6304 = vmatmul.mubr.f32.gmra.mrb[136].mxu1 %v6169_v26  ;;  %8855 = vpow2.f32 %v6077_v54  ;;  %v6081_v53 = vmul.f32 1.442695, %v5995_v16  ;;  %v6003_v23 = vadd.f32 %v13635_v43, %v14988_v40  ;;  %v14993_v16 = vld [vmem:[#allocation8_spill] sm:$0xff] }
 0xf3f   : > { %6308 = vmatprep.mubr.f32.mxu1 %v6172_v34  ;;  %v8838_v1 = vpop.eup %8837  ;;  %8857 = vpow2.f32 %v6083_v52  ;;  %v6001_v34 = vadd.f32 %v13635_v43, %v14984_v11  ;;  %v6008_v54 = vadd.f32 %v13638_v8, %v14993_v16  ;;  %v14994_v52 = vld [vmem:[#allocation49_spill] sm:$0xff] }
 0xf40   : > { %v8840_v62 = vpop.eup %8839  ;;  %v6178_v35 = vmul.f32 %v13120_v61, %v8838_v1  ;;  %v14976_v61 = vld [vmem:[#allocation63_spill] sm:$0xff]  ;;  %8859 = vpow2.f32 %v6081_v53  ;;  %v14990_v1 = vld [vmem:[#allocation45_spill] sm:$0xff]  ;;  %v14997_v53 = vld [vmem:[#allocation12_spill] sm:$0xff] }
 0xf41   : > { %v8842_v42 = vpop.eup %8841  ;;  %v6177_v55 = vmul.f32 %v14974_v13, %v8840_v62  ;;  %v5997_v12 = vadd.f32 %v13635_v43, %v14976_v61  ;;  %8861 = vpow2.f32 %v6087_v27  ;;  %v6093_v6 = vmul.f32 1.442695, %v6001_v34  ;;  %v14992_v62 = vld [vmem:[#allocation2_spill] sm:$0xff]  ;;  %v14998_v27 = vld [vmem:[#allocation53_spill] sm:$0xff] }
 0xf42   : > { %6309 = vmatmul.mubr.f32.gmra.mrb[138].mxu1 %v6171_v50  ;;  %v8844_v18 = vpop.eup %8843  ;;  %v6180_v28 = vmul.f32 %v14975_v32, %v8842_v42  ;;  %v6097_v42 = vmul.f32 1.442695, %v6003_v23  ;;  %v6010_v30 = vadd.f32 %v13638_v8, %v14997_v53  ;;  %v6107_v0 = vmul.f32 1.442695, %v6008_v54 }
 0xf43   : > { %6313 = vmatprep.mubr.f32.mxu1 %v6174_v46  ;;  %v8846_v31 = vpop.eup %8845  ;;  %v6179_v33 = vmul.f32 %v14978_v37, %v8844_v18  ;;  %v6085_v63 = vmul.f32 1.442695, %v5997_v12  ;;  %v14987_v46 = vld [vmem:[#allocation55_spill] sm:$0xff]  ;;  %v14995_v18 = vld [vmem:[#allocation57_spill] sm:$0xff] }
 0xf44   : > { %v8848_v29 = vpop.eup %8847  ;;  %v6182_v25 = vmul.f32 %v14979_v49, %v8846_v31  ;;  %v14996_v31 = vld [vmem:[#allocation6_spill] sm:$0xff]  ;;  %v6111_v48 = vmul.f32 1.442695, %v6010_v30 }
 0xf45   : > { %v8850_v39 = vpop.eup %8849  ;;  %v6181_v44 = vmul.f32 %v14982_v58, %v8848_v29  ;;  %8863 = vpow2.f32 %v6085_v63  ;;  %v6007_v61 = vadd.f32 %v13635_v43, %v14996_v31  ;;  %v14999_v29 = vld [vmem:[#allocation89_spill] sm:$0xff]  ;;  %v15001_v63 = vld [vmem:[#allocation16_spill] sm:$0xff] }
 0xf46   : > { %6314 = vmatmul.mubr.f32.gmra.mrb[140].mxu1 %v6173_v10  ;;  %v8852_v36 = vpop.eup %8851  ;;  %v6184_v3 = vmul.f32 %v14983_v9, %v8850_v39  ;;  %8865 = vpow2.f32 %v6091_v5  ;;  %v14989_v10 = vld [vmem:[#allocation4_spill] sm:$0xff]  ;;  %v15000_v39 = vld [vmem:[#allocation10_spill] sm:$0xff]  ;;  %v6012_v56 = vadd.f32 %v13638_v8, %v15001_v63  ;;  %v15002_v5 = vld [vmem:[#allocation87_spill] sm:$0xff] }
 0xf47   : > { %6318 = vmatprep.mubr.f32.mxu1 %v6176_v59  ;;  %v8854_v26 = vpop.eup %8853  ;;  %v6183_v50 = vmul.f32 %v14986_v60, %v8852_v36  ;;  %8867 = vpow2.f32 %v6089_v7  ;;  %v6006_v41 = vadd.f32 %v13638_v8, %v14989_v10  ;;  %v6099_v59 = vmul.f32 1.442695, %v6004_v21  ;;  %v15003_v36 = vld [vmem:[#allocation66_spill] sm:$0xff]  ;;  %v15005_v7 = vld [vmem:[#allocation20_spill] sm:$0xff] }
 0xf48   : > { %v8856_v2 = vpop.eup %8855  ;;  %v6186_v38 = vmul.f32 %v14987_v46, %v8854_v26  ;;  %8869 = vpow2.f32 %v6095_v4  ;;  %v6009_v14 = vadd.f32 %v13635_v43, %v15000_v39  ;;  %v6105_v57 = vmul.f32 1.442695, %v6007_v61  ;;  %v15004_v26 = vld [vmem:[#allocation14_spill] sm:$0xff] }
 0xf49   : > { %v8858_v20 = vpop.eup %8857  ;;  %v6185_v15 = vmul.f32 %v14990_v1, %v8856_v2  ;;  %8871 = vpow2.f32 %v6093_v6  ;;  %v6103_v24 = vmul.f32 1.442695, %v6006_v41  ;;  %v6011_v11 = vadd.f32 %v13635_v43, %v15004_v26  ;;  %v15006_v4 = vld [vmem:[#allocation90_spill] sm:$0xff]  ;;  %v15009_v6 = vld [vmem:[#allocation24_spill] sm:$0xff] }
 0xf4a   : > { %6319 = vmatmul.mubr.f32.gmra.mrb[142].mxu1 %v6175_v17  ;;  %v8860_v47 = vpop.eup %8859  ;;  %v6188_v22 = vmul.f32 %v14991_v45, %v8858_v20  ;;  %8873 = vpow2.f32 %v6099_v59  ;;  %v6109_v34 = vmul.f32 1.442695, %v6009_v14  ;;  %v6014_v19 = vadd.f32 %v13638_v8, %v15005_v7  ;;  %v15007_v2 = vld [vmem:[#allocation70_spill] sm:$0xff]  ;;  %v15010_v59 = vld [vmem:[#allocation68_spill] sm:$0xff] }
 0xf4b   : > { %6323 = vmatprep.mubr.f32.mxu1 %v6178_v35  ;;  %v8862_v17 = vpop.eup %8861  ;;  %v6005_v35 = vadd.f32 %v13635_v43, %v14992_v62  ;;  %v6187_v13 = vmul.f32 %v14994_v52, %v8860_v47  ;;  %8875 = vpow2.f32 %v6097_v42  ;;  %v6115_v21 = vmul.f32 1.442695, %v6012_v56  ;;  %v15008_v20 = vld [vmem:[#allocation18_spill] sm:$0xff]  ;;  %v15011_v47 = vld [vmem:[#allocation75_spill] sm:$0xff]  ;;  %v15013_v42 = vld [vmem:[#allocation28_spill] sm:$0xff] }
 0xf4c   : > { %v6190_v32 = vmul.f32 %v14995_v18, %v8862_v17  ;;  %8877 = vpow2.f32 %v6103_v24  ;;  %v6013_v40 = vadd.f32 %v13635_v43, %v15008_v20  ;;  %v6113_v23 = vmul.f32 1.442695, %v6011_v11  ;;  %v15012_v17 = vld [vmem:[#allocation22_spill] sm:$0xff]  ;;  %v15014_v24 = vld [vmem:[#allocation73_spill] sm:$0xff] }
 0xf4d   : > { %v6101_v12 = vmul.f32 1.442695, %v6005_v35  ;;  %v6016_v10 = vadd.f32 %v13638_v8, %v15009_v6  ;;  %v6119_v41 = vmul.f32 1.442695, %v6014_v19  ;;  %v6015_v62 = vadd.f32 %v13635_v43, %v15012_v17 }
 0xf4e   : > { %6324 = vmatmul.mubr.f32.gmra.mrb[144].mxu1 %v6177_v55  ;;  %v6117_v35 = vmul.f32 1.442695, %v6013_v40  ;;  %v6018_v16 = vadd.f32 %v13638_v8, %v15013_v42 }
 0xf4f   : > { %6328 = vmatprep.mubr.f32.mxu1 %v6180_v28  ;;  %v8864_v55 = vpop.eup %8863  ;;  %8879 = vpow2.f32 %v6101_v12  ;;  %v6123_v54 = vmul.f32 1.442695, %v6016_v10  ;;  %v6121_v61 = vmul.f32 1.442695, %v6015_v62  ;;  %v15017_v12 = vld [vmem:[#allocation32_spill] sm:$0xff] }
 0xf50   : > { %v8866_v28 = vpop.eup %8865  ;;  %v6189_v37 = vmul.f32 %v14998_v27, %v8864_v55  ;;  %8881 = vpow2.f32 %v6107_v0  ;;  %v15015_v55 = vld [vmem:[#allocation77_spill] sm:$0xff]  ;;  %v6020_v53 = vadd.f32 %v13638_v8, %v15017_v12  ;;  %v6127_v30 = vmul.f32 1.442695, %v6018_v16  ;;  %v15018_v0 = vld [vmem:[#allocation72_spill] sm:$0xff] }
 0xf51   : > { %v6192_v49 = vmul.f32 %v14999_v29, %v8866_v28  ;;  %8883 = vpow2.f32 %v6105_v57  ;;  %v15016_v28 = vld [vmem:[#allocation26_spill] sm:$0xff]  ;;  %v15021_v57 = vld [vmem:[#allocation36_spill] sm:$0xff] }
 0xf52   : > { %6329 = vmatmul.mubr.f32.gmra.mrb[146].mxu1 %v6179_v33  ;;  %v8868_v33 = vpop.eup %8867  ;;  %8885 = vpow2.f32 %v6111_v48  ;;  %v6017_v31 = vadd.f32 %v13635_v43, %v15016_v28  ;;  %v6022_v63 = vadd.f32 %v13638_v8, %v15021_v57  ;;  %v6131_v56 = vmul.f32 1.442695, %v6020_v53  ;;  %v15022_v48 = vld [vmem:[#allocation74_spill] sm:$0xff] }
 0xf53   : > { %6333 = vmatprep.mubr.f32.mxu1 %v6182_v25  ;;  %v8870_v25 = vpop.eup %8869  ;;  %v6191_v58 = vmul.f32 %v15002_v5, %v8868_v33  ;;  %8887 = vpow2.f32 %v6109_v34  ;;  %v15019_v33 = vld [vmem:[#allocation79_spill] sm:$0xff]  ;;  %v15025_v34 = vld [vmem:[#allocation40_spill] sm:$0xff] }
 0xf54   : > { %v6194_v9 = vmul.f32 %v15003_v36, %v8870_v25  ;;  %8889 = vpow2.f32 %v6115_v21  ;;  %v15020_v25 = vld [vmem:[#allocation30_spill] sm:$0xff]  ;;  %v6125_v14 = vmul.f32 1.442695, %v6017_v31  ;;  %v6024_v7 = vadd.f32 %v13638_v8, %v15025_v34  ;;  %v15026_v21 = vld [vmem:[#allocation76_spill] sm:$0xff] }
 0xf55   : > { %8891 = vpow2.f32 %v6113_v23  ;;  %v6019_v39 = vadd.f32 %v13635_v43, %v15020_v25  ;;  %v6135_v19 = vmul.f32 1.442695, %v6022_v63  ;;  %v15029_v23 = vld [vmem:[#allocation44_spill] sm:$0xff] }
 0xf56   : > { %6334 = vmatmul.mubr.f32.gmra.mrb[148].mxu1 %v6181_v44  ;;  %v8872_v44 = vpop.eup %8871  ;;  %8893 = vpow2.f32 %v6119_v41  ;;  %v6026_v6 = vadd.f32 %v13638_v8, %v15029_v23  ;;  %v6139_v10 = vmul.f32 1.442695, %v6024_v7  ;;  %v15030_v41 = vld [vmem:[#allocation78_spill] sm:$0xff] }
 0xf57   : > { %6338 = vmatprep.mubr.f32.mxu1 %v6184_v3  ;;  %v8874_v3 = vpop.eup %8873  ;;  %v6193_v60 = vmul.f32 %v15006_v4, %v8872_v44  ;;  %8895 = vpow2.f32 %v6117_v35  ;;  %v15023_v44 = vld [vmem:[#allocation81_spill] sm:$0xff]  ;;  %v6129_v11 = vmul.f32 1.442695, %v6019_v39  ;;  %v15033_v35 = vld [vmem:[#allocation48_spill] sm:$0xff] }
 0xf58   : > { %v6196_v46 = vmul.f32 %v15007_v2, %v8874_v3  ;;  %8897 = vpow2.f32 %v6123_v54  ;;  %v15024_v3 = vld [vmem:[#allocation34_spill] sm:$0xff]  ;;  %v6028_v42 = vadd.f32 %v13638_v8, %v15033_v35  ;;  %v6143_v16 = vmul.f32 1.442695, %v6026_v6  ;;  %v15034_v54 = vld [vmem:[#allocation80_spill] sm:$0xff]  ;;  %v15049_v6 = vld [vmem:[#allocation7_spill] sm:$0xff] }
 0xf59   : > { %8899 = vpow2.f32 %v6121_v61  ;;  %v6021_v26 = vadd.f32 %v13635_v43, %v15024_v3  ;;  %v15037_v61 = vld [vmem:[#allocation52_spill] sm:$0xff] }
 0xf5a   : > { %6339 = vmatmul.mubr.f32.gmra.mrb[150].mxu1 %v6183_v50  ;;  %v8876_v50 = vpop.eup %8875  ;;  %8901 = vpow2.f32 %v6127_v30  ;;  %v6030_v12 = vadd.f32 %v13638_v8, %v15037_v61  ;;  %v6147_v53 = vmul.f32 1.442695, %v6028_v42  ;;  %v15038_v30 = vld [vmem:[#allocation82_spill] sm:$0xff]  ;;  %v15057_v61 = vld [vmem:[#allocation92_spill] sm:$0xff] }
 0xf5b   : > { %6343 = vmatprep.mubr.f32.mxu1 %v6186_v38  ;;  %v8878_v38 = vpop.eup %8877  ;;  %v6195_v1 = vmul.f32 %v15010_v59, %v8876_v50  ;;  %8903 = vpow2.f32 %v6125_v14  ;;  %v15027_v50 = vld [vmem:[#allocation83_spill] sm:$0xff]  ;;  %v6133_v40 = vmul.f32 1.442695, %v6021_v26  ;;  %v15041_v14 = vld [vmem:[#allocation56_spill] sm:$0xff] }
 0xf5c   : > { %v6198_v45 = vmul.f32 %v15011_v47, %v8878_v38  ;;  %8905 = vpow2.f32 %v6131_v56  ;;  %v15028_v38 = vld [vmem:[#allocation38_spill] sm:$0xff]  ;;  %v6032_v57 = vadd.f32 %v13638_v8, %v15041_v14  ;;  %v6151_v63 = vmul.f32 1.442695, %v6030_v12  ;;  %v15042_v56 = vld [vmem:[#allocation84_spill] sm:$0xff]  ;;  %v15061_v14 = vld [vmem:[#allocation29_spill] sm:$0xff] }
 0xf5d   : > { %v6023_v20 = vadd.f32 %v13635_v43, %v15028_v38  ;;  %8907 = vpow2.f32 %v6129_v11  ;;  %v15045_v11 = vld [vmem:[#allocation60_spill] sm:$0xff] }
 0xf5e   : > { %6344 = vmatmul.mubr.f32.gmra.mrb[152].mxu1 %v6185_v15  ;;  %v8880_v15 = vpop.eup %8879  ;;  %8909 = vpow2.f32 %v6135_v19  ;;  %v6034_v34 = vadd.f32 %v13638_v8, %v15045_v11  ;;  %v6155_v7 = vmul.f32 1.442695, %v6032_v57  ;;  %v15046_v19 = vld [vmem:[#allocation3_spill] sm:$0xff] }
 0xf5f   : > { %6348 = vmatprep.mubr.f32.mxu1 %v6188_v22  ;;  %v8882_v22 = vpop.eup %8881  ;;  %v6197_v52 = vmul.f32 %v15014_v24, %v8880_v15  ;;  %v15031_v15 = vld [vmem:[#allocation85_spill] sm:$0xff]  ;;  %8911 = vpow2.f32 %v6133_v40  ;;  %v6137_v62 = vmul.f32 1.442695, %v6023_v20  ;;  %v6036_v40 = vadd.f32 %v13638_v8, %v13623_v51 }
 0xf60   : > { %v6200_v18 = vmul.f32 %v15015_v55, %v8882_v22  ;;  %v15032_v22 = vld [vmem:[#allocation42_spill] sm:$0xff]  ;;  %8913 = vpow2.f32 %v6139_v10  ;;  %v6159_v23 = vmul.f32 1.442695, %v6034_v34  ;;  %v15053_v8 = vld [vmem:[#allocation21_spill] sm:$0xff] }
 0xf61   : > { %v6025_v17 = vadd.f32 %v13635_v43, %v15032_v22 }
 0xf62   : > { %6349 = vmatmul.mubr.f32.gmra.mrb[154].mxu1 %v6187_v13  ;;  %v8884_v13 = vpop.eup %8883  ;;  %8915 = vpow2.f32 %v6137_v62  ;;  %v15052_v62 = vld [vmem:[#allocation11_spill] sm:$0xff] }
 0xf63   : > { %6353 = vmatprep.mubr.f32.mxu1 %v6190_v32  ;;  %v8886_v32 = vpop.eup %8885  ;;  %v6199_v27 = vmul.f32 %v15018_v0, %v8884_v13  ;;  %v15035_v13 = vld [vmem:[#allocation86_spill] sm:$0xff]  ;;  %v6141_v31 = vmul.f32 1.442695, %v6025_v17  ;;  %8917 = vpow2.f32 %v6143_v16  ;;  %v6163_v17 = vmul.f32 1.442695, %v6036_v40 }
 0xf64   : > { %v6202_v29 = vmul.f32 %v15019_v33, %v8886_v32  ;;  %v15036_v32 = vld [vmem:[#allocation46_spill] sm:$0xff] }
 0xf65   : > { %v6027_v28 = vadd.f32 %v13635_v43, %v15036_v32  ;;  %v15056_v32 = vld [vmem:[#allocation19_spill] sm:$0xff] }
 0xf66   : > { %6354 = vmatmul.mubr.f32.gmra.mrb[156].mxu1 %v6189_v37  ;;  %v8888_v37 = vpop.eup %8887  ;;  %8919 = vpow2.f32 %v6141_v31 }
 0xf67   : > { %6358 = vmatprep.mubr.f32.mxu1 %v6192_v49  ;;  %v8890_v49 = vpop.eup %8889  ;;  %v6201_v5 = vmul.f32 %v15022_v48, %v8888_v37  ;;  %v15039_v37 = vld [vmem:[#allocation5_spill] sm:$0xff]  ;;  %v6145_v39 = vmul.f32 1.442695, %v6027_v28  ;;  %8921 = vpow2.f32 %v6147_v53 }
 0xf68   : > { %v6204_v36 = vmul.f32 %v15023_v44, %v8890_v49  ;;  %v15040_v49 = vld [vmem:[#allocation50_spill] sm:$0xff] }
 0xf69   : > { %v6029_v25 = vadd.f32 %v13635_v43, %v15040_v49  ;;  %v15060_v49 = vld [vmem:[#allocation27_spill] sm:$0xff] }
 0xf6a   : > { %6359 = vmatmul.mubr.f32.gmra.mrb[158].mxu1 %v6191_v58  ;;  %v8892_v58 = vpop.eup %8891  ;;  %8923 = vpow2.f32 %v6145_v39 }
 0xf6b   : > { %6363 = vmatprep.mubr.f32.mxu1 %v6194_v9  ;;  %v8894_v9 = vpop.eup %8893  ;;  %v6203_v4 = vmul.f32 %v15026_v21, %v8892_v58  ;;  %v15043_v58 = vld [vmem:[#allocation9_spill] sm:$0xff]  ;;  %v6149_v26 = vmul.f32 1.442695, %v6029_v25  ;;  %8925 = vpow2.f32 %v6151_v63  ;;  %v15062_v63 = vld [vmem:[#allocation31_spill] sm:$0xff] }
 0xf6c   : > { %v6206_v2 = vmul.f32 %v15027_v50, %v8894_v9  ;;  %v15044_v9 = vld [vmem:[#allocation54_spill] sm:$0xff] }
 0xf6d   : > { %v6031_v3 = vadd.f32 %v13635_v43, %v15044_v9 }
 0xf6e   : > { %6364 = vmatmul.mubr.f32.gmra.mrb[160].mxu1 %v6193_v60  ;;  %v8896_v60 = vpop.eup %8895  ;;  %8927 = vpow2.f32 %v6149_v26 }
 0xf6f   : > { %6368 = vmatprep.mubr.f32.mxu1 %v6196_v46  ;;  %v8898_v46 = vpop.eup %8897  ;;  %v6205_v59 = vmul.f32 %v15030_v41, %v8896_v60  ;;  %v15047_v60 = vld [vmem:[#allocation13_spill] sm:$0xff]  ;;  %v6153_v20 = vmul.f32 1.442695, %v6031_v3  ;;  %8929 = vpow2.f32 %v6155_v7 }
 0xf70   : > { %v6208_v47 = vmul.f32 %v15031_v15, %v8898_v46  ;;  %v15048_v46 = vld [vmem:[#allocation58_spill] sm:$0xff] }
 0xf71   : > { %v6033_v38 = vadd.f32 %v13635_v43, %v15048_v46 }
 0xf72   : > { %6369 = vmatmul.mubr.f32.gmra.mrb[162].mxu1 %v6195_v1  ;;  %v8900_v1 = vpop.eup %8899  ;;  %8931 = vpow2.f32 %v6153_v20 }
 0xf73   : > { %6373 = vmatprep.mubr.f32.mxu1 %v6198_v45  ;;  %v8902_v45 = vpop.eup %8901  ;;  %v6207_v24 = vmul.f32 %v15034_v54, %v8900_v1  ;;  %v6157_v22 = vmul.f32 1.442695, %v6033_v38  ;;  %8933 = vpow2.f32 %v6159_v23 }
 0xf74   : > { %v6210_v55 = vmul.f32 %v15035_v13, %v8902_v45 }
 0xf76   : > { %6374 = vmatmul.mubr.f32.gmra.mrb[164].mxu1 %v6197_v52  ;;  %v8904_v52 = vpop.eup %8903  ;;  %8935 = vpow2.f32 %v6157_v22 }
 0xf77   : > { %6378 = vmatprep.mubr.f32.mxu1 %v6200_v18  ;;  %v8906_v18 = vpop.eup %8905  ;;  %v6209_v0 = vmul.f32 %v15038_v30, %v8904_v52  ;;  %8937 = vpow2.f32 %v6163_v17  ;;  %v15058_v30 = vld [vmem:[#allocation23_spill] sm:$0xff] }
 0xf78   : > { %v6212_v33 = vmul.f32 %v15039_v37, %v8906_v18  ;;  %v15059_v37 = vld [vmem:[#allocation25_spill] sm:$0xff] }
 0xf7a   : > { %6379 = vmatmul.mubr.f32.gmra.mrb[166].mxu1 %v6199_v27  ;;  %v8908_v27 = vpop.eup %8907 }
 0xf7b   : > { %6383 = vmatprep.mubr.f32.mxu1 %v6202_v29  ;;  %v8910_v29 = vpop.eup %8909  ;;  %v6211_v48 = vmul.f32 %v15042_v56, %v8908_v27 }
 0xf7c   : > { %v6214_v44 = vmul.f32 %v15043_v58, %v8910_v29 }
 0xf7e   : > { %6384 = vmatmul.mubr.f32.gmra.mrb[168].mxu1 %v6201_v5  ;;  %v8912_v5 = vpop.eup %8911 }
 0xf7f   : > { %6388 = vmatprep.mubr.f32.mxu1 %v6204_v36  ;;  %v8914_v36 = vpop.eup %8913  ;;  %v6213_v21 = vmul.f32 %v15046_v19, %v8912_v5 }
 0xf80   : > { %v6216_v50 = vmul.f32 %v15047_v60, %v8914_v36 }
 0xf82   : > { %6389 = vmatmul.mubr.f32.gmra.mrb[170].mxu1 %v6203_v4  ;;  %v8916_v4 = vpop.eup %8915 }
 0xf83   : > { %6393 = vmatprep.mubr.f32.mxu1 %v6206_v2  ;;  %v8918_v2 = vpop.eup %8917  ;;  %v6215_v10 = vmul.f32 %v15049_v6, %v8916_v4 }
 0xf84   : > { %v8920_v41 = vpop.eup %8919 }
 0xf85   : > { %v8922_v15 = vpop.eup %8921  ;;  %v6217_v35 = vmul.f32 %v15052_v62, %v8920_v41 }
 0xf86   : > { %6394 = vmatmul.mubr.f32.gmra.mrb[172].mxu1 %v6205_v59  ;;  %v15050_v59 = vld [vmem:[#allocation17_spill] sm:$0xff]  ;;  %v8924_v51 = vpop.eup %8923  ;;  %v6220_v42 = vmul.f32 %v15053_v8, %v8922_v15 }
 0xf87   : > { %6398 = vmatprep.mubr.f32.mxu1 %v6208_v47  ;;  %v6218_v1 = vmul.f32 %v15050_v59, %v8918_v2  ;;  %v15051_v47 = vld [vmem:[#allocation62_spill] sm:$0xff]  ;;  %v8926_v16 = vpop.eup %8925 }
 0xf88   : > { %v6035_v45 = vadd.f32 %v13635_v43, %v15051_v47  ;;  %v8928_v13 = vpop.eup %8927  ;;  %v15055_v43 = vld [vmem:[#allocation91_spill] sm:$0xff] }
 0xf89   : > { %v8930_v18 = vpop.eup %8929  ;;  %v6221_v28 = vmul.f32 %v15056_v32, %v8928_v13 }
 0xf8a   : > { %6399 = vmatmul.mubr.f32.gmra.mrb[174].mxu1 %v6207_v24  ;;  %v6161_v54 = vmul.f32 1.442695, %v6035_v45  ;;  %v15054_v24 = vld [vmem:[#allocation15_spill] sm:$0xff]  ;;  %v8932_v31 = vpop.eup %8931  ;;  %v6224_v12 = vmul.f32 %v15057_v61, %v8930_v18 }
 0xf8b   : > { %6403 = vmatprep.mubr.f32.mxu1 %v6210_v55  ;;  %v6219_v52 = vmul.f32 %v15054_v24, %v8924_v51  ;;  %v6222_v55 = vmul.f32 %v15055_v43, %v8926_v16  ;;  %v8934_v53 = vpop.eup %8933 }
 0xf8c   : > { %8939 = vpow2.f32 %v6161_v54  ;;  %v8936_v27 = vpop.eup %8935 }
 0xf8d   : > { %v8938_v29 = vpop.eup %8937  ;;  %v6225_v25 = vmul.f32 %v15060_v49, %v8936_v27 }
 0xf8e   : > { %6404 = vmatmul.mubr.f32.gmra.mrb[176].mxu1 %v6209_v0  ;;  %v6223_v0 = vmul.f32 %v15058_v30, %v8932_v31  ;;  %v6228_v57 = vmul.f32 %v15061_v14, %v8938_v29 }
 0xf8f   : > { %6408 = vmatprep.mubr.f32.mxu1 %v6212_v33  ;;  %v6226_v33 = vmul.f32 %v15059_v37, %v8934_v53 }
 0xf92   : > { %6409 = vmatmul.mubr.f32.gmra.mrb[178].mxu1 %v6211_v48 }
 0xf93   : > { %6413 = vmatprep.mubr.f32.mxu1 %v6214_v44 }
 0xf96   : > { %6414 = vmatmul.mubr.f32.gmra.mrb[180].mxu1 %v6213_v21  ;;  %v8940_v39 = vpop.eup %8939 }
 0xf97   : > { %6418 = vmatprep.mubr.f32.mxu1 %v6216_v50  ;;  %v6227_v56 = vmul.f32 %v15062_v63, %v8940_v39 }
 0xf9a   : > { %6419 = vmatmul.mubr.f32.gmra.mrb[182].mxu1 %v6215_v10 }
 0xf9b   : > { %6423 = vmatprep.mubr.f32.mxu1 %v6218_v1 }
 0xf9e   : > { %6424 = vmatmul.mubr.f32.gmra.mrb[184].mxu1 %v6217_v35 }
 0xf9f   : > { %6428 = vmatprep.mubr.f32.mxu1 %v6220_v42 }
 0xfa2   : > { %6429 = vmatmul.mubr.f32.gmra.mrb[186].mxu1 %v6219_v52 }
 0xfa3   : > { %6433 = vmatprep.mubr.f32.mxu1 %v6222_v55 }
 0xfa6   : > { %6434 = vmatmul.mubr.f32.gmra.mrb[188].mxu1 %v6221_v28 }
 0xfa7   : > { %6438 = vmatprep.mubr.f32.mxu1 %v6224_v12 }
 0xfaa   : > { %6439 = vmatmul.mubr.f32.gmra.mrb[190].mxu1 %v6223_v0 }
 0xfab   : > { %6443 = vmatprep.mubr.f32.mxu1 %v6226_v33 }
 0xfae   : > { %6444 = vmatmul.mubr.f32.gmra.mrb[192].mxu1 %v6225_v25 }
 0xfaf   : > { %6448 = vmatprep.mubr.f32.mxu1 %v6228_v57 }
 0xfb2   : > { %6449 = vmatmul.mubr.f32.gmra.mrb[194].mxu1 %v6227_v56 }
0x1009   : > { %v6295_v48 = vpop.f32.mrb[132].mxu1 }
0x100a   : > { %v6297_v5 = vpop.f32.mrb[133].mxu1  ;;  %v6454_v44 = vsel %vm316_vm0, %v6295_v48, 0.0 }
0x100d   : > { %v6300_v58 = vpop.f32.mrb[134].mxu1 }
0x100e   : > { %v6455_v36 = vsel %vm316_vm0, %v6300_v58, 0.0  ;;  %v6302_v9 = vpop.f32.mrb[135].mxu1 }
0x100f   : > { %v6456_v3 = vadd.f32 %v6455_v36, %v6454_v44 }
0x1011   : > { %v6305_v26 = vpop.f32.mrb[136].mxu1 }
0x1012   : > { %v6457_v11 = vsel %vm316_vm0, %v6305_v26, 0.0  ;;  %v6307_v34 = vpop.f32.mrb[137].mxu1 }
0x1013   : > { %v6458_v7 = vadd.f32 %v6457_v11, %v6456_v3 }
0x1015   : > { %v6310_v19 = vpop.f32.mrb[138].mxu1 }
0x1016   : > { %v6459_v21 = vsel %vm316_vm0, %v6310_v19, 0.0  ;;  %v6312_v4 = vpop.f32.mrb[139].mxu1 }
0x1017   : > { %v6460_v60 = vadd.f32 %v6459_v21, %v6458_v7 }
0x1019   : > { %v6315_v50 = vpop.f32.mrb[140].mxu1 }
0x101a   : > { %v6461_v2 = vsel %vm316_vm0, %v6315_v50, 0.0  ;;  %v6317_v46 = vpop.f32.mrb[141].mxu1 }
0x101b   : > { %v6462_v38 = vadd.f32 %v6461_v2, %v6460_v60 }
0x101d   : > { %v6320_v20 = vpop.f32.mrb[142].mxu1 }
0x101e   : > { %v6463_v40 = vsel %vm316_vm0, %v6320_v20, 0.0  ;;  %v6322_v23 = vpop.f32.mrb[143].mxu1 }
0x101f   : > { %v6464_v6 = vadd.f32 %v6463_v40, %v6462_v38 }
0x1021   : > { %v6325_v10 = vpop.f32.mrb[144].mxu1 }
0x1022   : > { %v6465_v41 = vsel %vm316_vm0, %v6325_v10, 0.0  ;;  %v6327_v59 = vpop.f32.mrb[145].mxu1 }
0x1023   : > { %v6466_v1 = vadd.f32 %v6465_v41, %v6464_v6 }
0x1025   : > { %v6330_v15 = vpop.f32.mrb[146].mxu1 }
0x1026   : > { %v6467_v47 = vsel %vm316_vm0, %v6330_v15, 0.0  ;;  %v6332_v45 = vpop.f32.mrb[147].mxu1 }
0x1027   : > { %v6468_v22 = vadd.f32 %v6467_v47, %v6466_v1 }
0x1029   : > { %v6335_v17 = vpop.f32.mrb[148].mxu1 }
0x102a   : > { %v6469_v62 = vsel %vm316_vm0, %v6335_v17, 0.0  ;;  %v6337_v35 = vpop.f32.mrb[149].mxu1 }
0x102b   : > { %v6470_v51 = vadd.f32 %v6469_v62, %v6468_v22 }
0x102d   : > { %v6340_v8 = vpop.f32.mrb[150].mxu1 }
0x102e   : > { %v6471_v42 = vsel %vm316_vm0, %v6340_v8, 0.0  ;;  %v6342_v16 = vpop.f32.mrb[151].mxu1 }
0x102f   : > { %v6472_v54 = vadd.f32 %v6471_v42, %v6470_v51 }
0x1031   : > { %v6345_v24 = vpop.f32.mrb[152].mxu1 }
0x1032   : > { %v6473_v52 = vsel %vm316_vm0, %v6345_v24, 0.0  ;;  %v6347_v13 = vpop.f32.mrb[153].mxu1 }
0x1033   : > { %v6474_v43 = vadd.f32 %v6473_v52, %v6472_v54 }
0x1035   : > { %v6350_v55 = vpop.f32.mrb[154].mxu1 }
0x1036   : > { %v6475_v18 = vsel %vm316_vm0, %v6350_v55, 0.0  ;;  %v6352_v32 = vpop.f32.mrb[155].mxu1 }
0x1037   : > { %v6476_v28 = vadd.f32 %v6475_v18, %v6474_v43 }
0x1039   : > { %v6355_v31 = vpop.f32.mrb[156].mxu1 }
0x103a   : > { %v6477_v61 = vsel %vm316_vm0, %v6355_v31, 0.0  ;;  %v6357_v12 = vpop.f32.mrb[157].mxu1 }
0x103b   : > { %v6478_v53 = vadd.f32 %v6477_v61, %v6476_v28 }
0x103d   : > { %v6360_v30 = vpop.f32.mrb[158].mxu1 }
0x103e   : > { %v6479_v0 = vsel %vm316_vm0, %v6360_v30, 0.0  ;;  %v6362_v27 = vpop.f32.mrb[159].mxu1 }
0x103f   : > { %v6480_v37 = vadd.f32 %v6479_v0, %v6478_v53 }
0x1041   : > { %v6365_v33 = vpop.f32.mrb[160].mxu1 }
0x1042   : > { %v6481_v29 = vsel %vm316_vm0, %v6365_v33, 0.0  ;;  %v6367_v49 = vpop.f32.mrb[161].mxu1 }
0x1043   : > { %v6482_v25 = vadd.f32 %v6481_v29, %v6480_v37 }
0x1045   : > { %v6370_v39 = vpop.f32.mrb[162].mxu1 }
0x1046   : > { %v6483_v14 = vsel %vm316_vm0, %v6370_v39, 0.0  ;;  %v6372_v57 = vpop.f32.mrb[163].mxu1 }
0x1047   : > { %v6484_v63 = vadd.f32 %v6483_v14, %v6482_v25 }
0x1049   : > { %v6375_v56 = vpop.f32.mrb[164].mxu1 }
0x104a   : > { %v6485_v48 = vsel %vm316_vm0, %v6375_v56, 0.0  ;;  %v6377_v5 = vpop.f32.mrb[165].mxu1 }
0x104b   : > { %v6486_v58 = vadd.f32 %v6485_v48, %v6484_v63 }
0x104d   : > { %v6380_v44 = vpop.f32.mrb[166].mxu1 }
0x104e   : > { %v6487_v36 = vsel %vm316_vm0, %v6380_v44, 0.0  ;;  %v6382_v9 = vpop.f32.mrb[167].mxu1 }
0x104f   : > { %v6488_v3 = vadd.f32 %v6487_v36, %v6486_v58 }
0x1051   : > { %v6385_v26 = vpop.f32.mrb[168].mxu1 }
0x1052   : > { %v6489_v11 = vsel %vm316_vm0, %v6385_v26, 0.0  ;;  %v6387_v34 = vpop.f32.mrb[169].mxu1 }
0x1053   : > { %v6490_v7 = vadd.f32 %v6489_v11, %v6488_v3 }
0x1055   : > { %v6390_v19 = vpop.f32.mrb[170].mxu1 }
0x1056   : > { %v6491_v21 = vsel %vm316_vm0, %v6390_v19, 0.0  ;;  %v6392_v4 = vpop.f32.mrb[171].mxu1 }
0x1057   : > { %v6492_v60 = vadd.f32 %v6491_v21, %v6490_v7 }
0x1059   : > { %v6395_v50 = vpop.f32.mrb[172].mxu1 }
0x105a   : > { %v6493_v2 = vsel %vm316_vm0, %v6395_v50, 0.0  ;;  %v6397_v46 = vpop.f32.mrb[173].mxu1 }
0x105b   : > { %v6494_v38 = vadd.f32 %v6493_v2, %v6492_v60 }
0x105d   : > { %v6400_v20 = vpop.f32.mrb[174].mxu1 }
0x105e   : > { %v6495_v40 = vsel %vm316_vm0, %v6400_v20, 0.0  ;;  %v6402_v23 = vpop.f32.mrb[175].mxu1 }
0x105f   : > { %v6496_v6 = vadd.f32 %v6495_v40, %v6494_v38 }
0x1061   : > { %v6405_v10 = vpop.f32.mrb[176].mxu1 }
0x1062   : > { %v6497_v41 = vsel %vm316_vm0, %v6405_v10, 0.0  ;;  %v6407_v59 = vpop.f32.mrb[177].mxu1 }
0x1063   : > { %v6498_v1 = vadd.f32 %v6497_v41, %v6496_v6 }
0x1065   : > { %v6410_v15 = vpop.f32.mrb[178].mxu1 }
0x1066   : > { %v6499_v47 = vsel %vm316_vm0, %v6410_v15, 0.0  ;;  %v6412_v45 = vpop.f32.mrb[179].mxu1 }
0x1067   : > { %v6500_v22 = vadd.f32 %v6499_v47, %v6498_v1 }
0x1069   : > { %v6415_v17 = vpop.f32.mrb[180].mxu1 }
0x106a   : > { %v6501_v62 = vsel %vm316_vm0, %v6415_v17, 0.0  ;;  %v6417_v35 = vpop.f32.mrb[181].mxu1 }
0x106b   : > { %v6502_v51 = vadd.f32 %v6501_v62, %v6500_v22 }
0x106d   : > { %v6420_v8 = vpop.f32.mrb[182].mxu1 }
0x106e   : > { %v6503_v42 = vsel %vm316_vm0, %v6420_v8, 0.0  ;;  %v6422_v16 = vpop.f32.mrb[183].mxu1 }
0x106f   : > { %v6504_v54 = vadd.f32 %v6503_v42, %v6502_v51 }
0x1071   : > { %v6425_v24 = vpop.f32.mrb[184].mxu1 }
0x1072   : > { %v6505_v52 = vsel %vm316_vm0, %v6425_v24, 0.0  ;;  %v6427_v13 = vpop.f32.mrb[185].mxu1 }
0x1073   : > { %v6506_v43 = vadd.f32 %v6505_v52, %v6504_v54 }
0x1075   : > { %v6430_v55 = vpop.f32.mrb[186].mxu1 }
0x1076   : > { %v6507_v18 = vsel %vm316_vm0, %v6430_v55, 0.0  ;;  %v6432_v32 = vpop.f32.mrb[187].mxu1 }
0x1077   : > { %v6508_v28 = vadd.f32 %v6507_v18, %v6506_v43 }
0x1079   : > { %v6435_v31 = vpop.f32.mrb[188].mxu1 }
0x107a   : > { %v6509_v61 = vsel %vm316_vm0, %v6435_v31, 0.0  ;;  %v6437_v12 = vpop.f32.mrb[189].mxu1 }
0x107b   : > { %v6510_v53 = vadd.f32 %v6509_v61, %v6508_v28 }
0x107d   : > { %v6440_v30 = vpop.f32.mrb[190].mxu1 }
0x107e   : > { %v6511_v0 = vsel %vm316_vm0, %v6440_v30, 0.0  ;;  %v6442_v27 = vpop.f32.mrb[191].mxu1 }
0x107f   : > { %v6512_v37 = vadd.f32 %v6511_v0, %v6510_v53 }
0x1081   : > { %v6445_v33 = vpop.f32.mrb[192].mxu1 }
0x1082   : > { %v6513_v29 = vsel %vm316_vm0, %v6445_v33, 0.0  ;;  %v6447_v49 = vpop.f32.mrb[193].mxu1 }
0x1083   : > { %v6514_v25 = vadd.f32 %v6513_v29, %v6512_v37 }
0x1085   : > { %v6450_v39 = vpop.f32.mrb[194].mxu1 }
0x1086   : > { %v6515_v14 = vsel %vm316_vm0, %v6450_v39, 0.0  ;;  %v6452_v57 = vpop.f32.mrb[195].mxu1 }
0x1087   : > { %v6516_v63 = vadd.f32 %v6515_v14, %v6514_v25 }
0x1089   : > { %v6517_v56 = vrot.slane %v6516_v63, 4 }
0x108b   : > { %v6518_v48 = vadd.f32 %v6517_v56, %v6516_v63 }
0x108d   : > { %v6519_v5 = vrot.slane %v6518_v48, 2 }
0x108f   : > { %v6520_v58 = vadd.f32 %v6519_v5, %v6518_v48 }
0x1091   : > { %v6521_v44 = vrot.slane %v6520_v58, 1 }
0x1093   : > { %v6522_v36 = vadd.f32 %v6521_v44, %v6520_v58 }
0x1095   : > { %v6523_v9 = vmul.f32 -0.01, %v6522_v36 }
0x1097   : > { %6525 = vst.msk [vmem:[%s183_s20] sm:$0x1] %vm6524_vm2, %v6523_v9 }
0x1098 PF: > { %s13_s12 = sadd.s32 1, %s9267_s12  }
0x1099   : > { %p10_p4 = scmp.ge.s32.totalorder %s13_s12, 4  }
0x109b   :  { %12 = sbr.rel (!%p10_p4) target bundleno = 1 (0x1), region = 65 }

</bundles_post_ra>
